<compile_context>
chip_gen: v7x
topology: tpu7x:2x2x1
jax: 0.10.0
libtpu: 0.0.40
codegen_flags: <defaults>
</compile_context>

<pallas_src>
import functools

import jax
import jax.numpy as jnp
from jax.experimental import pallas as pl
from jax.experimental.pallas import tpu as pltpu


# ----------------------------------------------------------------------------
# Fused kernel: conv trunk (3x Conv+BN+ReLU, 2x MaxPool2d(2)) + MLP head.
# One grid step processes B images; everything stays in VMEM.
# ----------------------------------------------------------------------------
def _cnn_dqn_kernel(patch_ref, w1_ref, sc1_ref, w2_ref, sc2_ref, w3_ref, sc3_ref,
                    fw1_ref, fb1_ref, fw2_ref, fb2_ref, q_ref,
                    pad2, bufh2, pad3, bufh3):
    f32 = jnp.float32
    bf16 = jnp.bfloat16
    B = pad2.shape[0]                       # images per grid step

    # Zero only the 1-pixel halo the 3x3 taps actually read (the interior is
    # fully overwritten every step).  Done every step so the kernel is correct
    # under a "parallel" grid, where each core's scratch starts uninitialized.
    pad2[:, 0:1, :, :] = jnp.zeros((B, 1, 32, 16), f32)
    pad2[:, 17:18, :, :] = jnp.zeros((B, 1, 32, 16), f32)
    pad2[:, :, 7:8, :] = jnp.zeros((B, 18, 1, 16), f32)
    pad2[:, :, 24:25, :] = jnp.zeros((B, 18, 1, 16), f32)
    pad3[:, 0:1, :, :] = jnp.zeros((B, 1, 24, 32), f32)
    pad3[:, 9:10, :, :] = jnp.zeros((B, 1, 24, 32), f32)
    pad3[:, :, 7:8, :] = jnp.zeros((B, 10, 1, 32), f32)
    pad3[:, :, 16:17, :] = jnp.zeros((B, 10, 1, 32), f32)

    # ---- conv1: 8x8, stride 4, pad 2 -> one bf16 MXU matmul, M = B*256 ----
    y = jnp.dot(patch_ref[...], w1_ref[...], preferred_element_type=f32)     # (B*256, 16)
    y = jnp.maximum(y * sc1_ref[0:1, :] + sc1_ref[1:2, :], 0.0)              # folded BN + ReLU
    pad2[:, 1:17, 8:24, :] = y.reshape(B, 16, 16, 16)                        # aligned interior store

    # ---- conv2: 3x3 s1 p1 + BN + ReLU + 2x2 max-pool ----
    taps = [pad2[:, dh:dh + 16, 7 + dw:23 + dw, :]
            for dh in range(3) for dw in range(3)]                           # 9 x (B,16,16,16)
    p2 = jnp.concatenate(taps, axis=-1).reshape(B * 256, 144).astype(bf16)   # im2col, K = 144
    y = jnp.dot(p2, w2_ref[...], preferred_element_type=f32)                 # (B*256, 32)
    y = jnp.maximum(y * sc2_ref[0:1, :] + sc2_ref[1:2, :], 0.0)
    y = y.reshape(B * 8, 2, 16, 32)                                          # (b*h2, hpair, w, c)
    bufh2[...] = jnp.maximum(y[:, 0], y[:, 1]).reshape(B * 128, 32)          # H pool in registers
    pooled = jnp.maximum(bufh2[pl.ds(0, B * 64, 2), :],
                         bufh2[pl.ds(1, B * 64, 2), :])                      # W pool -> (B*64, 32)
    pad3[:, 1:9, 8:16, :] = pooled.reshape(B, 8, 8, 32)

    # ---- conv3: 3x3 s1 p1 + BN + ReLU + 2x2 max-pool ----
    taps = [pad3[:, dh:dh + 8, 7 + dw:15 + dw, :]
            for dh in range(3) for dw in range(3)]                           # 9 x (B,8,8,32)
    p3 = jnp.concatenate(taps, axis=-1).reshape(B * 64, 288).astype(bf16)    # im2col, K = 288
    y = jnp.dot(p3, w3_ref[...], preferred_element_type=f32)                 # (B*64, 64)
    y = jnp.maximum(y * sc3_ref[0:1, :] + sc3_ref[1:2, :], 0.0)
    y = y.reshape(B * 4, 2, 8, 64)
    bufh3[...] = jnp.maximum(y[:, 0], y[:, 1]).reshape(B * 32, 64)           # H pool in registers
    feats = jnp.maximum(bufh3[pl.ds(0, B * 16, 2), :],
                        bufh3[pl.ds(1, B * 16, 2), :])                       # (B*16, 64)
    # AdaptiveMaxPool2d((4,4)) is the identity on the 4x4 feature map.

    # ---- fused MLP head: Linear(1024,256) + ReLU + Linear(256, A_pad) ----
    # Contract over the 16 pixels with 16 accumulated K=64 dots (avoids a
    # lane-merging (B*16,64)->(B,1024) reshape inside the kernel).
    feat3 = feats.reshape(B, 16, 64)                 # (image, pixel p=h*4+w, channel)
    acc = jnp.zeros((B, fw1_ref.shape[1]), f32)
    for p in range(16):
        acc += jnp.dot(feat3[:, p, :].astype(bf16),
                       fw1_ref[p * 64:(p + 1) * 64, :],
                       preferred_element_type=f32)
    h = jnp.maximum(acc + fb1_ref[...], 0.0)
    q_ref[...] = jnp.dot(h.astype(bf16), fw2_ref[...],
                         preferred_element_type=f32) + fb2_ref[...]


# ----------------------------------------------------------------------------
# Wrapper: builds the conv1 im2col (bf16) and launches the single fused kernel.
# ----------------------------------------------------------------------------
def cnn_dqn_forward(x_nchw, params, *, n_actions, block_b=8):
    conv_params, fc_params = params
    (w1f, sc1), (w2f, sc2), (w3f, sc3) = conv_params
    fw1, fb1, fw2, fb2 = fc_params

    N, _, H, W = x_nchw.shape
    assert H == 64 and W == 64, "kernel geometry is specialized to 64x64 inputs"

    B = min(block_b, N)                     # images per grid step
    n_pad = (-N) % B
    x = jnp.transpose(x_nchw, (0, 2, 3, 1)).astype(jnp.bfloat16)             # NHWC, bf16
    if n_pad:
        x = jnp.pad(x, ((0, n_pad), (0, 0), (0, 0), (0, 0)))
    Np = N + n_pad

    # conv1 im2col as ONE fused XLA op; output feature order is (cin, kh, kw),
    # matching the conv1 weight row order built in make_conv_bn_params("ckk").
    patches = jax.lax.conv_general_dilated_patches(
        x, filter_shape=(8, 8), window_strides=(4, 4),
        padding=((2, 2), (2, 2)),
        dimension_numbers=("NHWC", "HWIO", "NHWC"))                          # (Np,16,16,256)
    patches = patches.reshape(Np * 256, 256)

    A = fw2.shape[1]                                                         # lane-padded (128)
    q = pl.pallas_call(
        _cnn_dqn_kernel,
        out_shape=jax.ShapeDtypeStruct((Np, A), jnp.float32),
        grid_spec=pltpu.PrefetchScalarGridSpec(
            num_scalar_prefetch=0,
            grid=(Np // B,),
            in_specs=[
                pl.BlockSpec((B * 256, 256), lambda b: (b, 0)),   # conv1 im2col (bf16)
                pl.BlockSpec((256, 16), lambda b: (0, 0)),        # conv1 weight (K, Cout)
                pl.BlockSpec((2, 16), lambda b: (0, 0)),          # conv1 BN scale/shift
                pl.BlockSpec((144, 32), lambda b: (0, 0)),        # conv2 weight
                pl.BlockSpec((2, 32), lambda b: (0, 0)),
                pl.BlockSpec((288, 64), lambda b: (0, 0)),        # conv3 weight
                pl.BlockSpec((2, 64), lambda b: (0, 0)),
                pl.BlockSpec((1024, 256), lambda b: (0, 0)),      # fc1 weight
                pl.BlockSpec((1, 256), lambda b: (0, 0)),         # fc1 bias
                pl.BlockSpec((256, A), lambda b: (0, 0)),         # fc2 weight (lane-padded)
                pl.BlockSpec((1, A), lambda b: (0, 0)),           # fc2 bias
            ],
            out_specs=pl.BlockSpec((B, A), lambda b: (b, 0)),
            scratch_shapes=[
                pltpu.VMEM((B, 18, 32, 16), jnp.float32),   # zero-padded conv2 input
                pltpu.VMEM((B * 128, 32), jnp.float32),     # H-pooled conv2 rows (W pool)
                pltpu.VMEM((B, 10, 24, 32), jnp.float32),   # zero-padded conv3 input
                pltpu.VMEM((B * 32, 64), jnp.float32),      # H-pooled conv3 rows (W pool)
            ]),
        compiler_params=pltpu.CompilerParams(
            dimension_semantics=("parallel",),               # megacore / v7x sharding
            vmem_limit_bytes=64 * 1024 * 1024),
    )(patches,
      w1f.astype(jnp.bfloat16), sc1,
      w2f.astype(jnp.bfloat16), sc2,
      w3f.astype(jnp.bfloat16), sc3,
      fw1.astype(jnp.bfloat16), fb1,
      fw2.astype(jnp.bfloat16), fb2)

    return q[:N, :n_actions]


# ----------------------------------------------------------------------------
# Deterministic synthetic parameters (PyTorch conventions, then permuted)
# ----------------------------------------------------------------------------
def make_conv_bn_params(key, cin, cout, k, *, row_order):
    """Conv2d(bias=False) + BatchNorm2d(eval) folded to (w2d, [scale; shift])."""
    k1, k2, k3, k4, k5 = jax.random.split(key, 5)
    w_pt = jax.random.normal(k1, (cout, cin, k, k), jnp.float32) \
        * (1.0 / (cin * k * k) ** 0.5)
    gamma = 1.0 + 0.1 * jax.random.normal(k2, (cout,), jnp.float32)
    beta = 0.1 * jax.random.normal(k3, (cout,), jnp.float32)
    rmean = 0.1 * jax.random.normal(k4, (cout,), jnp.float32)
    rvar = 1.0 + 0.1 * jax.random.uniform(k5, (cout,), jnp.float32)
    eps = 1e-5
    scale = gamma / jnp.sqrt(rvar + eps)
    shift = beta - rmean * scale
    if row_order == "ckk":      # rows (cin, kh, kw): matches conv_general_dilated_patches
        w2d = w_pt.reshape(cout, cin * k * k).T
    elif row_order == "kkc":    # rows (kh, kw, cin): matches the in-kernel tap concat
        w2d = jnp.transpose(w_pt, (2, 3, 1, 0)).reshape(k * k * cin, cout)
    else:
        raise ValueError(row_order)
    return w2d, jnp.stack([scale, shift], axis=0)            # (K, Cout), (2, Cout)


def make_fc_params(key, c_last, fc_dim, n_actions):
    k1, k2, k3, k4 = jax.random.split(key, 4)
    d_in = 4 * 4 * c_last
    w1_pt = jax.random.normal(k1, (fc_dim, c_last, 4, 4), jnp.float32) \
        * (1.0 / d_in ** 0.5)
    b1 = 0.01 * jax.random.normal(k2, (fc_dim,), jnp.float32)
    w2_pt = jax.random.normal(k3, (n_actions, fc_dim), jnp.float32) \
        * (1.0 / fc_dim ** 0.5)
    b2 = 0.01 * jax.random.normal(k4, (n_actions,), jnp.float32)
    # PyTorch flattens NCHW as (c,h,w); the kernel's features are (h,w,c)-ordered
    # -> permute FC1 input rows so the math matches exactly.  Row index = p*64 + c.
    w1 = jnp.transpose(w1_pt, (2, 3, 1, 0)).reshape(d_in, fc_dim)
    # Pad FC2 columns to a full 128-lane vreg so the Q-value store is unmasked.
    a_pad = ((n_actions + 127) // 128) * 128
    w2 = jnp.pad(w2_pt.T, ((0, 0), (0, a_pad - n_actions)))
    b2p = jnp.pad(b2, (0, a_pad - n_actions))
    return w1, b1.reshape(1, fc_dim), w2, b2p.reshape(1, a_pad)


# ----------------------------------------------------------------------------
if __name__ == "__main__":
    key = jax.random.PRNGKey(0)
    kx, k0, k1, k2, kf = jax.random.split(key, 5)

    in_channels, n_actions = 4, 6
    filters = [16, 32, 64]
    fc = [256]

    # NCHW input like the PyTorch module; 64x64 -> 16 -> 8 -> 4 spatial, so
    # AdaptiveMaxPool2d((4,4)) is exactly the identity.
    x = jax.random.normal(kx, (2, in_channels, 64, 64), jnp.float32)

    params = (
        (
            make_conv_bn_params(k0, in_channels, filters[0], 8, row_order="ckk"),
            make_conv_bn_params(k1, filters[0], filters[1], 3, row_order="kkc"),
            make_conv_bn_params(k2, filters[1], filters[2], 3, row_order="kkc"),
        ),
        make_fc_params(kf, filters[2], fc[0], n_actions),
    )

    fwd = jax.jit(functools.partial(cnn_dqn_forward, n_actions=n_actions))
    out = jax.block_until_ready(fwd(x, params))
    assert out.shape == (2, n_actions), out.shape
    assert bool(jnp.all(jnp.isfinite(out)))
    print("KERNEL_OK")
</pallas_src>

<mosaic_0001>
module attributes {stable_mosaic.version = 11 : i64} {
  func.func @_cnn_dqn_kernel(%arg0: i32, %arg1: memref<512x256xbf16, #tpu.memory_space<vmem>>, %arg2: memref<256x16xbf16, #tpu.memory_space<vmem>>, %arg3: memref<2x16xf32, #tpu.memory_space<vmem>>, %arg4: memref<144x32xbf16, #tpu.memory_space<vmem>>, %arg5: memref<2x32xf32, #tpu.memory_space<vmem>>, %arg6: memref<288x64xbf16, #tpu.memory_space<vmem>>, %arg7: memref<2x64xf32, #tpu.memory_space<vmem>>, %arg8: memref<1024x256xbf16, #tpu.memory_space<vmem>>, %arg9: memref<1x256xf32, #tpu.memory_space<vmem>>, %arg10: memref<256x128xbf16, #tpu.memory_space<vmem>>, %arg11: memref<1x128xf32, #tpu.memory_space<vmem>>, %arg12: memref<2x128xf32, #tpu.memory_space<vmem>>, %arg13: memref<2x18x32x16xf32, #tpu.memory_space<vmem>>, %arg14: memref<256x32xf32, #tpu.memory_space<vmem>>, %arg15: memref<2x10x24x32xf32, #tpu.memory_space<vmem>>, %arg16: memref<64x64xf32, #tpu.memory_space<vmem>>) attributes {dimension_semantics = [#tpu.dimension_semantics<parallel>], iteration_bounds = array<i64: 1>, scalar_prefetch = 0 : i64, scratch_operands = 4 : i64, tpu.core_type = #tpu.core_type<tc>, window_params = [{transform_indices = @transform_0, window_bounds = array<i64: 512, 256>}, {pipeline_mode = #tpu.pipeline_mode<synchronous>, transform_indices = @transform_1, window_bounds = array<i64: 256, 16>}, {pipeline_mode = #tpu.pipeline_mode<synchronous>, transform_indices = @transform_2, window_bounds = array<i64: 2, 16>}, {pipeline_mode = #tpu.pipeline_mode<synchronous>, transform_indices = @transform_3, window_bounds = array<i64: 144, 32>}, {pipeline_mode = #tpu.pipeline_mode<synchronous>, transform_indices = @transform_4, window_bounds = array<i64: 2, 32>}, {pipeline_mode = #tpu.pipeline_mode<synchronous>, transform_indices = @transform_5, window_bounds = array<i64: 288, 64>}, {pipeline_mode = #tpu.pipeline_mode<synchronous>, transform_indices = @transform_6, window_bounds = array<i64: 2, 64>}, {pipeline_mode = #tpu.pipeline_mode<synchronous>, transform_indices = @transform_7, window_bounds = array<i64: 1024, 256>}, {pipeline_mode = #tpu.pipeline_mode<synchronous>, transform_indices = @transform_8, window_bounds = array<i64: 1, 256>}, {pipeline_mode = #tpu.pipeline_mode<synchronous>, transform_indices = @transform_9, window_bounds = array<i64: 256, 128>}, {pipeline_mode = #tpu.pipeline_mode<synchronous>, transform_indices = @transform_10, window_bounds = array<i64: 1, 128>}, {transform_indices = @transform_11, window_bounds = array<i64: 2, 128>}]} {
    %cst = arith.constant 0.000000e+00 : f32
    %0 = vector.broadcast %cst : f32 to vector<2x1x32x16xf32>
    %c0 = arith.constant 0 : index
    %c0_0 = arith.constant 0 : index
    %c0_1 = arith.constant 0 : index
    %c0_2 = arith.constant 0 : index
    %1 = vector.load %arg13[%c0, %c0_0, %c0_1, %c0_2] : memref<2x18x32x16xf32, #tpu.memory_space<vmem>>, vector<2x1x32x16xf32>
    tpu.vector_store %arg13[%c0, %c0_0, %c0_1, %c0_2], %0 {strides = array<i32>} : memref<2x18x32x16xf32, #tpu.memory_space<vmem>>, vector<2x1x32x16xf32>,
    %cst_3 = arith.constant 0.000000e+00 : f32
    %2 = vector.broadcast %cst_3 : f32 to vector<2x1x32x16xf32>
    %c0_4 = arith.constant 0 : index
    %c17 = arith.constant 17 : index
    %c0_5 = arith.constant 0 : index
    %c0_6 = arith.constant 0 : index
    %3 = vector.load %arg13[%c0_4, %c17, %c0_5, %c0_6] : memref<2x18x32x16xf32, #tpu.memory_space<vmem>>, vector<2x1x32x16xf32>
    tpu.vector_store %arg13[%c0_4, %c17, %c0_5, %c0_6], %2 {strides = array<i32>} : memref<2x18x32x16xf32, #tpu.memory_space<vmem>>, vector<2x1x32x16xf32>,
    %cst_7 = arith.constant 0.000000e+00 : f32
    %4 = vector.broadcast %cst_7 : f32 to vector<2x18x1x16xf32>
    %c0_8 = arith.constant 0 : index
    %c0_9 = arith.constant 0 : index
    %c7 = arith.constant 7 : index
    %c0_10 = arith.constant 0 : index
    %5 = vector.load %arg13[%c0_8, %c0_9, %c7, %c0_10] : memref<2x18x32x16xf32, #tpu.memory_space<vmem>>, vector<2x18x1x16xf32>
    tpu.vector_store %arg13[%c0_8, %c0_9, %c7, %c0_10], %4 {strides = array<i32>} : memref<2x18x32x16xf32, #tpu.memory_space<vmem>>, vector<2x18x1x16xf32>,
    %cst_11 = arith.constant 0.000000e+00 : f32
    %6 = vector.broadcast %cst_11 : f32 to vector<2x18x1x16xf32>
    %c0_12 = arith.constant 0 : index
    %c0_13 = arith.constant 0 : index
    %c24 = arith.constant 24 : index
    %c0_14 = arith.constant 0 : index
    %7 = vector.load %arg13[%c0_12, %c0_13, %c24, %c0_14] : memref<2x18x32x16xf32, #tpu.memory_space<vmem>>, vector<2x18x1x16xf32>
    tpu.vector_store %arg13[%c0_12, %c0_13, %c24, %c0_14], %6 {strides = array<i32>} : memref<2x18x32x16xf32, #tpu.memory_space<vmem>>, vector<2x18x1x16xf32>,
    %cst_15 = arith.constant 0.000000e+00 : f32
    %8 = vector.broadcast %cst_15 : f32 to vector<2x1x24x32xf32>
    %c0_16 = arith.constant 0 : index
    %c0_17 = arith.constant 0 : index
    %c0_18 = arith.constant 0 : index
    %c0_19 = arith.constant 0 : index
    %9 = vector.load %arg15[%c0_16, %c0_17, %c0_18, %c0_19] : memref<2x10x24x32xf32, #tpu.memory_space<vmem>>, vector<2x1x24x32xf32>
    tpu.vector_store %arg15[%c0_16, %c0_17, %c0_18, %c0_19], %8 {strides = array<i32>} : memref<2x10x24x32xf32, #tpu.memory_space<vmem>>, vector<2x1x24x32xf32>,
    %cst_20 = arith.constant 0.000000e+00 : f32
    %10 = vector.broadcast %cst_20 : f32 to vector<2x1x24x32xf32>
    %c0_21 = arith.constant 0 : index
    %c9 = arith.constant 9 : index
    %c0_22 = arith.constant 0 : index
    %c0_23 = arith.constant 0 : index
    %11 = vector.load %arg15[%c0_21, %c9, %c0_22, %c0_23] : memref<2x10x24x32xf32, #tpu.memory_space<vmem>>, vector<2x1x24x32xf32>
    tpu.vector_store %arg15[%c0_21, %c9, %c0_22, %c0_23], %10 {strides = array<i32>} : memref<2x10x24x32xf32, #tpu.memory_space<vmem>>, vector<2x1x24x32xf32>,
    %cst_24 = arith.constant 0.000000e+00 : f32
    %12 = vector.broadcast %cst_24 : f32 to vector<2x10x1x32xf32>
    %c0_25 = arith.constant 0 : index
    %c0_26 = arith.constant 0 : index
    %c7_27 = arith.constant 7 : index
    %c0_28 = arith.constant 0 : index
    %13 = vector.load %arg15[%c0_25, %c0_26, %c7_27, %c0_28] : memref<2x10x24x32xf32, #tpu.memory_space<vmem>>, vector<2x10x1x32xf32>
    tpu.vector_store %arg15[%c0_25, %c0_26, %c7_27, %c0_28], %12 {strides = array<i32>} : memref<2x10x24x32xf32, #tpu.memory_space<vmem>>, vector<2x10x1x32xf32>,
    %cst_29 = arith.constant 0.000000e+00 : f32
    %14 = vector.broadcast %cst_29 : f32 to vector<2x10x1x32xf32>
    %c0_30 = arith.constant 0 : index
    %c0_31 = arith.constant 0 : index
    %c16 = arith.constant 16 : index
    %c0_32 = arith.constant 0 : index
    %15 = vector.load %arg15[%c0_30, %c0_31, %c16, %c0_32] : memref<2x10x24x32xf32, #tpu.memory_space<vmem>>, vector<2x10x1x32xf32>
    tpu.vector_store %arg15[%c0_30, %c0_31, %c16, %c0_32], %14 {strides = array<i32>} : memref<2x10x24x32xf32, #tpu.memory_space<vmem>>, vector<2x10x1x32xf32>,
    %c0_33 = arith.constant 0 : index
    %c0_34 = arith.constant 0 : index
    %16 = vector.load %arg1[%c0_33, %c0_34] : memref<512x256xbf16, #tpu.memory_space<vmem>>, vector<512x256xbf16>
    %c0_35 = arith.constant 0 : index
    %c0_36 = arith.constant 0 : index
    %17 = vector.load %arg2[%c0_35, %c0_36] : memref<256x16xbf16, #tpu.memory_space<vmem>>, vector<256x16xbf16>
    %cst_37 = arith.constant dense<0.000000e+00> : vector<512x16xf32>
    %18 = tpu.matmul %16, %17, %cst_37 {dimension_numbers = #tpu.dot_dimension_numbers<[1], [0], [0], [1], [0, 0, 1, 1], [], []>} : vector<512x256xbf16>, vector<256x16xbf16>, vector<512x16xf32> -> vector<512x16xf32>
    %c0_38 = arith.constant 0 : index
    %c0_39 = arith.constant 0 : index
    %19 = vector.load %arg3[%c0_38, %c0_39] : memref<2x16xf32, #tpu.memory_space<vmem>>, vector<1x16xf32>
    %20 = vector.broadcast %19 : vector<1x16xf32> to vector<512x16xf32>
    %21 = arith.mulf %18, %20 : vector<512x16xf32>
    %c1 = arith.constant 1 : index
    %c0_40 = arith.constant 0 : index
    %22 = vector.load %arg3[%c1, %c0_40] : memref<2x16xf32, #tpu.memory_space<vmem>>, vector<1x16xf32>
    %23 = vector.broadcast %22 : vector<1x16xf32> to vector<512x16xf32>
    %24 = arith.addf %21, %23 : vector<512x16xf32>
    %cst_41 = arith.constant 0.000000e+00 : f32
    %25 = vector.broadcast %cst_41 : f32 to vector<512x16xf32>
    %26 = arith.maximumf %24, %25 : vector<512x16xf32>
    %27 = vector.shape_cast %26 : vector<512x16xf32> to vector<2x16x16x16xf32>
    %c0_42 = arith.constant 0 : index
    %c1_43 = arith.constant 1 : index
    %c8 = arith.constant 8 : index
    %c0_44 = arith.constant 0 : index
    %28 = vector.load %arg13[%c0_42, %c1_43, %c8, %c0_44] : memref<2x18x32x16xf32, #tpu.memory_space<vmem>>, vector<2x16x16x16xf32>
    tpu.vector_store %arg13[%c0_42, %c1_43, %c8, %c0_44], %27 {strides = array<i32>} : memref<2x18x32x16xf32, #tpu.memory_space<vmem>>, vector<2x16x16x16xf32>,
    %c0_45 = arith.constant 0 : index
    %c0_46 = arith.constant 0 : index
    %c7_47 = arith.constant 7 : index
    %c0_48 = arith.constant 0 : index
    %29 = vector.load %arg13[%c0_45, %c0_46, %c7_47, %c0_48] : memref<2x18x32x16xf32, #tpu.memory_space<vmem>>, vector<2x16x16x16xf32>
    %c0_49 = arith.constant 0 : index
    %c0_50 = arith.constant 0 : index
    %c8_51 = arith.constant 8 : index
    %c0_52 = arith.constant 0 : index
    %30 = vector.load %arg13[%c0_49, %c0_50, %c8_51, %c0_52] : memref<2x18x32x16xf32, #tpu.memory_space<vmem>>, vector<2x16x16x16xf32>
    %c0_53 = arith.constant 0 : index
    %c0_54 = arith.constant 0 : index
    %c9_55 = arith.constant 9 : index
    %c0_56 = arith.constant 0 : index
    %31 = vector.load %arg13[%c0_53, %c0_54, %c9_55, %c0_56] : memref<2x18x32x16xf32, #tpu.memory_space<vmem>>, vector<2x16x16x16xf32>
    %c0_57 = arith.constant 0 : index
    %c1_58 = arith.constant 1 : index
    %c7_59 = arith.constant 7 : index
    %c0_60 = arith.constant 0 : index
    %32 = vector.load %arg13[%c0_57, %c1_58, %c7_59, %c0_60] : memref<2x18x32x16xf32, #tpu.memory_space<vmem>>, vector<2x16x16x16xf32>
    %c0_61 = arith.constant 0 : index
    %c1_62 = arith.constant 1 : index
    %c8_63 = arith.constant 8 : index
    %c0_64 = arith.constant 0 : index
    %33 = vector.load %arg13[%c0_61, %c1_62, %c8_63, %c0_64] : memref<2x18x32x16xf32, #tpu.memory_space<vmem>>, vector<2x16x16x16xf32>
    %c0_65 = arith.constant 0 : index
    %c1_66 = arith.constant 1 : index
    %c9_67 = arith.constant 9 : index
    %c0_68 = arith.constant 0 : index
    %34 = vector.load %arg13[%c0_65, %c1_66, %c9_67, %c0_68] : memref<2x18x32x16xf32, #tpu.memory_space<vmem>>, vector<2x16x16x16xf32>
    %c0_69 = arith.constant 0 : index
    %c2 = arith.constant 2 : index
    %c7_70 = arith.constant 7 : index
    %c0_71 = arith.constant 0 : index
    %35 = vector.load %arg13[%c0_69, %c2, %c7_70, %c0_71] : memref<2x18x32x16xf32, #tpu.memory_space<vmem>>, vector<2x16x16x16xf32>
    %c0_72 = arith.constant 0 : index
    %c2_73 = arith.constant 2 : index
    %c8_74 = arith.constant 8 : index
    %c0_75 = arith.constant 0 : index
    %36 = vector.load %arg13[%c0_72, %c2_73, %c8_74, %c0_75] : memref<2x18x32x16xf32, #tpu.memory_space<vmem>>, vector<2x16x16x16xf32>
    %c0_76 = arith.constant 0 : index
    %c2_77 = arith.constant 2 : index
    %c9_78 = arith.constant 9 : index
    %c0_79 = arith.constant 0 : index
    %37 = vector.load %arg13[%c0_76, %c2_77, %c9_78, %c0_79] : memref<2x18x32x16xf32, #tpu.memory_space<vmem>>, vector<2x16x16x16xf32>
    %38 = tpu.concatenate %29, %30, %31, %32, %33, %34, %35, %36, %37 in 3 : vector<2x16x16x16xf32>, vector<2x16x16x16xf32>, vector<2x16x16x16xf32>, vector<2x16x16x16xf32>, vector<2x16x16x16xf32>, vector<2x16x16x16xf32>, vector<2x16x16x16xf32>, vector<2x16x16x16xf32>, vector<2x16x16x16xf32> -> vector<2x16x16x144xf32>
    %39 = vector.shape_cast %38 : vector<2x16x16x144xf32> to vector<512x144xf32>
    %40 = arith.truncf %39 : vector<512x144xf32> to vector<512x144xbf16>
    %c0_80 = arith.constant 0 : index
    %c0_81 = arith.constant 0 : index
    %41 = vector.load %arg4[%c0_80, %c0_81] : memref<144x32xbf16, #tpu.memory_space<vmem>>, vector<144x32xbf16>
    %cst_82 = arith.constant dense<0.000000e+00> : vector<512x32xf32>
    %42 = tpu.matmul %40, %41, %cst_82 {dimension_numbers = #tpu.dot_dimension_numbers<[1], [0], [0], [1], [0, 0, 1, 1], [], []>} : vector<512x144xbf16>, vector<144x32xbf16>, vector<512x32xf32> -> vector<512x32xf32>
    %c0_83 = arith.constant 0 : index
    %c0_84 = arith.constant 0 : index
    %43 = vector.load %arg5[%c0_83, %c0_84] : memref<2x32xf32, #tpu.memory_space<vmem>>, vector<1x32xf32>
    %44 = vector.broadcast %43 : vector<1x32xf32> to vector<512x32xf32>
    %45 = arith.mulf %42, %44 : vector<512x32xf32>
    %c1_85 = arith.constant 1 : index
    %c0_86 = arith.constant 0 : index
    %46 = vector.load %arg5[%c1_85, %c0_86] : memref<2x32xf32, #tpu.memory_space<vmem>>, vector<1x32xf32>
    %47 = vector.broadcast %46 : vector<1x32xf32> to vector<512x32xf32>
    %48 = arith.addf %45, %47 : vector<512x32xf32>
    %cst_87 = arith.constant 0.000000e+00 : f32
    %49 = vector.broadcast %cst_87 : f32 to vector<512x32xf32>
    %50 = arith.maximumf %48, %49 : vector<512x32xf32>
    %51 = vector.shape_cast %50 : vector<512x32xf32> to vector<16x2x16x32xf32>
    %52 = vector.extract_strided_slice %51 {offsets = [0, 0, 0, 0], sizes = [16, 1, 16, 32], strides = [1, 1, 1, 1]} : vector<16x2x16x32xf32> to vector<16x1x16x32xf32>
    %53 = vector.shape_cast %52 : vector<16x1x16x32xf32> to vector<16x16x32xf32>
    %54 = vector.extract_strided_slice %51 {offsets = [0, 1, 0, 0], sizes = [16, 1, 16, 32], strides = [1, 1, 1, 1]} : vector<16x2x16x32xf32> to vector<16x1x16x32xf32>
    %55 = vector.shape_cast %54 : vector<16x1x16x32xf32> to vector<16x16x32xf32>
    %56 = arith.maximumf %53, %55 : vector<16x16x32xf32>
    %57 = vector.shape_cast %56 : vector<16x16x32xf32> to vector<256x32xf32>
    %c0_88 = arith.constant 0 : index
    %c0_89 = arith.constant 0 : index
    %58 = vector.load %arg14[%c0_88, %c0_89] : memref<256x32xf32, #tpu.memory_space<vmem>>, vector<256x32xf32>
    tpu.vector_store %arg14[%c0_88, %c0_89], %57 {strides = array<i32>} : memref<256x32xf32, #tpu.memory_space<vmem>>, vector<256x32xf32>,
    %c0_90 = arith.constant 0 : index
    %c0_91 = arith.constant 0 : index
    %59 = tpu.strided_load %arg14[%c0_90, %c0_91] {strides = array<i32: 2, 1>} : memref<256x32xf32, #tpu.memory_space<vmem>>, vector<128x32xf32>
    %c1_92 = arith.constant 1 : index
    %c0_93 = arith.constant 0 : index
    %60 = tpu.strided_load %arg14[%c1_92, %c0_93] {strides = array<i32: 2, 1>} : memref<256x32xf32, #tpu.memory_space<vmem>>, vector<128x32xf32>
    %61 = arith.maximumf %59, %60 : vector<128x32xf32>
    %62 = vector.shape_cast %61 : vector<128x32xf32> to vector<2x8x8x32xf32>
    %c0_94 = arith.constant 0 : index
    %c1_95 = arith.constant 1 : index
    %c8_96 = arith.constant 8 : index
    %c0_97 = arith.constant 0 : index
    %63 = vector.load %arg15[%c0_94, %c1_95, %c8_96, %c0_97] : memref<2x10x24x32xf32, #tpu.memory_space<vmem>>, vector<2x8x8x32xf32>
    tpu.vector_store %arg15[%c0_94, %c1_95, %c8_96, %c0_97], %62 {strides = array<i32>} : memref<2x10x24x32xf32, #tpu.memory_space<vmem>>, vector<2x8x8x32xf32>,
    %c0_98 = arith.constant 0 : index
    %c0_99 = arith.constant 0 : index
    %c7_100 = arith.constant 7 : index
    %c0_101 = arith.constant 0 : index
    %64 = vector.load %arg15[%c0_98, %c0_99, %c7_100, %c0_101] : memref<2x10x24x32xf32, #tpu.memory_space<vmem>>, vector<2x8x8x32xf32>
    %c0_102 = arith.constant 0 : index
    %c0_103 = arith.constant 0 : index
    %c8_104 = arith.constant 8 : index
    %c0_105 = arith.constant 0 : index
    %65 = vector.load %arg15[%c0_102, %c0_103, %c8_104, %c0_105] : memref<2x10x24x32xf32, #tpu.memory_space<vmem>>, vector<2x8x8x32xf32>
    %c0_106 = arith.constant 0 : index
    %c0_107 = arith.constant 0 : index
    %c9_108 = arith.constant 9 : index
    %c0_109 = arith.constant 0 : index
    %66 = vector.load %arg15[%c0_106, %c0_107, %c9_108, %c0_109] : memref<2x10x24x32xf32, #tpu.memory_space<vmem>>, vector<2x8x8x32xf32>
    %c0_110 = arith.constant 0 : index
    %c1_111 = arith.constant 1 : index
    %c7_112 = arith.constant 7 : index
    %c0_113 = arith.constant 0 : index
    %67 = vector.load %arg15[%c0_110, %c1_111, %c7_112, %c0_113] : memref<2x10x24x32xf32, #tpu.memory_space<vmem>>, vector<2x8x8x32xf32>
    %c0_114 = arith.constant 0 : index
    %c1_115 = arith.constant 1 : index
    %c8_116 = arith.constant 8 : index
    %c0_117 = arith.constant 0 : index
    %68 = vector.load %arg15[%c0_114, %c1_115, %c8_116, %c0_117] : memref<2x10x24x32xf32, #tpu.memory_space<vmem>>, vector<2x8x8x32xf32>
    %c0_118 = arith.constant 0 : index
    %c1_119 = arith.constant 1 : index
    %c9_120 = arith.constant 9 : index
    %c0_121 = arith.constant 0 : index
    %69 = vector.load %arg15[%c0_118, %c1_119, %c9_120, %c0_121] : memref<2x10x24x32xf32, #tpu.memory_space<vmem>>, vector<2x8x8x32xf32>
    %c0_122 = arith.constant 0 : index
    %c2_123 = arith.constant 2 : index
    %c7_124 = arith.constant 7 : index
    %c0_125 = arith.constant 0 : index
    %70 = vector.load %arg15[%c0_122, %c2_123, %c7_124, %c0_125] : memref<2x10x24x32xf32, #tpu.memory_space<vmem>>, vector<2x8x8x32xf32>
    %c0_126 = arith.constant 0 : index
    %c2_127 = arith.constant 2 : index
    %c8_128 = arith.constant 8 : index
    %c0_129 = arith.constant 0 : index
    %71 = vector.load %arg15[%c0_126, %c2_127, %c8_128, %c0_129] : memref<2x10x24x32xf32, #tpu.memory_space<vmem>>, vector<2x8x8x32xf32>
    %c0_130 = arith.constant 0 : index
    %c2_131 = arith.constant 2 : index
    %c9_132 = arith.constant 9 : index
    %c0_133 = arith.constant 0 : index
    %72 = vector.load %arg15[%c0_130, %c2_131, %c9_132, %c0_133] : memref<2x10x24x32xf32, #tpu.memory_space<vmem>>, vector<2x8x8x32xf32>
    %73 = tpu.concatenate %64, %65, %66, %67, %68, %69, %70, %71, %72 in 3 : vector<2x8x8x32xf32>, vector<2x8x8x32xf32>, vector<2x8x8x32xf32>, vector<2x8x8x32xf32>, vector<2x8x8x32xf32>, vector<2x8x8x32xf32>, vector<2x8x8x32xf32>, vector<2x8x8x32xf32>, vector<2x8x8x32xf32> -> vector<2x8x8x288xf32>
    %74 = vector.shape_cast %73 : vector<2x8x8x288xf32> to vector<128x288xf32>
    %75 = arith.truncf %74 : vector<128x288xf32> to vector<128x288xbf16>
    %c0_134 = arith.constant 0 : index
    %c0_135 = arith.constant 0 : index
    %76 = vector.load %arg6[%c0_134, %c0_135] : memref<288x64xbf16, #tpu.memory_space<vmem>>, vector<288x64xbf16>
    %cst_136 = arith.constant dense<0.000000e+00> : vector<128x64xf32>
    %77 = tpu.matmul %75, %76, %cst_136 {dimension_numbers = #tpu.dot_dimension_numbers<[1], [0], [0], [1], [0, 0, 1, 1], [], []>} : vector<128x288xbf16>, vector<288x64xbf16>, vector<128x64xf32> -> vector<128x64xf32>
    %c0_137 = arith.constant 0 : index
    %c0_138 = arith.constant 0 : index
    %78 = vector.load %arg7[%c0_137, %c0_138] : memref<2x64xf32, #tpu.memory_space<vmem>>, vector<1x64xf32>
    %79 = vector.broadcast %78 : vector<1x64xf32> to vector<128x64xf32>
    %80 = arith.mulf %77, %79 : vector<128x64xf32>
    %c1_139 = arith.constant 1 : index
    %c0_140 = arith.constant 0 : index
    %81 = vector.load %arg7[%c1_139, %c0_140] : memref<2x64xf32, #tpu.memory_space<vmem>>, vector<1x64xf32>
    %82 = vector.broadcast %81 : vector<1x64xf32> to vector<128x64xf32>
    %83 = arith.addf %80, %82 : vector<128x64xf32>
    %cst_141 = arith.constant 0.000000e+00 : f32
    %84 = vector.broadcast %cst_141 : f32 to vector<128x64xf32>
    %85 = arith.maximumf %83, %84 : vector<128x64xf32>
    %86 = vector.shape_cast %85 : vector<128x64xf32> to vector<8x2x8x64xf32>
    %87 = vector.extract_strided_slice %86 {offsets = [0, 0, 0, 0], sizes = [8, 1, 8, 64], strides = [1, 1, 1, 1]} : vector<8x2x8x64xf32> to vector<8x1x8x64xf32>
    %88 = vector.shape_cast %87 : vector<8x1x8x64xf32> to vector<8x8x64xf32>
    %89 = vector.extract_strided_slice %86 {offsets = [0, 1, 0, 0], sizes = [8, 1, 8, 64], strides = [1, 1, 1, 1]} : vector<8x2x8x64xf32> to vector<8x1x8x64xf32>
    %90 = vector.shape_cast %89 : vector<8x1x8x64xf32> to vector<8x8x64xf32>
    %91 = arith.maximumf %88, %90 : vector<8x8x64xf32>
    %92 = vector.shape_cast %91 : vector<8x8x64xf32> to vector<64x64xf32>
    %c0_142 = arith.constant 0 : index
    %c0_143 = arith.constant 0 : index
    %93 = vector.load %arg16[%c0_142, %c0_143] : memref<64x64xf32, #tpu.memory_space<vmem>>, vector<64x64xf32>
    tpu.vector_store %arg16[%c0_142, %c0_143], %92 {strides = array<i32>} : memref<64x64xf32, #tpu.memory_space<vmem>>, vector<64x64xf32>,
    %c0_144 = arith.constant 0 : index
    %c0_145 = arith.constant 0 : index
    %94 = tpu.strided_load %arg16[%c0_144, %c0_145] {strides = array<i32: 2, 1>} : memref<64x64xf32, #tpu.memory_space<vmem>>, vector<32x64xf32>
    %c1_146 = arith.constant 1 : index
    %c0_147 = arith.constant 0 : index
    %95 = tpu.strided_load %arg16[%c1_146, %c0_147] {strides = array<i32: 2, 1>} : memref<64x64xf32, #tpu.memory_space<vmem>>, vector<32x64xf32>
    %96 = arith.maximumf %94, %95 : vector<32x64xf32>
    %97 = vector.shape_cast %96 : vector<32x64xf32> to vector<2x16x64xf32>
    %cst_148 = arith.constant 0.000000e+00 : f32
    %98 = vector.broadcast %cst_148 : f32 to vector<2x256xf32>
    %99 = vector.extract_strided_slice %97 {offsets = [0, 0, 0], sizes = [2, 1, 64], strides = [1, 1, 1]} : vector<2x16x64xf32> to vector<2x1x64xf32>
    %100 = vector.shape_cast %99 : vector<2x1x64xf32> to vector<2x64xf32>
    %101 = arith.truncf %100 : vector<2x64xf32> to vector<2x64xbf16>
    %c0_149 = arith.constant 0 : index
    %c0_150 = arith.constant 0 : index
    %102 = vector.load %arg8[%c0_149, %c0_150] : memref<1024x256xbf16, #tpu.memory_space<vmem>>, vector<64x256xbf16>
    %cst_151 = arith.constant dense<0.000000e+00> : vector<2x256xf32>
    %103 = tpu.matmul %101, %102, %cst_151 {dimension_numbers = #tpu.dot_dimension_numbers<[1], [0], [0], [1], [0, 0, 1, 1], [], []>} : vector<2x64xbf16>, vector<64x256xbf16>, vector<2x256xf32> -> vector<2x256xf32>
    %104 = arith.addf %98, %103 : vector<2x256xf32>
    %105 = vector.extract_strided_slice %97 {offsets = [0, 1, 0], sizes = [2, 1, 64], strides = [1, 1, 1]} : vector<2x16x64xf32> to vector<2x1x64xf32>
    %106 = vector.shape_cast %105 : vector<2x1x64xf32> to vector<2x64xf32>
    %107 = arith.truncf %106 : vector<2x64xf32> to vector<2x64xbf16>
    %c64 = arith.constant 64 : index
    %c0_152 = arith.constant 0 : index
    %108 = vector.load %arg8[%c64, %c0_152] : memref<1024x256xbf16, #tpu.memory_space<vmem>>, vector<64x256xbf16>
    %cst_153 = arith.constant dense<0.000000e+00> : vector<2x256xf32>
    %109 = tpu.matmul %107, %108, %cst_153 {dimension_numbers = #tpu.dot_dimension_numbers<[1], [0], [0], [1], [0, 0, 1, 1], [], []>} : vector<2x64xbf16>, vector<64x256xbf16>, vector<2x256xf32> -> vector<2x256xf32>
    %110 = arith.addf %104, %109 : vector<2x256xf32>
    %111 = vector.extract_strided_slice %97 {offsets = [0, 2, 0], sizes = [2, 1, 64], strides = [1, 1, 1]} : vector<2x16x64xf32> to vector<2x1x64xf32>
    %112 = vector.shape_cast %111 : vector<2x1x64xf32> to vector<2x64xf32>
    %113 = arith.truncf %112 : vector<2x64xf32> to vector<2x64xbf16>
    %c128 = arith.constant 128 : index
    %c0_154 = arith.constant 0 : index
    %114 = vector.load %arg8[%c128, %c0_154] : memref<1024x256xbf16, #tpu.memory_space<vmem>>, vector<64x256xbf16>
    %cst_155 = arith.constant dense<0.000000e+00> : vector<2x256xf32>
    %115 = tpu.matmul %113, %114, %cst_155 {dimension_numbers = #tpu.dot_dimension_numbers<[1], [0], [0], [1], [0, 0, 1, 1], [], []>} : vector<2x64xbf16>, vector<64x256xbf16>, vector<2x256xf32> -> vector<2x256xf32>
    %116 = arith.addf %110, %115 : vector<2x256xf32>
    %117 = vector.extract_strided_slice %97 {offsets = [0, 3, 0], sizes = [2, 1, 64], strides = [1, 1, 1]} : vector<2x16x64xf32> to vector<2x1x64xf32>
    %118 = vector.shape_cast %117 : vector<2x1x64xf32> to vector<2x64xf32>
    %119 = arith.truncf %118 : vector<2x64xf32> to vector<2x64xbf16>
    %c192 = arith.constant 192 : index
    %c0_156 = arith.constant 0 : index
    %120 = vector.load %arg8[%c192, %c0_156] : memref<1024x256xbf16, #tpu.memory_space<vmem>>, vector<64x256xbf16>
    %cst_157 = arith.constant dense<0.000000e+00> : vector<2x256xf32>
    %121 = tpu.matmul %119, %120, %cst_157 {dimension_numbers = #tpu.dot_dimension_numbers<[1], [0], [0], [1], [0, 0, 1, 1], [], []>} : vector<2x64xbf16>, vector<64x256xbf16>, vector<2x256xf32> -> vector<2x256xf32>
    %122 = arith.addf %116, %121 : vector<2x256xf32>
    %123 = vector.extract_strided_slice %97 {offsets = [0, 4, 0], sizes = [2, 1, 64], strides = [1, 1, 1]} : vector<2x16x64xf32> to vector<2x1x64xf32>
    %124 = vector.shape_cast %123 : vector<2x1x64xf32> to vector<2x64xf32>
    %125 = arith.truncf %124 : vector<2x64xf32> to vector<2x64xbf16>
    %c256 = arith.constant 256 : index
    %c0_158 = arith.constant 0 : index
    %126 = vector.load %arg8[%c256, %c0_158] : memref<1024x256xbf16, #tpu.memory_space<vmem>>, vector<64x256xbf16>
    %cst_159 = arith.constant dense<0.000000e+00> : vector<2x256xf32>
    %127 = tpu.matmul %125, %126, %cst_159 {dimension_numbers = #tpu.dot_dimension_numbers<[1], [0], [0], [1], [0, 0, 1, 1], [], []>} : vector<2x64xbf16>, vector<64x256xbf16>, vector<2x256xf32> -> vector<2x256xf32>
    %128 = arith.addf %122, %127 : vector<2x256xf32>
    %129 = vector.extract_strided_slice %97 {offsets = [0, 5, 0], sizes = [2, 1, 64], strides = [1, 1, 1]} : vector<2x16x64xf32> to vector<2x1x64xf32>
    %130 = vector.shape_cast %129 : vector<2x1x64xf32> to vector<2x64xf32>
    %131 = arith.truncf %130 : vector<2x64xf32> to vector<2x64xbf16>
    %c320 = arith.constant 320 : index
    %c0_160 = arith.constant 0 : index
    %132 = vector.load %arg8[%c320, %c0_160] : memref<1024x256xbf16, #tpu.memory_space<vmem>>, vector<64x256xbf16>
    %cst_161 = arith.constant dense<0.000000e+00> : vector<2x256xf32>
    %133 = tpu.matmul %131, %132, %cst_161 {dimension_numbers = #tpu.dot_dimension_numbers<[1], [0], [0], [1], [0, 0, 1, 1], [], []>} : vector<2x64xbf16>, vector<64x256xbf16>, vector<2x256xf32> -> vector<2x256xf32>
    %134 = arith.addf %128, %133 : vector<2x256xf32>
    %135 = vector.extract_strided_slice %97 {offsets = [0, 6, 0], sizes = [2, 1, 64], strides = [1, 1, 1]} : vector<2x16x64xf32> to vector<2x1x64xf32>
    %136 = vector.shape_cast %135 : vector<2x1x64xf32> to vector<2x64xf32>
    %137 = arith.truncf %136 : vector<2x64xf32> to vector<2x64xbf16>
    %c384 = arith.constant 384 : index
    %c0_162 = arith.constant 0 : index
    %138 = vector.load %arg8[%c384, %c0_162] : memref<1024x256xbf16, #tpu.memory_space<vmem>>, vector<64x256xbf16>
    %cst_163 = arith.constant dense<0.000000e+00> : vector<2x256xf32>
    %139 = tpu.matmul %137, %138, %cst_163 {dimension_numbers = #tpu.dot_dimension_numbers<[1], [0], [0], [1], [0, 0, 1, 1], [], []>} : vector<2x64xbf16>, vector<64x256xbf16>, vector<2x256xf32> -> vector<2x256xf32>
    %140 = arith.addf %134, %139 : vector<2x256xf32>
    %141 = vector.extract_strided_slice %97 {offsets = [0, 7, 0], sizes = [2, 1, 64], strides = [1, 1, 1]} : vector<2x16x64xf32> to vector<2x1x64xf32>
    %142 = vector.shape_cast %141 : vector<2x1x64xf32> to vector<2x64xf32>
    %143 = arith.truncf %142 : vector<2x64xf32> to vector<2x64xbf16>
    %c448 = arith.constant 448 : index
    %c0_164 = arith.constant 0 : index
    %144 = vector.load %arg8[%c448, %c0_164] : memref<1024x256xbf16, #tpu.memory_space<vmem>>, vector<64x256xbf16>
    %cst_165 = arith.constant dense<0.000000e+00> : vector<2x256xf32>
    %145 = tpu.matmul %143, %144, %cst_165 {dimension_numbers = #tpu.dot_dimension_numbers<[1], [0], [0], [1], [0, 0, 1, 1], [], []>} : vector<2x64xbf16>, vector<64x256xbf16>, vector<2x256xf32> -> vector<2x256xf32>
    %146 = arith.addf %140, %145 : vector<2x256xf32>
    %147 = vector.extract_strided_slice %97 {offsets = [0, 8, 0], sizes = [2, 1, 64], strides = [1, 1, 1]} : vector<2x16x64xf32> to vector<2x1x64xf32>
    %148 = vector.shape_cast %147 : vector<2x1x64xf32> to vector<2x64xf32>
    %149 = arith.truncf %148 : vector<2x64xf32> to vector<2x64xbf16>
    %c512 = arith.constant 512 : index
    %c0_166 = arith.constant 0 : index
    %150 = vector.load %arg8[%c512, %c0_166] : memref<1024x256xbf16, #tpu.memory_space<vmem>>, vector<64x256xbf16>
    %cst_167 = arith.constant dense<0.000000e+00> : vector<2x256xf32>
    %151 = tpu.matmul %149, %150, %cst_167 {dimension_numbers = #tpu.dot_dimension_numbers<[1], [0], [0], [1], [0, 0, 1, 1], [], []>} : vector<2x64xbf16>, vector<64x256xbf16>, vector<2x256xf32> -> vector<2x256xf32>
    %152 = arith.addf %146, %151 : vector<2x256xf32>
    %153 = vector.extract_strided_slice %97 {offsets = [0, 9, 0], sizes = [2, 1, 64], strides = [1, 1, 1]} : vector<2x16x64xf32> to vector<2x1x64xf32>
    %154 = vector.shape_cast %153 : vector<2x1x64xf32> to vector<2x64xf32>
    %155 = arith.truncf %154 : vector<2x64xf32> to vector<2x64xbf16>
    %c576 = arith.constant 576 : index
    %c0_168 = arith.constant 0 : index
    %156 = vector.load %arg8[%c576, %c0_168] : memref<1024x256xbf16, #tpu.memory_space<vmem>>, vector<64x256xbf16>
    %cst_169 = arith.constant dense<0.000000e+00> : vector<2x256xf32>
    %157 = tpu.matmul %155, %156, %cst_169 {dimension_numbers = #tpu.dot_dimension_numbers<[1], [0], [0], [1], [0, 0, 1, 1], [], []>} : vector<2x64xbf16>, vector<64x256xbf16>, vector<2x256xf32> -> vector<2x256xf32>
    %158 = arith.addf %152, %157 : vector<2x256xf32>
    %159 = vector.extract_strided_slice %97 {offsets = [0, 10, 0], sizes = [2, 1, 64], strides = [1, 1, 1]} : vector<2x16x64xf32> to vector<2x1x64xf32>
    %160 = vector.shape_cast %159 : vector<2x1x64xf32> to vector<2x64xf32>
    %161 = arith.truncf %160 : vector<2x64xf32> to vector<2x64xbf16>
    %c640 = arith.constant 640 : index
    %c0_170 = arith.constant 0 : index
    %162 = vector.load %arg8[%c640, %c0_170] : memref<1024x256xbf16, #tpu.memory_space<vmem>>, vector<64x256xbf16>
    %cst_171 = arith.constant dense<0.000000e+00> : vector<2x256xf32>
    %163 = tpu.matmul %161, %162, %cst_171 {dimension_numbers = #tpu.dot_dimension_numbers<[1], [0], [0], [1], [0, 0, 1, 1], [], []>} : vector<2x64xbf16>, vector<64x256xbf16>, vector<2x256xf32> -> vector<2x256xf32>
    %164 = arith.addf %158, %163 : vector<2x256xf32>
    %165 = vector.extract_strided_slice %97 {offsets = [0, 11, 0], sizes = [2, 1, 64], strides = [1, 1, 1]} : vector<2x16x64xf32> to vector<2x1x64xf32>
    %166 = vector.shape_cast %165 : vector<2x1x64xf32> to vector<2x64xf32>
    %167 = arith.truncf %166 : vector<2x64xf32> to vector<2x64xbf16>
    %c704 = arith.constant 704 : index
    %c0_172 = arith.constant 0 : index
    %168 = vector.load %arg8[%c704, %c0_172] : memref<1024x256xbf16, #tpu.memory_space<vmem>>, vector<64x256xbf16>
    %cst_173 = arith.constant dense<0.000000e+00> : vector<2x256xf32>
    %169 = tpu.matmul %167, %168, %cst_173 {dimension_numbers = #tpu.dot_dimension_numbers<[1], [0], [0], [1], [0, 0, 1, 1], [], []>} : vector<2x64xbf16>, vector<64x256xbf16>, vector<2x256xf32> -> vector<2x256xf32>
    %170 = arith.addf %164, %169 : vector<2x256xf32>
    %171 = vector.extract_strided_slice %97 {offsets = [0, 12, 0], sizes = [2, 1, 64], strides = [1, 1, 1]} : vector<2x16x64xf32> to vector<2x1x64xf32>
    %172 = vector.shape_cast %171 : vector<2x1x64xf32> to vector<2x64xf32>
    %173 = arith.truncf %172 : vector<2x64xf32> to vector<2x64xbf16>
    %c768 = arith.constant 768 : index
    %c0_174 = arith.constant 0 : index
    %174 = vector.load %arg8[%c768, %c0_174] : memref<1024x256xbf16, #tpu.memory_space<vmem>>, vector<64x256xbf16>
    %cst_175 = arith.constant dense<0.000000e+00> : vector<2x256xf32>
    %175 = tpu.matmul %173, %174, %cst_175 {dimension_numbers = #tpu.dot_dimension_numbers<[1], [0], [0], [1], [0, 0, 1, 1], [], []>} : vector<2x64xbf16>, vector<64x256xbf16>, vector<2x256xf32> -> vector<2x256xf32>
    %176 = arith.addf %170, %175 : vector<2x256xf32>
    %177 = vector.extract_strided_slice %97 {offsets = [0, 13, 0], sizes = [2, 1, 64], strides = [1, 1, 1]} : vector<2x16x64xf32> to vector<2x1x64xf32>
    %178 = vector.shape_cast %177 : vector<2x1x64xf32> to vector<2x64xf32>
    %179 = arith.truncf %178 : vector<2x64xf32> to vector<2x64xbf16>
    %c832 = arith.constant 832 : index
    %c0_176 = arith.constant 0 : index
    %180 = vector.load %arg8[%c832, %c0_176] : memref<1024x256xbf16, #tpu.memory_space<vmem>>, vector<64x256xbf16>
    %cst_177 = arith.constant dense<0.000000e+00> : vector<2x256xf32>
    %181 = tpu.matmul %179, %180, %cst_177 {dimension_numbers = #tpu.dot_dimension_numbers<[1], [0], [0], [1], [0, 0, 1, 1], [], []>} : vector<2x64xbf16>, vector<64x256xbf16>, vector<2x256xf32> -> vector<2x256xf32>
    %182 = arith.addf %176, %181 : vector<2x256xf32>
    %183 = vector.extract_strided_slice %97 {offsets = [0, 14, 0], sizes = [2, 1, 64], strides = [1, 1, 1]} : vector<2x16x64xf32> to vector<2x1x64xf32>
    %184 = vector.shape_cast %183 : vector<2x1x64xf32> to vector<2x64xf32>
    %185 = arith.truncf %184 : vector<2x64xf32> to vector<2x64xbf16>
    %c896 = arith.constant 896 : index
    %c0_178 = arith.constant 0 : index
    %186 = vector.load %arg8[%c896, %c0_178] : memref<1024x256xbf16, #tpu.memory_space<vmem>>, vector<64x256xbf16>
    %cst_179 = arith.constant dense<0.000000e+00> : vector<2x256xf32>
    %187 = tpu.matmul %185, %186, %cst_179 {dimension_numbers = #tpu.dot_dimension_numbers<[1], [0], [0], [1], [0, 0, 1, 1], [], []>} : vector<2x64xbf16>, vector<64x256xbf16>, vector<2x256xf32> -> vector<2x256xf32>
    %188 = arith.addf %182, %187 : vector<2x256xf32>
    %189 = vector.extract_strided_slice %97 {offsets = [0, 15, 0], sizes = [2, 1, 64], strides = [1, 1, 1]} : vector<2x16x64xf32> to vector<2x1x64xf32>
    %190 = vector.shape_cast %189 : vector<2x1x64xf32> to vector<2x64xf32>
    %191 = arith.truncf %190 : vector<2x64xf32> to vector<2x64xbf16>
    %c960 = arith.constant 960 : index
    %c0_180 = arith.constant 0 : index
    %192 = vector.load %arg8[%c960, %c0_180] : memref<1024x256xbf16, #tpu.memory_space<vmem>>, vector<64x256xbf16>
    %cst_181 = arith.constant dense<0.000000e+00> : vector<2x256xf32>
    %193 = tpu.matmul %191, %192, %cst_181 {dimension_numbers = #tpu.dot_dimension_numbers<[1], [0], [0], [1], [0, 0, 1, 1], [], []>} : vector<2x64xbf16>, vector<64x256xbf16>, vector<2x256xf32> -> vector<2x256xf32>
    %194 = arith.addf %188, %193 : vector<2x256xf32>
    %c0_182 = arith.constant 0 : index
    %c0_183 = arith.constant 0 : index
    %195 = vector.load %arg9[%c0_182, %c0_183] : memref<1x256xf32, #tpu.memory_space<vmem>>, vector<1x256xf32>
    %196 = vector.broadcast %195 : vector<1x256xf32> to vector<2x256xf32>
    %197 = arith.addf %194, %196 : vector<2x256xf32>
    %cst_184 = arith.constant 0.000000e+00 : f32
    %198 = vector.broadcast %cst_184 : f32 to vector<2x256xf32>
    %199 = arith.maximumf %197, %198 : vector<2x256xf32>
    %200 = arith.truncf %199 : vector<2x256xf32> to vector<2x256xbf16>
    %c0_185 = arith.constant 0 : index
    %c0_186 = arith.constant 0 : index
    %201 = vector.load %arg10[%c0_185, %c0_186] : memref<256x128xbf16, #tpu.memory_space<vmem>>, vector<256x128xbf16>
    %cst_187 = arith.constant dense<0.000000e+00> : vector<2x128xf32>
    %202 = tpu.matmul %200, %201, %cst_187 {dimension_numbers = #tpu.dot_dimension_numbers<[1], [0], [0], [1], [0, 0, 1, 1], [], []>} : vector<2x256xbf16>, vector<256x128xbf16>, vector<2x128xf32> -> vector<2x128xf32>
    %c0_188 = arith.constant 0 : index
    %c0_189 = arith.constant 0 : index
    %203 = vector.load %arg11[%c0_188, %c0_189] : memref<1x128xf32, #tpu.memory_space<vmem>>, vector<1x128xf32>
    %204 = vector.broadcast %203 : vector<1x128xf32> to vector<2x128xf32>
    %205 = arith.addf %202, %204 : vector<2x128xf32>
    %c0_190 = arith.constant 0 : index
    %c0_191 = arith.constant 0 : index
    %206 = vector.load %arg12[%c0_190, %c0_191] : memref<2x128xf32, #tpu.memory_space<vmem>>, vector<2x128xf32>
    tpu.vector_store %arg12[%c0_190, %c0_191], %205 {strides = array<i32>} : memref<2x128xf32, #tpu.memory_space<vmem>>, vector<2x128xf32>,
    return
  }
  func.func @transform_0(%arg0: i32) -> (i32, i32) {
    %c0_i32 = arith.constant 0 : i32
    %c0_i32_0 = arith.constant 0 : i32
    return %arg0, %c0_i32 : i32, i32
  }
  func.func @transform_1(%arg0: i32) -> (i32, i32) {
    %c0_i32 = arith.constant 0 : i32
    %c0_i32_0 = arith.constant 0 : i32
    %c0_i32_1 = arith.constant 0 : i32
    return %c0_i32, %c0_i32_0 : i32, i32
  }
  func.func @transform_2(%arg0: i32) -> (i32, i32) {
    %c0_i32 = arith.constant 0 : i32
    %c0_i32_0 = arith.constant 0 : i32
    %c0_i32_1 = arith.constant 0 : i32
    return %c0_i32, %c0_i32_0 : i32, i32
  }
  func.func @transform_3(%arg0: i32) -> (i32, i32) {
    %c0_i32 = arith.constant 0 : i32
    %c0_i32_0 = arith.constant 0 : i32
    %c0_i32_1 = arith.constant 0 : i32
    return %c0_i32, %c0_i32_0 : i32, i32
  }
  func.func @transform_4(%arg0: i32) -> (i32, i32) {
    %c0_i32 = arith.constant 0 : i32
    %c0_i32_0 = arith.constant 0 : i32
    %c0_i32_1 = arith.constant 0 : i32
    return %c0_i32, %c0_i32_0 : i32, i32
  }
  func.func @transform_5(%arg0: i32) -> (i32, i32) {
    %c0_i32 = arith.constant 0 : i32
    %c0_i32_0 = arith.constant 0 : i32
    %c0_i32_1 = arith.constant 0 : i32
    return %c0_i32, %c0_i32_0 : i32, i32
  }
  func.func @transform_6(%arg0: i32) -> (i32, i32) {
    %c0_i32 = arith.constant 0 : i32
    %c0_i32_0 = arith.constant 0 : i32
    %c0_i32_1 = arith.constant 0 : i32
    return %c0_i32, %c0_i32_0 : i32, i32
  }
  func.func @transform_7(%arg0: i32) -> (i32, i32) {
    %c0_i32 = arith.constant 0 : i32
    %c0_i32_0 = arith.constant 0 : i32
    %c0_i32_1 = arith.constant 0 : i32
    return %c0_i32, %c0_i32_0 : i32, i32
  }
  func.func @transform_8(%arg0: i32) -> (i32, i32) {
    %c0_i32 = arith.constant 0 : i32
    %c0_i32_0 = arith.constant 0 : i32
    %c0_i32_1 = arith.constant 0 : i32
    return %c0_i32, %c0_i32_0 : i32, i32
  }
  func.func @transform_9(%arg0: i32) -> (i32, i32) {
    %c0_i32 = arith.constant 0 : i32
    %c0_i32_0 = arith.constant 0 : i32
    %c0_i32_1 = arith.constant 0 : i32
    return %c0_i32, %c0_i32_0 : i32, i32
  }
  func.func @transform_10(%arg0: i32) -> (i32, i32) {
    %c0_i32 = arith.constant 0 : i32
    %c0_i32_0 = arith.constant 0 : i32
    %c0_i32_1 = arith.constant 0 : i32
    return %c0_i32, %c0_i32_0 : i32, i32
  }
  func.func @transform_11(%arg0: i32) -> (i32, i32) {
    %c0_i32 = arith.constant 0 : i32
    %c0_i32_0 = arith.constant 0 : i32
    return %arg0, %c0_i32 : i32, i32
  }
}

</mosaic_0001>

<bundles_post_ra>
// kernel: cnn_dqn_forward.1
= control target key start
LH: loop header
LB: loop body
LE: loop exit
PB: predicated region body
PF: predicated region fallthrough
CT: control target
= control target key end

     0   :  { %16 = vsyncpa [#allocation7], 0  ;;  %s13003_s0 = inlined_call_operand.hbm [shape: bf16[512,256], index: 0, kind: input, shape index: {}]   ;;  %s13004_s1 = inlined_call_operand.hbm [shape: bf16[256,16], index: 1, kind: input, shape index: {}]   ;;  %s13005_s2 = inlined_call_operand.hbm [shape: f32[2,16], index: 2, kind: input, shape index: {}]   ;;  %s13006_s3 = inlined_call_operand.hbm [shape: bf16[144,32], index: 3, kind: input, shape index: {}]   ;;  %s13007_s4 = inlined_call_operand.hbm [shape: f32[2,32], index: 4, kind: input, shape index: {}]   ;;  %s13008_s5 = inlined_call_operand.hbm [shape: bf16[288,64], index: 5, kind: input, shape index: {}]   ;;  %s13009_s6 = inlined_call_operand.hbm [shape: f32[2,64], index: 6, kind: input, shape index: {}]   ;;  %s13010_s7 = inlined_call_operand.hbm [shape: bf16[1024,256], index: 7, kind: input, shape index: {}]   ;;  %s13011_s8 = inlined_call_operand.hbm [shape: f32[1,256], index: 8, kind: input, shape index: {}]   ;;  %s13012_s9 = inlined_call_operand.hbm [shape: bf16[256,128], index: 9, kind: input, shape index: {}]   ;;  %s13013_s10 = inlined_call_operand.hbm [shape: f32[1,128], index: 10, kind: input, shape index: {}]   ;;  %s13014_s11 = inlined_call_operand.hbm [shape: f32[2,128], index: 11, kind: output, shape index: {}]  }
   0x1   :  { %17 = vsyncpa [#allocation10], 0 }
   0x2   :  { %18 = vsyncpa [#allocation13], 0 }
   0x3   :  { %19 = vsyncpa [#allocation16], 0 }
   0x4   :  { %20 = vsyncpa [#allocation19], 0 }
   0x5   :  { %21 = vsyncpa [#allocation22], 0 }
   0x6   :  { %22 = vsyncpa [#allocation8], 0  ;;  %s10444_s17 = smov [#allocation9]   ;;  %s10166_s21 = scalar_lea.hbm %s13004_s1, 2048 }
   0x7   :  { %s40_s18 = sshll.u32 %s10444_s17, 4  ;;  %p10167_p0 = scmp.ne.s32.totalorder %s13004_s1, %s10166_s21  ;;  %s41_s18 = int_to_ptr.vmem [resolvable:$true] %s40_s18 }
   0x8   :  { %p10170_p1 = scmp.lt.u32.totalorder %s10166_s21, %s13004_s1 }
   0xa   :  { %p10172_p2 = pnand %p10170_p1, %p10167_p0 }
   0xc   :  { %10175 = shalt.err (!%p10172_p2)
}
   0xd   :  { %s10176_s26 = scalar_lea.vmem %s41_s18, 2048  ;;  %p10181_p4 = scmp.lt.s32.totalorder %s41_s18, %s41_s18 }
   0xe   :  { %p10177_p3 = scmp.ne.s32.totalorder %s41_s18, %s10176_s26  ;;  %p10182_p5 = scmp.lt.s32.totalorder %s10176_s26, %s10176_s26 }
  0x10   :  { %p10183_p6 = por %p10182_p5, %p10181_p4 }
  0x12   :  { %p10184_p7 = pnand %p10183_p6, %p10177_p3 }
  0x14   :  { %10187 = shalt.err (!%p10184_p7)
}
  0x15   :  { %s10445_s27 = smov 64   ;;  %s10446_s28 = smov 4  }
  0x16   :  { %46 = dma.hbm_to_vmem [thread:$0]  %s13004_s1, 2048, %s41_s18, [#allocation10], %s10445_s27, %s10445_s27, %s10446_s28  }
  0x17   :  { %s10447_s12 = smov [#allocation12]   ;;  %s10448_s14 = smov [#allocation15]  }
  0x18   :  { %s62_s13 = sshll.u32 %s10447_s12, 4  ;;  %s84_s15 = sshll.u32 %s10448_s14, 4  ;;  %s63_s13 = int_to_ptr.vmem [resolvable:$true] %s62_s13  ;;  %s85_s15 = int_to_ptr.vmem [resolvable:$true] %s84_s15 }
  0x19   :  { %s10188_s19 = scalar_lea.hbm %s13006_s3, 1152 }
  0x1a   :  { %p10189_p8 = scmp.ne.s32.totalorder %s13006_s3, %s10188_s19  ;;  %p10192_p9 = scmp.lt.u32.totalorder %s10188_s19, %s13006_s3 }
  0x1c   :  { %p10194_p10 = pnand %p10192_p9, %p10189_p8 }
  0x1e   :  { %10197 = shalt.err (!%p10194_p10)
}
  0x1f   :  { %s10198_s1 = scalar_lea.vmem %s63_s13, 1152  ;;  %p10203_p12 = scmp.lt.s32.totalorder %s63_s13, %s63_s13 }
  0x20   :  { %p10199_p11 = scmp.ne.s32.totalorder %s63_s13, %s10198_s1  ;;  %p10204_p13 = scmp.lt.s32.totalorder %s10198_s1, %s10198_s1 }
  0x22   :  { %p10205_p0 = por %p10204_p13, %p10203_p12 }
  0x24   :  { %p10206_p1 = pnand %p10205_p0, %p10199_p11 }
  0x26   :  { %10209 = shalt.err (!%p10206_p1)
}
  0x27   :  { %68 = dma.hbm_to_vmem [thread:$0]  %s13006_s3, 1152, %s63_s13, [#allocation13], %s10445_s27, %s10445_s27, %s10446_s28  }
  0x28   :  { %s10210_s29 = scalar_lea.hbm %s13008_s5, 2304 }
  0x29   :  { %p10211_p2 = scmp.ne.s32.totalorder %s13008_s5, %s10210_s29  ;;  %p10214_p3 = scmp.lt.u32.totalorder %s10210_s29, %s13008_s5 }
  0x2b   :  { %p10216_p4 = pnand %p10214_p3, %p10211_p2 }
  0x2d   :  { %10219 = shalt.err (!%p10216_p4)
}
  0x2e   :  { %s10220_s17 = scalar_lea.vmem %s85_s15, 2304  ;;  %p10225_p6 = scmp.lt.s32.totalorder %s85_s15, %s85_s15 }
  0x2f   :  { %p10221_p5 = scmp.ne.s32.totalorder %s85_s15, %s10220_s17  ;;  %p10226_p7 = scmp.lt.s32.totalorder %s10220_s17, %s10220_s17 }
  0x31   :  { %p10227_p8 = por %p10226_p7, %p10225_p6 }
  0x33   :  { %p10228_p9 = pnand %p10227_p8, %p10221_p5 }
  0x35   :  { %10231 = shalt.err (!%p10228_p9)
}
  0x36   :  { %90 = dma.hbm_to_vmem [thread:$0]  %s13008_s5, 2304, %s85_s15, [#allocation16], %s10445_s27, %s10445_s27, %s10446_s28  }
  0x37   :  { %s10449_s19 = smov [#allocation18]   ;;  %s10450_s21 = smov [#allocation21]  }
  0x38   :  { %s106_s20 = sshll.u32 %s10449_s19, 4  ;;  %s128_s22 = sshll.u32 %s10450_s21, 4  ;;  %s107_s20 = int_to_ptr.vmem [resolvable:$true] %s106_s20  ;;  %s129_s22 = int_to_ptr.vmem [resolvable:$true] %s128_s22 }
  0x39   :  { %s10232_s18 = scalar_lea.hbm %s13010_s7, 16384 }
  0x3a   :  { %p10233_p10 = scmp.ne.s32.totalorder %s13010_s7, %s10232_s18  ;;  %p10236_p11 = scmp.lt.u32.totalorder %s10232_s18, %s13010_s7 }
  0x3c   :  { %p10238_p12 = pnand %p10236_p11, %p10233_p10 }
  0x3e   :  { %10241 = shalt.err (!%p10238_p12)
}
  0x3f   :  { %s10242_s5 = scalar_lea.vmem %s107_s20, 16384  ;;  %p10247_p0 = scmp.lt.s32.totalorder %s107_s20, %s107_s20 }
  0x40   :  { %p10243_p13 = scmp.ne.s32.totalorder %s107_s20, %s10242_s5  ;;  %p10248_p1 = scmp.lt.s32.totalorder %s10242_s5, %s10242_s5 }
  0x42   :  { %p10249_p2 = por %p10248_p1, %p10247_p0 }
  0x44   :  { %p10250_p3 = pnand %p10249_p2, %p10243_p13 }
  0x46   :  { %10253 = shalt.err (!%p10250_p3)
}
  0x47   :  { %s10451_s15 = smov 128   ;;  %s10452_s30 = smov 8  }
  0x48   :  { %112 = dma.hbm_to_vmem [thread:$0]  %s13010_s7, 16384, %s107_s20, [#allocation19], %s10451_s15, %s10451_s15, %s10452_s30  }
  0x49   :  { %s10254_s3 = scalar_lea.hbm %s13012_s9, 2048 }
  0x4a   :  { %p10255_p4 = scmp.ne.s32.totalorder %s13012_s9, %s10254_s3  ;;  %p10258_p5 = scmp.lt.u32.totalorder %s10254_s3, %s13012_s9 }
  0x4c   :  { %p10260_p6 = pnand %p10258_p5, %p10255_p4 }
  0x4e   :  { %10263 = shalt.err (!%p10260_p6)
}
  0x4f   :  { %s10264_s1 = scalar_lea.vmem %s129_s22, 2048  ;;  %p10269_p8 = scmp.lt.s32.totalorder %s129_s22, %s129_s22 }
  0x50   :  { %p10265_p7 = scmp.ne.s32.totalorder %s129_s22, %s10264_s1  ;;  %p10270_p9 = scmp.lt.s32.totalorder %s10264_s1, %s10264_s1 }
  0x52   :  { %p10271_p10 = por %p10270_p9, %p10269_p8 }
  0x54   :  { %p10272_p11 = pnand %p10271_p10, %p10265_p7 }
  0x56   :  { %10275 = shalt.err (!%p10272_p11)
}
  0x57   :  { %134 = dma.hbm_to_vmem [thread:$0]  %s13012_s9, 2048, %s129_s22, [#allocation22], %s10445_s27, %s10445_s27, %s10446_s28  }
  0x58   :  { %s10453_s18 = smov [#allocation6]   ;;  %s10454_s25 = smov [#allocation11]  }
  0x59   :  { %s28_s24 = sshll.u32 %s10453_s18, 4  ;;  %s53_s26 = sshll.u32 %s10454_s25, 4  ;;  %s29_s24 = int_to_ptr.vmem [resolvable:$true] %s28_s24  ;;  %s54_s26 = int_to_ptr.vmem [resolvable:$true] %s53_s26 }
  0x5a   :  { %s10276_s12 = scalar_lea.hbm %s13003_s0, 8192 }
  0x5b   :  { %p10277_p12 = scmp.ne.s32.totalorder %s13003_s0, %s10276_s12  ;;  %p10280_p13 = scmp.lt.u32.totalorder %s10276_s12, %s13003_s0 }
  0x5d   :  { %p10282_p0 = pnand %p10280_p13, %p10277_p12 }
  0x5f   :  { %10285 = shalt.err (!%p10282_p0)
}
  0x60   :  { %s10286_s9 = scalar_lea.vmem %s29_s24, 8192  ;;  %p10291_p2 = scmp.lt.s32.totalorder %s29_s24, %s29_s24 }
  0x61   :  { %p10287_p1 = scmp.ne.s32.totalorder %s29_s24, %s10286_s9  ;;  %p10292_p3 = scmp.lt.s32.totalorder %s10286_s9, %s10286_s9 }
  0x63   :  { %p10293_p4 = por %p10292_p3, %p10291_p2 }
  0x65   :  { %p10294_p5 = pnand %p10293_p4, %p10287_p1 }
  0x67   :  { %10297 = shalt.err (!%p10294_p5)
}
  0x68   :  { %34 = dma.hbm_to_vmem [thread:$0]  %s13003_s0, 8192, %s29_s24, [#allocation7], %s10451_s15, %s10451_s15, %s10452_s30  }
  0x69   :  { %s10298_s21 = scalar_lea.hbm %s13005_s2, 32 }
  0x6a   :  { %p10299_p6 = scmp.ne.s32.totalorder %s13005_s2, %s10298_s21  ;;  %p10302_p7 = scmp.lt.u32.totalorder %s10298_s21, %s13005_s2 }
  0x6c   :  { %p10304_p8 = pnand %p10302_p7, %p10299_p6 }
  0x6e   :  { %10307 = shalt.err (!%p10304_p8)
}
  0x6f   :  { %s10308_s18 = scalar_lea.vmem %s54_s26, 32  ;;  %p10313_p10 = scmp.lt.s32.totalorder %s54_s26, %s54_s26 }
  0x70   :  { %p10309_p9 = scmp.ne.s32.totalorder %s54_s26, %s10308_s18  ;;  %p10314_p11 = scmp.lt.s32.totalorder %s10308_s18, %s10308_s18 }
  0x72   :  { %p10315_p12 = por %p10314_p11, %p10313_p10 }
  0x74   :  { %p10316_p13 = pnand %p10315_p12, %p10309_p9 }
  0x76   :  { %10319 = shalt.err (!%p10316_p13)
}
  0x77   :  { %56 = dma.hbm_to_vmem [thread:$0]  %s13005_s2, 32, %s54_s26, [#allocation10]  }
  0x78   :  { %s10455_s30 = smov [#allocation14]   ;;  %s10456_s25 = smov [#allocation17]  }
  0x79   :  { %s75_s24 = sshll.u32 %s10455_s30, 4  ;;  %s97_s29 = sshll.u32 %s10456_s25, 4  ;;  %s76_s24 = int_to_ptr.vmem [resolvable:$true] %s75_s24  ;;  %s98_s29 = int_to_ptr.vmem [resolvable:$true] %s97_s29 }
  0x7a   :  { %s10320_s14 = scalar_lea.hbm %s13007_s4, 32 }
  0x7b   :  { %p10321_p0 = scmp.ne.s32.totalorder %s13007_s4, %s10320_s14  ;;  %p10324_p1 = scmp.lt.u32.totalorder %s10320_s14, %s13007_s4 }
  0x7d   :  { %p10326_p2 = pnand %p10324_p1, %p10321_p0 }
  0x7f   :  { %10329 = shalt.err (!%p10326_p2)
}
  0x80   :  { %s10330_s2 = scalar_lea.vmem %s76_s24, 32  ;;  %p10335_p4 = scmp.lt.s32.totalorder %s76_s24, %s76_s24 }
  0x81   :  { %p10331_p3 = scmp.ne.s32.totalorder %s76_s24, %s10330_s2  ;;  %p10336_p5 = scmp.lt.s32.totalorder %s10330_s2, %s10330_s2 }
  0x83   :  { %p10337_p6 = por %p10336_p5, %p10335_p4 }
  0x85   :  { %p10338_p7 = pnand %p10337_p6, %p10331_p3 }
  0x87   :  { %10341 = shalt.err (!%p10338_p7)
}
  0x88   :  { %78 = dma.hbm_to_vmem [thread:$0]  %s13007_s4, 32, %s76_s24, [#allocation13]  }
  0x89   :  { %s10342_s19 = scalar_lea.hbm %s13009_s6, 32 }
  0x8a   :  { %p10343_p8 = scmp.ne.s32.totalorder %s13009_s6, %s10342_s19  ;;  %p10346_p9 = scmp.lt.u32.totalorder %s10342_s19, %s13009_s6 }
  0x8c   :  { %p10348_p10 = pnand %p10346_p9, %p10343_p8 }
  0x8e   :  { %10351 = shalt.err (!%p10348_p10)
}
  0x8f   :  { %s10352_s20 = scalar_lea.vmem %s98_s29, 32  ;;  %p10357_p12 = scmp.lt.s32.totalorder %s98_s29, %s98_s29 }
  0x90   :  { %p10353_p11 = scmp.ne.s32.totalorder %s98_s29, %s10352_s20  ;;  %p10358_p13 = scmp.lt.s32.totalorder %s10352_s20, %s10352_s20 }
  0x92   :  { %p10359_p0 = por %p10358_p13, %p10357_p12 }
  0x94   :  { %p10360_p1 = pnand %p10359_p0, %p10353_p11 }
  0x96   :  { %10363 = shalt.err (!%p10360_p1)
}
  0x97   :  { %100 = dma.hbm_to_vmem [thread:$0]  %s13009_s6, 32, %s98_s29, [#allocation16]  }
  0x98   :  { %s10457_s0 = smov [#allocation20]   ;;  %s10458_s30 = smov [#allocation23]  }
  0x99   :  { %s119_s15 = sshll.u32 %s10457_s0, 4  ;;  %s141_s24 = sshll.u32 %s10458_s30, 4  ;;  %s120_s15 = int_to_ptr.vmem [resolvable:$true] %s119_s15  ;;  %s142_s24 = int_to_ptr.vmem [resolvable:$true] %s141_s24 }
  0x9a   :  { %s10364_s12 = scalar_lea.hbm %s13011_s8, 32 }
  0x9b   :  { %p10365_p2 = scmp.ne.s32.totalorder %s13011_s8, %s10364_s12  ;;  %p10368_p3 = scmp.lt.u32.totalorder %s10364_s12, %s13011_s8 }
  0x9d   :  { %p10370_p4 = pnand %p10368_p3, %p10365_p2 }
  0x9f   :  { %10373 = shalt.err (!%p10370_p4)
}
  0xa0   :  { %s10374_s6 = scalar_lea.vmem %s120_s15, 32  ;;  %p10379_p6 = scmp.lt.s32.totalorder %s120_s15, %s120_s15 }
  0xa1   :  { %p10375_p5 = scmp.ne.s32.totalorder %s120_s15, %s10374_s6  ;;  %p10380_p7 = scmp.lt.s32.totalorder %s10374_s6, %s10374_s6 }
  0xa3   :  { %p10381_p8 = por %p10380_p7, %p10379_p6 }
  0xa5   :  { %p10382_p9 = pnand %p10381_p8, %p10375_p5 }
  0xa7   :  { %10385 = shalt.err (!%p10382_p9)
}
  0xa8   :  { %122 = dma.hbm_to_vmem [thread:$0]  %s13011_s8, 32, %s120_s15, [#allocation19]  }
  0xa9   :  { %s10386_s28 = scalar_lea.hbm %s13013_s10, 16 }
  0xaa   :  { %p10387_p10 = scmp.ne.s32.totalorder %s13013_s10, %s10386_s28  ;;  %p10390_p11 = scmp.lt.u32.totalorder %s10386_s28, %s13013_s10 }
  0xac   :  { %p10392_p12 = pnand %p10390_p11, %p10387_p10 }
  0xae   :  { %10395 = shalt.err (!%p10392_p12)
}
  0xaf   :  { %s10396_s23 = scalar_lea.vmem %s142_s24, 16  ;;  %s10400_s1 = scalar_lea.vmem %s142_s24, 32 }
  0xb0   :  { %p10397_p13 = scmp.ne.s32.totalorder %s142_s24, %s10396_s23  ;;  %p10401_p0 = scmp.lt.s32.totalorder %s142_s24, %s142_s24 }
  0xb1   :  { %p10402_p1 = scmp.lt.s32.totalorder %s10400_s1, %s10396_s23 }
  0xb3   :  { %p10403_p2 = por %p10402_p1, %p10401_p0 }
  0xb5   :  { %p10404_p3 = pnand %p10403_p2, %p10397_p13 }
  0xb7   :  { %10407 = shalt.err (!%p10404_p3)
}
  0xb8   :  { %144 = dma.hbm_to_vmem [thread:$0]  %s13013_s10, 16, %s142_s24, [#allocation22]  }
  0xb9   :  { %10430 = dma.done.wait [#allocation7], 8192  }
  0xba   :  { %10431 = vsyncadd [#allocation7], 4294959104 }
  0xbb   :  { %10432 = dma.done.wait [#allocation10], 2080  }
  0xbc   :  { %10433 = vsyncadd [#allocation10], 4294965216 }
  0xbd   :  { %10434 = dma.done.wait [#allocation13], 1184  }
  0xbe   :  { %10435 = vsyncadd [#allocation13], 4294966112 }
  0xbf   :  { %10436 = dma.done.wait [#allocation16], 2336  }
  0xc0   :  { %10437 = vsyncadd [#allocation16], 4294964960 }
  0xc1   :  { %10438 = dma.done.wait [#allocation19], 16416  }
  0xc2   :  { %10439 = vsyncadd [#allocation19], 4294950880 }
  0xc3   :  { %10440 = dma.done.wait [#allocation22], 2064  }
  0xc4   :  { %10441 = vsyncadd [#allocation22], 4294965232  ;;  %v10459_v0 = vmov 0   ;;  %v9807_v1 = vld [vmem:[#allocation9] sm:$0xff]   ;;  %v9808_v2 = vld [vmem:[#allocation9 + $0x8] sm:$0xff]   ;;  %vm179_vm0 = vcmask 130048  }
  0xc5   :  { %837 = vmatprep.subr.bf16.mxu0 %v10459_v0  ;;  %4447 = vmatprep.subr.bf16.mxu1 %v10459_v0  ;;  %v9809_v3 = vld [vmem:[#allocation9 + $0x10] sm:$0xff]   ;;  %v9810_v4 = vld [vmem:[#allocation9 + $0x18] sm:$0xff]   ;;  %v9811_v5 = vld [vmem:[#allocation9 + $0x20] sm:$0xff]   ;;  %v10460_v38 = vmov 0.0   ;;  %vm197_vm1 = vcmask 122880   ;;  %s10461_s10 = smov 16  }
  0xc6   :  { %838 = vmatpush1.bf16.msra.mxu0 %v9807_v1  ;;  %v9825_v6 = vld [vmem:[#allocation6 + $0x4] ss:$8 sps:$4 sm:$0xff]   ;;  %v9813_v8 = vld [vmem:[#allocation9 + $0x30] sm:$0xff]   ;;  %v9814_v9 = vld [vmem:[#allocation9 + $0x38] sm:$0xff]   ;;  %181 = vst.msk [vmem:[#allocation2 + $0x8] sm:$0xff] %vm179_vm0, %v10460_v38  ;;  %s10462_s20 = smov 32  }
  0xc7   :  { %839 = vmatprep.subr.bf16.mxu0 %v10459_v0  ;;  %v9812_v7 = vld [vmem:[#allocation9 + $0x28] sm:$0xff]   ;;  %869 = vmatprep.mubr.bf16.mxu0 %v9825_v6  ;;  %v9815_v10 = vld [vmem:[#allocation9 + $0x40] sm:$0xff]   ;;  %v9817_v12 = vld [vmem:[#allocation9 + $0x50] sm:$0xff]   ;;  %182 = vst.msk [vmem:[#allocation2 + $0x10] sm:$0xff] %vm179_vm0, %v10460_v38  ;;  %s10463_s4 = smov 96   ;;  %s10464_s18 = smov 112  }
  0xc8   :  { %v9816_v11 = vld [vmem:[#allocation9 + $0x48] sm:$0xff]   ;;  %v9818_v13 = vld [vmem:[#allocation9 + $0x58] sm:$0xff]   ;;  %v9819_v14 = vld [vmem:[#allocation9 + $0x60] sm:$0xff]   ;;  %180 = vst.msk [vmem:[#allocation2] sm:$0xff] %vm179_vm0, %v10460_v38  ;;  %vm270_vm2 = vcmask 261120   ;;  %s10465_s0 = smov 48  }
  0xc9   :  { %v9820_v15 = vld [vmem:[#allocation9 + $0x68] sm:$0xff]   ;;  %v9821_v16 = vld [vmem:[#allocation9 + $0x70] sm:$0xff]   ;;  %v9822_v17 = vld [vmem:[#allocation9 + $0x78] sm:$0xff]   ;;  %183 = vst.msk [vmem:[#allocation2 + $0x18] sm:$0xff] %vm179_vm0, %v10460_v38  ;;  %s10466_s15 = smov 80   ;;  %vm3890_vm3 = vcmask 392192  }
  0xca   :  { %840 = vmatpush1.bf16.msra.mxu0 %v9808_v2  ;;  %v9823_v18 = vld [vmem:[#allocation6] ss:$8 sps:$4 sm:$0xff]   ;;  %v9826_v19 = vld [vmem:[#allocation6 + $0x14] ss:$8 sps:$4 sm:$0xff]   ;;  %v9828_v20 = vld [vmem:[#allocation6 + $0x10] ss:$8 sps:$4 sm:$0xff]  }
  0xcb   :  { %841 = vmatprep.subr.bf16.mxu0 %v10459_v0  ;;  %v9829_v21 = vld [vmem:[#allocation6 + $0x24] ss:$8 sps:$4 sm:$0xff]   ;;  %v9831_v22 = vld [vmem:[#allocation6 + $0x20] ss:$8 sps:$4 sm:$0xff]   ;;  %v9832_v23 = vld [vmem:[#allocation6 + $0x34] ss:$8 sps:$4 sm:$0xff]  }
  0xcc   :  { %v9834_v24 = vld [vmem:[#allocation6 + $0x30] ss:$8 sps:$4 sm:$0xff]   ;;  %v9835_v25 = vld [vmem:[#allocation6 + $0x44] ss:$8 sps:$4 sm:$0xff]   ;;  %v9837_v26 = vld [vmem:[#allocation6 + $0x40] ss:$8 sps:$4 sm:$0xff]  }
  0xcd   :  { %v9838_v27 = vld [vmem:[#allocation6 + $0x54] ss:$8 sps:$4 sm:$0xff]   ;;  %v9840_v28 = vld [vmem:[#allocation6 + $0x50] ss:$8 sps:$4 sm:$0xff]   ;;  %v9841_v29 = vld [vmem:[#allocation6 + $0x64] ss:$8 sps:$4 sm:$0xff]  }
  0xce   :  { %842 = vmatpush1.bf16.msra.mxu0 %v9809_v3  ;;  %v9843_v30 = vld [vmem:[#allocation6 + $0x60] ss:$8 sps:$4 sm:$0xff]   ;;  %v9844_v31 = vld [vmem:[#allocation6 + $0x74] ss:$8 sps:$4 sm:$0xff]   ;;  %v9846_v32 = vld [vmem:[#allocation6 + $0x70] ss:$8 sps:$4 sm:$0xff]  }
  0xcf   :  { %843 = vmatprep.subr.bf16.mxu0 %v10459_v0  ;;  %v9847_v33 = vld [vmem:[#allocation6 + $0x84] ss:$8 sps:$4 sm:$0xff]   ;;  %v9849_v34 = vld [vmem:[#allocation6 + $0x80] ss:$8 sps:$4 sm:$0xff]   ;;  %v9850_v35 = vld [vmem:[#allocation6 + $0x94] ss:$8 sps:$4 sm:$0xff]  }
  0xd0   :  { %v9852_v36 = vld [vmem:[#allocation6 + $0x90] ss:$8 sps:$4 sm:$0xff]   ;;  %v9853_v37 = vld [vmem:[#allocation6 + $0xa4] ss:$8 sps:$4 sm:$0xff]   ;;  %184 = vst.msk [vmem:[#allocation2 + $0x240] sm:$0xff] %vm179_vm0, %v10460_v38  ;;  %185 = vst.msk [vmem:[#allocation2 + $0x248] sm:$0xff] %vm179_vm0, %v10460_v38 }
  0xd1   :  { %186 = vst.msk [vmem:[#allocation2 + $0x250] sm:$0xff] %vm179_vm0, %v10460_v38  ;;  %187 = vst.msk [vmem:[#allocation2 + $0x258] sm:$0xff] %vm179_vm0, %v10460_v38  ;;  %v10727_v39 = vld [vmem:[#allocation6 + $0xa0] ss:$8 sps:$4 sm:$0xff]   ;;  %v10729_v40 = vld [vmem:[#allocation6 + $0xb4] ss:$8 sps:$4 sm:$0xff]  }
  0xd2   :  { %844 = vmatpush1.bf16.msra.mxu0 %v9810_v4  ;;  %189 = vst.msk [vmem:[#allocation2 + $0x220] sm:$0xff] %vm179_vm0, %v10460_v38  ;;  %190 = vst.msk [vmem:[#allocation2 + $0x228] sm:$0xff] %vm179_vm0, %v10460_v38  ;;  %v1457_v41 = vld [vmem:[#allocation2 + $0x8] sm:$0xff]  ;;  %v1458_v42 = vld [vmem:[#allocation2 + $0x10] sm:$0xff]  ;;  %vm3955_vm4 = vcmask 523264   ;;  %vm4020_vm5 = vcmask 654336  }
  0xd3   :  { %845 = vmatprep.subr.bf16.mxu0 %v10459_v0  ;;  %191 = vst.msk [vmem:[#allocation2 + $0x230] sm:$0xff] %vm179_vm0, %v10460_v38  ;;  %192 = vst.msk [vmem:[#allocation2 + $0x238] sm:$0xff] %vm179_vm0, %v10460_v38  ;;  %v8447_v43 = vpack.i.bf16 %v1458_v42, %v1457_v41  ;;  %v9858_v44 = vld [vmem:[#allocation6 + $0xb0] ss:$8 sps:$4 sm:$0xff]   ;;  %v9859_v45 = vld [vmem:[#allocation6 + $0xc4] ss:$8 sps:$4 sm:$0xff]  }
  0xd4   :  { %193 = vst.msk [vmem:[#allocation2 + $0x460] sm:$0xff] %vm179_vm0, %v10460_v38  ;;  %194 = vst.msk [vmem:[#allocation2 + $0x468] sm:$0xff] %vm179_vm0, %v10460_v38  ;;  %v1521_v46 = vld [vmem:[#allocation2 + $0x9] sm:$0xff]  ;;  %v9862_v56 = vld [vmem:[#allocation6 + $0xd4] ss:$8 sps:$4 sm:$0xff]   ;;  %vm4085_vm6 = vcmask 785408  }
  0xd5   :  { %195 = vst.msk [vmem:[#allocation2 + $0x470] sm:$0xff] %vm179_vm0, %v10460_v38  ;;  %196 = vst.msk [vmem:[#allocation2 + $0x478] sm:$0xff] %vm179_vm0, %v10460_v38  ;;  %8448 = vrot.lane.b32.xlu0 %v8447_v43, %s10461_s10  ;;  %v9861_v54 = vld [vmem:[#allocation6 + $0xc0] ss:$8 sps:$4 sm:$0xff]   ;;  %v9864_v63 = vld [vmem:[#allocation6 + $0xd0] ss:$8 sps:$4 sm:$0xff]  }
  0xd6   :  { %846 = vmatpush1.bf16.msra.mxu0 %v9811_v5  ;;  %234 = vst.msk [vmem:[#allocation2 + $0x18] sm:$0x1] %vm197_vm1, %v10460_v38  ;;  %198 = vst.msk [vmem:[#allocation2 + $0x7] sm:$0x1] %vm197_vm1, %v10460_v38  ;;  %v9865_v1 = vld [vmem:[#allocation6 + $0xe4] ss:$8 sps:$4 sm:$0xff]  }
  0xd7   :  { %847 = vmatprep.subr.bf16.mxu0 %v10459_v0  ;;  %199 = vst.msk [vmem:[#allocation2 + $0x27] sm:$0x1] %vm197_vm1, %v10460_v38  ;;  %200 = vst.msk [vmem:[#allocation2 + $0x47] sm:$0x1] %vm197_vm1, %v10460_v38  ;;  %v1489_v57 = vld [vmem:[#allocation2 + $0x248] sm:$0xff]  ;;  %vm4150_vm7 = vcmask 916480  }
  0xd8   :  { %201 = vst.msk [vmem:[#allocation2 + $0x67] sm:$0x1] %vm197_vm1, %v10460_v38  ;;  %202 = vst.msk [vmem:[#allocation2 + $0x87] sm:$0x1] %vm197_vm1, %v10460_v38  ;;  %v1490_v58 = vld [vmem:[#allocation2 + $0x250] sm:$0xff]  ;;  %vm284_vm8 = vcmask 253952  }
  0xd9   :  { %203 = vst.msk [vmem:[#allocation2 + $0xa7] sm:$0x1] %vm197_vm1, %v10460_v38  ;;  %204 = vst.msk [vmem:[#allocation2 + $0xc7] sm:$0x1] %vm197_vm1, %v10460_v38  ;;  %v1872_v52 = vld [vmem:[#allocation2 + $0x228] sm:$0xff]  ;;  %v8467_v59 = vpack.i.bf16 %v1490_v58, %v1489_v57  ;;  %vm6225_vm9 = vcmask 1041409  }
  0xda   :  { %848 = vmatpush1.bf16.msra.mxu0 %v9812_v7  ;;  %205 = vst.msk [vmem:[#allocation2 + $0xe7] sm:$0x1] %vm197_vm1, %v10460_v38  ;;  %206 = vst.msk [vmem:[#allocation2 + $0x107] sm:$0x1] %vm197_vm1, %v10460_v38  ;;  %v1809_v50 = vld [vmem:[#allocation2 + $0x22f] sm:$0xff] }
  0xdb   :  { %849 = vmatprep.subr.bf16.mxu0 %v10459_v0  ;;  %207 = vst.msk [vmem:[#allocation2 + $0x127] sm:$0x1] %vm197_vm1, %v10460_v38  ;;  %208 = vst.msk [vmem:[#allocation2 + $0x147] sm:$0x1] %vm197_vm1, %v10460_v38  ;;  %v1873_v53 = vld [vmem:[#allocation2 + $0x230] sm:$0xff] }
  0xdc   :  { %209 = vst.msk [vmem:[#allocation2 + $0x167] sm:$0x1] %vm197_vm1, %v10460_v38  ;;  %210 = vst.msk [vmem:[#allocation2 + $0x187] sm:$0x1] %vm197_vm1, %v10460_v38  ;;  %v8452_v55 = vpack.i.bf16 %v1873_v53, %v1872_v52  ;;  %v1553_v60 = vld [vmem:[#allocation2 + $0x249] sm:$0xff]  ;;  %v9910_v53 = vld [vmem:[#allocation12 + $0x30] sm:$0xff]  }
  0xdd   :  { %211 = vst.msk [vmem:[#allocation2 + $0x1a7] sm:$0x1] %vm197_vm1, %v10460_v38  ;;  %212 = vst.msk [vmem:[#allocation2 + $0x1c7] sm:$0x1] %vm197_vm1, %v10460_v38  ;;  %v1522_v47 = vld [vmem:[#allocation2 + $0x11] sm:$0xff] }
  0xde   :  { %850 = vmatpush1.bf16.msra.mxu0 %v9813_v8  ;;  %213 = vst.msk [vmem:[#allocation2 + $0x1e7] sm:$0x1] %vm197_vm1, %v10460_v38  ;;  %214 = vst.msk [vmem:[#allocation2 + $0x207] sm:$0x1] %vm197_vm1, %v10460_v38  ;;  %v8457_v48 = vpack.i.bf16 %v1522_v47, %v1521_v46  ;;  %8453 = vrot.lane.b32.xlu1 %v8452_v55, %s10464_s18  ;;  %v9867_v2 = vld [vmem:[#allocation6 + $0xe0] ss:$8 sps:$4 sm:$0xff]  }
  0xdf   :  { %851 = vmatprep.subr.bf16.mxu0 %v10459_v0  ;;  %215 = vst.msk [vmem:[#allocation2 + $0x227] sm:$0x1] %vm197_vm1, %v10460_v38  ;;  %216 = vst.msk [vmem:[#allocation2 + $0x247] sm:$0x1] %vm197_vm1, %v10460_v38  ;;  %v9868_v3 = vld [vmem:[#allocation6 + $0xf4] ss:$8 sps:$4 sm:$0xff]  }
  0xe0   :  { %217 = vst.msk [vmem:[#allocation2 + $0x267] sm:$0x1] %vm197_vm1, %v10460_v38  ;;  %218 = vst.msk [vmem:[#allocation2 + $0x287] sm:$0x1] %vm197_vm1, %v10460_v38  ;;  %8458 = vrot.lane.b32.xlu0 %v8457_v48, %s10462_s20  ;;  %v9870_v4 = vld [vmem:[#allocation6 + $0xf0] ss:$8 sps:$4 sm:$0xff]  }
  0xe1   :  { %219 = vst.msk [vmem:[#allocation2 + $0x2a7] sm:$0x1] %vm197_vm1, %v10460_v38  ;;  %220 = vst.msk [vmem:[#allocation2 + $0x2c7] sm:$0x1] %vm197_vm1, %v10460_v38  ;;  %v9871_v5 = vld [vmem:[#allocation6 + $0x104] ss:$8 sps:$4 sm:$0xff]  }
  0xe2   :  { %852 = vmatpush1.bf16.msra.mxu0 %v9814_v9  ;;  %221 = vst.msk [vmem:[#allocation2 + $0x2e7] sm:$0x1] %vm197_vm1, %v10460_v38  ;;  %222 = vst.msk [vmem:[#allocation2 + $0x307] sm:$0x1] %vm197_vm1, %v10460_v38  ;;  %v9873_v6 = vld [vmem:[#allocation6 + $0x100] ss:$8 sps:$4 sm:$0xff]  }
  0xe3   :  { %853 = vmatprep.subr.bf16.mxu0 %v10459_v0  ;;  %223 = vst.msk [vmem:[#allocation2 + $0x327] sm:$0x1] %vm197_vm1, %v10460_v38  ;;  %224 = vst.msk [vmem:[#allocation2 + $0x347] sm:$0x1] %vm197_vm1, %v10460_v38  ;;  %v9874_v7 = vld [vmem:[#allocation6 + $0x114] ss:$8 sps:$4 sm:$0xff]  }
  0xe4   :  { %225 = vst.msk [vmem:[#allocation2 + $0x367] sm:$0x1] %vm197_vm1, %v10460_v38  ;;  %226 = vst.msk [vmem:[#allocation2 + $0x387] sm:$0x1] %vm197_vm1, %v10460_v38  ;;  %v9876_v8 = vld [vmem:[#allocation6 + $0x110] ss:$8 sps:$4 sm:$0xff]  }
  0xe5   :  { %227 = vst.msk [vmem:[#allocation2 + $0x3a7] sm:$0x1] %vm197_vm1, %v10460_v38  ;;  %228 = vst.msk [vmem:[#allocation2 + $0x3c7] sm:$0x1] %vm197_vm1, %v10460_v38  ;;  %v9877_v9 = vld [vmem:[#allocation6 + $0x124] ss:$8 sps:$4 sm:$0xff]  }
  0xe6   :  { %854 = vmatpush1.bf16.msra.mxu0 %v9815_v10  ;;  %229 = vst.msk [vmem:[#allocation2 + $0x3e7] sm:$0x1] %vm197_vm1, %v10460_v38  ;;  %230 = vst.msk [vmem:[#allocation2 + $0x407] sm:$0x1] %vm197_vm1, %v10460_v38  ;;  %v1808_v49 = vld [vmem:[#allocation2 + $0x227] sm:$0xff] }
  0xe7   :  { %855 = vmatprep.subr.bf16.mxu0 %v10459_v0  ;;  %231 = vst.msk [vmem:[#allocation2 + $0x427] sm:$0x1] %vm197_vm1, %v10460_v38  ;;  %232 = vst.msk [vmem:[#allocation2 + $0x447] sm:$0x1] %vm197_vm1, %v10460_v38  ;;  %v8462_v51 = vpack.i.bf16 %v1809_v50, %v1808_v49  ;;  %v9879_v10 = vld [vmem:[#allocation6 + $0x120] ss:$8 sps:$4 sm:$0xff]  }
  0xe8   :  { %233 = vst.msk [vmem:[#allocation2 + $0x467] sm:$0x1] %vm197_vm1, %v10460_v38  ;;  %235 = vst.msk [vmem:[#allocation2 + $0x38] sm:$0x1] %vm197_vm1, %v10460_v38  ;;  %v9906_v43 = vld [vmem:[#allocation6 + $0x1a4] ss:$8 sps:$4 sm:$0xff]  }
  0xe9   :  { %236 = vst.msk [vmem:[#allocation2 + $0x58] sm:$0x1] %vm197_vm1, %v10460_v38  ;;  %237 = vst.msk [vmem:[#allocation2 + $0x78] sm:$0x1] %vm197_vm1, %v10460_v38  ;;  %8463 = vrot.lane.b32.xlu0 %v8462_v51, %s10463_s4  ;;  %v9909_v46 = vld [vmem:[#allocation12 + $0x28] sm:$0xff]  }
  0xea   :  { %856 = vmatpush1.bf16.msra.mxu0 %v9816_v11  ;;  %238 = vst.msk [vmem:[#allocation2 + $0x98] sm:$0x1] %vm197_vm1, %v10460_v38  ;;  %239 = vst.msk [vmem:[#allocation2 + $0xb8] sm:$0x1] %vm197_vm1, %v10460_v38  ;;  %v9880_v11 = vld [vmem:[#allocation6 + $0x134] ss:$8 sps:$4 sm:$0xff]  }
  0xeb   :  { %857 = vmatprep.subr.bf16.mxu0 %v10459_v0  ;;  %240 = vst.msk [vmem:[#allocation2 + $0xd8] sm:$0x1] %vm197_vm1, %v10460_v38  ;;  %241 = vst.msk [vmem:[#allocation2 + $0xf8] sm:$0x1] %vm197_vm1, %v10460_v38 }
  0xec   :  { %242 = vst.msk [vmem:[#allocation2 + $0x118] sm:$0x1] %vm197_vm1, %v10460_v38  ;;  %243 = vst.msk [vmem:[#allocation2 + $0x138] sm:$0x1] %vm197_vm1, %v10460_v38 }
  0xed   :  { %244 = vst.msk [vmem:[#allocation2 + $0x158] sm:$0x1] %vm197_vm1, %v10460_v38  ;;  %245 = vst.msk [vmem:[#allocation2 + $0x178] sm:$0x1] %vm197_vm1, %v10460_v38  ;;  %8468 = vrot.lane.b32.xlu0 %v8467_v59, %s10461_s10 }
  0xee   :  { %858 = vmatpush1.bf16.msra.mxu0 %v9817_v12  ;;  %246 = vst.msk [vmem:[#allocation2 + $0x198] sm:$0x1] %vm197_vm1, %v10460_v38  ;;  %247 = vst.msk [vmem:[#allocation2 + $0x1b8] sm:$0x1] %vm197_vm1, %v10460_v38  ;;  %v9882_v12 = vld [vmem:[#allocation6 + $0x130] ss:$8 sps:$4 sm:$0xff]  }
  0xef   :  { %859 = vmatprep.subr.bf16.mxu0 %v10459_v0  ;;  %248 = vst.msk [vmem:[#allocation2 + $0x1d8] sm:$0x1] %vm197_vm1, %v10460_v38  ;;  %249 = vst.msk [vmem:[#allocation2 + $0x1f8] sm:$0x1] %vm197_vm1, %v10460_v38 }
  0xf0   :  { %250 = vst.msk [vmem:[#allocation2 + $0x218] sm:$0x1] %vm197_vm1, %v10460_v38  ;;  %251 = vst.msk [vmem:[#allocation2 + $0x238] sm:$0x1] %vm197_vm1, %v10460_v38 }
  0xf1   :  { %252 = vst.msk [vmem:[#allocation2 + $0x258] sm:$0x1] %vm197_vm1, %v10460_v38  ;;  %253 = vst.msk [vmem:[#allocation2 + $0x278] sm:$0x1] %vm197_vm1, %v10460_v38 }
  0xf2   :  { %860 = vmatpush1.bf16.msra.mxu0 %v9818_v13  ;;  %254 = vst.msk [vmem:[#allocation2 + $0x298] sm:$0x1] %vm197_vm1, %v10460_v38  ;;  %255 = vst.msk [vmem:[#allocation2 + $0x2b8] sm:$0x1] %vm197_vm1, %v10460_v38  ;;  %v9883_v13 = vld [vmem:[#allocation6 + $0x144] ss:$8 sps:$4 sm:$0xff]  }
  0xf3   :  { %861 = vmatprep.subr.bf16.mxu0 %v10459_v0  ;;  %256 = vst.msk [vmem:[#allocation2 + $0x2d8] sm:$0x1] %vm197_vm1, %v10460_v38  ;;  %257 = vst.msk [vmem:[#allocation2 + $0x2f8] sm:$0x1] %vm197_vm1, %v10460_v38 }
  0xf4   :  { %258 = vst.msk [vmem:[#allocation2 + $0x318] sm:$0x1] %vm197_vm1, %v10460_v38  ;;  %259 = vst.msk [vmem:[#allocation2 + $0x338] sm:$0x1] %vm197_vm1, %v10460_v38 }
  0xf5   :  { %260 = vst.msk [vmem:[#allocation2 + $0x358] sm:$0x1] %vm197_vm1, %v10460_v38  ;;  %261 = vst.msk [vmem:[#allocation2 + $0x378] sm:$0x1] %vm197_vm1, %v10460_v38 }
  0xf6   :  { %862 = vmatpush1.bf16.msra.mxu0 %v9819_v14  ;;  %262 = vst.msk [vmem:[#allocation2 + $0x398] sm:$0x1] %vm197_vm1, %v10460_v38  ;;  %263 = vst.msk [vmem:[#allocation2 + $0x3b8] sm:$0x1] %vm197_vm1, %v10460_v38  ;;  %v9885_v14 = vld [vmem:[#allocation6 + $0x140] ss:$8 sps:$4 sm:$0xff]  }
  0xf7   :  { %863 = vmatprep.subr.bf16.mxu0 %v10459_v0  ;;  %264 = vst.msk [vmem:[#allocation2 + $0x3d8] sm:$0x1] %vm197_vm1, %v10460_v38  ;;  %265 = vst.msk [vmem:[#allocation2 + $0x3f8] sm:$0x1] %vm197_vm1, %v10460_v38 }
  0xf8   :  { %266 = vst.msk [vmem:[#allocation2 + $0x418] sm:$0x1] %vm197_vm1, %v10460_v38  ;;  %267 = vst.msk [vmem:[#allocation2 + $0x438] sm:$0x1] %vm197_vm1, %v10460_v38  ;;  %v1554_v61 = vld [vmem:[#allocation2 + $0x251] sm:$0xff] }
  0xf9   :  { %268 = vst.msk [vmem:[#allocation2 + $0x458] sm:$0x1] %vm197_vm1, %v10460_v38  ;;  %269 = vst.msk [vmem:[#allocation2 + $0x478] sm:$0x1] %vm197_vm1, %v10460_v38  ;;  %v8472_v62 = vpack.i.bf16 %v1554_v61, %v1553_v60 }
  0xfa   :  { %864 = vmatpush1.bf16.msra.mxu0 %v9820_v15  ;;  %v9886_v15 = vld [vmem:[#allocation6 + $0x154] ss:$8 sps:$4 sm:$0xff]   ;;  %271 = vst.msk [vmem:[#allocation4] sm:$0xff] %vm270_vm2, %v10460_v38  ;;  %272 = vst.msk [vmem:[#allocation4 + $0x8] sm:$0xff] %vm270_vm2, %v10460_v38 }
  0xfb   :  { %865 = vmatprep.subr.bf16.mxu0 %v10459_v0  ;;  %8473 = vrot.lane.b32.xlu1 %v8472_v62, %s10462_s20  ;;  %273 = vst.msk [vmem:[#allocation4 + $0x10] sm:$0xff] %vm270_vm2, %v10460_v38  ;;  %274 = vst.msk [vmem:[#allocation4 + $0xf0] sm:$0xff] %vm270_vm2, %v10460_v38 }
  0xfc   :  { %275 = vst.msk [vmem:[#allocation4 + $0xf8] sm:$0xff] %vm270_vm2, %v10460_v38  ;;  %276 = vst.msk [vmem:[#allocation4 + $0x100] sm:$0xff] %vm270_vm2, %v10460_v38 }
  0xfd   :  { %278 = vst.msk [vmem:[#allocation4 + $0xd8] sm:$0xff] %vm270_vm2, %v10460_v38  ;;  %279 = vst.msk [vmem:[#allocation4 + $0xe0] sm:$0xff] %vm270_vm2, %v10460_v38 }
  0xfe   :  { %866 = vmatpush1.bf16.msra.mxu0 %v9821_v16  ;;  %v9888_v16 = vld [vmem:[#allocation6 + $0x150] ss:$8 sps:$4 sm:$0xff]   ;;  %280 = vst.msk [vmem:[#allocation4 + $0xe8] sm:$0xff] %vm270_vm2, %v10460_v38  ;;  %281 = vst.msk [vmem:[#allocation4 + $0x1c8] sm:$0xff] %vm270_vm2, %v10460_v38 }
  0xff   :  { %867 = vmatprep.subr.bf16.mxu0 %v10459_v0  ;;  %282 = vst.msk [vmem:[#allocation4 + $0x1d0] sm:$0xff] %vm270_vm2, %v10460_v38  ;;  %283 = vst.msk [vmem:[#allocation4 + $0x1d8] sm:$0xff] %vm270_vm2, %v10460_v38 }
 0x100   :  { %306 = vst.msk [vmem:[#allocation4 + $0x28] sm:$0x1] %vm284_vm8, %v10460_v38  ;;  %307 = vst.msk [vmem:[#allocation4 + $0x40] sm:$0x1] %vm284_vm8, %v10460_v38 }
 0x101   :  { %285 = vst.msk [vmem:[#allocation4 + $0x7] sm:$0x1] %vm284_vm8, %v10460_v38  ;;  %286 = vst.msk [vmem:[#allocation4 + $0x1f] sm:$0x1] %vm284_vm8, %v10460_v38 }
 0x102   :  { %868 = vmatpush1.bf16.msra.mxu0 %v9822_v17  ;;  %v9889_v17 = vld [vmem:[#allocation6 + $0x164] ss:$8 sps:$4 sm:$0xff]   ;;  %287 = vst.msk [vmem:[#allocation4 + $0x37] sm:$0x1] %vm284_vm8, %v10460_v38  ;;  %288 = vst.msk [vmem:[#allocation4 + $0x4f] sm:$0x1] %vm284_vm8, %v10460_v38 }
 0x103   :  { %289 = vst.msk [vmem:[#allocation4 + $0x67] sm:$0x1] %vm284_vm8, %v10460_v38  ;;  %290 = vst.msk [vmem:[#allocation4 + $0x7f] sm:$0x1] %vm284_vm8, %v10460_v38 }
 0x104   :  { %291 = vst.msk [vmem:[#allocation4 + $0x97] sm:$0x1] %vm284_vm8, %v10460_v38  ;;  %292 = vst.msk [vmem:[#allocation4 + $0xaf] sm:$0x1] %vm284_vm8, %v10460_v38 }
 0x105   :  { %870 = vmatmul.mubr.bf16.vlgmr.msra.gmra.mrb[0].mxu0 %v9823_v18  ;;  %v9891_v18 = vld [vmem:[#allocation6 + $0x160] ss:$8 sps:$4 sm:$0xff]   ;;  %293 = vst.msk [vmem:[#allocation4 + $0xc7] sm:$0x1] %vm284_vm8, %v10460_v38  ;;  %294 = vst.msk [vmem:[#allocation4 + $0xdf] sm:$0x1] %vm284_vm8, %v10460_v38 }
 0x106   :  { %877 = vmatprep.mubr.bf16.mxu0 %v9826_v19  ;;  %v9892_v19 = vld [vmem:[#allocation6 + $0x174] ss:$8 sps:$4 sm:$0xff]   ;;  %295 = vst.msk [vmem:[#allocation4 + $0xf7] sm:$0x1] %vm284_vm8, %v10460_v38  ;;  %296 = vst.msk [vmem:[#allocation4 + $0x10f] sm:$0x1] %vm284_vm8, %v10460_v38 }
 0x107   :  { %297 = vst.msk [vmem:[#allocation4 + $0x127] sm:$0x1] %vm284_vm8, %v10460_v38  ;;  %298 = vst.msk [vmem:[#allocation4 + $0x13f] sm:$0x1] %vm284_vm8, %v10460_v38 }
 0x108   :  { %299 = vst.msk [vmem:[#allocation4 + $0x157] sm:$0x1] %vm284_vm8, %v10460_v38  ;;  %300 = vst.msk [vmem:[#allocation4 + $0x16f] sm:$0x1] %vm284_vm8, %v10460_v38 }
 0x109   :  { %301 = vst.msk [vmem:[#allocation4 + $0x187] sm:$0x1] %vm284_vm8, %v10460_v38  ;;  %302 = vst.msk [vmem:[#allocation4 + $0x19f] sm:$0x1] %vm284_vm8, %v10460_v38 }
 0x10a   :  { %303 = vst.msk [vmem:[#allocation4 + $0x1b7] sm:$0x1] %vm284_vm8, %v10460_v38  ;;  %304 = vst.msk [vmem:[#allocation4 + $0x1cf] sm:$0x1] %vm284_vm8, %v10460_v38 }
 0x10b   :  { %305 = vst.msk [vmem:[#allocation4 + $0x10] sm:$0x1] %vm284_vm8, %v10460_v38  ;;  %308 = vst.msk [vmem:[#allocation4 + $0x58] sm:$0x1] %vm284_vm8, %v10460_v38 }
 0x10c   :  { %309 = vst.msk [vmem:[#allocation4 + $0x70] sm:$0x1] %vm284_vm8, %v10460_v38  ;;  %310 = vst.msk [vmem:[#allocation4 + $0x88] sm:$0x1] %vm284_vm8, %v10460_v38 }
 0x10d   :  { %878 = vmatmul.mubr.bf16.gmra.mrb[4].mxu0 %v9828_v20  ;;  %v9894_v20 = vld [vmem:[#allocation6 + $0x170] ss:$8 sps:$4 sm:$0xff]   ;;  %311 = vst.msk [vmem:[#allocation4 + $0xa0] sm:$0x1] %vm284_vm8, %v10460_v38  ;;  %312 = vst.msk [vmem:[#allocation4 + $0xb8] sm:$0x1] %vm284_vm8, %v10460_v38 }
 0x10e   :  { %885 = vmatprep.mubr.bf16.mxu0 %v9829_v21  ;;  %v9895_v21 = vld [vmem:[#allocation6 + $0x184] ss:$8 sps:$4 sm:$0xff]   ;;  %313 = vst.msk [vmem:[#allocation4 + $0xd0] sm:$0x1] %vm284_vm8, %v10460_v38  ;;  %314 = vst.msk [vmem:[#allocation4 + $0xe8] sm:$0x1] %vm284_vm8, %v10460_v38 }
 0x10f   :  { %315 = vst.msk [vmem:[#allocation4 + $0x100] sm:$0x1] %vm284_vm8, %v10460_v38  ;;  %316 = vst.msk [vmem:[#allocation4 + $0x118] sm:$0x1] %vm284_vm8, %v10460_v38 }
 0x110   :  { %317 = vst.msk [vmem:[#allocation4 + $0x130] sm:$0x1] %vm284_vm8, %v10460_v38  ;;  %318 = vst.msk [vmem:[#allocation4 + $0x148] sm:$0x1] %vm284_vm8, %v10460_v38 }
 0x111   :  { %319 = vst.msk [vmem:[#allocation4 + $0x160] sm:$0x1] %vm284_vm8, %v10460_v38  ;;  %320 = vst.msk [vmem:[#allocation4 + $0x178] sm:$0x1] %vm284_vm8, %v10460_v38 }
 0x112   :  { %321 = vst.msk [vmem:[#allocation4 + $0x190] sm:$0x1] %vm284_vm8, %v10460_v38  ;;  %322 = vst.msk [vmem:[#allocation4 + $0x1a8] sm:$0x1] %vm284_vm8, %v10460_v38 }
 0x113   :  { %323 = vst.msk [vmem:[#allocation4 + $0x1c0] sm:$0x1] %vm284_vm8, %v10460_v38  ;;  %324 = vst.msk [vmem:[#allocation4 + $0x1d8] sm:$0x1] %vm284_vm8, %v10460_v38 }
 0x115   :  { %886 = vmatmul.mubr.bf16.gmra.mrb[8].mxu0 %v9831_v22  ;;  %v9897_v22 = vld [vmem:[#allocation6 + $0x180] ss:$8 sps:$4 sm:$0xff]  }
 0x116   :  { %893 = vmatprep.mubr.bf16.mxu0 %v9832_v23  ;;  %v9898_v23 = vld [vmem:[#allocation12] sm:$0xff]  }
 0x117   :  { %4448 = vmatpush1.bf16.msra.mxu1 %v9898_v23 }
 0x118   :  { %4449 = vmatprep.subr.bf16.mxu1 %v10459_v0 }
 0x11d   :  { %894 = vmatmul.mubr.bf16.gmra.mrb[12].mxu0 %v9834_v24  ;;  %v9899_v24 = vld [vmem:[#allocation12 + $0x8] sm:$0xff]  }
 0x11e   :  { %901 = vmatprep.mubr.bf16.mxu0 %v9835_v25  ;;  %4450 = vmatpush1.bf16.msra.mxu1 %v9899_v24  ;;  %v9900_v25 = vld [vmem:[#allocation6 + $0x194] ss:$8 sps:$4 sm:$0xff]  }
 0x11f   :  { %4451 = vmatprep.subr.bf16.mxu1 %v10459_v0 }
 0x125   :  { %902 = vmatmul.mubr.bf16.gmra.mrb[16].mxu0 %v9837_v26  ;;  %v9902_v26 = vld [vmem:[#allocation6 + $0x190] ss:$8 sps:$4 sm:$0xff]  }
 0x126   :  { %909 = vmatprep.mubr.bf16.mxu0 %v9838_v27  ;;  %v9903_v27 = vld [vmem:[#allocation12 + $0x10] sm:$0xff]  }
 0x127   :  { %4452 = vmatpush1.bf16.msra.mxu1 %v9903_v27 }
 0x128   :  { %4453 = vmatprep.subr.bf16.mxu1 %v10459_v0 }
 0x12d   :  { %910 = vmatmul.mubr.bf16.gmra.mrb[20].mxu0 %v9840_v28  ;;  %v10909_v28 = vld [vmem:[#allocation11] ss:$0 sm:$0xff] }
 0x12e   :  { %917 = vmatprep.mubr.bf16.mxu0 %v9841_v29  ;;  %v9904_v29 = vld [vmem:[#allocation12 + $0x18] sm:$0xff]  }
 0x12f   :  { %4454 = vmatpush1.bf16.msra.mxu1 %v9904_v29 }
 0x130   :  { %4455 = vmatprep.subr.bf16.mxu1 %v10459_v0 }
 0x135   :  { %918 = vmatmul.mubr.bf16.gmra.mrb[24].mxu0 %v9843_v30 }
 0x136   :  { %925 = vmatprep.mubr.bf16.mxu0 %v9844_v31  ;;  %v10912_v31 = vld [vmem:[#allocation11 + $0x1] ss:$0 sm:$0xff] }
 0x13d   :  { %926 = vmatmul.mubr.bf16.gmra.mrb[28].mxu0 %v9846_v32 }
 0x13e   :  { %933 = vmatprep.mubr.bf16.mxu0 %v9847_v33 }
 0x145   :  { %934 = vmatmul.mubr.bf16.gmra.mrb[32].mxu0 %v9849_v34 }
 0x146   :  { %941 = vmatprep.mubr.bf16.mxu0 %v9850_v35 }
 0x14d   :  { %942 = vmatmul.mubr.bf16.gmra.mrb[36].mxu0 %v9852_v36 }
 0x14e   :  { %949 = vmatprep.mubr.bf16.mxu0 %v9853_v37 }
 0x155   :  { %950 = vmatmul.mubr.bf16.gmra.mrb[40].mxu0 %v10727_v39  ;;  %v9905_v39 = vld [vmem:[#allocation12 + $0x20] sm:$0xff]  }
 0x156   :  { %957 = vmatprep.mubr.bf16.mxu0 %v10729_v40  ;;  %4456 = vmatpush1.bf16.msra.mxu1 %v9905_v39 }
 0x157   :  { %4457 = vmatprep.subr.bf16.mxu1 %v10459_v0 }
 0x15a   :  { %4458 = vmatpush1.bf16.msra.mxu1 %v9909_v46 }
 0x15b   :  { %4459 = vmatprep.subr.bf16.mxu1 %v10459_v0 }
 0x15d   :  { %958 = vmatmul.mubr.bf16.gmra.mrb[44].mxu0 %v9858_v44 }
 0x15e   :  { %965 = vmatprep.mubr.bf16.mxu0 %v9859_v45  ;;  %v9908_v45 = vld [vmem:[#allocation6 + $0x1a0] ss:$8 sps:$4 sm:$0xff]   ;;  %4460 = vmatpush1.bf16.msra.mxu1 %v9910_v53 }
 0x15f   :  { %4461 = vmatprep.subr.bf16.mxu1 %v10459_v0 }
 0x165   :  { %966 = vmatmul.mubr.bf16.gmra.mrb[48].mxu0 %v9861_v54 }
 0x166   :  { %973 = vmatprep.mubr.bf16.mxu0 %v9862_v56 }
 0x16d   :  { %974 = vmatmul.mubr.bf16.gmra.mrb[52].mxu0 %v9864_v63 }
 0x16e   :  { %981 = vmatprep.mubr.bf16.mxu0 %v9865_v1 }
 0x175   :  { %982 = vmatmul.mubr.bf16.gmra.mrb[56].mxu0 %v9867_v2 }
 0x176   :  { %989 = vmatprep.mubr.bf16.mxu0 %v9868_v3  ;;  %v9911_v3 = vld [vmem:[#allocation12 + $0x38] sm:$0xff]  }
 0x177   :  { %4462 = vmatpush1.bf16.msra.mxu1 %v9911_v3 }
 0x178   :  { %4463 = vmatprep.subr.bf16.mxu1 %v10459_v0 }
 0x17d   :  { %990 = vmatmul.mubr.bf16.gmra.mrb[60].mxu0 %v9870_v4 }
 0x17e   :  { %997 = vmatprep.mubr.bf16.mxu0 %v9871_v5 }
 0x185   :  { %998 = vmatmul.mubr.bf16.gmra.mrb[64].mxu0 %v9873_v6 }
 0x186   :  { %1005 = vmatprep.mubr.bf16.mxu0 %v9874_v7 }
 0x18d   :  { %1006 = vmatmul.mubr.bf16.gmra.mrb[68].mxu0 %v9876_v8 }
 0x18e   :  { %1013 = vmatprep.mubr.bf16.mxu0 %v9877_v9 }
 0x195   :  { %1014 = vmatmul.mubr.bf16.gmra.mrb[72].mxu0 %v9879_v10  ;;  %v9912_v10 = vld [vmem:[#allocation12 + $0x40] sm:$0xff]  }
 0x196   :  { %1021 = vmatprep.mubr.bf16.mxu0 %v9880_v11  ;;  %4464 = vmatpush1.bf16.msra.mxu1 %v9912_v10 }
 0x19d   :  { %1022 = vmatmul.mubr.bf16.gmra.mrb[76].mxu0 %v9882_v12 }
 0x19e   :  { %1029 = vmatprep.mubr.bf16.mxu0 %v9883_v13 }
 0x1a5   :  { %1030 = vmatmul.mubr.bf16.gmra.mrb[80].mxu0 %v9885_v14 }
 0x1a6   :  { %1037 = vmatprep.mubr.bf16.mxu0 %v9886_v15 }
 0x1ad   :  { %1038 = vmatmul.mubr.bf16.gmra.mrb[84].mxu0 %v9888_v16  ;;  %v9913_v16 = vld [vmem:[#allocation6 + $0x1b4] ss:$8 sps:$4 sm:$0xff]  }
 0x1ae   :  { %1045 = vmatprep.mubr.bf16.mxu0 %v9889_v17 }
 0x1b5   :  { %1046 = vmatmul.mubr.bf16.gmra.mrb[88].mxu0 %v9891_v18 }
 0x1b6   :  { %1053 = vmatprep.mubr.bf16.mxu0 %v9892_v19 }
 0x1bd   :  { %1054 = vmatmul.mubr.bf16.gmra.mrb[92].mxu0 %v9894_v20 }
 0x1be   :  { %1061 = vmatprep.mubr.bf16.mxu0 %v9895_v21 }
 0x1c5   :  { %1062 = vmatmul.mubr.bf16.gmra.mrb[96].mxu0 %v9897_v22 }
 0x1c6   :  { %1069 = vmatprep.mubr.bf16.mxu0 %v9900_v25  ;;  %v9915_v25 = vld [vmem:[#allocation6 + $0x1b0] ss:$8 sps:$4 sm:$0xff]  }
 0x1cd   :  { %1070 = vmatmul.mubr.bf16.gmra.mrb[100].mxu0 %v9902_v26 }
 0x1ce   :  { %1077 = vmatprep.mubr.bf16.mxu0 %v9906_v43 }
 0x1d5   :  { %1078 = vmatmul.mubr.bf16.gmra.mrb[104].mxu0 %v9908_v45 }
 0x1d6   :  { %1085 = vmatprep.mubr.bf16.mxu0 %v9913_v16 }
 0x1d8   :  { %v871_v30 = vpop.f32.mrb[0].mxu0 }
 0x1d9   :  { %v1131_v32 = vmul.f32 %v10909_v28, %v871_v30  ;;  %v873_v33 = vpop.f32.mrb[1].mxu0 }
 0x1da   :  { %v874_v34 = vpop.f32.mrb[2].mxu0 }
 0x1db   :  { %v1200_v35 = vadd.f32 %v10912_v31, %v1131_v32  ;;  %v1132_v36 = vmul.f32 %v10909_v28, %v874_v34  ;;  %v876_v37 = vpop.f32.mrb[3].mxu0 }
 0x1dd   :  { %v1264_v40 = vmax.f32 %v1200_v35, 0.0  ;;  %v1201_v41 = vadd.f32 %v10912_v31, %v1132_v36  ;;  %1086 = vmatmul.mubr.bf16.gmra.mrb[108].mxu0 %v9915_v25 }
 0x1df   :  { %1329 = vst.msk [vmem:[#allocation2 + $0x28] sm:$0xff] %vm179_vm0, %v1264_v40  ;;  %v1265_v42 = vmax.f32 %v1201_v41, 0.0 }
 0x1e0   :  { %v879_v44 = vpop.f32.mrb[4].mxu0 }
 0x1e1   :  { %1330 = vst.msk [vmem:[#allocation2 + $0x30] sm:$0xff] %vm179_vm0, %v1265_v42  ;;  %v1133_v47 = vmul.f32 %v10909_v28, %v879_v44  ;;  %v881_v48 = vpop.f32.mrb[5].mxu0 }
 0x1e2   :  { %v882_v49 = vpop.f32.mrb[6].mxu0 }
 0x1e3   :  { %v1202_v50 = vadd.f32 %v10912_v31, %v1133_v47  ;;  %v1134_v51 = vmul.f32 %v10909_v28, %v882_v49  ;;  %v884_v52 = vpop.f32.mrb[7].mxu0  ;;  %v9916_v49 = vld [vmem:[#allocation6 + $0x1c4] ss:$8 sps:$4 sm:$0xff]  }
 0x1e4   :  { %1093 = vmatprep.mubr.bf16.mxu0 %v9916_v49 }
 0x1e5   :  { %v1266_v54 = vmax.f32 %v1202_v50, 0.0  ;;  %v1203_v55 = vadd.f32 %v10912_v31, %v1134_v51  ;;  %v9918_v50 = vld [vmem:[#allocation6 + $0x1c0] ss:$8 sps:$4 sm:$0xff]  }
 0x1e6   :  { %v10928_v57 = vld [vmem:[#allocation2 + $0x27] sm:$0xff]  ;;  %1094 = vmatmul.mubr.bf16.gmra.mrb[112].mxu0 %v9918_v50 }
 0x1e7   :  { %1331 = vst.msk [vmem:[#allocation2 + $0x48] sm:$0xff] %vm179_vm0, %v1266_v54  ;;  %v1267_v56 = vmax.f32 %v1203_v55, 0.0  ;;  %v1649_v9 = vld [vmem:[#allocation2 + $0x28] sm:$0xff] }
 0x1e8   :  { %v10931_v58 = vld [vmem:[#allocation2 + $0x2f] sm:$0xff]  ;;  %v887_v61 = vpop.f32.mrb[8].mxu0 }
 0x1e9   :  { %v1713_v59 = vld [vmem:[#allocation2 + $0x29] sm:$0xff]  ;;  %v1714_v60 = vld [vmem:[#allocation2 + $0x31] sm:$0xff]  ;;  %1332 = vst.msk [vmem:[#allocation2 + $0x50] sm:$0xff] %vm179_vm0, %v1267_v56  ;;  %v8477_v62 = vpack.i.bf16 %v10931_v58, %v10928_v57  ;;  %v1135_v1 = vmul.f32 %v10909_v28, %v887_v61  ;;  %v889_v2 = vpop.f32.mrb[9].mxu0 }
 0x1ea   :  { %v8487_v63 = vpack.i.bf16 %v1714_v60, %v1713_v59  ;;  %v890_v4 = vpop.f32.mrb[10].mxu0  ;;  %v1650_v5 = vld [vmem:[#allocation2 + $0x30] sm:$0xff] }
 0x1eb   :  { %8478 = vrot.lane.b32.xlu1 %v8477_v62, %s10465_s0  ;;  %v1204_v6 = vadd.f32 %v10912_v31, %v1135_v1  ;;  %v1136_v7 = vmul.f32 %v10909_v28, %v890_v4  ;;  %v892_v8 = vpop.f32.mrb[11].mxu0  ;;  %v8482_v13 = vpack.i.bf16 %v1650_v5, %v1649_v9 }
 0x1ec   :  { %8488 = vrot.lane.b32.xlu0 %v8487_v63, %s10466_s15 }
 0x1ed   :  { %v1268_v11 = vmax.f32 %v1204_v6, 0.0  ;;  %v1205_v12 = vadd.f32 %v10912_v31, %v1136_v7 }
 0x1ee   :  { %v1842_v14 = vld [vmem:[#allocation2 + $0x48] sm:$0xff] }
 0x1ef   :  { %1333 = vst.msk [vmem:[#allocation2 + $0x68] sm:$0xff] %vm179_vm0, %v1268_v11  ;;  %v1269_v15 = vmax.f32 %v1205_v12, 0.0  ;;  %8483 = vrot.lane.b32.xlu1 %v8482_v13, %s10445_s27  ;;  %v1778_v26 = vld [vmem:[#allocation2 + $0x47] sm:$0xff] }
 0x1f0   :  { %8498 = vrot.lane.b32.xlu0 %v8487_v63, %s10462_s20  ;;  %v1843_v17 = vld [vmem:[#allocation2 + $0x50] sm:$0xff]  ;;  %v895_v20 = vpop.f32.mrb[12].mxu0 }
 0x1f1   :  { %v1906_v18 = vld [vmem:[#allocation2 + $0x49] sm:$0xff]  ;;  %v1907_v19 = vld [vmem:[#allocation2 + $0x51] sm:$0xff]  ;;  %1334 = vst.msk [vmem:[#allocation2 + $0x70] sm:$0xff] %vm179_vm0, %v1269_v15  ;;  %v8507_v21 = vpack.i.bf16 %v1843_v17, %v1842_v14  ;;  %v1137_v23 = vmul.f32 %v10909_v28, %v895_v20  ;;  %v897_v24 = vpop.f32.mrb[13].mxu0 }
 0x1f2   :  { %v4216_v22 = vpack.c.bf16 %v1907_v19, %v1906_v18  ;;  %v1779_v27 = vld [vmem:[#allocation2 + $0x4f] sm:$0xff]  ;;  %v898_v29 = vpop.f32.mrb[14].mxu0  ;;  %v8522_v51 = vpack.i.bf16 %v1907_v19, %v1906_v18 }
 0x1f3   :  { %8493 = vrot.lane.b32.xlu1 %v8482_v13, %s10461_s10  ;;  %v1206_v30 = vadd.f32 %v10912_v31, %v1137_v23  ;;  %v1138_v32 = vmul.f32 %v10909_v28, %v898_v29  ;;  %v900_v33 = vpop.f32.mrb[15].mxu0  ;;  %v8502_v34 = vpack.i.bf16 %v1779_v27, %v1778_v26  ;;  %v9919_v20 = vld [vmem:[#allocation6 + $0x1d4] ss:$8 sps:$4 sm:$0xff]  }
 0x1f4   :  { %8508 = vrot.lane.b32.xlu0 %v8507_v21, %s10464_s18  ;;  %8080 = vmatprep.mubr.msk.bf16.mxu1 %vm179_vm0, %v4216_v22 }
 0x1f5   :  { %v1270_v35 = vmax.f32 %v1206_v30, 0.0  ;;  %v1207_v36 = vadd.f32 %v10912_v31, %v1138_v32  ;;  %1101 = vmatprep.mubr.bf16.mxu0 %v9919_v20 }
 0x1f6   :  { %v1780_v39 = vld [vmem:[#allocation2 + $0x67] sm:$0xff] }
 0x1f7   :  { %8503 = vrot.lane.b32.xlu1 %v8502_v34, %s10463_s4  ;;  %1335 = vst.msk [vmem:[#allocation2 + $0x88] sm:$0xff] %vm179_vm0, %v1270_v35  ;;  %v1271_v37 = vmax.f32 %v1207_v36, 0.0  ;;  %v1844_v56 = vld [vmem:[#allocation2 + $0x68] sm:$0xff] }
 0x1f8   :  { %8518 = vrot.lane.b32.xlu0 %v8507_v21, %s10445_s27  ;;  %v1781_v40 = vld [vmem:[#allocation2 + $0x6f] sm:$0xff]  ;;  %v903_v41 = vpop.f32.mrb[16].mxu0 }
 0x1f9   :  { %1336 = vst.msk [vmem:[#allocation2 + $0x90] sm:$0xff] %vm179_vm0, %v1271_v37  ;;  %v1139_v42 = vmul.f32 %v10909_v28, %v903_v41  ;;  %v905_v43 = vpop.f32.mrb[17].mxu0  ;;  %v8537_v45 = vpack.i.bf16 %v1781_v40, %v1780_v39  ;;  %v1845_v61 = vld [vmem:[#allocation2 + $0x70] sm:$0xff] }
 0x1fa   :  { %v906_v44 = vpop.f32.mrb[18].mxu0  ;;  %v1717_v62 = vld [vmem:[#allocation2 + $0x69] sm:$0xff]  ;;  %v1718_v63 = vld [vmem:[#allocation2 + $0x71] sm:$0xff]  ;;  %v8542_v5 = vpack.i.bf16 %v1845_v61, %v1844_v56 }
 0x1fb   :  { %8513 = vrot.lane.b32.xlu1 %v8502_v34, %s10465_s0  ;;  %v1208_v46 = vadd.f32 %v10912_v31, %v1139_v42  ;;  %v1140_v47 = vmul.f32 %v10909_v28, %v906_v44  ;;  %v908_v48 = vpop.f32.mrb[19].mxu0  ;;  %v8557_v6 = vpack.i.bf16 %v1718_v63, %v1717_v62 }
 0x1fc   :  { %8528 = vrot.lane.b32.xlu0 %v8507_v21, %s10461_s10  ;;  %v9921_v21 = vld [vmem:[#allocation6 + $0x1d0] ss:$8 sps:$4 sm:$0xff]  }
 0x1fd   :  { %v1272_v52 = vmax.f32 %v1208_v46, 0.0  ;;  %v1209_v53 = vadd.f32 %v10912_v31, %v1140_v47  ;;  %1102 = vmatmul.mubr.bf16.gmra.mrb[116].mxu0 %v9921_v21  ;;  %v9922_v46 = vld [vmem:[#allocation6 + $0x1e4] ss:$8 sps:$4 sm:$0xff]   ;;  %v9924_v47 = vld [vmem:[#allocation6 + $0x1e0] ss:$8 sps:$4 sm:$0xff]  }
 0x1fe   :  { %v1846_v10 = vld [vmem:[#allocation2 + $0x88] sm:$0xff]  ;;  %1109 = vmatprep.mubr.bf16.mxu0 %v9922_v46  ;;  %v9927_v21 = vld [vmem:[#allocation6 + $0x1f0] ss:$8 sps:$4 sm:$0xff]  }
 0x1ff   :  { %8523 = vrot.lane.b32.xlu1 %v8522_v51, %s10466_s15  ;;  %1337 = vst.msk [vmem:[#allocation2 + $0xa8] sm:$0xff] %vm179_vm0, %v1272_v52  ;;  %v1273_v54 = vmax.f32 %v1209_v53, 0.0  ;;  %v1782_v24 = vld [vmem:[#allocation2 + $0x87] sm:$0xff] }
 0x200   :  { %8538 = vrot.lane.b32.xlu0 %v8537_v45, %s10463_s4  ;;  %v911_v55 = vpop.f32.mrb[20].mxu0  ;;  %v1847_v11 = vld [vmem:[#allocation2 + $0x90] sm:$0xff] }
 0x201   :  { %1338 = vst.msk [vmem:[#allocation2 + $0xb0] sm:$0xff] %vm179_vm0, %v1273_v54  ;;  %v1141_v59 = vmul.f32 %v10909_v28, %v911_v55  ;;  %v913_v60 = vpop.f32.mrb[21].mxu0  ;;  %v8577_v16 = vpack.i.bf16 %v1847_v11, %v1846_v10  ;;  %v1783_v25 = vld [vmem:[#allocation2 + $0x8f] sm:$0xff] }
 0x202   :  { %v914_v1 = vpop.f32.mrb[22].mxu0  ;;  %v8572_v29 = vpack.i.bf16 %v1783_v25, %v1782_v24  ;;  %v1719_v42 = vld [vmem:[#allocation2 + $0x89] sm:$0xff]  ;;  %v1720_v43 = vld [vmem:[#allocation2 + $0x91] sm:$0xff] }
 0x203   :  { %8533 = vrot.lane.b32.xlu1 %v8522_v51, %s10462_s20  ;;  %v1210_v2 = vadd.f32 %v10912_v31, %v1141_v59  ;;  %v1142_v3 = vmul.f32 %v10909_v28, %v914_v1  ;;  %v916_v4 = vpop.f32.mrb[23].mxu0  ;;  %v8592_v49 = vpack.i.bf16 %v1720_v43, %v1719_v42 }
 0x204   :  { %8548 = vrot.lane.b32.xlu0 %v8537_v45, %s10465_s0 }
 0x205   :  { %v1274_v7 = vmax.f32 %v1210_v2, 0.0  ;;  %v1211_v8 = vadd.f32 %v10912_v31, %v1142_v3  ;;  %1110 = vmatmul.mubr.bf16.gmra.mrb[120].mxu0 %v9924_v47 }
 0x206   :  { %v1784_v37 = vld [vmem:[#allocation2 + $0xa7] sm:$0xff] }
 0x207   :  { %8543 = vrot.lane.b32.xlu1 %v8542_v5, %s10464_s18  ;;  %1339 = vst.msk [vmem:[#allocation2 + $0xc8] sm:$0xff] %vm179_vm0, %v1274_v7  ;;  %v1275_v9 = vmax.f32 %v1211_v8, 0.0  ;;  %v1848_v56 = vld [vmem:[#allocation2 + $0xa8] sm:$0xff] }
 0x208   :  { %8558 = vrot.lane.b32.xlu0 %v8557_v6, %s10466_s15  ;;  %v919_v12 = vpop.f32.mrb[24].mxu0  ;;  %v1785_v39 = vld [vmem:[#allocation2 + $0xaf] sm:$0xff] }
 0x209   :  { %1340 = vst.msk [vmem:[#allocation2 + $0xd0] sm:$0xff] %vm179_vm0, %v1275_v9  ;;  %v1143_v13 = vmul.f32 %v10909_v28, %v919_v12  ;;  %v921_v14 = vpop.f32.mrb[25].mxu0  ;;  %v8607_v44 = vpack.i.bf16 %v1785_v39, %v1784_v37  ;;  %v1849_v61 = vld [vmem:[#allocation2 + $0xb0] sm:$0xff] }
 0x20a   :  { %v922_v15 = vpop.f32.mrb[26].mxu0  ;;  %v1721_v62 = vld [vmem:[#allocation2 + $0xa9] sm:$0xff]  ;;  %v1722_v63 = vld [vmem:[#allocation2 + $0xb1] sm:$0xff]  ;;  %v8612_v3 = vpack.i.bf16 %v1849_v61, %v1848_v56 }
 0x20b   :  { %8553 = vrot.lane.b32.xlu1 %v8542_v5, %s10445_s27  ;;  %v1212_v17 = vadd.f32 %v10912_v31, %v1143_v13  ;;  %v1144_v18 = vmul.f32 %v10909_v28, %v922_v15  ;;  %v924_v19 = vpop.f32.mrb[27].mxu0  ;;  %v8627_v4 = vpack.i.bf16 %v1722_v63, %v1721_v62 }
 0x20c   :  { %8568 = vrot.lane.b32.xlu0 %v8557_v6, %s10462_s20 }
 0x20d   :  { %v1276_v22 = vmax.f32 %v1212_v17, 0.0  ;;  %v1213_v23 = vadd.f32 %v10912_v31, %v1144_v18  ;;  %v9925_v17 = vld [vmem:[#allocation6 + $0x1f4] ss:$8 sps:$4 sm:$0xff]  }
 0x20e   :  { %v1850_v11 = vld [vmem:[#allocation2 + $0xc8] sm:$0xff]  ;;  %1117 = vmatprep.mubr.bf16.mxu0 %v9925_v17 }
 0x20f   :  { %8563 = vrot.lane.b32.xlu1 %v8542_v5, %s10461_s10  ;;  %1341 = vst.msk [vmem:[#allocation2 + $0xe8] sm:$0xff] %vm179_vm0, %v1276_v22  ;;  %v1277_v26 = vmax.f32 %v1213_v23, 0.0  ;;  %v1786_v22 = vld [vmem:[#allocation2 + $0xc7] sm:$0xff]  ;;  %1118 = vmatmul.mubr.bf16.gmra.mrb[124].mxu0 %v9927_v21 }
 0x210   :  { %8578 = vrot.lane.b32.xlu0 %v8577_v16, %s10464_s18  ;;  %v927_v27 = vpop.f32.mrb[28].mxu0  ;;  %v1851_v12 = vld [vmem:[#allocation2 + $0xd0] sm:$0xff] }
 0x211   :  { %1342 = vst.msk [vmem:[#allocation2 + $0xf0] sm:$0xff] %vm179_vm0, %v1277_v26  ;;  %v1145_v30 = vmul.f32 %v10909_v28, %v927_v27  ;;  %v929_v32 = vpop.f32.mrb[29].mxu0  ;;  %v8647_v15 = vpack.i.bf16 %v1851_v12, %v1850_v11  ;;  %v1787_v23 = vld [vmem:[#allocation2 + $0xcf] sm:$0xff] }
 0x212   :  { %v930_v33 = vpop.f32.mrb[30].mxu0 }
 0x213   :  { %8573 = vrot.lane.b32.xlu1 %v8572_v29, %s10463_s4  ;;  %v1214_v34 = vadd.f32 %v10912_v31, %v1145_v30  ;;  %v1146_v35 = vmul.f32 %v10909_v28, %v930_v33  ;;  %v932_v36 = vpop.f32.mrb[31].mxu0 }
 0x214   :  { %8588 = vrot.lane.b32.xlu0 %v8577_v16, %s10445_s27 }
 0x215   :  { %v1278_v40 = vmax.f32 %v1214_v34, 0.0  ;;  %v1215_v41 = vadd.f32 %v10912_v31, %v1146_v35 }
 0x216   :  { %v1788_v34 = vld [vmem:[#allocation2 + $0xe7] sm:$0xff] }
 0x217   :  { %8583 = vrot.lane.b32.xlu1 %v8572_v29, %s10465_s0  ;;  %1343 = vst.msk [vmem:[#allocation2 + $0x108] sm:$0xff] %vm179_vm0, %v1278_v40  ;;  %v1279_v45 = vmax.f32 %v1215_v41, 0.0  ;;  %v8642_v29 = vpack.i.bf16 %v1787_v23, %v1786_v22  ;;  %v1723_v40 = vld [vmem:[#allocation2 + $0xc9] sm:$0xff]  ;;  %v1724_v41 = vld [vmem:[#allocation2 + $0xd1] sm:$0xff] }
 0x218   :  { %8598 = vrot.lane.b32.xlu0 %v8577_v16, %s10461_s10  ;;  %v935_v48 = vpop.f32.mrb[32].mxu0  ;;  %v1789_v35 = vld [vmem:[#allocation2 + $0xef] sm:$0xff]  ;;  %v8662_v47 = vpack.i.bf16 %v1724_v41, %v1723_v40 }
 0x219   :  { %1344 = vst.msk [vmem:[#allocation2 + $0x110] sm:$0xff] %vm179_vm0, %v1279_v45  ;;  %v1147_v50 = vmul.f32 %v10909_v28, %v935_v48  ;;  %v937_v51 = vpop.f32.mrb[33].mxu0  ;;  %v8677_v43 = vpack.i.bf16 %v1789_v35, %v1788_v34  ;;  %v1725_v56 = vld [vmem:[#allocation2 + $0xe9] sm:$0xff] }
 0x21a   :  { %v938_v52 = vpop.f32.mrb[34].mxu0 }
 0x21b   :  { %8593 = vrot.lane.b32.xlu1 %v8592_v49, %s10466_s15  ;;  %v1216_v53 = vadd.f32 %v10912_v31, %v1147_v50  ;;  %v1148_v54 = vmul.f32 %v10909_v28, %v938_v52  ;;  %v940_v55 = vpop.f32.mrb[35].mxu0  ;;  %v1852_v52 = vld [vmem:[#allocation2 + $0xe8] sm:$0xff] }
 0x21c   :  { %8608 = vrot.lane.b32.xlu0 %v8607_v44, %s10463_s4  ;;  %v1853_v55 = vld [vmem:[#allocation2 + $0xf0] sm:$0xff] }
 0x21d   :  { %v1280_v59 = vmax.f32 %v1216_v53, 0.0  ;;  %v1217_v60 = vadd.f32 %v10912_v31, %v1148_v54 }
 0x21f   :  { %8603 = vrot.lane.b32.xlu1 %v8592_v49, %s10462_s20  ;;  %1345 = vst.msk [vmem:[#allocation2 + $0x128] sm:$0xff] %vm179_vm0, %v1280_v59  ;;  %v1281_v1 = vmax.f32 %v1217_v60, 0.0  ;;  %v1726_v59 = vld [vmem:[#allocation2 + $0xf1] sm:$0xff] }
 0x220   :  { %8618 = vrot.lane.b32.xlu0 %v8607_v44, %s10465_s0  ;;  %v943_v2 = vpop.f32.mrb[36].mxu0 }
 0x221   :  { %1346 = vst.msk [vmem:[#allocation2 + $0x130] sm:$0xff] %vm179_vm0, %v1281_v1  ;;  %v1149_v5 = vmul.f32 %v10909_v28, %v943_v2  ;;  %v945_v6 = vpop.f32.mrb[37].mxu0  ;;  %v8682_v1 = vpack.i.bf16 %v1853_v55, %v1852_v52  ;;  %v8697_v2 = vpack.i.bf16 %v1726_v59, %v1725_v56 }
 0x222   :  { %v946_v7 = vpop.f32.mrb[38].mxu0  ;;  %v1854_v6 = vld [vmem:[#allocation2 + $0x108] sm:$0xff] }
 0x223   :  { %8613 = vrot.lane.b32.xlu1 %v8612_v3, %s10464_s18  ;;  %v1218_v8 = vadd.f32 %v10912_v31, %v1149_v5  ;;  %v1150_v9 = vmul.f32 %v10909_v28, %v946_v7  ;;  %v948_v10 = vpop.f32.mrb[39].mxu0  ;;  %v1855_v7 = vld [vmem:[#allocation2 + $0x110] sm:$0xff] }
 0x224   :  { %8628 = vrot.lane.b32.xlu0 %v8627_v4, %s10466_s15  ;;  %v8717_v12 = vpack.i.bf16 %v1855_v7, %v1854_v6 }
 0x225   :  { %v1282_v13 = vmax.f32 %v1218_v8, 0.0  ;;  %v1219_v14 = vadd.f32 %v10912_v31, %v1150_v9 }
 0x226   :  { %v1856_v52 = vld [vmem:[#allocation2 + $0x128] sm:$0xff] }
 0x227   :  { %8623 = vrot.lane.b32.xlu1 %v8612_v3, %s10445_s27  ;;  %1347 = vst.msk [vmem:[#allocation2 + $0x148] sm:$0xff] %vm179_vm0, %v1282_v13  ;;  %v1283_v16 = vmax.f32 %v1219_v14, 0.0 }
 0x228   :  { %8638 = vrot.lane.b32.xlu0 %v8627_v4, %s10462_s20  ;;  %v951_v18 = vpop.f32.mrb[40].mxu0  ;;  %v1793_v34 = vld [vmem:[#allocation2 + $0x12f] sm:$0xff] }
 0x229   :  { %1348 = vst.msk [vmem:[#allocation2 + $0x150] sm:$0xff] %vm179_vm0, %v1283_v16  ;;  %v1151_v19 = vmul.f32 %v10909_v28, %v951_v18  ;;  %v953_v20 = vpop.f32.mrb[41].mxu0  ;;  %v11053_v16 = vpop.permute.xlu0 %8448  ;;  %v1857_v55 = vld [vmem:[#allocation2 + $0x130] sm:$0xff] }
 0x22a   :  { %v954_v24 = vpop.f32.mrb[42].mxu0  ;;  %v1791_v20 = vld [vmem:[#allocation2 + $0x10f] sm:$0xff] }
 0x22b   :  { %8633 = vrot.lane.b32.xlu1 %v8612_v3, %s10461_s10  ;;  %v1220_v25 = vadd.f32 %v10912_v31, %v1151_v19  ;;  %v1152_v26 = vmul.f32 %v10909_v28, %v954_v24  ;;  %v956_v27 = vpop.f32.mrb[43].mxu0  ;;  %v1790_v19 = vld [vmem:[#allocation2 + $0x107] sm:$0xff]  ;;  %v1730_v59 = vld [vmem:[#allocation2 + $0x131] sm:$0xff] }
 0x22c   :  { %8648 = vrot.lane.b32.xlu0 %v8647_v15, %s10464_s18  ;;  %v8712_v23 = vpack.i.bf16 %v1791_v20, %v1790_v19  ;;  %v1729_v56 = vld [vmem:[#allocation2 + $0x129] sm:$0xff] }
 0x22d   :  { %v1284_v30 = vmax.f32 %v1220_v25, 0.0  ;;  %v1221_v32 = vadd.f32 %v10912_v31, %v1152_v26  ;;  %v11061_v26 = vpop.permute.xlu0 %8458  ;;  %v1394_v19 = vld [vmem:[#allocation2 + $0xf] sm:$0xff] }
 0x22f   :  { %8643 = vrot.lane.b32.xlu1 %v8642_v29, %s10463_s4  ;;  %1349 = vst.msk [vmem:[#allocation2 + $0x168] sm:$0xff] %vm179_vm0, %v1284_v30  ;;  %v1285_v33 = vmax.f32 %v1221_v32, 0.0 }
 0x230   :  { %8658 = vrot.lane.b32.xlu0 %v8647_v15, %s10445_s27  ;;  %v959_v36 = vpop.f32.mrb[44].mxu0 }
 0x231   :  { %1350 = vst.msk [vmem:[#allocation2 + $0x170] sm:$0xff] %vm179_vm0, %v1285_v33  ;;  %v1153_v37 = vmul.f32 %v10909_v28, %v959_v36  ;;  %v961_v39 = vpop.f32.mrb[45].mxu0  ;;  %v1792_v33 = vld [vmem:[#allocation2 + $0x127] sm:$0xff] }
 0x232   :  { %v962_v42 = vpop.f32.mrb[46].mxu0  ;;  %v1728_v39 = vld [vmem:[#allocation2 + $0x111] sm:$0xff]  ;;  %v8747_v40 = vpack.i.bf16 %v1793_v34, %v1792_v33  ;;  %v1794_v33 = vld [vmem:[#allocation2 + $0x147] sm:$0xff] }
 0x233   :  { %8653 = vrot.lane.b32.xlu1 %v8642_v29, %s10465_s0  ;;  %v1222_v44 = vadd.f32 %v10912_v31, %v1153_v37  ;;  %v1154_v45 = vmul.f32 %v10909_v28, %v962_v42  ;;  %v964_v46 = vpop.f32.mrb[47].mxu0  ;;  %v1727_v37 = vld [vmem:[#allocation2 + $0x109] sm:$0xff]  ;;  %v11071_v42 = vpop.permute.xlu0 %8463 }
 0x234   :  { %8668 = vrot.lane.b32.xlu0 %v8647_v15, %s10461_s10  ;;  %v1795_v34 = vld [vmem:[#allocation2 + $0x14f] sm:$0xff] }
 0x235   :  { %v1286_v48 = vmax.f32 %v1222_v44, 0.0  ;;  %v1223_v49 = vadd.f32 %v10912_v31, %v1154_v45  ;;  %v8732_v44 = vpack.i.bf16 %v1728_v39, %v1727_v37  ;;  %v11073_v45 = vpop.permute.xlu1 %8453 }
 0x237   :  { %8663 = vrot.lane.b32.xlu1 %v8662_v47, %s10466_s15  ;;  %1351 = vst.msk [vmem:[#allocation2 + $0x188] sm:$0xff] %vm179_vm0, %v1286_v48  ;;  %v1287_v50 = vmax.f32 %v1223_v49, 0.0 }
 0x238   :  { %8678 = vrot.lane.b32.xlu0 %v8677_v43, %s10463_s4  ;;  %v967_v51 = vpop.f32.mrb[48].mxu0 }
 0x239   :  { %1352 = vst.msk [vmem:[#allocation2 + $0x190] sm:$0xff] %vm179_vm0, %v1287_v50  ;;  %v1155_v53 = vmul.f32 %v10909_v28, %v967_v51  ;;  %v969_v54 = vpop.f32.mrb[49].mxu0 }
 0x23a   :  { %v970_v60 = vpop.f32.mrb[50].mxu0 }
 0x23b   :  { %8673 = vrot.lane.b32.xlu1 %v8662_v47, %s10462_s20  ;;  %v1224_v61 = vadd.f32 %v10912_v31, %v1155_v53  ;;  %v1156_v62 = vmul.f32 %v10909_v28, %v970_v60  ;;  %v972_v63 = vpop.f32.mrb[51].mxu0  ;;  %v11084_v60 = vpop.permute.xlu0 %8468 }
 0x23c   :  { %8688 = vrot.lane.b32.xlu0 %v8677_v43, %s10465_s0 }
 0x23d   :  { %v1288_v3 = vmax.f32 %v1224_v61, 0.0  ;;  %v1225_v4 = vadd.f32 %v10912_v31, %v1156_v62  ;;  %v11086_v61 = vpop.permute.xlu1 %8473 }
 0x23f   :  { %8683 = vrot.lane.b32.xlu1 %v8682_v1, %s10464_s18  ;;  %1353 = vst.msk [vmem:[#allocation2 + $0x1a8] sm:$0xff] %vm179_vm0, %v1288_v3  ;;  %v1289_v5 = vmax.f32 %v1225_v4, 0.0 }
 0x240   :  { %8698 = vrot.lane.b32.xlu0 %v8697_v2, %s10466_s15  ;;  %v975_v8 = vpop.f32.mrb[52].mxu0 }
 0x241   :  { %1354 = vst.msk [vmem:[#allocation2 + $0x1b0] sm:$0xff] %vm179_vm0, %v1289_v5  ;;  %v1157_v9 = vmul.f32 %v10909_v28, %v975_v8  ;;  %v977_v10 = vpop.f32.mrb[53].mxu0 }
 0x242   :  { %v978_v11 = vpop.f32.mrb[54].mxu0  ;;  %v1859_v10 = vld [vmem:[#allocation2 + $0x150] sm:$0xff] }
 0x243   :  { %8693 = vrot.lane.b32.xlu1 %v8682_v1, %s10445_s27  ;;  %v1226_v13 = vadd.f32 %v10912_v31, %v1157_v9  ;;  %v1158_v14 = vmul.f32 %v10909_v28, %v978_v11  ;;  %v980_v15 = vpop.f32.mrb[55].mxu0  ;;  %v1858_v9 = vld [vmem:[#allocation2 + $0x148] sm:$0xff] }
 0x244   :  { %8708 = vrot.lane.b32.xlu0 %v8697_v2, %s10462_s20  ;;  %v8767_v2 = vpack.i.bf16 %v1730_v59, %v1729_v56  ;;  %v8451_v15 = vunpack.i.h.bf16 %v11053_v16  ;;  %v8787_v20 = vpack.i.bf16 %v1859_v10, %v1858_v9  ;;  %v1731_v9 = vld [vmem:[#allocation2 + $0x149] sm:$0xff]  ;;  %v1732_v10 = vld [vmem:[#allocation2 + $0x151] sm:$0xff] }
 0x245   :  { %v1290_v17 = vmax.f32 %v1226_v13, 0.0  ;;  %v1227_v18 = vadd.f32 %v10912_v31, %v1158_v14 }
 0x247   :  { %8703 = vrot.lane.b32.xlu1 %v8682_v1, %s10461_s10  ;;  %1355 = vst.msk [vmem:[#allocation2 + $0x1c8] sm:$0xff] %vm179_vm0, %v1290_v17  ;;  %v1291_v21 = vmax.f32 %v1227_v18, 0.0  ;;  %v8752_v1 = vpack.i.bf16 %v1857_v55, %v1856_v52  ;;  %v8450_v17 = vunpack.i.l.bf16 %v11053_v16  ;;  %v1393_v18 = vld [vmem:[#allocation2 + $0x7] sm:$0xff] }
 0x248   :  { %8718 = vrot.lane.b32.xlu0 %v8717_v12, %s10464_s18  ;;  %v983_v22 = vpop.f32.mrb[56].mxu0  ;;  %v1796_v52 = vld [vmem:[#allocation2 + $0x167] sm:$0xff] }
 0x249   :  { %1356 = vst.msk [vmem:[#allocation2 + $0x1d0] sm:$0xff] %vm179_vm0, %v1291_v21  ;;  %v1159_v24 = vmul.f32 %v10909_v28, %v983_v22  ;;  %v985_v25 = vpop.f32.mrb[57].mxu0 }
 0x24a   :  { %v986_v27 = vpop.f32.mrb[58].mxu0 }
 0x24b   :  { %8713 = vrot.lane.b32.xlu1 %v8712_v23, %s10463_s4  ;;  %v1228_v29 = vadd.f32 %v10912_v31, %v1159_v24  ;;  %v1160_v30 = vmul.f32 %v10909_v28, %v986_v27  ;;  %v988_v32 = vpop.f32.mrb[59].mxu0  ;;  %v3762_v27 = vsel %vm179_vm0, %v1393_v18, %v8450_v17 }
 0x24c   :  { %8728 = vrot.lane.b32.xlu0 %v8717_v12, %s10445_s27 }
 0x24d   :  { %v1292_v35 = vmax.f32 %v1228_v29, 0.0  ;;  %v1229_v36 = vadd.f32 %v10912_v31, %v1160_v30  ;;  %v3763_v29 = vsel %vm179_vm0, %v1394_v19, %v8451_v15  ;;  %v8461_v30 = vunpack.i.h.bf16 %v11061_v26 }
 0x24f   :  { %8723 = vrot.lane.b32.xlu1 %v8712_v23, %s10465_s0  ;;  %1357 = vst.msk [vmem:[#allocation2 + $0x1e8] sm:$0xff] %vm179_vm0, %v1292_v35  ;;  %v1293_v41 = vmax.f32 %v1229_v36, 0.0  ;;  %v8460_v23 = vunpack.i.l.bf16 %v11061_v26 }
 0x250   :  { %8738 = vrot.lane.b32.xlu0 %v8717_v12, %s10461_s10  ;;  %v991_v43 = vpop.f32.mrb[60].mxu0 }
 0x251   :  { %1358 = vst.msk [vmem:[#allocation2 + $0x1f0] sm:$0xff] %vm179_vm0, %v1293_v41  ;;  %v1161_v46 = vmul.f32 %v10909_v28, %v991_v43  ;;  %v993_v47 = vpop.f32.mrb[61].mxu0  ;;  %v3826_v26 = vsel %vm270_vm2, %v3762_v27, %v8460_v23 }
 0x252   :  { %v994_v48 = vpop.f32.mrb[62].mxu0 }
 0x253   :  { %8733 = vrot.lane.b32.xlu1 %v8732_v44, %s10466_s15  ;;  %v1230_v49 = vadd.f32 %v10912_v31, %v1161_v46  ;;  %v1162_v50 = vmul.f32 %v10909_v28, %v994_v48  ;;  %v996_v51 = vpop.f32.mrb[63].mxu0  ;;  %v8782_v48 = vpack.i.bf16 %v1795_v34, %v1794_v33  ;;  %v1909_v33 = vld [vmem:[#allocation2 + $0x71] sm:$0xff] }
 0x254   :  { %8748 = vrot.lane.b32.xlu0 %v8747_v40, %s10463_s4 }
 0x255   :  { %v1294_v53 = vmax.f32 %v1230_v49, 0.0  ;;  %v1231_v54 = vadd.f32 %v10912_v31, %v1162_v50  ;;  %v3827_v50 = vsel %vm270_vm2, %v3763_v29, %v8461_v30 }
 0x257   :  { %8743 = vrot.lane.b32.xlu1 %v8732_v44, %s10462_s20  ;;  %1359 = vst.msk [vmem:[#allocation2 + $0x208] sm:$0xff] %vm179_vm0, %v1294_v53  ;;  %v1295_v62 = vmax.f32 %v1231_v54, 0.0  ;;  %v1797_v53 = vld [vmem:[#allocation2 + $0x16f] sm:$0xff] }
 0x258   :  { %8758 = vrot.lane.b32.xlu0 %v8747_v40, %s10465_s0  ;;  %v999_v63 = vpop.f32.mrb[64].mxu0 }
 0x259   :  { %1360 = vst.msk [vmem:[#allocation2 + $0x210] sm:$0xff] %vm179_vm0, %v1295_v62  ;;  %v1163_v3 = vmul.f32 %v10909_v28, %v999_v63  ;;  %v1001_v4 = vpop.f32.mrb[65].mxu0 }
 0x25a   :  { %v1002_v5 = vpop.f32.mrb[66].mxu0  ;;  %v8817_v4 = vpack.i.bf16 %v1797_v53, %v1796_v52  ;;  %v1861_v52 = vld [vmem:[#allocation2 + $0x170] sm:$0xff] }
 0x25b   :  { %8753 = vrot.lane.b32.xlu1 %v8752_v1, %s10464_s18  ;;  %v1232_v6 = vadd.f32 %v10912_v31, %v1163_v3  ;;  %v1164_v7 = vmul.f32 %v10909_v28, %v1002_v5  ;;  %v1004_v8 = vpop.f32.mrb[67].mxu0  ;;  %v1734_v53 = vld [vmem:[#allocation2 + $0x171] sm:$0xff] }
 0x25c   :  { %8768 = vrot.lane.b32.xlu0 %v8767_v2, %s10466_s15 }
 0x25d   :  { %v8479_v11 = vpop.permute.xlu1 %8478  ;;  %v1296_v13 = vmax.f32 %v1232_v6, 0.0  ;;  %v1233_v14 = vadd.f32 %v10912_v31, %v1164_v7 }
 0x25e   :  { %v11095_v12 = vpop.permute.xlu0 %8488  ;;  %v8480_v32 = vunpack.i.l.bf16 %v8479_v11  ;;  %v8481_v36 = vunpack.i.h.bf16 %v8479_v11 }
 0x25f   :  { %8763 = vrot.lane.b32.xlu1 %v8752_v1, %s10445_s27  ;;  %1361 = vst.msk [vmem:[#allocation2 + $0x268] sm:$0xff] %vm179_vm0, %v1296_v13  ;;  %v1297_v21 = vmax.f32 %v1233_v14, 0.0  ;;  %v8490_v59 = vunpack.i.l.bf16 %v11095_v12 }
 0x260   :  { %8778 = vrot.lane.b32.xlu0 %v8767_v2, %s10462_s20  ;;  %v1007_v22 = vpop.f32.mrb[68].mxu0  ;;  %v3891_v51 = vsel %vm3890_vm3, %v3826_v26, %v8480_v32  ;;  %v3892_v54 = vsel %vm3890_vm3, %v3827_v50, %v8481_v36  ;;  %v1908_v32 = vld [vmem:[#allocation2 + $0x69] sm:$0xff] }
 0x261   :  { %v8484_v24 = vpop.permute.xlu1 %8483  ;;  %1362 = vst.msk [vmem:[#allocation2 + $0x270] sm:$0xff] %vm179_vm0, %v1297_v21  ;;  %v1165_v16 = vmul.f32 %v10909_v28, %v1007_v22  ;;  %v1009_v35 = vpop.f32.mrb[69].mxu0  ;;  %v4218_v26 = vpack.c.bf16 %v1909_v33, %v1908_v32 }
 0x262   :  { %v11104_v25 = vpop.permute.xlu0 %8498  ;;  %v8485_v37 = vunpack.i.l.bf16 %v8484_v24  ;;  %v1010_v40 = vpop.f32.mrb[70].mxu0  ;;  %v8486_v41 = vunpack.i.h.bf16 %v8484_v24 }
 0x263   :  { %8773 = vrot.lane.b32.xlu1 %v8752_v1, %s10461_s10  ;;  %v1234_v39 = vadd.f32 %v10912_v31, %v1165_v16  ;;  %v1166_v43 = vmul.f32 %v10909_v28, %v1010_v40  ;;  %v1012_v44 = vpop.f32.mrb[71].mxu0  ;;  %v8491_v1 = vunpack.i.h.bf16 %v11095_v12 }
 0x264   :  { %8788 = vrot.lane.b32.xlu0 %v8787_v20, %s10464_s18  ;;  %v3956_v55 = vsel %vm3955_vm4, %v3891_v51, %v8485_v37  ;;  %v3957_v62 = vsel %vm3955_vm4, %v3892_v54, %v8486_v41  ;;  %v8500_v41 = vunpack.i.l.bf16 %v11104_v25 }
 0x265   :  { %v11116_v46 = vpop.permute.xlu1 %8493  ;;  %v1298_v49 = vmax.f32 %v1234_v39, 0.0  ;;  %v1235_v56 = vadd.f32 %v10912_v31, %v1166_v43  ;;  %v4021_v11 = vsel %vm4020_vm5, %v3956_v55, %v8490_v59  ;;  %v4022_v12 = vsel %vm4020_vm5, %v3957_v62, %v8491_v1 }
 0x266   :  { %v8509_v47 = vpop.permute.xlu0 %8508  ;;  %v8495_v6 = vunpack.i.l.bf16 %v11116_v46  ;;  %v8496_v19 = vunpack.i.h.bf16 %v11116_v46 }
 0x267   :  { %8783 = vrot.lane.b32.xlu1 %v8782_v48, %s10463_s4  ;;  %1363 = vst.msk [vmem:[#allocation2 + $0x288] sm:$0xff] %vm179_vm0, %v1298_v49  ;;  %v1299_v5 = vmax.f32 %v1235_v56, 0.0  ;;  %v8511_v14 = vunpack.i.h.bf16 %v8509_v47  ;;  %v8510_v15 = vunpack.i.l.bf16 %v8509_v47  ;;  %v8501_v47 = vunpack.i.h.bf16 %v11104_v25  ;;  %v1860_v49 = vld [vmem:[#allocation2 + $0x168] sm:$0xff] }
 0x268   :  { %8798 = vrot.lane.b32.xlu0 %v8787_v20, %s10445_s27  ;;  %v1015_v63 = vpop.f32.mrb[72].mxu0  ;;  %v3764_v35 = vsel %vm179_vm0, %v10928_v57, %v8495_v6  ;;  %v3765_v43 = vsel %vm179_vm0, %v10931_v58, %v8496_v19  ;;  %v1733_v58 = vld [vmem:[#allocation2 + $0x169] sm:$0xff] }
 0x269   :  { %v8504_v2 = vpop.permute.xlu1 %8503  ;;  %v1017_v13 = vpop.f32.mrb[73].mxu0  ;;  %1364 = vst.msk [vmem:[#allocation2 + $0x290] sm:$0xff] %vm179_vm0, %v1299_v5  ;;  %v1167_v17 = vmul.f32 %v10909_v28, %v1015_v63  ;;  %v3829_v25 = vsel %vm270_vm2, %v3765_v43, %v8501_v47  ;;  %v11170_v5 = vld [vmem:[#allocation11] ss:$0 sm:$0xff]  ;;  %v1910_v47 = vld [vmem:[#allocation2 + $0x89] sm:$0xff] }
 0x26a   :  { %v11129_v3 = vpop.permute.xlu0 %8518  ;;  %v8506_v7 = vunpack.i.h.bf16 %v8504_v2  ;;  %v8505_v8 = vunpack.i.l.bf16 %v8504_v2  ;;  %v1018_v18 = vpop.f32.mrb[74].mxu0 }
 0x26b   :  { %8793 = vrot.lane.b32.xlu1 %v8782_v48, %s10465_s0  ;;  %v1168_v23 = vmul.f32 %v10909_v28, %v1018_v18  ;;  %v1020_v24 = vpop.f32.mrb[75].mxu0  ;;  %v1236_v34 = vadd.f32 %v10912_v31, %v1167_v17  ;;  %v8520_v55 = vunpack.i.l.bf16 %v11129_v3 }
 0x26c   :  { %8808 = vrot.lane.b32.xlu0 %v8787_v20, %s10461_s10  ;;  %v4086_v21 = vsel %vm4085_vm6, %v4021_v11, %v8505_v8  ;;  %v4087_v22 = vsel %vm4085_vm6, %v4022_v12, %v8506_v7  ;;  %v8802_v20 = vpack.i.bf16 %v1732_v10, %v1731_v9  ;;  %v8521_v8 = vunpack.i.h.bf16 %v11129_v3  ;;  %v1863_v12 = vld [vmem:[#allocation2 + $0x190] sm:$0xff] }
 0x26d   :  { %v8514_v16 = vpop.permute.xlu1 %8513  ;;  %v4151_v29 = vsel %vm4150_vm7, %v4086_v21, %v8510_v15  ;;  %v4152_v30 = vsel %vm4150_vm7, %v4087_v22, %v8511_v14  ;;  %v1300_v39 = vmax.f32 %v1236_v34, 0.0  ;;  %v1237_v40 = vadd.f32 %v10912_v31, %v1168_v23  ;;  %v1862_v15 = vld [vmem:[#allocation2 + $0x188] sm:$0xff] }
 0x26e   :  { %v11142_v27 = vpop.permute.xlu0 %8528  ;;  %v8515_v36 = vunpack.i.l.bf16 %v8514_v16  ;;  %v4215_v37 = vpack.c.bf16 %v4152_v30, %v4151_v29  ;;  %v8516_v44 = vunpack.i.h.bf16 %v8514_v16  ;;  %v3828_v31 = vsel %vm270_vm2, %v3764_v35, %v8500_v41 }
 0x26f   :  { %8803 = vrot.lane.b32.xlu1 %v8802_v20, %s10466_s15  ;;  %1365 = vst.msk [vmem:[#allocation2 + $0x2a8] sm:$0xff] %vm179_vm0, %v1300_v39  ;;  %v1301_v50 = vmax.f32 %v1237_v40, 0.0  ;;  %v8822_v10 = vpack.i.bf16 %v1861_v52, %v1860_v49  ;;  %v8837_v11 = vpack.i.bf16 %v1734_v53, %v1733_v58  ;;  %v8530_v24 = vunpack.i.l.bf16 %v11142_v27 }
 0x270   :  { %8818 = vrot.lane.b32.xlu0 %v8817_v4, %s10463_s4  ;;  %v1023_v46 = vpop.f32.mrb[76].mxu0  ;;  %4480 = vmatmul.mubr.bf16.vlgmr.msra.gmra.mrb[0].mxu1 %v4215_v37  ;;  %v3893_v56 = vsel %vm3890_vm3, %v3828_v31, %v8515_v36  ;;  %v3894_v63 = vsel %vm3890_vm3, %v3829_v25, %v8516_v44  ;;  %v11187_v29 = vpack.i.bf16 %v1863_v12, %v1862_v15  ;;  %v8531_v33 = vunpack.i.h.bf16 %v11142_v27 }
 0x271   :  { %v8524_v57 = vpop.permute.xlu1 %8523  ;;  %v1169_v51 = vmul.f32 %v10909_v28, %v1023_v46  ;;  %8081 = vmatprep.mubr.msk.bf16.mxu1 %vm179_vm0, %v4218_v26  ;;  %v1025_v54 = vpop.f32.mrb[77].mxu0  ;;  %1366 = vst.msk [vmem:[#allocation2 + $0x2b0] sm:$0xff] %vm179_vm0, %v1301_v50  ;;  %v11166_v28 = vld [vmem:[#allocation11 + $0x1] ss:$0 sm:$0xff]  ;;  %v3958_v14 = vsel %vm3955_vm4, %v3893_v56, %v8520_v55  ;;  %v3959_v17 = vsel %vm3955_vm4, %v3894_v63, %v8521_v8  ;;  %v1397_v26 = vld [vmem:[#allocation2 + $0x47] sm:$0xff]  ;;  %v1398_v50 = vld [vmem:[#allocation2 + $0x4f] sm:$0xff] }
 0x272   :  { %v8539_v48 = vpop.permute.xlu0 %8538  ;;  %v1026_v62 = vpop.f32.mrb[78].mxu0  ;;  %v8526_v1 = vunpack.i.h.bf16 %v8524_v57  ;;  %v8525_v2 = vunpack.i.l.bf16 %v8524_v57  ;;  %v1911_v57 = vld [vmem:[#allocation2 + $0x91] sm:$0xff]  ;;  %v3767_v55 = vsel %vm179_vm0, %v1398_v50, %v8531_v33 }
 0x273   :  { %8813 = vrot.lane.b32.xlu1 %v8802_v20, %s10462_s20  ;;  %v1238_v59 = vadd.f32 %v11166_v28, %v1169_v51  ;;  %v1170_v6 = vmul.f32 %v11170_v5, %v1026_v62  ;;  %v1028_v7 = vpop.f32.mrb[79].mxu0  ;;  %v8541_v18 = vunpack.i.h.bf16 %v8539_v48  ;;  %v8540_v19 = vunpack.i.l.bf16 %v8539_v48  ;;  %v1798_v62 = vld [vmem:[#allocation2 + $0x187] sm:$0xff]  ;;  %v1799_v63 = vld [vmem:[#allocation2 + $0x18f] sm:$0xff] }
 0x274   :  { %8828 = vrot.lane.b32.xlu0 %v8817_v4, %s10465_s0  ;;  %v4023_v21 = vsel %vm4020_vm5, %v3958_v14, %v8525_v2  ;;  %v4024_v22 = vsel %vm4020_vm5, %v3959_v17, %v8526_v1  ;;  %v3766_v51 = vsel %vm179_vm0, %v1397_v26, %v8530_v24  ;;  %v1800_v17 = vld [vmem:[#allocation2 + $0x1a7] sm:$0xff]  ;;  %v1400_v50 = vld [vmem:[#allocation2 + $0x6f] sm:$0xff] }
 0x275   :  { %v8534_v9 = vpop.permute.xlu1 %8533  ;;  %v1302_v13 = vmax.f32 %v1238_v59, 0.0  ;;  %v1239_v3 = vadd.f32 %v11166_v28, %v1170_v6  ;;  %v4088_v40 = vsel %vm4085_vm6, %v4023_v21, %v8540_v19  ;;  %v4089_v41 = vsel %vm4085_vm6, %v4024_v22, %v8541_v18  ;;  %v1801_v18 = vld [vmem:[#allocation2 + $0x1af] sm:$0xff] }
 0x276   :  { %v11174_v4 = vpop.permute.xlu0 %8548  ;;  %v8535_v34 = vunpack.i.l.bf16 %v8534_v9  ;;  %v8536_v39 = vunpack.i.h.bf16 %v8534_v9  ;;  %v4220_v6 = vpack.c.bf16 %v1911_v57, %v1910_v47 }
 0x277   :  { %8823 = vrot.lane.b32.xlu1 %v8822_v10, %s10464_s18  ;;  %1367 = vst.msk [vmem:[#allocation2 + $0x2c8] sm:$0xff] %vm179_vm0, %v1302_v13  ;;  %v1303_v30 = vmax.f32 %v1239_v3, 0.0  ;;  %v8550_v31 = vunpack.i.l.bf16 %v11174_v4  ;;  %v8551_v56 = vunpack.i.h.bf16 %v11174_v4  ;;  %v8852_v13 = vpack.i.bf16 %v1799_v63, %v1798_v62 }
 0x278   :  { %8838 = vrot.lane.b32.xlu0 %v8837_v11, %s10466_s15  ;;  %v1031_v23 = vpop.f32.mrb[80].mxu0  ;;  %v3830_v25 = vsel %vm270_vm2, %v3766_v51, %v8535_v34  ;;  %v3831_v1 = vsel %vm270_vm2, %v3767_v55, %v8536_v39  ;;  %v1735_v34 = vld [vmem:[#allocation2 + $0x189] sm:$0xff] }
 0x279   :  { %v8544_v16 = vpop.permute.xlu1 %8543  ;;  %v1171_v32 = vmul.f32 %v11170_v5, %v1031_v23  ;;  %v1033_v37 = vpop.f32.mrb[81].mxu0  ;;  %1368 = vst.msk [vmem:[#allocation2 + $0x2d0] sm:$0xff] %vm179_vm0, %v1303_v30  ;;  %v3895_v9 = vsel %vm3890_vm3, %v3830_v25, %v8550_v31  ;;  %v3896_v15 = vsel %vm3890_vm3, %v3831_v1, %v8551_v56  ;;  %v1399_v56 = vld [vmem:[#allocation2 + $0x67] sm:$0xff] }
 0x27a   :  { %v11185_v20 = vpop.permute.xlu0 %8558  ;;  %v8546_v35 = vunpack.i.h.bf16 %v8544_v16  ;;  %v8545_v36 = vunpack.i.l.bf16 %v8544_v16  ;;  %v1034_v44 = vpop.f32.mrb[82].mxu0 }
 0x27b   :  { %8833 = vrot.lane.b32.xlu1 %v8822_v10, %s10445_s27  ;;  %v1240_v43 = vadd.f32 %v11166_v28, %v1171_v32  ;;  %v1172_v48 = vmul.f32 %v11170_v5, %v1034_v44  ;;  %v1036_v49 = vpop.f32.mrb[83].mxu0  ;;  %v8560_v3 = vunpack.i.l.bf16 %v11185_v20  ;;  %v8561_v24 = vunpack.i.h.bf16 %v11185_v20 }
 0x27c   :  { %8848 = vrot.lane.b32.xlu0 %v8837_v11, %s10462_s20  ;;  %v4153_v27 = vsel %vm4150_vm7, %v4088_v40, %v8545_v36  ;;  %v4154_v46 = vsel %vm4150_vm7, %v4089_v41, %v8546_v35  ;;  %v1736_v35 = vld [vmem:[#allocation2 + $0x191] sm:$0xff]  ;;  %v8887_v36 = vpack.i.bf16 %v1801_v18, %v1800_v17 }
 0x27d   :  { %v8554_v52 = vpop.permute.xlu1 %8553  ;;  %v4217_v53 = vpack.c.bf16 %v4154_v46, %v4153_v27  ;;  %v1304_v54 = vmax.f32 %v1240_v43, 0.0  ;;  %v1241_v7 = vadd.f32 %v11166_v28, %v1172_v48  ;;  %v8872_v47 = vpack.i.bf16 %v1736_v35, %v1735_v34  ;;  %v1865_v18 = vld [vmem:[#allocation2 + $0x1b0] sm:$0xff] }
 0x27e   :  { %v11202_v58 = vpop.permute.xlu0 %8568  ;;  %v8555_v59 = vunpack.i.l.bf16 %v8554_v52  ;;  %v8556_v2 = vunpack.i.h.bf16 %v8554_v52 }
 0x27f   :  { %8843 = vrot.lane.b32.xlu1 %v8822_v10, %s10461_s10  ;;  %1369 = vst.msk [vmem:[#allocation2 + $0x2e8] sm:$0xff] %vm179_vm0, %v1304_v54  ;;  %4488 = vmatmul.mubr.bf16.gmra.mrb[4].mxu1 %v4217_v53  ;;  %v1305_v14 = vmax.f32 %v1241_v7, 0.0  ;;  %v1912_v54 = vld [vmem:[#allocation2 + $0xa9] sm:$0xff] }
 0x280   :  { %8858 = vrot.lane.b32.xlu0 %v11187_v29, %s10464_s18  ;;  %v1039_v8 = vpop.f32.mrb[84].mxu0  ;;  %8082 = vmatprep.mubr.msk.bf16.mxu1 %vm179_vm0, %v4220_v6  ;;  %v3960_v12 = vsel %vm3955_vm4, %v3895_v9, %v8555_v59  ;;  %v3961_v21 = vsel %vm3955_vm4, %v3896_v15, %v8556_v2  ;;  %v8570_v9 = vunpack.i.l.bf16 %v11202_v58 }
 0x281   :  { %v8564_v4 = vpop.permute.xlu1 %8563  ;;  %v1173_v10 = vmul.f32 %v11170_v5, %v1039_v8  ;;  %v1041_v19 = vpop.f32.mrb[85].mxu0  ;;  %1370 = vst.msk [vmem:[#allocation2 + $0x2f0] sm:$0xff] %vm179_vm0, %v1305_v14  ;;  %v4025_v37 = vsel %vm4020_vm5, %v3960_v12, %v8560_v3  ;;  %v4026_v44 = vsel %vm4020_vm5, %v3961_v21, %v8561_v24  ;;  %v8571_v8 = vunpack.i.h.bf16 %v11202_v58  ;;  %v1738_v3 = vld [vmem:[#allocation2 + $0x1b1] sm:$0xff] }
 0x282   :  { %v8579_v11 = vpop.permute.xlu0 %8578  ;;  %v1042_v23 = vpop.f32.mrb[86].mxu0  ;;  %v8566_v40 = vunpack.i.h.bf16 %v8564_v4  ;;  %v8565_v26 = vunpack.i.l.bf16 %v8564_v4  ;;  %v1737_v19 = vld [vmem:[#allocation2 + $0x1a9] sm:$0xff] }
 0x283   :  { %8853 = vrot.lane.b32.xlu1 %v8852_v13, %s10463_s4  ;;  %v1242_v22 = vadd.f32 %v11166_v28, %v1173_v10  ;;  %v1174_v16 = vmul.f32 %v11170_v5, %v1042_v23  ;;  %v1044_v30 = vpop.f32.mrb[87].mxu0  ;;  %v8581_v27 = vunpack.i.h.bf16 %v8579_v11  ;;  %v8580_v20 = vunpack.i.l.bf16 %v8579_v11  ;;  %v1864_v10 = vld [vmem:[#allocation2 + $0x1a8] sm:$0xff] }
 0x284   :  { %8868 = vrot.lane.b32.xlu0 %v11187_v29, %s10445_s27  ;;  %v3769_v59 = vsel %vm179_vm0, %v1400_v50, %v8566_v40  ;;  %v3768_v63 = vsel %vm179_vm0, %v1399_v56, %v8565_v26  ;;  %v8907_v40 = vpack.i.bf16 %v1738_v3, %v1737_v19  ;;  %v1866_v26 = vld [vmem:[#allocation2 + $0x1c8] sm:$0xff] }
 0x285   :  { %v8574_v32 = vpop.permute.xlu1 %8573  ;;  %v1306_v39 = vmax.f32 %v1242_v22, 0.0  ;;  %v1243_v46 = vadd.f32 %v11166_v28, %v1174_v16  ;;  %v3832_v12 = vsel %vm270_vm2, %v3768_v63, %v8570_v9  ;;  %v3833_v17 = vsel %vm270_vm2, %v3769_v59, %v8571_v8  ;;  %v1401_v8 = vld [vmem:[#allocation2 + $0x87] sm:$0xff] }
 0x286   :  { %v11227_v33 = vpop.permute.xlu0 %8588  ;;  %v8576_v41 = vunpack.i.h.bf16 %v8574_v32  ;;  %v8575_v43 = vunpack.i.l.bf16 %v8574_v32 }
 0x287   :  { %8863 = vrot.lane.b32.xlu1 %v8852_v13, %s10465_s0  ;;  %1371 = vst.msk [vmem:[#allocation2 + $0x308] sm:$0xff] %vm179_vm0, %v1306_v39  ;;  %v1307_v55 = vmax.f32 %v1243_v46, 0.0  ;;  %v8591_v24 = vunpack.i.h.bf16 %v11227_v33  ;;  %v8590_v16 = vunpack.i.l.bf16 %v11227_v33  ;;  %v8892_v39 = vpack.i.bf16 %v1865_v18, %v1864_v10  ;;  %v1867_v33 = vld [vmem:[#allocation2 + $0x1d0] sm:$0xff] }
 0x288   :  { %8878 = vrot.lane.b32.xlu0 %v11187_v29, %s10461_s10  ;;  %v4090_v57 = vsel %vm4085_vm6, %v4025_v37, %v8575_v43  ;;  %v4091_v48 = vsel %vm4085_vm6, %v4026_v44, %v8576_v41  ;;  %v1047_v49 = vpop.f32.mrb[88].mxu0  ;;  %v1913_v29 = vld [vmem:[#allocation2 + $0xb1] sm:$0xff] }
 0x289   :  { %v8584_v51 = vpop.permute.xlu1 %8583  ;;  %v4155_v52 = vsel %vm4150_vm7, %v4090_v57, %v8580_v20  ;;  %v4156_v53 = vsel %vm4150_vm7, %v4091_v48, %v8581_v27  ;;  %v1175_v25 = vmul.f32 %v11170_v5, %v1047_v49  ;;  %v1049_v62 = vpop.f32.mrb[89].mxu0  ;;  %1372 = vst.msk [vmem:[#allocation2 + $0x310] sm:$0xff] %vm179_vm0, %v1307_v55  ;;  %v4222_v4 = vpack.c.bf16 %v1913_v29, %v1912_v54 }
 0x28a   :  { %v11238_v31 = vpop.permute.xlu0 %8598  ;;  %v8586_v1 = vunpack.i.h.bf16 %v8584_v51  ;;  %v8585_v2 = vunpack.i.l.bf16 %v8584_v51  ;;  %v4219_v6 = vpack.c.bf16 %v4156_v53, %v4155_v52  ;;  %v1050_v7 = vpop.f32.mrb[90].mxu0  ;;  %v11277_v55 = vpack.i.bf16 %v1867_v33, %v1866_v26  ;;  %v1804_v26 = vld [vmem:[#allocation2 + $0x1e7] sm:$0xff]  ;;  %v1805_v33 = vld [vmem:[#allocation2 + $0x1ef] sm:$0xff] }
 0x28b   :  { %8873 = vrot.lane.b32.xlu1 %v8872_v47, %s10466_s15  ;;  %v1052_v11 = vpop.f32.mrb[91].mxu0  ;;  %v1244_v15 = vadd.f32 %v11166_v28, %v1175_v25  ;;  %v1176_v23 = vmul.f32 %v11170_v5, %v1050_v7  ;;  %v8600_v53 = vunpack.i.l.bf16 %v11238_v31  ;;  %v8601_v56 = vunpack.i.h.bf16 %v11238_v31 }
 0x28c   :  { %8888 = vrot.lane.b32.xlu0 %v8887_v36, %s10463_s4  ;;  %4496 = vmatmul.mubr.bf16.gmra.mrb[8].mxu1 %v4219_v6  ;;  %v3897_v21 = vsel %vm3890_vm3, %v3832_v12, %v8585_v2  ;;  %v3898_v58 = vsel %vm3890_vm3, %v3833_v17, %v8586_v1  ;;  %v1915_v11 = vld [vmem:[#allocation2 + $0xd1] sm:$0xff] }
 0x28d   :  { %v8594_v13 = vpop.permute.xlu1 %8593  ;;  %8083 = vmatprep.mubr.msk.bf16.mxu1 %vm179_vm0, %v4222_v4  ;;  %v1308_v22 = vmax.f32 %v1244_v15, 0.0  ;;  %v1245_v41 = vadd.f32 %v11166_v28, %v1176_v23  ;;  %v3962_v43 = vsel %vm3955_vm4, %v3897_v21, %v8590_v16  ;;  %v3963_v44 = vsel %vm3955_vm4, %v3898_v58, %v8591_v24  ;;  %v1914_v4 = vld [vmem:[#allocation2 + $0xc9] sm:$0xff] }
 0x28e   :  { %v8609_v14 = vpop.permute.xlu0 %8608  ;;  %v8596_v30 = vunpack.i.h.bf16 %v8594_v13  ;;  %v8595_v32 = vunpack.i.l.bf16 %v8594_v13  ;;  %v1402_v13 = vld [vmem:[#allocation2 + $0x8f] sm:$0xff] }
 0x28f   :  { %8883 = vrot.lane.b32.xlu1 %v8872_v47, %s10462_s20  ;;  %1373 = vst.msk [vmem:[#allocation2 + $0x328] sm:$0xff] %vm179_vm0, %v1308_v22  ;;  %v8611_v20 = vunpack.i.h.bf16 %v8609_v14  ;;  %v8610_v46 = vunpack.i.l.bf16 %v8609_v14  ;;  %v1309_v47 = vmax.f32 %v1245_v41, 0.0  ;;  %v3770_v14 = vsel %vm179_vm0, %v1401_v8, %v8600_v53  ;;  %v1802_v22 = vld [vmem:[#allocation2 + $0x1c7] sm:$0xff]  ;;  %v1803_v23 = vld [vmem:[#allocation2 + $0x1cf] sm:$0xff] }
 0x290   :  { %8898 = vrot.lane.b32.xlu0 %v8887_v36, %s10465_s0  ;;  %v1055_v34 = vpop.f32.mrb[92].mxu0  ;;  %v4027_v49 = vsel %vm4020_vm5, %v3962_v43, %v8595_v32  ;;  %v4028_v50 = vsel %vm4020_vm5, %v3963_v44, %v8596_v30  ;;  %v3771_v19 = vsel %vm179_vm0, %v1402_v13, %v8601_v56  ;;  %v4224_v32 = vpack.c.bf16 %v1915_v11, %v1914_v4 }
 0x291   :  { %v8604_v35 = vpop.permute.xlu1 %8603  ;;  %v1177_v36 = vmul.f32 %v11170_v5, %v1055_v34  ;;  %v1057_v27 = vpop.f32.mrb[93].mxu0  ;;  %1374 = vst.msk [vmem:[#allocation2 + $0x330] sm:$0xff] %vm179_vm0, %v1309_v47  ;;  %v4092_v2 = vsel %vm4085_vm6, %v4027_v49, %v8610_v46  ;;  %v4093_v6 = vsel %vm4085_vm6, %v4028_v50, %v8611_v20  ;;  %v8922_v43 = vpack.i.bf16 %v1803_v23, %v1802_v22 }
 0x292   :  { %v11261_v37 = vpop.permute.xlu0 %8618  ;;  %v1058_v48 = vpop.f32.mrb[94].mxu0  ;;  %v8605_v59 = vunpack.i.l.bf16 %v8604_v35  ;;  %v8606_v1 = vunpack.i.h.bf16 %v8604_v35 }
 0x293   :  { %8893 = vrot.lane.b32.xlu1 %v8892_v39, %s10464_s18  ;;  %v1246_v57 = vadd.f32 %v11166_v28, %v1177_v36  ;;  %v1178_v51 = vmul.f32 %v11170_v5, %v1058_v48  ;;  %v1060_v52 = vpop.f32.mrb[95].mxu0  ;;  %v8620_v10 = vunpack.i.l.bf16 %v11261_v37  ;;  %v8621_v21 = vunpack.i.h.bf16 %v11261_v37 }
 0x294   :  { %8908 = vrot.lane.b32.xlu0 %v8907_v40, %s10466_s15  ;;  %v3834_v3 = vsel %vm270_vm2, %v3770_v14, %v8605_v59  ;;  %v3835_v16 = vsel %vm270_vm2, %v3771_v19, %v8606_v1 }
 0x295   :  { %v8614_v54 = vpop.permute.xlu1 %8613  ;;  %v1310_v25 = vmax.f32 %v1246_v57, 0.0  ;;  %v1247_v7 = vadd.f32 %v11166_v28, %v1178_v51  ;;  %v8957_v51 = vpack.i.bf16 %v1805_v33, %v1804_v26 }
 0x296   :  { %v11275_v29 = vpop.permute.xlu0 %8628  ;;  %v8616_v62 = vunpack.i.h.bf16 %v8614_v54  ;;  %v8615_v63 = vunpack.i.l.bf16 %v8614_v54 }
 0x297   :  { %8903 = vrot.lane.b32.xlu1 %v8892_v39, %s10445_s27  ;;  %1375 = vst.msk [vmem:[#allocation2 + $0x348] sm:$0xff] %vm179_vm0, %v1310_v25  ;;  %v1311_v18 = vmax.f32 %v1247_v7, 0.0  ;;  %v8630_v20 = vunpack.i.l.bf16 %v11275_v29  ;;  %v8631_v48 = vunpack.i.h.bf16 %v11275_v29 }
 0x298   :  { %8918 = vrot.lane.b32.xlu0 %v8907_v40, %s10462_s20  ;;  %v4157_v9 = vsel %vm4150_vm7, %v4092_v2, %v8615_v63  ;;  %v4158_v31 = vsel %vm4150_vm7, %v4093_v6, %v8616_v62  ;;  %v1063_v24 = vpop.f32.mrb[96].mxu0  ;;  %v3899_v40 = vsel %vm3890_vm3, %v3834_v3, %v8620_v10  ;;  %v1739_v62 = vld [vmem:[#allocation2 + $0x1c9] sm:$0xff]  ;;  %v1740_v63 = vld [vmem:[#allocation2 + $0x1d1] sm:$0xff] }
 0x299   :  { %v8624_v15 = vpop.permute.xlu1 %8623  ;;  %v4221_v17 = vpack.c.bf16 %v4158_v31, %v4157_v9  ;;  %1376 = vst.msk [vmem:[#allocation2 + $0x350] sm:$0xff] %vm179_vm0, %v1311_v18  ;;  %v1179_v34 = vmul.f32 %v11170_v5, %v1063_v24  ;;  %v1065_v35 = vpop.f32.mrb[97].mxu0  ;;  %v1404_v31 = vld [vmem:[#allocation2 + $0xaf] sm:$0xff]  ;;  %v8942_v13 = vpack.i.bf16 %v1740_v63, %v1739_v62 }
 0x29a   :  { %v11291_v12 = vpop.permute.xlu0 %8638  ;;  %v8625_v58 = vunpack.i.l.bf16 %v8624_v15  ;;  %v8626_v30 = vunpack.i.h.bf16 %v8624_v15  ;;  %v1066_v37 = vpop.f32.mrb[98].mxu0  ;;  %v1916_v15 = vld [vmem:[#allocation2 + $0xe9] sm:$0xff] }
 0x29b   :  { %8913 = vrot.lane.b32.xlu1 %v8892_v39, %s10461_s10  ;;  %4504 = vmatmul.mubr.bf16.gmra.mrb[12].mxu1 %v4221_v17  ;;  %v3900_v39 = vsel %vm3890_vm3, %v3835_v16, %v8621_v21  ;;  %v1068_v27 = vpop.f32.mrb[99].mxu0  ;;  %v1248_v47 = vadd.f32 %v11166_v28, %v1179_v34  ;;  %v1180_v57 = vmul.f32 %v11170_v5, %v1066_v37  ;;  %v1917_v17 = vld [vmem:[#allocation2 + $0xf1] sm:$0xff]  ;;  %v8641_v22 = vunpack.i.h.bf16 %v11291_v12 }
 0x29c   :  { %8928 = vrot.lane.b32.xlu0 %v11277_v55, %s10464_s18  ;;  %8084 = vmatprep.mubr.msk.bf16.mxu1 %vm179_vm0, %v4224_v32  ;;  %v3964_v44 = vsel %vm3955_vm4, %v3899_v40, %v8625_v58  ;;  %v3965_v46 = vsel %vm3955_vm4, %v3900_v39, %v8626_v30  ;;  %v8640_v23 = vunpack.i.l.bf16 %v11291_v12  ;;  %v4226_v24 = vpack.c.bf16 %v1917_v17, %v1916_v15  ;;  %v1868_v32 = vld [vmem:[#allocation2 + $0x1e8] sm:$0xff]  ;;  %v1869_v37 = vld [vmem:[#allocation2 + $0x1f0] sm:$0xff] }
 0x29d   :  { %v8634_v41 = vpop.permute.xlu1 %8633  ;;  %v4029_v52 = vsel %vm4020_vm5, %v3964_v44, %v8630_v20  ;;  %v1312_v53 = vmax.f32 %v1248_v47, 0.0  ;;  %v1249_v54 = vadd.f32 %v11166_v28, %v1180_v57  ;;  %v4030_v1 = vsel %vm4020_vm5, %v3965_v46, %v8631_v48  ;;  %v1741_v40 = vld [vmem:[#allocation2 + $0x1e9] sm:$0xff] }
 0x29e   :  { %v8649_v36 = vpop.permute.xlu0 %8648  ;;  %v8636_v25 = vunpack.i.h.bf16 %v8634_v41  ;;  %v8635_v2 = vunpack.i.l.bf16 %v8634_v41  ;;  %v1742_v41 = vld [vmem:[#allocation2 + $0x1f1] sm:$0xff]  ;;  %v8962_v48 = vpack.i.bf16 %v1869_v37, %v1868_v32 }
 0x29f   :  { %8923 = vrot.lane.b32.xlu1 %v8922_v43, %s10463_s4  ;;  %v8651_v6 = vunpack.i.h.bf16 %v8649_v36  ;;  %v8650_v7 = vunpack.i.l.bf16 %v8649_v36  ;;  %1377 = vst.msk [vmem:[#allocation2 + $0x368] sm:$0xff] %vm179_vm0, %v1312_v53  ;;  %v1313_v29 = vmax.f32 %v1249_v54, 0.0  ;;  %v1807_v37 = vld [vmem:[#allocation2 + $0x20f] sm:$0xff] }
 0x2a0   :  { %8938 = vrot.lane.b32.xlu0 %v11277_v55, %s10445_s27  ;;  %v3773_v18 = vsel %vm179_vm0, %v1404_v31, %v8636_v25  ;;  %v1071_v36 = vpop.f32.mrb[100].mxu0 }
 0x2a1   :  { %v8644_v49 = vpop.permute.xlu1 %8643  ;;  %1378 = vst.msk [vmem:[#allocation2 + $0x370] sm:$0xff] %vm179_vm0, %v1313_v29  ;;  %v3837_v35 = vsel %vm270_vm2, %v3773_v18, %v8641_v22  ;;  %v1181_v12 = vmul.f32 %v11170_v5, %v1071_v36  ;;  %v1073_v44 = vpop.f32.mrb[101].mxu0  ;;  %v1919_v18 = vld [vmem:[#allocation2 + $0x111] sm:$0xff] }
 0x2a2   :  { %v11314_v50 = vpop.permute.xlu0 %8658  ;;  %v8646_v56 = vunpack.i.h.bf16 %v8644_v49  ;;  %v8645_v59 = vunpack.i.l.bf16 %v8644_v49  ;;  %v1074_v46 = vpop.f32.mrb[102].mxu0  ;;  %v8977_v49 = vpack.i.bf16 %v1742_v41, %v1741_v40 }
 0x2a3   :  { %8933 = vrot.lane.b32.xlu1 %v8922_v43, %s10465_s0  ;;  %v8661_v26 = vunpack.i.h.bf16 %v11314_v50  ;;  %v8660_v33 = vunpack.i.l.bf16 %v11314_v50  ;;  %v1182_v53 = vmul.f32 %v11170_v5, %v1074_v46  ;;  %v1076_v25 = vpop.f32.mrb[103].mxu0 }
 0x2a4   :  { %8948 = vrot.lane.b32.xlu0 %v11277_v55, %s10461_s10  ;;  %v4094_v8 = vsel %vm4085_vm6, %v4029_v52, %v8645_v59  ;;  %v4095_v9 = vsel %vm4085_vm6, %v4030_v1, %v8646_v56  ;;  %v1403_v55 = vld [vmem:[#allocation2 + $0xa7] sm:$0xff]  ;;  %v1250_v52 = vadd.f32 %v11166_v28, %v1181_v12  ;;  %v1618_v12 = vld [vmem:[#allocation2 + $0x26f] sm:$0xff] }
 0x2a5   :  { %v8654_v4 = vpop.permute.xlu1 %8653  ;;  %v4159_v14 = vsel %vm4150_vm7, %v4094_v8, %v8650_v7  ;;  %v4160_v10 = vsel %vm4150_vm7, %v4095_v9, %v8651_v6  ;;  %v3772_v19 = vsel %vm179_vm0, %v1403_v55, %v8635_v2  ;;  %v1251_v62 = vadd.f32 %v11166_v28, %v1182_v53  ;;  %v1870_v2 = vld [vmem:[#allocation2 + $0x208] sm:$0xff]  ;;  %v1871_v6 = vld [vmem:[#allocation2 + $0x210] sm:$0xff] }
 0x2a6   :  { %v11325_v11 = vpop.permute.xlu0 %8668  ;;  %v8656_v3 = vunpack.i.h.bf16 %v8654_v4  ;;  %v8655_v21 = vunpack.i.l.bf16 %v8654_v4  ;;  %v4223_v58 = vpack.c.bf16 %v4160_v10, %v4159_v14  ;;  %v3836_v34 = vsel %vm270_vm2, %v3772_v19, %v8640_v23  ;;  %v1918_v55 = vld [vmem:[#allocation2 + $0x109] sm:$0xff] }
 0x2a7   :  { %8943 = vrot.lane.b32.xlu1 %v8942_v13, %s10466_s15  ;;  %v1314_v50 = vmax.f32 %v1250_v52, 0.0  ;;  %v1315_v8 = vmax.f32 %v1251_v62, 0.0  ;;  %v8671_v9 = vunpack.i.h.bf16 %v11325_v11  ;;  %v8670_v31 = vunpack.i.l.bf16 %v11325_v11 }
 0x2a8   :  { %8958 = vrot.lane.b32.xlu0 %v8957_v51, %s10463_s4  ;;  %4512 = vmatmul.mubr.bf16.gmra.mrb[16].mxu1 %v4223_v58  ;;  %v3901_v43 = vsel %vm3890_vm3, %v3836_v34, %v8655_v21  ;;  %v3902_v39 = vsel %vm3890_vm3, %v3837_v35, %v8656_v3  ;;  %v8997_v10 = vpack.i.bf16 %v1871_v6, %v1870_v2  ;;  %v1405_v21 = vld [vmem:[#allocation2 + $0xc7] sm:$0xff]  ;;  %v1406_v58 = vld [vmem:[#allocation2 + $0xcf] sm:$0xff]  ;;  %v1079_v40 = vpop.f32.mrb[104].mxu0 }
 0x2a9   :  { %v8664_v16 = vpop.permute.xlu1 %8663  ;;  %8085 = vmatprep.mubr.msk.bf16.mxu1 %vm179_vm0, %v4226_v24  ;;  %v3967_v54 = vsel %vm3955_vm4, %v3902_v39, %v8661_v26  ;;  %1379 = vst.msk [vmem:[#allocation2 + $0x388] sm:$0xff] %vm179_vm0, %v1314_v50  ;;  %1380 = vst.msk [vmem:[#allocation2 + $0x390] sm:$0xff] %vm179_vm0, %v1315_v8  ;;  %v4228_v34 = vpack.c.bf16 %v1919_v18, %v1918_v55  ;;  %v1806_v35 = vld [vmem:[#allocation2 + $0x207] sm:$0xff]  ;;  %v1183_v44 = vmul.f32 %v11170_v5, %v1079_v40  ;;  %v1081_v26 = vpop.f32.mrb[105].mxu0  ;;  %v1682_v40 = vld [vmem:[#allocation2 + $0x270] sm:$0xff] }
 0x2aa   :  { %v8679_v30 = vpop.permute.xlu0 %8678  ;;  %v8666_v27 = vunpack.i.h.bf16 %v8664_v16  ;;  %v8665_v20 = vunpack.i.l.bf16 %v8664_v16  ;;  %v3775_v16 = vsel %vm179_vm0, %v1406_v58, %v8671_v9  ;;  %v1617_v39 = vld [vmem:[#allocation2 + $0x267] sm:$0xff] }
 0x2ab   :  { %8953 = vrot.lane.b32.xlu1 %v8942_v13, %s10462_s20  ;;  %v8681_v56 = vunpack.i.h.bf16 %v8679_v30  ;;  %v8680_v59 = vunpack.i.l.bf16 %v8679_v30  ;;  %v3774_v30 = vsel %vm179_vm0, %v1405_v21, %v8670_v31  ;;  %v9017_v53 = vpack.i.bf16 %v1618_v12, %v1617_v39 }
 0x2ac   :  { %8968 = vrot.lane.b32.xlu0 %v8957_v51, %s10465_s0  ;;  %v3966_v51 = vsel %vm3955_vm4, %v3901_v43, %v8660_v33  ;;  %v4032_v1 = vsel %vm4020_vm5, %v3967_v54, %v8666_v27  ;;  %v1746_v54 = vld [vmem:[#allocation2 + $0x271] sm:$0xff] }
 0x2ad   :  { %v8674_v47 = vpop.permute.xlu1 %8673  ;;  %v4031_v63 = vsel %vm4020_vm5, %v3966_v51, %v8665_v20  ;;  %v4097_v17 = vsel %vm4085_vm6, %v4032_v1, %v8681_v56  ;;  %v1082_v20 = vpop.f32.mrb[106].mxu0  ;;  %v1745_v51 = vld [vmem:[#allocation2 + $0x269] sm:$0xff] }
 0x2ae   :  { %v11346_v57 = vpop.permute.xlu0 %8688  ;;  %v8675_v14 = vunpack.i.l.bf16 %v8674_v47  ;;  %v4096_v15 = vsel %vm4085_vm6, %v4031_v63, %v8680_v59  ;;  %v8676_v19 = vunpack.i.h.bf16 %v8674_v47  ;;  %v1084_v25 = vpop.f32.mrb[107].mxu0  ;;  %v9027_v8 = vpack.i.bf16 %v1746_v54, %v1745_v51 }
 0x2af   :  { %8963 = vrot.lane.b32.xlu1 %v8962_v48, %s10464_s18  ;;  %v8690_v32 = vunpack.i.l.bf16 %v11346_v57  ;;  %v8691_v36 = vunpack.i.h.bf16 %v11346_v57  ;;  %v8992_v57 = vpack.i.bf16 %v1807_v37, %v1806_v35  ;;  %v1681_v37 = vld [vmem:[#allocation2 + $0x268] sm:$0xff] }
 0x2b0   :  { %8978 = vrot.lane.b32.xlu0 %v8977_v49, %s10466_s15  ;;  %v3838_v41 = vsel %vm270_vm2, %v3774_v30, %v8675_v14  ;;  %v3839_v33 = vsel %vm270_vm2, %v3775_v16, %v8676_v19  ;;  %v1743_v14 = vld [vmem:[#allocation2 + $0x209] sm:$0xff]  ;;  %v1087_v51 = vpop.f32.mrb[108].mxu0 }
 0x2b1   :  { %v8684_v7 = vpop.permute.xlu1 %8683  ;;  %v3903_v52 = vsel %vm3890_vm3, %v3838_v41, %v8690_v32  ;;  %v3904_v56 = vsel %vm3890_vm3, %v3839_v33, %v8691_v36  ;;  %v1920_v30 = vld [vmem:[#allocation2 + $0x129] sm:$0xff]  ;;  %v1921_v32 = vld [vmem:[#allocation2 + $0x131] sm:$0xff] }
 0x2b2   :  { %v11357_v29 = vpop.permute.xlu0 %8698  ;;  %v8686_v4 = vunpack.i.h.bf16 %v8684_v7  ;;  %v8685_v13 = vunpack.i.l.bf16 %v8684_v7  ;;  %v4230_v26 = vpack.c.bf16 %v1921_v32, %v1920_v30  ;;  %v1874_v33 = vld [vmem:[#allocation2 + $0x288] sm:$0xff] }
 0x2b3   :  { %8973 = vrot.lane.b32.xlu1 %v8962_v48, %s10445_s27  ;;  %v8700_v63 = vunpack.i.l.bf16 %v11357_v29  ;;  %v8701_v2 = vunpack.i.h.bf16 %v11357_v29 }
 0x2b4   :  { %8988 = vrot.lane.b32.xlu0 %v8977_v49, %s10462_s20  ;;  %v4161_v3 = vsel %vm4150_vm7, %v4096_v15, %v8685_v13  ;;  %v4162_v11 = vsel %vm4150_vm7, %v4097_v17, %v8686_v4  ;;  %v1252_v49 = vadd.f32 %v11166_v28, %v1183_v44 }
 0x2b5   :  { %v8694_v22 = vpop.permute.xlu1 %8693  ;;  %v4225_v24 = vpack.c.bf16 %v4162_v11, %v4161_v3  ;;  %v1408_v11 = vld [vmem:[#allocation2 + $0xef] sm:$0xff] }
 0x2b6   :  { %v11369_v23 = vpop.permute.xlu0 %8708  ;;  %v8695_v43 = vunpack.i.l.bf16 %v8694_v22  ;;  %v8696_v27 = vunpack.i.h.bf16 %v8694_v22  ;;  %v1316_v50 = vmax.f32 %v1252_v49, 0.0 }
 0x2b7   :  { %8983 = vrot.lane.b32.xlu1 %v8962_v48, %s10461_s10  ;;  %4520 = vmatmul.mubr.bf16.gmra.mrb[20].mxu1 %v4225_v24  ;;  %v1184_v48 = vmul.f32 %v11170_v5, %v1082_v20  ;;  %v8711_v12 = vunpack.i.h.bf16 %v11369_v23  ;;  %v8710_v44 = vunpack.i.l.bf16 %v11369_v23 }
 0x2b8   :  { %8998 = vrot.lane.b32.xlu0 %v8997_v10, %s10464_s18  ;;  %8086 = vmatprep.mubr.msk.bf16.mxu1 %vm179_vm0, %v4228_v34  ;;  %v3968_v59 = vsel %vm3955_vm4, %v3903_v52, %v8695_v43  ;;  %v3969_v1 = vsel %vm3955_vm4, %v3904_v56, %v8696_v27  ;;  %1381 = vst.msk [vmem:[#allocation2 + $0x3a8] sm:$0xff] %vm179_vm0, %v1316_v50  ;;  %v1407_v34 = vld [vmem:[#allocation2 + $0xe7] sm:$0xff]  ;;  %v1875_v27 = vld [vmem:[#allocation2 + $0x290] sm:$0xff]  ;;  %v1089_v50 = vpop.f32.mrb[109].mxu0 }
 0x2b9   :  { %v8704_v46 = vpop.permute.xlu1 %8703  ;;  %v1253_v62 = vadd.f32 %v11166_v28, %v1184_v48  ;;  %v4033_v15 = vsel %vm4020_vm5, %v3968_v59, %v8700_v63  ;;  %v4034_v29 = vsel %vm4020_vm5, %v3969_v1, %v8701_v2  ;;  %v11420_v23 = vpack.i.bf16 %v1875_v27, %v1874_v33 }
 0x2ba   :  { %v8719_v47 = vpop.permute.xlu0 %8718  ;;  %v8706_v31 = vunpack.i.h.bf16 %v8704_v46  ;;  %v8705_v17 = vunpack.i.l.bf16 %v8704_v46  ;;  %v1185_v59 = vmul.f32 %v11170_v5, %v1087_v51 }
 0x2bb   :  { %8993 = vrot.lane.b32.xlu1 %v8992_v57, %s10463_s4  ;;  %v1317_v9 = vmax.f32 %v1253_v62, 0.0  ;;  %v8721_v55 = vunpack.i.h.bf16 %v8719_v47  ;;  %v8720_v18 = vunpack.i.l.bf16 %v8719_v47  ;;  %v9022_v47 = vpack.i.bf16 %v1682_v40, %v1681_v37 }
 0x2bc   :  { %9008 = vrot.lane.b32.xlu0 %v8997_v10, %s10445_s27  ;;  %v1744_v10 = vld [vmem:[#allocation2 + $0x211] sm:$0xff]  ;;  %v3777_v35 = vsel %vm179_vm0, %v1408_v11, %v8706_v31  ;;  %v3776_v41 = vsel %vm179_vm0, %v1407_v34, %v8705_v17 }
 0x2bd   :  { %v8714_v6 = vpop.permute.xlu1 %8713  ;;  %1382 = vst.msk [vmem:[#allocation2 + $0x3b0] sm:$0xff] %vm179_vm0, %v1317_v9  ;;  %v9012_v22 = vpack.i.bf16 %v1744_v10, %v1743_v14  ;;  %v3841_v49 = vsel %vm270_vm2, %v3777_v35, %v8711_v12  ;;  %v1090_v9 = vpop.f32.mrb[110].mxu0  ;;  %v1813_v34 = vld [vmem:[#allocation2 + $0x2af] sm:$0xff] }
 0x2be   :  { %v11392_v7 = vpop.permute.xlu0 %8728  ;;  %v8716_v4 = vunpack.i.h.bf16 %v8714_v6  ;;  %v8715_v13 = vunpack.i.l.bf16 %v8714_v6  ;;  %v1810_v6 = vld [vmem:[#allocation2 + $0x287] sm:$0xff]  ;;  %v1092_v14 = vpop.f32.mrb[111].mxu0 }
 0x2bf   :  { %9003 = vrot.lane.b32.xlu1 %v8992_v57, %s10465_s0  ;;  %v3840_v57 = vsel %vm270_vm2, %v3776_v41, %v8710_v44  ;;  %v8731_v48 = vunpack.i.h.bf16 %v11392_v7  ;;  %v8730_v54 = vunpack.i.l.bf16 %v11392_v7  ;;  %v1254_v7 = vadd.f32 %v11166_v28, %v1185_v59  ;;  %v1409_v41 = vld [vmem:[#allocation2 + $0x107] sm:$0xff] }
 0x2c0   :  { %9018 = vrot.lane.b32.xlu0 %v9017_v53, %s10465_s0  ;;  %v4098_v19 = vsel %vm4085_vm6, %v4033_v15, %v8715_v13  ;;  %v4099_v3 = vsel %vm4085_vm6, %v4034_v29, %v8716_v4  ;;  %v1186_v13 = vmul.f32 %v11170_v5, %v1090_v9  ;;  %v1923_v5 = vld [vmem:[#allocation2 + $0x151] sm:$0xff] }
 0x2c1   :  { %v8724_v21 = vpop.permute.xlu1 %8723  ;;  %v4163_v24 = vsel %vm4150_vm7, %v4098_v19, %v8720_v18  ;;  %v4164_v16 = vsel %vm4150_vm7, %v4099_v3, %v8721_v55  ;;  %v1318_v29 = vmax.f32 %v1254_v7, 0.0 }
 0x2c2   :  { %v11402_v58 = vpop.permute.xlu0 %8738  ;;  %v8726_v36 = vunpack.i.h.bf16 %v8724_v21  ;;  %v8725_v43 = vunpack.i.l.bf16 %v8724_v21  ;;  %v4227_v39 = vpack.c.bf16 %v4164_v16, %v4163_v24  ;;  %v1255_v19 = vadd.f32 %v11166_v28, %v1186_v13  ;;  %v1922_v24 = vld [vmem:[#allocation2 + $0x149] sm:$0xff] }
 0x2c3   :  { %9013 = vrot.lane.b32.xlu1 %v9012_v22, %s10466_s15  ;;  %v8741_v3 = vunpack.i.h.bf16 %v11402_v58  ;;  %v8740_v11 = vunpack.i.l.bf16 %v11402_v58  ;;  %v1812_v28 = vld [vmem:[#allocation2 + $0x2a7] sm:$0xff]  ;;  %1383 = vst.msk [vmem:[#allocation2 + $0x3c8] sm:$0xff] %vm179_vm0, %v1318_v29  ;;  %v4232_v44 = vpack.c.bf16 %v1923_v5, %v1922_v24  ;;  %v1750_v24 = vld [vmem:[#allocation2 + $0x2b1] sm:$0xff] }
 0x2c4   :  { %9028 = vrot.lane.b32.xlu0 %v9027_v8, %s10466_s15  ;;  %4528 = vmatmul.mubr.bf16.gmra.mrb[24].mxu1 %v4227_v39  ;;  %v3905_v52 = vsel %vm3890_vm3, %v3840_v57, %v8725_v43  ;;  %v3906_v53 = vsel %vm3890_vm3, %v3841_v49, %v8726_v36  ;;  %v1319_v58 = vmax.f32 %v1255_v19, 0.0  ;;  %v1410_v36 = vld [vmem:[#allocation2 + $0x10f] sm:$0xff]  ;;  %v1095_v57 = vpop.f32.mrb[112].mxu0 }
 0x2c5   :  { %v8734_v20 = vpop.permute.xlu1 %8733  ;;  %8087 = vmatprep.mubr.msk.bf16.mxu1 %vm179_vm0, %v4230_v26  ;;  %v3970_v1 = vsel %vm3955_vm4, %v3905_v52, %v8730_v54  ;;  %v3971_v2 = vsel %vm3955_vm4, %v3906_v53, %v8731_v48  ;;  %v3779_v26 = vsel %vm179_vm0, %v1410_v36, %v8741_v3  ;;  %v3778_v33 = vsel %vm179_vm0, %v1409_v41, %v8740_v11  ;;  %v11463_v53 = vld [vmem:[#allocation11] ss:$0 sm:$0xff]  ;;  %v1097_v54 = vpop.f32.mrb[113].mxu0 }
 0x2c6   :  { %v8749_v46 = vpop.permute.xlu0 %8748  ;;  %v8736_v25 = vunpack.i.h.bf16 %v8734_v20  ;;  %v8735_v56 = vunpack.i.l.bf16 %v8734_v20  ;;  %1384 = vst.msk [vmem:[#allocation2 + $0x3d0] sm:$0xff] %vm179_vm0, %v1319_v58  ;;  %v1747_v20 = vld [vmem:[#allocation2 + $0x289] sm:$0xff]  ;;  %v1187_v51 = vmul.f32 %v11463_v53, %v1095_v57  ;;  %v1098_v59 = vpop.f32.mrb[114].mxu0 }
 0x2c7   :  { %9023 = vrot.lane.b32.xlu1 %v9022_v47, %s10445_s27  ;;  %v8751_v31 = vunpack.i.h.bf16 %v8749_v46  ;;  %v8750_v4 = vunpack.i.l.bf16 %v8749_v46  ;;  %v1748_v46 = vld [vmem:[#allocation2 + $0x291] sm:$0xff] }
 0x2c8   :  { %9038 = vrot.lane.b32.xlu0 %v9027_v8, %s10462_s20  ;;  %v1811_v8 = vld [vmem:[#allocation2 + $0x28f] sm:$0xff]  ;;  %v4035_v10 = vsel %vm4020_vm5, %v3970_v1, %v8735_v56  ;;  %v4036_v15 = vsel %vm4020_vm5, %v3971_v2, %v8736_v25  ;;  %v11468_v1 = vld [vmem:[#allocation11 + $0x1] ss:$0 sm:$0xff] }
 0x2c9   :  { %v11424_v62 = vpop.permute.xlu1 %8743  ;;  %v9042_v18 = vpack.i.bf16 %v1811_v8, %v1810_v6  ;;  %v4100_v30 = vsel %vm4085_vm6, %v4035_v10, %v8750_v4  ;;  %v4101_v32 = vsel %vm4085_vm6, %v4036_v15, %v8751_v31  ;;  %v1256_v2 = vadd.f32 %v11468_v1, %v1187_v51  ;;  %v1100_v8 = vpop.f32.mrb[115].mxu0  ;;  %v1412_v58 = vld [vmem:[#allocation2 + $0x12f] sm:$0xff] }
 0x2ca   :  { %v11426_v63 = vpop.permute.xlu0 %8758  ;;  %v8745_v16 = vunpack.i.l.bf16 %v11424_v62  ;;  %v8746_v35 = vunpack.i.h.bf16 %v11424_v62  ;;  %v1879_v51 = vld [vmem:[#allocation2 + $0x2d0] sm:$0xff] }
 0x2cb   :  { %9033 = vrot.lane.b32.xlu1 %v9022_v47, %s10461_s10  ;;  %v8760_v27 = vunpack.i.l.bf16 %v11426_v63  ;;  %v9077_v47 = vpack.i.bf16 %v1813_v34, %v1812_v28  ;;  %v8761_v48 = vunpack.i.h.bf16 %v11426_v63  ;;  %v9062_v63 = vpack.i.bf16 %v1748_v46, %v1747_v20 }
 0x2cc   :  { %9048 = vrot.lane.b32.xlu0 %v11420_v23, %s10464_s18  ;;  %v3842_v49 = vsel %vm270_vm2, %v3778_v33, %v8745_v16  ;;  %v3843_v25 = vsel %vm270_vm2, %v3779_v26, %v8746_v35  ;;  %v1320_v4 = vmax.f32 %v1256_v2, 0.0  ;;  %v1411_v26 = vld [vmem:[#allocation2 + $0x127] sm:$0xff] }
 0x2cd   :  { %v8754_v17 = vpop.permute.xlu1 %8753  ;;  %v3907_v6 = vsel %vm3890_vm3, %v3842_v49, %v8760_v27  ;;  %v3908_v9 = vsel %vm3890_vm3, %v3843_v25, %v8761_v48 }
 0x2ce   :  { %v11437_v55 = vpop.permute.xlu0 %8768  ;;  %v8756_v21 = vunpack.i.h.bf16 %v8754_v17  ;;  %v8755_v22 = vunpack.i.l.bf16 %v8754_v17  ;;  %1385 = vst.msk [vmem:[#allocation2 + $0x3e8] sm:$0xff] %vm179_vm0, %v1320_v4 }
 0x2cf   :  { %9043 = vrot.lane.b32.xlu1 %v9042_v18, %s10463_s4  ;;  %v8770_v13 = vunpack.i.l.bf16 %v11437_v55  ;;  %v8771_v10 = vunpack.i.h.bf16 %v11437_v55 }
 0x2d0   :  { %9058 = vrot.lane.b32.xlu0 %v11420_v23, %s10445_s27  ;;  %v4165_v37 = vsel %vm4150_vm7, %v4100_v30, %v8755_v22  ;;  %v4166_v40 = vsel %vm4150_vm7, %v4101_v32, %v8756_v21  ;;  %v1877_v21 = vld [vmem:[#allocation2 + $0x2b0] sm:$0xff] }
 0x2d1   :  { %v8764_v43 = vpop.permute.xlu1 %8763  ;;  %v4229_v12 = vpack.c.bf16 %v4166_v40, %v4165_v37  ;;  %v1749_v22 = vld [vmem:[#allocation2 + $0x2a9] sm:$0xff] }
 0x2d2   :  { %v11452_v39 = vpop.permute.xlu0 %8778  ;;  %v8765_v52 = vunpack.i.l.bf16 %v8764_v43  ;;  %v8766_v56 = vunpack.i.h.bf16 %v8764_v43  ;;  %v9097_v41 = vpack.i.bf16 %v1750_v24, %v1749_v22 }
 0x2d3   :  { %9053 = vrot.lane.b32.xlu1 %v9042_v18, %s10465_s0  ;;  %4536 = vmatmul.mubr.bf16.gmra.mrb[28].mxu1 %v4229_v12  ;;  %v1876_v18 = vld [vmem:[#allocation2 + $0x2a8] sm:$0xff]  ;;  %v8781_v57 = vunpack.i.h.bf16 %v11452_v39  ;;  %v8780_v49 = vunpack.i.l.bf16 %v11452_v39 }
 0x2d4   :  { %9068 = vrot.lane.b32.xlu0 %v11420_v23, %s10461_s10  ;;  %8088 = vmatprep.mubr.msk.bf16.mxu1 %vm179_vm0, %v4232_v44  ;;  %v1188_v23 = vmul.f32 %v11463_v53, %v1098_v59  ;;  %v3972_v31 = vsel %vm3955_vm4, %v3907_v6, %v8765_v52  ;;  %v3973_v14 = vsel %vm3955_vm4, %v3908_v9, %v8766_v56  ;;  %v1924_v12 = vld [vmem:[#allocation2 + $0x169] sm:$0xff]  ;;  %v1925_v44 = vld [vmem:[#allocation2 + $0x171] sm:$0xff] }
 0x2d5   :  { %v8774_v50 = vpop.permute.xlu1 %8773  ;;  %v4037_v5 = vsel %vm4020_vm5, %v3972_v31, %v8770_v13  ;;  %v4038_v55 = vsel %vm4020_vm5, %v3973_v14, %v8771_v10  ;;  %v9082_v40 = vpack.i.bf16 %v1877_v21, %v1876_v18  ;;  %v4234_v48 = vpack.c.bf16 %v1925_v44, %v1924_v12  ;;  %v1878_v52 = vld [vmem:[#allocation2 + $0x2c8] sm:$0xff] }
 0x2d6   :  { %v8789_v62 = vpop.permute.xlu0 %8788  ;;  %v1257_v7 = vadd.f32 %v11468_v1, %v1188_v23  ;;  %v8776_v19 = vunpack.i.h.bf16 %v8774_v50  ;;  %v8775_v16 = vunpack.i.l.bf16 %v8774_v50  ;;  %v1103_v50 = vpop.f32.mrb[116].mxu0  ;;  %v11511_v2 = vpack.i.bf16 %v1879_v51, %v1878_v52  ;;  %v1814_v18 = vld [vmem:[#allocation2 + $0x2c7] sm:$0xff]  ;;  %v1817_v12 = vld [vmem:[#allocation2 + $0x2ef] sm:$0xff] }
 0x2d7   :  { %9063 = vrot.lane.b32.xlu1 %v9062_v63, %s10466_s15  ;;  %v8791_v30 = vunpack.i.h.bf16 %v8789_v62  ;;  %v8790_v32 = vunpack.i.l.bf16 %v8789_v62  ;;  %v1105_v23 = vpop.f32.mrb[117].mxu0  ;;  %v1189_v31 = vmul.f32 %v11463_v53, %v1103_v50 }
 0x2d8   :  { %9078 = vrot.lane.b32.xlu0 %v9077_v47, %s10463_s4  ;;  %v1321_v29 = vmax.f32 %v1257_v7, 0.0  ;;  %v3781_v33 = vsel %vm179_vm0, %v1412_v58, %v8776_v19  ;;  %v3780_v27 = vsel %vm179_vm0, %v1411_v26, %v8775_v16  ;;  %v1106_v4 = vpop.f32.mrb[118].mxu0 }
 0x2d9   :  { %v8784_v15 = vpop.permute.xlu1 %8783  ;;  %v3844_v56 = vsel %vm270_vm2, %v3780_v27, %v8780_v49  ;;  %v3845_v59 = vsel %vm270_vm2, %v3781_v33, %v8781_v57  ;;  %v1190_v14 = vmul.f32 %v11463_v53, %v1106_v4  ;;  %v1108_v19 = vpop.f32.mrb[119].mxu0  ;;  %v1413_v27 = vld [vmem:[#allocation2 + $0x147] sm:$0xff] }
 0x2da   :  { %v11481_v17 = vpop.permute.xlu0 %8798  ;;  %v8786_v3 = vunpack.i.h.bf16 %v8784_v15  ;;  %v8785_v11 = vunpack.i.l.bf16 %v8784_v15  ;;  %1386 = vst.msk [vmem:[#allocation2 + $0x3f0] sm:$0xff] %vm179_vm0, %v1321_v29  ;;  %v1815_v29 = vld [vmem:[#allocation2 + $0x2cf] sm:$0xff] }
 0x2db   :  { %9073 = vrot.lane.b32.xlu1 %v9062_v63, %s10462_s20  ;;  %v8801_v62 = vunpack.i.h.bf16 %v11481_v17  ;;  %v8800_v6 = vunpack.i.l.bf16 %v11481_v17  ;;  %v11531_v21 = vadd.f32 %v11468_v1, %v1190_v14 }
 0x2dc   :  { %9088 = vrot.lane.b32.xlu0 %v9077_v47, %s10465_s0  ;;  %v4102_v28 = vsel %vm4085_vm6, %v4037_v5, %v8785_v11  ;;  %v4103_v34 = vsel %vm4085_vm6, %v4038_v55, %v8786_v3  ;;  %v11528_v11 = vadd.f32 %v11468_v1, %v1189_v31 }
 0x2dd   :  { %v8794_v35 = vpop.permute.xlu1 %8793  ;;  %v4167_v36 = vsel %vm4150_vm7, %v4102_v28, %v8790_v32  ;;  %v4168_v43 = vsel %vm4150_vm7, %v4103_v34, %v8791_v30  ;;  %v11539_v30 = vpack.i.bf16 %v1815_v29, %v1814_v18  ;;  %v1323_v55 = vmax.f32 %v11531_v21, 0.0 }
 0x2de   :  { %v11491_v37 = vpop.permute.xlu0 %8808  ;;  %v8796_v20 = vunpack.i.h.bf16 %v8794_v35  ;;  %v8795_v46 = vunpack.i.l.bf16 %v8794_v35  ;;  %v4231_v47 = vpack.c.bf16 %v4168_v43, %v4167_v36  ;;  %v1322_v32 = vmax.f32 %v11528_v11, 0.0  ;;  %v1816_v43 = vld [vmem:[#allocation2 + $0x2e7] sm:$0xff] }
 0x2df   :  { %9083 = vrot.lane.b32.xlu1 %v9082_v40, %s10464_s18  ;;  %v8811_v28 = vunpack.i.h.bf16 %v11491_v37  ;;  %v8810_v34 = vunpack.i.l.bf16 %v11491_v37  ;;  %1388 = vst.msk [vmem:[#allocation2 + $0x410] sm:$0xff] %vm179_vm0, %v1323_v55 }
 0x2e0   :  { %9098 = vrot.lane.b32.xlu0 %v9097_v41, %s10466_s15  ;;  %4544 = vmatmul.mubr.bf16.gmra.mrb[32].mxu1 %v4231_v47  ;;  %v3909_v63 = vsel %vm3890_vm3, %v3844_v56, %v8795_v46  ;;  %v3910_v39 = vsel %vm3890_vm3, %v3845_v59, %v8796_v20  ;;  %1387 = vst.msk [vmem:[#allocation2 + $0x408] sm:$0xff] %vm179_vm0, %v1322_v32  ;;  %v1414_v20 = vld [vmem:[#allocation2 + $0x14f] sm:$0xff]  ;;  %v1111_v59 = vpop.f32.mrb[120].mxu0 }
 0x2e1   :  { %v8804_v54 = vpop.permute.xlu1 %8803  ;;  %8089 = vmatprep.mubr.msk.bf16.mxu1 %vm179_vm0, %v4234_v48  ;;  %v3974_v10 = vsel %vm3955_vm4, %v3909_v63, %v8800_v6  ;;  %v3975_v15 = vsel %vm3955_vm4, %v3910_v39, %v8801_v62  ;;  %v3783_v48 = vsel %vm179_vm0, %v1414_v20, %v8811_v28  ;;  %v3782_v52 = vsel %vm179_vm0, %v1413_v27, %v8810_v34  ;;  %v1113_v23 = vpop.f32.mrb[121].mxu0  ;;  %v1881_v28 = vld [vmem:[#allocation2 + $0x2f0] sm:$0xff] }
 0x2e2   :  { %v11501_v25 = vpop.permute.xlu0 %8818  ;;  %v8806_v8 = vunpack.i.h.bf16 %v8804_v54  ;;  %v8805_v9 = vunpack.i.l.bf16 %v8804_v54  ;;  %v1751_v54 = vld [vmem:[#allocation2 + $0x2c9] sm:$0xff]  ;;  %v9147_v56 = vpack.i.bf16 %v1817_v12, %v1816_v43  ;;  %v1191_v39 = vmul.f32 %v11463_v53, %v1111_v59 }
 0x2e3   :  { %9093 = vrot.lane.b32.xlu1 %v9082_v40, %s10445_s27  ;;  %v8821_v17 = vunpack.i.h.bf16 %v11501_v25  ;;  %v8820_v3 = vunpack.i.l.bf16 %v11501_v25  ;;  %v1752_v25 = vld [vmem:[#allocation2 + $0x2d1] sm:$0xff]  ;;  %v1753_v34 = vld [vmem:[#allocation2 + $0x2e9] sm:$0xff] }
 0x2e4   :  { %9108 = vrot.lane.b32.xlu0 %v9097_v41, %s10462_s20  ;;  %v4039_v22 = vsel %vm4020_vm5, %v3974_v10, %v8805_v9  ;;  %v4040_v24 = vsel %vm4020_vm5, %v3975_v15, %v8806_v8  ;;  %v1927_v41 = vld [vmem:[#allocation2 + $0x191] sm:$0xff]  ;;  %v1114_v9 = vpop.f32.mrb[122].mxu0 }
 0x2e5   :  { %v11515_v7 = vpop.permute.xlu1 %8813  ;;  %v4104_v38 = vsel %vm4085_vm6, %v4039_v22, %v8820_v3  ;;  %v4105_v37 = vsel %vm4085_vm6, %v4040_v24, %v8821_v17  ;;  %v1192_v14 = vmul.f32 %v11463_v53, %v1114_v9  ;;  %v1880_v24 = vld [vmem:[#allocation2 + $0x2e8] sm:$0xff] }
 0x2e6   :  { %v11517_v13 = vpop.permute.xlu0 %8828  ;;  %v8815_v36 = vunpack.i.l.bf16 %v11515_v7  ;;  %v8816_v44 = vunpack.i.h.bf16 %v11515_v7  ;;  %v9132_v7 = vpack.i.bf16 %v1752_v25, %v1751_v54  ;;  %v1416_v43 = vld [vmem:[#allocation2 + $0x16f] sm:$0xff] }
 0x2e7   :  { %9103 = vrot.lane.b32.xlu1 %v9082_v40, %s10461_s10  ;;  %v1926_v40 = vld [vmem:[#allocation2 + $0x189] sm:$0xff]  ;;  %v8830_v51 = vunpack.i.l.bf16 %v11517_v13  ;;  %v8831_v62 = vunpack.i.h.bf16 %v11517_v13  ;;  %v1260_v13 = vadd.f32 %v11468_v1, %v1191_v39  ;;  %v1261_v19 = vadd.f32 %v11468_v1, %v1192_v14 }
 0x2e8   :  { %9118 = vrot.lane.b32.xlu0 %v11511_v2, %s10464_s18  ;;  %v4236_v49 = vpack.c.bf16 %v1927_v41, %v1926_v40  ;;  %v3846_v50 = vsel %vm270_vm2, %v3782_v52, %v8815_v36  ;;  %v3847_v6 = vsel %vm270_vm2, %v3783_v48, %v8816_v44 }
 0x2e9   :  { %v11535_v5 = vpop.permute.xlu1 %8823  ;;  %v3911_v10 = vsel %vm3890_vm3, %v3846_v50, %v8830_v51  ;;  %v3912_v15 = vsel %vm3890_vm3, %v3847_v6, %v8831_v62  ;;  %v1324_v29 = vmax.f32 %v1260_v13, 0.0  ;;  %v1882_v62 = vld [vmem:[#allocation2 + $0x308] sm:$0xff] }
 0x2ea   :  { %v11537_v16 = vpop.permute.xlu0 %8838  ;;  %v8826_v58 = vunpack.i.h.bf16 %v11535_v5  ;;  %v8825_v35 = vunpack.i.l.bf16 %v11535_v5  ;;  %v1325_v5 = vmax.f32 %v1261_v19, 0.0 }
 0x2eb   :  { %9113 = vrot.lane.b32.xlu1 %v11539_v30, %s10463_s4  ;;  %v8840_v17 = vunpack.i.l.bf16 %v11537_v16  ;;  %v8841_v11 = vunpack.i.h.bf16 %v11537_v16  ;;  %1389 = vst.msk [vmem:[#allocation2 + $0x428] sm:$0xff] %vm179_vm0, %v1324_v29 }
 0x2ec   :  { %9128 = vrot.lane.b32.xlu0 %v11511_v2, %s10445_s27  ;;  %v4169_v26 = vsel %vm4150_vm7, %v4104_v38, %v8825_v35  ;;  %v4170_v33 = vsel %vm4150_vm7, %v4105_v37, %v8826_v58  ;;  %v1754_v58 = vld [vmem:[#allocation2 + $0x2f1] sm:$0xff]  ;;  %1390 = vst.msk [vmem:[#allocation2 + $0x430] sm:$0xff] %vm179_vm0, %v1325_v5 }
 0x2ed   :  { %v8834_v46 = vpop.permute.xlu1 %8833  ;;  %v4233_v57 = vpack.c.bf16 %v4170_v33, %v4169_v26  ;;  %v9152_v26 = vpack.i.bf16 %v1881_v28, %v1880_v24  ;;  %v9167_v33 = vpack.i.bf16 %v1754_v58, %v1753_v34 }
 0x2ee   :  { %v11643_v47 = vpop.permute.xlu0 %8848  ;;  %v8835_v63 = vunpack.i.l.bf16 %v8834_v46  ;;  %v8836_v8 = vunpack.i.h.bf16 %v8834_v46  ;;  %v1928_v46 = vld [vmem:[#allocation2 + $0x1a9] sm:$0xff] }
 0x2ef   :  { %9123 = vrot.lane.b32.xlu1 %v11539_v30, %s10465_s0  ;;  %4552 = vmatmul.mubr.bf16.gmra.mrb[36].mxu1 %v4233_v57  ;;  %v1929_v57 = vld [vmem:[#allocation2 + $0x1b1] sm:$0xff]  ;;  %v8850_v59 = vunpack.i.l.bf16 %v11643_v47 }
 0x2f0   :  { %9138 = vrot.lane.b32.xlu0 %v11511_v2, %s10461_s10  ;;  %8090 = vmatprep.mubr.msk.bf16.mxu1 %vm179_vm0, %v4236_v49  ;;  %v1116_v2 = vpop.f32.mrb[123].mxu0  ;;  %v3976_v18 = vsel %vm3955_vm4, %v3911_v10, %v8835_v63  ;;  %v3977_v3 = vsel %vm3955_vm4, %v3912_v15, %v8836_v8  ;;  %v1415_v49 = vld [vmem:[#allocation2 + $0x167] sm:$0xff]  ;;  %v4238_v50 = vpack.c.bf16 %v1929_v57, %v1928_v46  ;;  %v1883_v63 = vld [vmem:[#allocation2 + $0x310] sm:$0xff] }
 0x2f1   :  { %v8844_v31 = vpop.permute.xlu1 %8843  ;;  %v4041_v35 = vsel %vm4020_vm5, %v3976_v18, %v8840_v17  ;;  %v4042_v16 = vsel %vm4020_vm5, %v3977_v3, %v8841_v11  ;;  %v1818_v3 = vld [vmem:[#allocation2 + $0x307] sm:$0xff]  ;;  %v1819_v11 = vld [vmem:[#allocation2 + $0x30f] sm:$0xff] }
 0x2f2   :  { %v8859_v4 = vpop.permute.xlu0 %8858  ;;  %v8846_v30 = vunpack.i.h.bf16 %v8844_v31  ;;  %v8845_v40 = vunpack.i.l.bf16 %v8844_v31 }
 0x2f3   :  { %9133 = vrot.lane.b32.xlu1 %v9132_v7, %s10466_s15  ;;  %v8861_v41 = vunpack.i.h.bf16 %v8859_v4  ;;  %v8860_v36 = vunpack.i.l.bf16 %v8859_v4  ;;  %v1119_v4 = vpop.f32.mrb[124].mxu0 }
 0x2f4   :  { %9148 = vrot.lane.b32.xlu0 %v9147_v56, %s10463_s4  ;;  %v3785_v48 = vsel %vm179_vm0, %v1416_v43, %v8846_v30  ;;  %v3784_v52 = vsel %vm179_vm0, %v1415_v49, %v8845_v40  ;;  %v1121_v2 = vpop.f32.mrb[125].mxu0  ;;  %v1193_v29 = vmul.f32 %v11463_v53, %v1119_v4  ;;  %v1417_v49 = vld [vmem:[#allocation2 + $0x187] sm:$0xff] }
 0x2f5   :  { %v8854_v21 = vpop.permute.xlu1 %8853  ;;  %v3848_v6 = vsel %vm270_vm2, %v3784_v52, %v8850_v59  ;;  %v1756_v59 = vld [vmem:[#allocation2 + $0x311] sm:$0xff] }
 0x2f6   :  { %v11668_v22 = vpop.permute.xlu0 %8868  ;;  %v8856_v32 = vunpack.i.h.bf16 %v8854_v21  ;;  %v8855_v55 = vunpack.i.l.bf16 %v8854_v21  ;;  %v1122_v21 = vpop.f32.mrb[126].mxu0 }
 0x2f7   :  { %9143 = vrot.lane.b32.xlu1 %v9132_v7, %s10462_s20  ;;  %v8871_v7 = vunpack.i.h.bf16 %v11668_v22  ;;  %v8870_v13 = vunpack.i.l.bf16 %v11668_v22  ;;  %v1262_v22 = vadd.f32 %v11468_v1, %v1193_v29  ;;  %v1194_v30 = vmul.f32 %v11463_v53, %v1122_v21  ;;  %v1885_v21 = vld [vmem:[#allocation2 + $0x330] sm:$0xff] }
 0x2f8   :  { %9158 = vrot.lane.b32.xlu0 %v9147_v56, %s10465_s0  ;;  %v4106_v38 = vsel %vm4085_vm6, %v4041_v35, %v8855_v55  ;;  %v4107_v37 = vsel %vm4085_vm6, %v4042_v16, %v8856_v32  ;;  %v8851_v56 = vunpack.i.h.bf16 %v11643_v47  ;;  %v9187_v47 = vpack.i.bf16 %v1883_v63, %v1882_v62  ;;  %v1124_v32 = vpop.f32.mrb[127].mxu0 }
 0x2f9   :  { %v8864_v12 = vpop.permute.xlu1 %8863  ;;  %v4171_v27 = vsel %vm4150_vm7, %v4106_v38, %v8860_v36  ;;  %v4172_v20 = vsel %vm4150_vm7, %v4107_v37, %v8861_v41  ;;  %v9182_v35 = vpack.i.bf16 %v1819_v11, %v1818_v3  ;;  %v1326_v40 = vmax.f32 %v1262_v22, 0.0  ;;  %v1930_v37 = vld [vmem:[#allocation2 + $0x1c9] sm:$0xff] }
 0x2fa   :  { %v11678_v44 = vpop.permute.xlu0 %8878  ;;  %v8866_v51 = vunpack.i.h.bf16 %v8864_v12  ;;  %v8865_v54 = vunpack.i.l.bf16 %v8864_v12  ;;  %v4235_v25 = vpack.c.bf16 %v4172_v20, %v4171_v27  ;;  %v3849_v8 = vsel %vm270_vm2, %v3785_v48, %v8851_v56  ;;  %v1821_v27 = vld [vmem:[#allocation2 + $0x32f] sm:$0xff] }
 0x2fb   :  { %9153 = vrot.lane.b32.xlu1 %v9152_v26, %s10464_s18  ;;  %v1263_v41 = vadd.f32 %v11468_v1, %v1194_v30  ;;  %v8881_v36 = vunpack.i.h.bf16 %v11678_v44  ;;  %v8880_v43 = vunpack.i.l.bf16 %v11678_v44  ;;  %1391 = vst.msk [vmem:[#allocation2 + $0x448] sm:$0xff] %vm179_vm0, %v1326_v40  ;;  %v1755_v56 = vld [vmem:[#allocation2 + $0x309] sm:$0xff] }
 0x2fc   :  { %9168 = vrot.lane.b32.xlu0 %v9167_v33, %s10466_s15  ;;  %4560 = vmatmul.mubr.bf16.gmra.mrb[40].mxu1 %v4235_v25  ;;  %v3913_v9 = vsel %vm3890_vm3, %v3848_v6, %v8865_v54  ;;  %v3914_v31 = vsel %vm3890_vm3, %v3849_v8, %v8866_v51  ;;  %v1418_v54 = vld [vmem:[#allocation2 + $0x18f] sm:$0xff] }
 0x2fd   :  { %v8874_v39 = vpop.permute.xlu1 %8873  ;;  %8091 = vmatprep.mubr.msk.bf16.mxu1 %vm179_vm0, %v4238_v50  ;;  %v3978_v19 = vsel %vm3955_vm4, %v3913_v9, %v8870_v13  ;;  %v3979_v17 = vsel %vm3955_vm4, %v3914_v31, %v8871_v7  ;;  %v1327_v1 = vmax.f32 %v1263_v41, 0.0  ;;  %v3787_v62 = vsel %vm179_vm0, %v1418_v54, %v8881_v36  ;;  %v1932_v40 = vld [vmem:[#allocation2 + $0x1e9] sm:$0xff]  ;;  %v1933_v41 = vld [vmem:[#allocation2 + $0x1f1] sm:$0xff] }
 0x2fe   :  { %v8889_v23 = vpop.permute.xlu0 %8888  ;;  %v8876_v14 = vunpack.i.h.bf16 %v8874_v39  ;;  %v8875_v10 = vunpack.i.l.bf16 %v8874_v39  ;;  %v3786_v63 = vsel %vm179_vm0, %v1417_v49, %v8880_v43  ;;  %v9202_v13 = vpack.i.bf16 %v1756_v59, %v1755_v56  ;;  %v1887_v49 = vld [vmem:[#allocation2 + $0x350] sm:$0xff] }
 0x2ff   :  { %9163 = vrot.lane.b32.xlu1 %v9152_v26, %s10445_s27  ;;  %v8891_v24 = vunpack.i.h.bf16 %v8889_v23  ;;  %v8890_v5 = vunpack.i.l.bf16 %v8889_v23  ;;  %1392 = vst.msk [vmem:[#allocation2 + $0x450] sm:$0xff] %vm179_vm0, %v1327_v1 }
 0x300   :  { %9178 = vrot.lane.b32.xlu0 %v9167_v33, %s10462_s20  ;;  %v4043_v55 = vsel %vm4020_vm5, %v3978_v19, %v8875_v10  ;;  %v4044_v28 = vsel %vm4020_vm5, %v3979_v17, %v8876_v14  ;;  %v1820_v33 = vld [vmem:[#allocation2 + $0x327] sm:$0xff] }
 0x301   :  { %v8884_v15 = vpop.permute.xlu1 %8883  ;;  %v4108_v53 = vsel %vm4085_vm6, %v4043_v55, %v8890_v5  ;;  %v4109_v12 = vsel %vm4085_vm6, %v4044_v28, %v8891_v24  ;;  %v9217_v50 = vpack.i.bf16 %v1821_v27, %v1820_v33  ;;  %v1884_v17 = vld [vmem:[#allocation2 + $0x328] sm:$0xff]  ;;  %v1758_v5 = vld [vmem:[#allocation2 + $0x331] sm:$0xff]  ;;  %v4242_v27 = vpack.c.bf16 %v1933_v41, %v1932_v40 }
 0x302   :  { %v11697_v18 = vpop.permute.xlu0 %8898  ;;  %v8886_v20 = vunpack.i.h.bf16 %v8884_v15  ;;  %v8885_v46 = vunpack.i.l.bf16 %v8884_v15  ;;  %v1757_v24 = vld [vmem:[#allocation2 + $0x329] sm:$0xff] }
 0x303   :  { %9173 = vrot.lane.b32.xlu1 %v9152_v26, %s10461_s10  ;;  %v1931_v26 = vld [vmem:[#allocation2 + $0x1d1] sm:$0xff]  ;;  %v8901_v39 = vunpack.i.h.bf16 %v11697_v18  ;;  %v8900_v23 = vunpack.i.l.bf16 %v11697_v18 }
 0x304   :  { %9188 = vrot.lane.b32.xlu0 %v9187_v47, %s10464_s18  ;;  %v4240_v25 = vpack.c.bf16 %v1931_v26, %v1930_v37  ;;  %v3850_v6 = vsel %vm270_vm2, %v3786_v63, %v8885_v46  ;;  %v3851_v8 = vsel %vm270_vm2, %v3787_v62, %v8886_v20  ;;  %v9237_v37 = vpack.i.bf16 %v1758_v5, %v1757_v24  ;;  %v1420_v26 = vld [vmem:[#allocation2 + $0x1af] sm:$0xff] }
 0x305   :  { %v8894_v34 = vpop.permute.xlu1 %8893  ;;  %v3915_v14 = vsel %vm3890_vm3, %v3850_v6, %v8900_v23  ;;  %v3916_v10 = vsel %vm3890_vm3, %v3851_v8, %v8901_v39 }
 0x306   :  { %v11708_v58 = vpop.permute.xlu0 %8908  ;;  %v8896_v16 = vunpack.i.h.bf16 %v8894_v34  ;;  %v8895_v38 = vunpack.i.l.bf16 %v8894_v34 }
 0x307   :  { %9183 = vrot.lane.b32.xlu1 %v9182_v35, %s10463_s4  ;;  %v8911_v15 = vunpack.i.h.bf16 %v11708_v58  ;;  %v8910_v18 = vunpack.i.l.bf16 %v11708_v58 }
 0x308   :  { %9198 = vrot.lane.b32.xlu0 %v9187_v47, %s10445_s27  ;;  %v4173_v57 = vsel %vm4150_vm7, %v4108_v53, %v8895_v38  ;;  %v4174_v44 = vsel %vm4150_vm7, %v4109_v12, %v8896_v16  ;;  %v9222_v38 = vpack.i.bf16 %v1885_v21, %v1884_v17  ;;  %v1419_v12 = vld [vmem:[#allocation2 + $0x1a7] sm:$0xff] }
 0x309   :  { %v8904_v48 = vpop.permute.xlu1 %8903  ;;  %v4237_v51 = vpack.c.bf16 %v4174_v44, %v4173_v57  ;;  %v1886_v44 = vld [vmem:[#allocation2 + $0x348] sm:$0xff] }
 0x30a   :  { %v11720_v52 = vpop.permute.xlu0 %8918  ;;  %v8906_v9 = vunpack.i.h.bf16 %v8904_v48  ;;  %v8905_v31 = vunpack.i.l.bf16 %v8904_v48 }
 0x30b   :  { %9193 = vrot.lane.b32.xlu1 %v9182_v35, %s10465_s0  ;;  %4568 = vmatmul.mubr.bf16.gmra.mrb[44].mxu1 %v4237_v51  ;;  %v8921_v48 = vunpack.i.h.bf16 %v11720_v52  ;;  %v8920_v51 = vunpack.i.l.bf16 %v11720_v52 }
 0x30c   :  { %9208 = vrot.lane.b32.xlu0 %v9187_v47, %s10461_s10  ;;  %8092 = vmatprep.mubr.msk.bf16.mxu1 %vm179_vm0, %v4240_v25  ;;  %v3980_v47 = vsel %vm3955_vm4, %v3915_v14, %v8905_v31  ;;  %v3981_v2 = vsel %vm3955_vm4, %v3916_v10, %v8906_v9  ;;  %v1822_v31 = vld [vmem:[#allocation2 + $0x347] sm:$0xff] }
 0x30d   :  { %v8914_v4 = vpop.permute.xlu1 %8913  ;;  %v4045_v32 = vsel %vm4020_vm5, %v3980_v47, %v8910_v18  ;;  %v4046_v55 = vsel %vm4020_vm5, %v3981_v2, %v8911_v15 }
 0x30e   :  { %v8929_v7 = vpop.permute.xlu0 %8928  ;;  %v8916_v28 = vunpack.i.h.bf16 %v8914_v4  ;;  %v8915_v34 = vunpack.i.l.bf16 %v8914_v4  ;;  %v1823_v4 = vld [vmem:[#allocation2 + $0x34f] sm:$0xff] }
 0x30f   :  { %9203 = vrot.lane.b32.xlu1 %v9202_v13, %s10466_s15  ;;  %v8931_v22 = vunpack.i.h.bf16 %v8929_v7  ;;  %v8930_v30 = vunpack.i.l.bf16 %v8929_v7 }
 0x310   :  { %9218 = vrot.lane.b32.xlu0 %v9217_v50, %s10463_s4  ;;  %v3789_v1 = vsel %vm179_vm0, %v1420_v26, %v8916_v28  ;;  %v3788_v20 = vsel %vm179_vm0, %v1419_v12, %v8915_v34 }
 0x311   :  { %v8924_v29 = vpop.permute.xlu1 %8923  ;;  %v3852_v56 = vsel %vm270_vm2, %v3788_v20, %v8920_v51  ;;  %v3853_v59 = vsel %vm270_vm2, %v3789_v1, %v8921_v48  ;;  %v1888_v51 = vld [vmem:[#allocation2 + $0x368] sm:$0xff] }
 0x312   :  { %v8939_v19 = vpop.permute.xlu0 %8938  ;;  %v8926_v3 = vunpack.i.h.bf16 %v8924_v29  ;;  %v8925_v11 = vunpack.i.l.bf16 %v8924_v29  ;;  %v9252_v29 = vpack.i.bf16 %v1823_v4, %v1822_v31  ;;  %v1423_v31 = vld [vmem:[#allocation2 + $0x1e7] sm:$0xff] }
 0x313   :  { %9213 = vrot.lane.b32.xlu1 %v9202_v13, %s10462_s20  ;;  %v8941_v23 = vunpack.i.h.bf16 %v8939_v19  ;;  %v8940_v6 = vunpack.i.l.bf16 %v8939_v19 }
 0x314   :  { %9228 = vrot.lane.b32.xlu0 %v9217_v50, %s10465_s0  ;;  %v4110_v58 = vsel %vm4085_vm6, %v4045_v32, %v8925_v11  ;;  %v4111_v35 = vsel %vm4085_vm6, %v4046_v55, %v8926_v3  ;;  %v9257_v50 = vpack.i.bf16 %v1887_v49, %v1886_v44  ;;  %v1934_v3 = vld [vmem:[#allocation2 + $0x209] sm:$0xff] }
 0x315   :  { %v8934_v36 = vpop.permute.xlu1 %8933  ;;  %v4175_v43 = vsel %vm4150_vm7, %v4110_v58, %v8930_v30  ;;  %v4176_v53 = vsel %vm4150_vm7, %v4111_v35, %v8931_v22  ;;  %v1935_v22 = vld [vmem:[#allocation2 + $0x211] sm:$0xff]  ;;  %v1824_v30 = vld [vmem:[#allocation2 + $0x367] sm:$0xff] }
 0x316   :  { %v11746_v16 = vpop.permute.xlu0 %8948  ;;  %v4239_v33 = vpack.c.bf16 %v4176_v53, %v4175_v43  ;;  %v8936_v46 = vunpack.i.h.bf16 %v8934_v36  ;;  %v8935_v57 = vunpack.i.l.bf16 %v8934_v36  ;;  %v1825_v32 = vld [vmem:[#allocation2 + $0x36f] sm:$0xff]  ;;  %v1421_v35 = vld [vmem:[#allocation2 + $0x1c7] sm:$0xff] }
 0x317   :  { %9223 = vrot.lane.b32.xlu1 %v9222_v38, %s10464_s18  ;;  %v8951_v11 = vunpack.i.h.bf16 %v11746_v16  ;;  %v8950_v21 = vunpack.i.l.bf16 %v11746_v16  ;;  %v1422_v16 = vld [vmem:[#allocation2 + $0x1cf] sm:$0xff]  ;;  %v9287_v53 = vpack.i.bf16 %v1825_v32, %v1824_v30 }
 0x318   :  { %9238 = vrot.lane.b32.xlu0 %v9237_v37, %s10466_s15  ;;  %4576 = vmatmul.mubr.bf16.gmra.mrb[48].mxu1 %v4239_v33  ;;  %v3917_v62 = vsel %vm3890_vm3, %v3852_v56, %v8935_v57  ;;  %v3918_v63 = vsel %vm3890_vm3, %v3853_v59, %v8936_v46  ;;  %v1760_v43 = vld [vmem:[#allocation2 + $0x351] sm:$0xff]  ;;  %v1761_v59 = vld [vmem:[#allocation2 + $0x369] sm:$0xff] }
 0x319   :  { %v8944_v54 = vpop.permute.xlu1 %8943  ;;  %8093 = vmatprep.mubr.msk.bf16.mxu1 %vm179_vm0, %v4242_v27  ;;  %v3982_v7 = vsel %vm3955_vm4, %v3917_v62, %v8940_v6  ;;  %v3983_v13 = vsel %vm3955_vm4, %v3918_v63, %v8941_v23  ;;  %v3791_v12 = vsel %vm179_vm0, %v1422_v16, %v8951_v11  ;;  %v3790_v26 = vsel %vm179_vm0, %v1421_v35, %v8950_v21  ;;  %v1889_v56 = vld [vmem:[#allocation2 + $0x370] sm:$0xff] }
 0x31a   :  { %v8959_v25 = vpop.permute.xlu0 %8958  ;;  %v8946_v39 = vunpack.i.h.bf16 %v8944_v54  ;;  %v8945_v52 = vunpack.i.l.bf16 %v8944_v54 }
 0x31b   :  { %9233 = vrot.lane.b32.xlu1 %v9222_v38, %s10445_s27  ;;  %v8961_v14 = vunpack.i.h.bf16 %v8959_v25  ;;  %v8960_v10 = vunpack.i.l.bf16 %v8959_v25 }
 0x31c   :  { %9248 = vrot.lane.b32.xlu0 %v9237_v37, %s10462_s20  ;;  %v4047_v47 = vsel %vm4020_vm5, %v3982_v7, %v8945_v52  ;;  %v4048_v2 = vsel %vm4020_vm5, %v3983_v13, %v8946_v39  ;;  %v1759_v37 = vld [vmem:[#allocation2 + $0x349] sm:$0xff]  ;;  %v11796_v13 = vpack.i.bf16 %v1889_v56, %v1888_v51  ;;  %v8456_v56 = vunpack.i.h.bf16 %v11073_v45 }
 0x31d   :  { %v8954_v8 = vpop.permute.xlu1 %8953  ;;  %v4112_v24 = vsel %vm4085_vm6, %v4047_v47, %v8960_v10  ;;  %v4113_v5 = vsel %vm4085_vm6, %v4048_v2, %v8961_v14  ;;  %v9272_v48 = vpack.i.bf16 %v1760_v43, %v1759_v37  ;;  %v1424_v10 = vld [vmem:[#allocation2 + $0x1ef] sm:$0xff]  ;;  %v8466_v43 = vunpack.i.h.bf16 %v11071_v42 }
 0x31e   :  { %v8969_v9 = vpop.permute.xlu0 %8968  ;;  %v8956_v55 = vunpack.i.h.bf16 %v8954_v8  ;;  %v8955_v28 = vunpack.i.l.bf16 %v8954_v8  ;;  %v1891_v37 = vld [vmem:[#allocation2 + $0x390] sm:$0xff] }
 0x31f   :  { %9243 = vrot.lane.b32.xlu1 %v9222_v38, %s10461_s10  ;;  %v4244_v38 = vpack.c.bf16 %v1935_v22, %v1934_v3  ;;  %v8971_v33 = vunpack.i.h.bf16 %v8969_v9  ;;  %v8970_v27 = vunpack.i.l.bf16 %v8969_v9 }
 0x320   :  { %9258 = vrot.lane.b32.xlu0 %v9257_v50, %s10464_s18  ;;  %v3854_v1 = vsel %vm270_vm2, %v3790_v26, %v8955_v28  ;;  %v3855_v20 = vsel %vm270_vm2, %v3791_v12, %v8956_v55 }
 0x321   :  { %v8964_v15 = vpop.permute.xlu1 %8963  ;;  %v3919_v54 = vsel %vm3890_vm3, %v3854_v1, %v8970_v27  ;;  %v3920_v25 = vsel %vm3890_vm3, %v3855_v20, %v8971_v33  ;;  %v8471_v27 = vunpack.i.h.bf16 %v11084_v60  ;;  %v8470_v1 = vunpack.i.l.bf16 %v11084_v60 }
 0x322   :  { %v11769_v18 = vpop.permute.xlu0 %8978  ;;  %v8966_v19 = vunpack.i.h.bf16 %v8964_v15  ;;  %v8965_v17 = vunpack.i.l.bf16 %v8964_v15 }
 0x323   :  { %9253 = vrot.lane.b32.xlu1 %v9252_v29, %s10463_s4  ;;  %v8981_v23 = vunpack.i.h.bf16 %v11769_v18  ;;  %v8980_v6 = vunpack.i.l.bf16 %v11769_v18  ;;  %v1936_v18 = vld [vmem:[#allocation2 + $0x229] sm:$0xff] }
 0x324   :  { %9268 = vrot.lane.b32.xlu0 %v9257_v50, %s10445_s27  ;;  %v4177_v34 = vsel %vm4150_vm7, %v4112_v24, %v8965_v17  ;;  %v4178_v58 = vsel %vm4150_vm7, %v4113_v5, %v8966_v19  ;;  %v1937_v19 = vld [vmem:[#allocation2 + $0x231] sm:$0xff] }
 0x325   :  { %v8974_v40 = vpop.permute.xlu1 %8973  ;;  %v4241_v36 = vpack.c.bf16 %v4178_v58, %v4177_v34  ;;  %v4246_v58 = vpack.c.bf16 %v1937_v19, %v1936_v18 }
 0x326   :  { %v11779_v41 = vpop.permute.xlu0 %8988  ;;  %v8976_v46 = vunpack.i.h.bf16 %v8974_v40  ;;  %v8975_v57 = vunpack.i.l.bf16 %v8974_v40 }
 0x327   :  { %9263 = vrot.lane.b32.xlu1 %v9252_v29, %s10465_s0  ;;  %4584 = vmatmul.mubr.bf16.gmra.mrb[52].mxu1 %v4241_v36  ;;  %v8991_v24 = vunpack.i.h.bf16 %v11779_v41  ;;  %v8990_v5 = vunpack.i.l.bf16 %v11779_v41 }
 0x328   :  { %9278 = vrot.lane.b32.xlu0 %v9257_v50, %s10461_s10  ;;  %8094 = vmatprep.mubr.msk.bf16.mxu1 %vm179_vm0, %v4244_v38  ;;  %v1762_v50 = vld [vmem:[#allocation2 + $0x371] sm:$0xff]  ;;  %v3984_v62 = vsel %vm3955_vm4, %v3919_v54, %v8975_v57  ;;  %v3985_v63 = vsel %vm3955_vm4, %v3920_v25, %v8976_v46  ;;  %v1890_v38 = vld [vmem:[#allocation2 + $0x388] sm:$0xff]  ;;  %v8465_v57 = vunpack.i.l.bf16 %v11071_v42  ;;  %v8455_v42 = vunpack.i.l.bf16 %v11073_v45 }
 0x329   :  { %v8984_v44 = vpop.permute.xlu1 %8983  ;;  %v9307_v14 = vpack.i.bf16 %v1762_v50, %v1761_v59  ;;  %v4049_v15 = vsel %vm4020_vm5, %v3984_v62, %v8980_v6  ;;  %v4050_v29 = vsel %vm4020_vm5, %v3985_v63, %v8981_v23  ;;  %v9327_v54 = vpack.i.bf16 %v1891_v37, %v1890_v38 }
 0x32a   :  { %v8999_v49 = vpop.permute.xlu0 %8998  ;;  %v8986_v39 = vunpack.i.h.bf16 %v8984_v44  ;;  %v8985_v52 = vunpack.i.l.bf16 %v8984_v44  ;;  %v1425_v44 = vld [vmem:[#allocation2 + $0x247] sm:$0xff]  ;;  %v8476_v6 = vunpack.i.h.bf16 %v11086_v61 }
 0x32b   :  { %9273 = vrot.lane.b32.xlu1 %v9272_v48, %s10466_s15  ;;  %v9001_v47 = vunpack.i.h.bf16 %v8999_v49  ;;  %v9000_v2 = vunpack.i.l.bf16 %v8999_v49  ;;  %v1426_v49 = vld [vmem:[#allocation2 + $0x24f] sm:$0xff]  ;;  %v3794_v23 = vsel %vm179_vm0, %v1425_v44, %v8470_v1 }
 0x32c   :  { %9288 = vrot.lane.b32.xlu0 %v9287_v53, %s10463_s4  ;;  %v3793_v17 = vsel %vm179_vm0, %v1424_v10, %v8986_v39  ;;  %v3792_v3 = vsel %vm179_vm0, %v1423_v31, %v8985_v52  ;;  %v1938_v39 = vld [vmem:[#allocation2 + $0x289] sm:$0xff]  ;;  %v3795_v52 = vsel %vm179_vm0, %v1426_v49, %v8471_v27  ;;  %v1941_v1 = vld [vmem:[#allocation2 + $0x2b1] sm:$0xff] }
 0x32d   :  { %v8994_v8 = vpop.permute.xlu1 %8993  ;;  %v3856_v35 = vsel %vm270_vm2, %v3792_v3, %v8990_v5  ;;  %v3857_v40 = vsel %vm270_vm2, %v3793_v17, %v8991_v24  ;;  %v1826_v31 = vld [vmem:[#allocation2 + $0x387] sm:$0xff]  ;;  %v3859_v3 = vsel %vm270_vm2, %v3795_v52, %v8476_v6  ;;  %v1829_v24 = vld [vmem:[#allocation2 + $0x3af] sm:$0xff] }
 0x32e   :  { %v9009_v9 = vpop.permute.xlu0 %9008  ;;  %v8996_v4 = vunpack.i.h.bf16 %v8994_v8  ;;  %v8995_v7 = vunpack.i.l.bf16 %v8994_v8  ;;  %v8475_v8 = vunpack.i.l.bf16 %v11086_v61  ;;  %v1940_v27 = vld [vmem:[#allocation2 + $0x2a9] sm:$0xff] }
 0x32f   :  { %9283 = vrot.lane.b32.xlu1 %v9272_v48, %s10462_s20  ;;  %v9010_v12 = vunpack.i.l.bf16 %v9009_v9 }
 0x330   :  { %9298 = vrot.lane.b32.xlu0 %v9287_v53, %s10465_s0  ;;  %v4114_v11 = vsel %vm4085_vm6, %v4049_v15, %v8995_v7  ;;  %v4115_v21 = vsel %vm4085_vm6, %v4050_v29, %v8996_v4  ;;  %v9011_v53 = vunpack.i.h.bf16 %v9009_v9  ;;  %v1939_v9 = vld [vmem:[#allocation2 + $0x291] sm:$0xff]  ;;  %v3858_v17 = vsel %vm270_vm2, %v3794_v23, %v8475_v8  ;;  %v11880_v8 = vld [vmem:[#allocation14] ss:$0 sm:$0xff] }
 0x331   :  { %v9004_v22 = vpop.permute.xlu1 %9003  ;;  %v4179_v32 = vsel %vm4150_vm7, %v4114_v11, %v9000_v2  ;;  %v4180_v55 = vsel %vm4150_vm7, %v4115_v21, %v9001_v47  ;;  %v1827_v4 = vld [vmem:[#allocation2 + $0x38f] sm:$0xff]  ;;  %v4248_v18 = vpack.c.bf16 %v1939_v9, %v1938_v39  ;;  %v1828_v21 = vld [vmem:[#allocation2 + $0x3a7] sm:$0xff] }
 0x332   :  { %v11808_v30 = vpop.permute.xlu0 %9018  ;;  %v9006_v28 = vunpack.i.h.bf16 %v9004_v22  ;;  %v9005_v34 = vunpack.i.l.bf16 %v9004_v22  ;;  %v4243_v41 = vpack.c.bf16 %v4180_v55, %v4179_v32  ;;  %v9322_v19 = vpack.i.bf16 %v1827_v4, %v1826_v31  ;;  %v1892_v31 = vld [vmem:[#allocation2 + $0x3a8] sm:$0xff]  ;;  %v1893_v4 = vld [vmem:[#allocation2 + $0x3b0] sm:$0xff] }
 0x333   :  { %9293 = vrot.lane.b32.xlu1 %v11796_v13, %s10464_s18  ;;  %v9021_v45 = vunpack.i.h.bf16 %v11808_v30  ;;  %v9020_v7 = vunpack.i.l.bf16 %v11808_v30 }
 0x334   :  { %9308 = vrot.lane.b32.xlu0 %v9307_v14, %s10466_s15  ;;  %v3921_v36 = vsel %vm3890_vm3, %v3856_v35, %v9005_v34  ;;  %v3922_v16 = vsel %vm3890_vm3, %v3857_v40, %v9006_v28  ;;  %4592 = vmatmul.mubr.bf16.gmra.mrb[56].mxu1 %v4243_v41  ;;  %v1763_v35 = vld [vmem:[#allocation2 + $0x389] sm:$0xff]  ;;  %v1764_v40 = vld [vmem:[#allocation2 + $0x391] sm:$0xff]  ;;  %v9357_v41 = vpack.i.bf16 %v1829_v24, %v1828_v21 }
 0x335   :  { %v9014_v26 = vpop.permute.xlu1 %9013  ;;  %8095 = vmatprep.mubr.msk.bf16.mxu1 %vm179_vm0, %v4246_v58  ;;  %v3986_v48 = vsel %vm3955_vm4, %v3921_v36, %v9010_v12  ;;  %v3987_v51 = vsel %vm3955_vm4, %v3922_v16, %v9011_v53  ;;  %v3924_v11 = vsel %vm3890_vm3, %v3859_v3, %v9021_v45  ;;  %v11891_v3 = vld [vmem:[#allocation14 + $0x1] ss:$0 sm:$0xff] }
 0x336   :  { %v11820_v33 = vpop.permute.xlu0 %9028  ;;  %v9016_v20 = vunpack.i.h.bf16 %v9014_v26  ;;  %v9015_v46 = vunpack.i.l.bf16 %v9014_v26 }
 0x337   :  { %9303 = vrot.lane.b32.xlu1 %v11796_v13, %s10445_s27  ;;  %v9031_v30 = vunpack.i.h.bf16 %v11820_v33  ;;  %v9030_v32 = vunpack.i.l.bf16 %v11820_v33 }
 0x338   :  { %9318 = vrot.lane.b32.xlu0 %v9307_v14, %s10462_s20  ;;  %v4051_v60 = vsel %vm4020_vm5, %v3986_v48, %v9015_v46  ;;  %v4052_v25 = vsel %vm4020_vm5, %v3987_v51, %v9016_v20 }
 0x339   :  { %v9024_v59 = vpop.permute.xlu1 %9023  ;;  %v4116_v62 = vsel %vm4085_vm6, %v4051_v60, %v8465_v57  ;;  %v4117_v63 = vsel %vm4085_vm6, %v4052_v25, %v8466_v43  ;;  %v9342_v57 = vpack.i.bf16 %v1764_v40, %v1763_v35  ;;  %v1427_v25 = vld [vmem:[#allocation2 + $0x267] sm:$0xff]  ;;  %v1895_v35 = vld [vmem:[#allocation2 + $0x3d0] sm:$0xff] }
 0x33a   :  { %v11835_v50 = vpop.permute.xlu0 %9038  ;;  %v4181_v14 = vsel %vm4150_vm7, %v4116_v62, %v8455_v42  ;;  %v4182_v10 = vsel %vm4150_vm7, %v4117_v63, %v8456_v56  ;;  %v9026_v47 = vunpack.i.h.bf16 %v9024_v59  ;;  %v9025_v2 = vunpack.i.l.bf16 %v9024_v59 }
 0x33b   :  { %9313 = vrot.lane.b32.xlu1 %v11796_v13, %s10461_s10  ;;  %v4245_v15 = vpack.c.bf16 %v4182_v10, %v4181_v14  ;;  %v3923_v13 = vsel %vm3890_vm3, %v3858_v17, %v9020_v7  ;;  %v4250_v42 = vpack.c.bf16 %v1941_v1, %v1940_v27  ;;  %v9041_v52 = vunpack.i.h.bf16 %v11835_v50  ;;  %v1765_v14 = vld [vmem:[#allocation2 + $0x3a9] sm:$0xff]  ;;  %v1766_v10 = vld [vmem:[#allocation2 + $0x3b1] sm:$0xff] }
 0x33c   :  { %9328 = vrot.lane.b32.xlu0 %v9327_v54, %s10464_s18  ;;  %v3988_v5 = vsel %vm3955_vm4, %v3923_v13, %v9025_v2  ;;  %v3989_v22 = vsel %vm3955_vm4, %v3924_v11, %v9026_v47  ;;  %v9040_v23 = vunpack.i.l.bf16 %v11835_v50  ;;  %v9362_v17 = vpack.i.bf16 %v1893_v4, %v1892_v31  ;;  %v1430_v1 = vld [vmem:[#allocation2 + $0x28f] sm:$0xff] }
 0x33d   :  { %v9034_v61 = vpop.permute.xlu1 %9033  ;;  %4600 = vmatmul.mubr.bf16.gmra.mrb[60].mxu1 %v4245_v15  ;;  %v4053_v38 = vsel %vm4020_vm5, %v3988_v5, %v9030_v32  ;;  %v4054_v37 = vsel %vm4020_vm5, %v3989_v22, %v9031_v30  ;;  %v9377_v11 = vpack.i.bf16 %v1766_v10, %v1765_v14 }
 0x33e   :  { %v9049_v29 = vpop.permute.xlu0 %9048  ;;  %8096 = vmatprep.mubr.msk.bf16.mxu1 %vm179_vm0, %v4248_v18  ;;  %v9036_v43 = vunpack.i.h.bf16 %v9034_v61  ;;  %v9035_v53 = vunpack.i.l.bf16 %v9034_v61 }
 0x33f   :  { %9323 = vrot.lane.b32.xlu1 %v9322_v19, %s10463_s4  ;;  %v9051_v36 = vunpack.i.h.bf16 %v9049_v29  ;;  %v9050_v16 = vunpack.i.l.bf16 %v9049_v29 }
 0x340   :  { %9338 = vrot.lane.b32.xlu0 %v9327_v54, %s10445_s27  ;;  %v3796_v62 = vsel %vm179_vm0, %v1427_v25, %v9035_v53 }
 0x341   :  { %v9044_v55 = vpop.permute.xlu1 %9043  ;;  %v3860_v45 = vsel %vm270_vm2, %v3796_v62, %v9040_v23 }
 0x342   :  { %v11861_v28 = vpop.permute.xlu0 %9058  ;;  %v9046_v34 = vunpack.i.h.bf16 %v9044_v55  ;;  %v9045_v58 = vunpack.i.l.bf16 %v9044_v55 }
 0x343   :  { %9333 = vrot.lane.b32.xlu1 %v9322_v19, %s10465_s0  ;;  %v4481_v12 = vpop.f32.mrb[0].mxu1  ;;  %v9061_v61 = vunpack.i.h.bf16 %v11861_v28  ;;  %v9060_v29 = vunpack.i.l.bf16 %v11861_v28 }
 0x344   :  { %9348 = vrot.lane.b32.xlu0 %v9327_v54, %s10461_s10  ;;  %v4118_v26 = vsel %vm4085_vm6, %v4053_v38, %v9045_v58  ;;  %v4119_v33 = vsel %vm4085_vm6, %v4054_v37, %v9046_v34  ;;  %v4483_v20 = vpop.f32.mrb[1].mxu1  ;;  %v1428_v54 = vld [vmem:[#allocation2 + $0x26f] sm:$0xff]  ;;  %v4741_v18 = vmul.f32 %v11880_v8, %v4481_v12 }
 0x345   :  { %v9054_v46 = vpop.permute.xlu1 %9053  ;;  %v4183_v44 = vsel %vm4150_vm7, %v4118_v26, %v9050_v16  ;;  %v4184_v49 = vsel %vm4150_vm7, %v4119_v33, %v9051_v36  ;;  %v4484_v51 = vpop.f32.mrb[2].mxu1  ;;  %v3797_v59 = vsel %vm179_vm0, %v1428_v54, %v9036_v43  ;;  %v1894_v58 = vld [vmem:[#allocation2 + $0x3c8] sm:$0xff]  ;;  %v1943_v43 = vld [vmem:[#allocation2 + $0x2d1] sm:$0xff] }
 0x346   :  { %v11871_v48 = vpop.permute.xlu0 %9068  ;;  %v4247_v60 = vpack.c.bf16 %v4184_v49, %v4183_v44  ;;  %v4486_v56 = vpop.f32.mrb[3].mxu1  ;;  %v9056_v63 = vunpack.i.h.bf16 %v9054_v46  ;;  %v9055_v39 = vunpack.i.l.bf16 %v9054_v46  ;;  %v3861_v7 = vsel %vm270_vm2, %v3797_v59, %v9041_v52  ;;  %v1942_v37 = vld [vmem:[#allocation2 + $0x2c9] sm:$0xff] }
 0x347   :  { %9343 = vrot.lane.b32.xlu1 %v9342_v57, %s10466_s15  ;;  %v4810_v55 = vadd.f32 %v11891_v3, %v4741_v18  ;;  %v9071_v28 = vunpack.i.h.bf16 %v11871_v48  ;;  %v9070_v40 = vunpack.i.l.bf16 %v11871_v48 }
 0x348   :  { %9358 = vrot.lane.b32.xlu0 %v9357_v41, %s10463_s4  ;;  %4608 = vmatmul.mubr.bf16.gmra.mrb[64].mxu1 %v4247_v60  ;;  %v3925_v47 = vsel %vm3890_vm3, %v3860_v45, %v9055_v39  ;;  %v3926_v50 = vsel %vm3890_vm3, %v3861_v7, %v9056_v63 }
 0x349   :  { %v9064_v6 = vpop.permute.xlu1 %9063  ;;  %8097 = vmatprep.mubr.msk.bf16.mxu1 %vm179_vm0, %v4250_v42  ;;  %v3990_v21 = vsel %vm3955_vm4, %v3925_v47, %v9060_v29  ;;  %v3991_v24 = vsel %vm3955_vm4, %v3926_v50, %v9061_v61  ;;  %v4874_v48 = vmax.f32 %v4810_v55, 0.0  ;;  %v3799_v60 = vsel %vm179_vm0, %v1430_v1, %v9071_v28  ;;  %v11932_v61 = vld [vmem:[#allocation15 + $0x80] sm:$0xff]  }
 0x34a   :  { %v9079_v9 = vpop.permute.xlu0 %9078  ;;  %v9066_v2 = vunpack.i.h.bf16 %v9064_v6  ;;  %v9065_v15 = vunpack.i.l.bf16 %v9064_v6  ;;  %v4252_v42 = vpack.c.bf16 %v1943_v43, %v1942_v37  ;;  %v1830_v6 = vld [vmem:[#allocation2 + $0x3c7] sm:$0xff]  ;;  %8399 = vmatprep.subr.bf16.mxu0 %v11932_v61 }
 0x34b   :  { %9353 = vrot.lane.b32.xlu1 %v9342_v57, %s10462_s20  ;;  %v9081_v5 = vunpack.i.h.bf16 %v9079_v9  ;;  %v9080_v22 = vunpack.i.l.bf16 %v9079_v9  ;;  %v11912_v57 = vpack.i.bf16 %v1895_v35, %v1894_v58  ;;  %v1831_v9 = vld [vmem:[#allocation2 + $0x3cf] sm:$0xff]  ;;  %8400 = vmatpush3.bf16.msra.mxu0 %v11932_v61 }
 0x34c   :  { %9368 = vrot.lane.b32.xlu0 %v9357_v41, %s10465_s0  ;;  %v4055_v30 = vsel %vm4020_vm5, %v3990_v21, %v9065_v15  ;;  %v4056_v32 = vsel %vm4020_vm5, %v3991_v24, %v9066_v2  ;;  %v4742_v41 = vmul.f32 %v11880_v8, %v4484_v51  ;;  %v1429_v51 = vld [vmem:[#allocation2 + $0x287] sm:$0xff]  ;;  %v9392_v15 = vpack.i.bf16 %v1831_v9, %v1830_v6  ;;  %v1833_v24 = vld [vmem:[#allocation2 + $0x3ef] sm:$0xff] }
 0x34d   :  { %v9074_v19 = vpop.permute.xlu1 %9073  ;;  %v4120_v33 = vsel %vm4085_vm6, %v4055_v30, %v9080_v22  ;;  %v4121_v27 = vsel %vm4085_vm6, %v4056_v32, %v9081_v5  ;;  %v3798_v59 = vsel %vm179_vm0, %v1429_v51, %v9070_v40  ;;  %v1832_v21 = vld [vmem:[#allocation2 + $0x3e7] sm:$0xff] }
 0x34e   :  { %v11893_v13 = vpop.permute.xlu0 %9088  ;;  %v9076_v53 = vunpack.i.h.bf16 %v9074_v19  ;;  %v9075_v12 = vunpack.i.l.bf16 %v9074_v19  ;;  %v4811_v62 = vadd.f32 %v11891_v3, %v4742_v41  ;;  %v1767_v41 = vld [vmem:[#allocation2 + $0x3c9] sm:$0xff] }
 0x34f   :  { %9363 = vrot.lane.b32.xlu1 %v9362_v17, %s10464_s18  ;;  %v9091_v45 = vunpack.i.h.bf16 %v11893_v13  ;;  %v9090_v7 = vunpack.i.l.bf16 %v11893_v13 }
 0x350   :  { %9378 = vrot.lane.b32.xlu0 %v9377_v11, %s10466_s15  ;;  %v3862_v31 = vsel %vm270_vm2, %v3798_v59, %v9075_v12  ;;  %v3863_v4 = vsel %vm270_vm2, %v3799_v60, %v9076_v53  ;;  %v4875_v29 = vmax.f32 %v4811_v62, 0.0 }
 0x351   :  { %v9084_v34 = vpop.permute.xlu1 %9083 }
 0x352   :  { %v9086_v36 = vunpack.i.h.bf16 %v9084_v34  ;;  %v9085_v16 = vunpack.i.l.bf16 %v9084_v34  ;;  %v11905_v38 = vpop.permute.xlu0 %9098  ;;  %v4489_v26 = vpop.f32.mrb[4].mxu1  ;;  %v9929_v34 = vld [vmem:[#allocation15 + $0x88] sm:$0xff]  }
 0x353   :  { %9373 = vrot.lane.b32.xlu1 %v9362_v17, %s10445_s27  ;;  %v4743_v20 = vmul.f32 %v11880_v8, %v4489_v26  ;;  %v4491_v46 = vpop.f32.mrb[5].mxu1  ;;  %v9101_v32 = vunpack.i.h.bf16 %v11905_v38  ;;  %v9100_v55 = vunpack.i.l.bf16 %v11905_v38  ;;  %8401 = vmatprep.subr.bf16.mxu0 %v9929_v34 }
 0x354   :  { %9388 = vrot.lane.b32.xlu0 %v9377_v11, %s10462_s20  ;;  %v4185_v44 = vsel %vm4150_vm7, %v4120_v33, %v9085_v16  ;;  %v4186_v49 = vsel %vm4150_vm7, %v4121_v27, %v9086_v36  ;;  %v4492_v25 = vpop.f32.mrb[6].mxu1  ;;  %v3928_v11 = vsel %vm3890_vm3, %v3863_v4, %v9091_v45  ;;  %v1768_v36 = vld [vmem:[#allocation2 + $0x3d1] sm:$0xff]  ;;  %v9427_v16 = vpack.i.bf16 %v1833_v24, %v1832_v21 }
 0x355   :  { %v9094_v54 = vpop.permute.xlu1 %9093  ;;  %v4249_v56 = vpack.c.bf16 %v4186_v49, %v4185_v44  ;;  %v4812_v63 = vadd.f32 %v11891_v3, %v4743_v20  ;;  %v4744_v39 = vmul.f32 %v11880_v8, %v4492_v25  ;;  %v4494_v23 = vpop.f32.mrb[7].mxu1  ;;  %v1944_v20 = vld [vmem:[#allocation2 + $0x2e9] sm:$0xff]  ;;  %v1945_v46 = vld [vmem:[#allocation2 + $0x2f1] sm:$0xff]  ;;  %8402 = vmatpush3.bf16.msra.mxu0 %v9929_v34 }
 0x356   :  { %v11921_v52 = vpop.permute.xlu0 %9108  ;;  %v9096_v47 = vunpack.i.h.bf16 %v9094_v54  ;;  %v9095_v50 = vunpack.i.l.bf16 %v9094_v54  ;;  %v4254_v62 = vpack.c.bf16 %v1945_v46, %v1944_v20 }
 0x357   :  { %9383 = vrot.lane.b32.xlu1 %v9362_v17, %s10461_s10  ;;  %4616 = vmatmul.mubr.bf16.gmra.mrb[68].mxu1 %v4249_v56  ;;  %v4876_v14 = vmax.f32 %v4812_v63, 0.0  ;;  %v4813_v10 = vadd.f32 %v11891_v3, %v4744_v39  ;;  %v3927_v17 = vsel %vm3890_vm3, %v3862_v31, %v9090_v7  ;;  %v9111_v4 = vunpack.i.h.bf16 %v11921_v52 }
 0x358   :  { %9398 = vrot.lane.b32.xlu0 %v11912_v57, %s10464_s18  ;;  %8098 = vmatprep.mubr.msk.bf16.mxu1 %vm179_vm0, %v4252_v42  ;;  %v3992_v22 = vsel %vm3955_vm4, %v3927_v17, %v9095_v50  ;;  %v3993_v30 = vsel %vm3955_vm4, %v3928_v11, %v9096_v47  ;;  %v1432_v42 = vld [vmem:[#allocation2 + $0x2af] sm:$0xff]  ;;  %v9110_v45 = vunpack.i.l.bf16 %v11921_v52 }
 0x359   :  { %v9104_v2 = vpop.permute.xlu1 %9103  ;;  %v4938_v18 = vmax.f32 %v4874_v48, %v4876_v14  ;;  %v4877_v19 = vmax.f32 %v4813_v10, 0.0  ;;  %v4057_v53 = vsel %vm4020_vm5, %v3992_v22, %v9100_v55  ;;  %v4058_v12 = vsel %vm4020_vm5, %v3993_v30, %v9101_v32  ;;  %v1896_v47 = vld [vmem:[#allocation2 + $0x3e8] sm:$0xff]  ;;  %v1897_v50 = vld [vmem:[#allocation2 + $0x3f0] sm:$0xff] }
 0x35a   :  { %v9119_v13 = vpop.permute.xlu0 %9118  ;;  %v9106_v38 = vunpack.i.h.bf16 %v9104_v2  ;;  %v9105_v26 = vunpack.i.l.bf16 %v9104_v2  ;;  %v9412_v48 = vpack.i.bf16 %v1768_v36, %v1767_v41  ;;  %v9432_v22 = vpack.i.bf16 %v1897_v50, %v1896_v47  ;;  %v1835_v47 = vld [vmem:[#allocation2 + $0x40f] sm:$0xff] }
 0x35b   :  { %9393 = vrot.lane.b32.xlu1 %v9392_v15, %s10463_s4  ;;  %4970 = vst.msk [vmem:[#allocation3] sm:$0xff] %vm270_vm2, %v4938_v18  ;;  %v4939_v5 = vmax.f32 %v4875_v29, %v4877_v19  ;;  %v9121_v37 = vunpack.i.h.bf16 %v9119_v13  ;;  %v9120_v43 = vunpack.i.l.bf16 %v9119_v13  ;;  %v1769_v29 = vld [vmem:[#allocation2 + $0x3e9] sm:$0xff]  ;;  %v1770_v18 = vld [vmem:[#allocation2 + $0x3f1] sm:$0xff] }
 0x35c   :  { %9408 = vrot.lane.b32.xlu0 %v11912_v57, %s10445_s27  ;;  %v3801_v63 = vsel %vm179_vm0, %v1432_v42, %v9106_v38  ;;  %v9447_v32 = vpack.i.bf16 %v1770_v18, %v1769_v29 }
 0x35d   :  { %v9114_v28 = vpop.permute.xlu1 %9113  ;;  %4971 = vst.msk [vmem:[#allocation3 + $0x8] sm:$0xff] %vm270_vm2, %v4939_v5 }
 0x35e   :  { %v9116_v58 = vunpack.i.h.bf16 %v9114_v28  ;;  %v9115_v35 = vunpack.i.l.bf16 %v9114_v28  ;;  %v11947_v40 = vpop.permute.xlu0 %9128 }
 0x35f   :  { %9403 = vrot.lane.b32.xlu1 %v9392_v15, %s10465_s0  ;;  %v4497_v33 = vpop.f32.mrb[8].mxu1  ;;  %v3865_v15 = vsel %vm270_vm2, %v3801_v63, %v9111_v4  ;;  %v9131_v11 = vunpack.i.h.bf16 %v11947_v40  ;;  %v9130_v21 = vunpack.i.l.bf16 %v11947_v40 }
 0x360   :  { %9418 = vrot.lane.b32.xlu0 %v11912_v57, %s10461_s10  ;;  %v4122_v27 = vsel %vm4085_vm6, %v4057_v53, %v9115_v35  ;;  %v4123_v1 = vsel %vm4085_vm6, %v4058_v12, %v9116_v58  ;;  %v4499_v44 = vpop.f32.mrb[9].mxu1  ;;  %v1431_v57 = vld [vmem:[#allocation2 + $0x2a7] sm:$0xff]  ;;  %v4745_v24 = vmul.f32 %v11880_v8, %v4497_v33 }
 0x361   :  { %v9124_v49 = vpop.permute.xlu1 %9123  ;;  %v4187_v51 = vsel %vm4150_vm7, %v4122_v27, %v9120_v43  ;;  %v4188_v60 = vsel %vm4150_vm7, %v4123_v1, %v9121_v37  ;;  %v4500_v54 = vpop.f32.mrb[10].mxu1  ;;  %v3800_v39 = vsel %vm179_vm0, %v1431_v57, %v9105_v26  ;;  %v1898_v37 = vld [vmem:[#allocation2 + $0x408] sm:$0xff]  ;;  %v1899_v43 = vld [vmem:[#allocation2 + $0x410] sm:$0xff] }
 0x362   :  { %v11958_v25 = vpop.permute.xlu0 %9138  ;;  %v4251_v56 = vpack.c.bf16 %v4188_v60, %v4187_v51  ;;  %v4502_v59 = vpop.f32.mrb[11].mxu1  ;;  %v9126_v23 = vunpack.i.h.bf16 %v9124_v49  ;;  %v9125_v6 = vunpack.i.l.bf16 %v9124_v49  ;;  %v3864_v2 = vsel %vm270_vm2, %v3800_v39, %v9110_v45  ;;  %v1946_v27 = vld [vmem:[#allocation2 + $0x309] sm:$0xff]  ;;  %v1947_v1 = vld [vmem:[#allocation2 + $0x311] sm:$0xff] }
 0x363   :  { %9413 = vrot.lane.b32.xlu1 %v9412_v48, %s10466_s15  ;;  %v4814_v40 = vadd.f32 %v11891_v3, %v4745_v24  ;;  %v9141_v36 = vunpack.i.h.bf16 %v11958_v25  ;;  %v9140_v53 = vunpack.i.l.bf16 %v11958_v25  ;;  %v4746_v12 = vmul.f32 %v11880_v8, %v4500_v54  ;;  %v1434_v51 = vld [vmem:[#allocation2 + $0x2cf] sm:$0xff]  ;;  %v1433_v59 = vld [vmem:[#allocation2 + $0x2c7] sm:$0xff] }
 0x364   :  { %9428 = vrot.lane.b32.xlu0 %v9427_v16, %s10463_s4  ;;  %4624 = vmatmul.mubr.bf16.gmra.mrb[72].mxu1 %v4251_v56  ;;  %v5002_v9 = vld [vmem:[#allocation3] ss:$2 sm:$0xff]  ;;  %v5034_v31 = vld [vmem:[#allocation3 + $0x1] ss:$2 sm:$0xff]  ;;  %v3929_v19 = vsel %vm3890_vm3, %v3864_v2, %v9125_v6  ;;  %v3930_v52 = vsel %vm3890_vm3, %v3865_v15, %v9126_v23  ;;  %v9467_v54 = vpack.i.bf16 %v1899_v43, %v1898_v37 }
 0x365   :  { %v9134_v7 = vpop.permute.xlu1 %9133  ;;  %8099 = vmatprep.mubr.msk.bf16.mxu1 %vm179_vm0, %v4254_v62  ;;  %v5065_v14 = vmax.f32 %v5002_v9, %v5034_v31  ;;  %v3994_v55 = vsel %vm3955_vm4, %v3929_v19, %v9130_v21  ;;  %v3995_v28 = vsel %vm3955_vm4, %v3930_v52, %v9131_v11  ;;  %v4878_v42 = vmax.f32 %v4814_v40, 0.0 }
 0x366   :  { %v9149_v10 = vpop.permute.xlu0 %9148  ;;  %v9136_v13 = vunpack.i.h.bf16 %v9134_v7  ;;  %v9135_v17 = vunpack.i.l.bf16 %v9134_v7  ;;  %v3803_v62 = vsel %vm179_vm0, %v1434_v51, %v9141_v36  ;;  %v4256_v6 = vpack.c.bf16 %v1947_v1, %v1946_v27  ;;  %v1948_v51 = vld [vmem:[#allocation2 + $0x329] sm:$0xff] }
 0x367   :  { %9423 = vrot.lane.b32.xlu1 %v9412_v48, %s10462_s20  ;;  %5082 = vst.msk [vmem:[#allocation4 + $0x20] sm:$0xff] %vm270_vm2, %v5065_v14  ;;  %v9151_v34 = vunpack.i.h.bf16 %v9149_v10  ;;  %v9150_v58 = vunpack.i.l.bf16 %v9149_v10  ;;  %v3802_v9 = vsel %vm179_vm0, %v1433_v59, %v9140_v53  ;;  %v4815_v31 = vadd.f32 %v11891_v3, %v4746_v12  ;;  %v1834_v10 = vld [vmem:[#allocation2 + $0x407] sm:$0xff]  ;;  %v1772_v12 = vld [vmem:[#allocation2 + $0x411] sm:$0xff] }
 0x368   :  { %9438 = vrot.lane.b32.xlu0 %v9427_v16, %s10465_s0  ;;  %v4059_v35 = vsel %vm4020_vm5, %v3994_v55, %v9135_v17  ;;  %v4060_v41 = vsel %vm4020_vm5, %v3995_v28, %v9136_v13  ;;  %v9462_v11 = vpack.i.bf16 %v1835_v47, %v1834_v10  ;;  %v1836_v55 = vld [vmem:[#allocation2 + $0x427] sm:$0xff]  ;;  %v1837_v28 = vld [vmem:[#allocation2 + $0x42f] sm:$0xff] }
 0x369   :  { %v9144_v5 = vpop.permute.xlu1 %9143  ;;  %v4124_v49 = vsel %vm4085_vm6, %v4059_v35, %v9150_v58  ;;  %v4125_v48 = vsel %vm4085_vm6, %v4060_v41, %v9151_v34  ;;  %v4879_v21 = vmax.f32 %v4815_v31, 0.0  ;;  %v1771_v53 = vld [vmem:[#allocation2 + $0x409] sm:$0xff] }
 0x36a   :  { %v11977_v30 = vpop.permute.xlu0 %9158  ;;  %v9146_v20 = vunpack.i.h.bf16 %v9144_v5  ;;  %v9145_v46 = vunpack.i.l.bf16 %v9144_v5 }
 0x36b   :  { %9433 = vrot.lane.b32.xlu1 %v9432_v22, %s10464_s18  ;;  %v9161_v15 = vunpack.i.h.bf16 %v11977_v30  ;;  %v9160_v29 = vunpack.i.l.bf16 %v11977_v30 }
 0x36c   :  { %9448 = vrot.lane.b32.xlu0 %v9447_v32, %s10466_s15  ;;  %v3866_v50 = vsel %vm270_vm2, %v3802_v9, %v9145_v46  ;;  %v3867_v2 = vsel %vm270_vm2, %v3803_v62, %v9146_v20 }
 0x36d   :  { %v9154_v16 = vpop.permute.xlu1 %9153  ;;  %v3931_v30 = vsel %vm3890_vm3, %v3866_v50, %v9160_v29 }
 0x36e   :  { %v9156_v38 = vunpack.i.h.bf16 %v9154_v16  ;;  %v9155_v26 = vunpack.i.l.bf16 %v9154_v16  ;;  %v11989_v33 = vpop.permute.xlu0 %9168  ;;  %v4505_v44 = vpop.f32.mrb[12].mxu1 }
 0x36f   :  { %9443 = vrot.lane.b32.xlu1 %v9432_v22, %s10445_s27  ;;  %v4747_v60 = vmul.f32 %v11880_v8, %v4505_v44  ;;  %v4507_v25 = vpop.f32.mrb[13].mxu1  ;;  %v9171_v41 = vunpack.i.h.bf16 %v11989_v33  ;;  %v9170_v40 = vunpack.i.l.bf16 %v11989_v33 }
 0x370   :  { %9458 = vrot.lane.b32.xlu0 %v9447_v32, %s10462_s20  ;;  %v4189_v56 = vsel %vm4150_vm7, %v4124_v49, %v9155_v26  ;;  %v4190_v57 = vsel %vm4150_vm7, %v4125_v48, %v9156_v38  ;;  %v4508_v63 = vpop.f32.mrb[14].mxu1  ;;  %v9497_v38 = vpack.i.bf16 %v1837_v28, %v1836_v55 }
 0x371   :  { %v9164_v39 = vpop.permute.xlu1 %9163  ;;  %v4253_v23 = vpack.c.bf16 %v4190_v57, %v4189_v56  ;;  %v4816_v4 = vadd.f32 %v11891_v3, %v4747_v60  ;;  %v4748_v45 = vmul.f32 %v11880_v8, %v4508_v63  ;;  %v4510_v14 = vpop.f32.mrb[15].mxu1  ;;  %v1949_v60 = vld [vmem:[#allocation2 + $0x331] sm:$0xff]  ;;  %v9482_v57 = vpack.i.bf16 %v1772_v12, %v1771_v53 }
 0x372   :  { %v12003_v7 = vpop.permute.xlu0 %9178  ;;  %v9166_v52 = vunpack.i.h.bf16 %v9164_v39  ;;  %v9165_v13 = vunpack.i.l.bf16 %v9164_v39  ;;  %v4258_v9 = vpack.c.bf16 %v1949_v60, %v1948_v51  ;;  %v1950_v51 = vld [vmem:[#allocation2 + $0x349] sm:$0xff]  ;;  %v1951_v60 = vld [vmem:[#allocation2 + $0x351] sm:$0xff] }
 0x373   :  { %9453 = vrot.lane.b32.xlu1 %v9432_v22, %s10461_s10  ;;  %4632 = vmatmul.mubr.bf16.gmra.mrb[76].mxu1 %v4253_v23  ;;  %v4880_v18 = vmax.f32 %v4816_v4, 0.0  ;;  %v4817_v19 = vadd.f32 %v11891_v3, %v4748_v45  ;;  %v3932_v22 = vsel %vm3890_vm3, %v3867_v2, %v9161_v15  ;;  %v1435_v23 = vld [vmem:[#allocation2 + $0x2e7] sm:$0xff]  ;;  %v9181_v50 = vunpack.i.h.bf16 %v12003_v7 }
 0x374   :  { %9468 = vrot.lane.b32.xlu0 %v9467_v54, %s10464_s18  ;;  %8100 = vmatprep.mubr.msk.bf16.mxu1 %vm179_vm0, %v4256_v6  ;;  %v3996_v58 = vsel %vm3955_vm4, %v3931_v30, %v9165_v13  ;;  %v3997_v35 = vsel %vm3955_vm4, %v3932_v22, %v9166_v52  ;;  %v9180_v2 = vunpack.i.l.bf16 %v12003_v7  ;;  %v1901_v52 = vld [vmem:[#allocation2 + $0x430] sm:$0xff] }
 0x375   :  { %v9174_v17 = vpop.permute.xlu1 %9173  ;;  %v4940_v24 = vmax.f32 %v4878_v42, %v4880_v18  ;;  %v4881_v5 = vmax.f32 %v4817_v19, 0.0  ;;  %v4061_v1 = vsel %vm4020_vm5, %v3996_v58, %v9170_v40  ;;  %v4062_v20 = vsel %vm4020_vm5, %v3997_v35, %v9171_v41  ;;  %v1900_v19 = vld [vmem:[#allocation2 + $0x428] sm:$0xff] }
 0x376   :  { %v9189_v32 = vpop.permute.xlu0 %9188  ;;  %v9176_v46 = vunpack.i.h.bf16 %v9174_v17  ;;  %v9175_v33 = vunpack.i.l.bf16 %v9174_v17  ;;  %v9930_v41 = vld [vmem:[#allocation15 + $0x40] sm:$0xff]  }
 0x377   :  { %9463 = vrot.lane.b32.xlu1 %v9462_v11, %s10463_s4  ;;  %4972 = vst.msk [vmem:[#allocation3 + $0x10] sm:$0xff] %vm270_vm2, %v4940_v24  ;;  %v4941_v34 = vmax.f32 %v4879_v21, %v4881_v5  ;;  %v9191_v26 = vunpack.i.h.bf16 %v9189_v32  ;;  %v9190_v27 = vunpack.i.l.bf16 %v9189_v32  ;;  %v1774_v21 = vld [vmem:[#allocation2 + $0x431] sm:$0xff]  ;;  %8303 = vmatprep.subr.bf16.mxu1 %v9930_v41  ;;  %v1840_v41 = vld [vmem:[#allocation2 + $0x467] sm:$0xff] }
 0x378   :  { %9478 = vrot.lane.b32.xlu0 %v9467_v54, %s10445_s27  ;;  %v3804_v4 = vsel %vm179_vm0, %v1435_v23, %v9175_v33 }
 0x379   :  { %v9184_v36 = vpop.permute.xlu1 %9183  ;;  %4973 = vst.msk [vmem:[#allocation3 + $0x18] sm:$0xff] %vm270_vm2, %v4941_v34  ;;  %v3868_v13 = vsel %vm270_vm2, %v3804_v4, %v9180_v2  ;;  %v12054_v34 = vpack.i.bf16 %v1901_v52, %v1900_v19  ;;  %v4260_v2 = vpack.c.bf16 %v1951_v60, %v1950_v51 }
 0x37a   :  { %v9186_v16 = vunpack.i.h.bf16 %v9184_v36  ;;  %v9185_v37 = vunpack.i.l.bf16 %v9184_v36  ;;  %v12023_v43 = vpop.permute.xlu0 %9198 }
 0x37b   :  { %9473 = vrot.lane.b32.xlu1 %v9462_v11, %s10465_s0  ;;  %v4513_v44 = vpop.f32.mrb[16].mxu1  ;;  %v1773_v11 = vld [vmem:[#allocation2 + $0x429] sm:$0xff]  ;;  %v9201_v30 = vunpack.i.h.bf16 %v12023_v43  ;;  %v9200_v22 = vunpack.i.l.bf16 %v12023_v43 }
 0x37c   :  { %9488 = vrot.lane.b32.xlu0 %v9467_v54, %s10461_s10  ;;  %v4126_v49 = vsel %vm4085_vm6, %v4061_v1, %v9185_v37  ;;  %v4127_v48 = vsel %vm4085_vm6, %v4062_v20, %v9186_v16  ;;  %v4515_v25 = vpop.f32.mrb[17].mxu1  ;;  %v1436_v54 = vld [vmem:[#allocation2 + $0x2ef] sm:$0xff]  ;;  %v4749_v55 = vmul.f32 %v11880_v8, %v4513_v44  ;;  %v9517_v35 = vpack.i.bf16 %v1774_v21, %v1773_v11  ;;  %v9934_v21 = vld [vmem:[#allocation15 + $0x50] sm:$0xff]  }
 0x37d   :  { %v9194_v56 = vpop.permute.xlu1 %9193  ;;  %v4191_v42 = vsel %vm4150_vm7, %v4126_v49, %v9190_v27  ;;  %v4192_v59 = vsel %vm4150_vm7, %v4127_v48, %v9191_v26  ;;  %v4516_v63 = vpop.f32.mrb[18].mxu1  ;;  %v3805_v31 = vsel %vm179_vm0, %v1436_v54, %v9176_v46  ;;  %v9931_v43 = vld [vmem:[#allocation15] sm:$0xff]   ;;  %v9932_v25 = vld [vmem:[#allocation15 + $0x48] sm:$0xff]  }
 0x37e   :  { %v12033_v62 = vpop.permute.xlu0 %9208  ;;  %v4255_v39 = vpack.c.bf16 %v4192_v59, %v4191_v42  ;;  %v4518_v6 = vpop.f32.mrb[19].mxu1  ;;  %v9196_v45 = vunpack.i.h.bf16 %v9194_v56  ;;  %v9195_v14 = vunpack.i.l.bf16 %v9194_v56  ;;  %v3869_v17 = vsel %vm270_vm2, %v3805_v31, %v9181_v50  ;;  %v1902_v1 = vld [vmem:[#allocation2 + $0x448] sm:$0xff]  ;;  %v1903_v20 = vld [vmem:[#allocation2 + $0x450] sm:$0xff]  ;;  %8304 = vmatpush3.bf16.msra.mxu1 %v9931_v43 }
 0x37f   :  { %9483 = vrot.lane.b32.xlu1 %v9482_v57, %s10466_s15  ;;  %v9211_v26 = vunpack.i.h.bf16 %v12033_v62  ;;  %v9210_v46 = vunpack.i.l.bf16 %v12033_v62  ;;  %v4750_v33 = vmul.f32 %v11880_v8, %v4516_v63  ;;  %v1438_v63 = vld [vmem:[#allocation2 + $0x30f] sm:$0xff]  ;;  %v9537_v54 = vpack.i.bf16 %v1903_v20, %v1902_v1  ;;  %8305 = vmatprep.subr.bf16.mxu1 %v9932_v25 }
 0x380   :  { %9498 = vrot.lane.b32.xlu0 %v9497_v38, %s10463_s4  ;;  %4640 = vmatmul.mubr.bf16.gmra.mrb[80].mxu1 %v4255_v39  ;;  %v5004_v10 = vld [vmem:[#allocation3 + $0x10] ss:$2 sm:$0xff]  ;;  %v5036_v47 = vld [vmem:[#allocation3 + $0x11] ss:$2 sm:$0xff]  ;;  %v3933_v24 = vsel %vm3890_vm3, %v3868_v13, %v9195_v14  ;;  %v3934_v7 = vsel %vm3890_vm3, %v3869_v17, %v9196_v45  ;;  %v1437_v45 = vld [vmem:[#allocation2 + $0x307] sm:$0xff] }
 0x381   :  { %v9204_v15 = vpop.permute.xlu1 %9203  ;;  %8101 = vmatprep.mubr.msk.bf16.mxu1 %vm179_vm0, %v4258_v9  ;;  %v5066_v29 = vmax.f32 %v5004_v10, %v5036_v47  ;;  %v3998_v40 = vsel %vm3955_vm4, %v3933_v24, %v9200_v22  ;;  %v3999_v36 = vsel %vm3955_vm4, %v3934_v7, %v9201_v30  ;;  %v9933_v31 = vld [vmem:[#allocation15 + $0x8] sm:$0xff]   ;;  %v3807_v14 = vsel %vm179_vm0, %v1438_v63, %v9211_v26  ;;  %v1838_v17 = vld [vmem:[#allocation2 + $0x447] sm:$0xff]  ;;  %v9935_v30 = vld [vmem:[#allocation15 + $0x10] sm:$0xff]  }
 0x382   :  { %v9219_v18 = vpop.permute.xlu0 %9218  ;;  %v9206_v5 = vunpack.i.h.bf16 %v9204_v15  ;;  %v9205_v32 = vunpack.i.l.bf16 %v9204_v15  ;;  %v3806_v15 = vsel %vm179_vm0, %v1437_v45, %v9210_v46  ;;  %v1839_v11 = vld [vmem:[#allocation2 + $0x44f] sm:$0xff]  ;;  %8306 = vmatpush3.bf16.msra.mxu1 %v9933_v31 }
 0x383   :  { %9493 = vrot.lane.b32.xlu1 %v9482_v57, %s10462_s20  ;;  %5083 = vst.msk [vmem:[#allocation4 + $0x38] sm:$0xff] %vm270_vm2, %v5066_v29  ;;  %v9221_v16 = vunpack.i.h.bf16 %v9219_v18  ;;  %v9220_v37 = vunpack.i.l.bf16 %v9219_v18  ;;  %v4819_v29 = vadd.f32 %v11891_v3, %v4750_v33  ;;  %8307 = vmatprep.subr.bf16.mxu1 %v9934_v21 }
 0x384   :  { %9508 = vrot.lane.b32.xlu0 %v9497_v38, %s10465_s0  ;;  %v4063_v53 = vsel %vm4020_vm5, %v3998_v40, %v9205_v32  ;;  %v4064_v12 = vsel %vm4020_vm5, %v3999_v36, %v9206_v5  ;;  %v12066_v38 = vadd.f32 %v11891_v3, %v4749_v55  ;;  %v1841_v40 = vld [vmem:[#allocation2 + $0x46f] sm:$0xff] }
 0x385   :  { %v12052_v28 = vpop.permute.xlu1 %9213  ;;  %v4128_v59 = vsel %vm4085_vm6, %v4063_v53, %v9220_v37  ;;  %v4129_v62 = vsel %vm4085_vm6, %v4064_v12, %v9221_v16  ;;  %v9532_v16 = vpack.i.bf16 %v1839_v11, %v1838_v17  ;;  %v9936_v53 = vld [vmem:[#allocation15 + $0x58] sm:$0xff]   ;;  %v9552_v26 = vpack.i.bf16 %v1841_v40, %v1840_v41  ;;  %v9941_v40 = vld [vmem:[#allocation15 + $0x28] sm:$0xff]  }
 0x386   :  { %v12056_v58 = vpop.permute.xlu0 %9228  ;;  %v9216_v56 = vunpack.i.h.bf16 %v12052_v28  ;;  %v9215_v57 = vunpack.i.l.bf16 %v12052_v28  ;;  %v4882_v4 = vmax.f32 %v12066_v38, 0.0  ;;  %8308 = vmatpush3.bf16.msra.mxu1 %v9935_v30 }
 0x387   :  { %9503 = vrot.lane.b32.xlu1 %v12054_v34, %s10464_s18  ;;  %v9231_v5 = vunpack.i.h.bf16 %v12056_v58  ;;  %v9230_v32 = vunpack.i.l.bf16 %v12056_v58  ;;  %v4883_v58 = vmax.f32 %v4819_v29, 0.0  ;;  %8309 = vmatprep.subr.bf16.mxu1 %v9936_v53  ;;  %v12124_v29 = vld [vmem:[#allocation4 + $0x21] sm:$0xff] }
 0x388   :  { %9518 = vrot.lane.b32.xlu0 %v9517_v35, %s10466_s15  ;;  %v3870_v24 = vsel %vm270_vm2, %v3806_v15, %v9215_v57  ;;  %v3871_v7 = vsel %vm270_vm2, %v3807_v14, %v9216_v56  ;;  %v1775_v56 = vld [vmem:[#allocation2 + $0x449] sm:$0xff]  ;;  %v1776_v57 = vld [vmem:[#allocation2 + $0x451] sm:$0xff] }
 0x389   :  { %v9224_v27 = vpop.permute.xlu1 %9223  ;;  %v3935_v12 = vsel %vm3890_vm3, %v3870_v24, %v9230_v32  ;;  %v3936_v38 = vsel %vm3890_vm3, %v3871_v7, %v9231_v5  ;;  %v1953_v14 = vld [vmem:[#allocation2 + $0x371] sm:$0xff]  ;;  %v9557_v15 = vpack.i.bf16 %v1776_v57, %v1775_v56  ;;  %v1439_v24 = vld [vmem:[#allocation2 + $0x327] sm:$0xff] }
 0x38a   :  { %v9226_v44 = vunpack.i.h.bf16 %v9224_v27  ;;  %v9225_v49 = vunpack.i.l.bf16 %v9224_v27  ;;  %v12071_v48 = vpop.permute.xlu0 %9238  ;;  %v4521_v42 = vpop.f32.mrb[20].mxu1  ;;  %v9937_v27 = vld [vmem:[#allocation15 + $0x18] sm:$0xff]   ;;  %v12115_v63 = vld [vmem:[#allocation4 + $0x39] sm:$0xff]  ;;  %v1440_v7 = vld [vmem:[#allocation2 + $0x32f] sm:$0xff] }
 0x38b   :  { %9513 = vrot.lane.b32.xlu1 %v12054_v34, %s10445_s27  ;;  %v4751_v39 = vmul.f32 %v11880_v8, %v4521_v42  ;;  %v4523_v23 = vpop.f32.mrb[21].mxu1  ;;  %v9241_v33 = vunpack.i.h.bf16 %v12071_v48  ;;  %8310 = vmatpush3.bf16.msra.mxu1 %v9937_v27  ;;  %v9938_v42 = vld [vmem:[#allocation15 + $0x60] sm:$0xff]   ;;  %v9577_v11 = vpack.i.bf16 %v12115_v63, %v12124_v29 }
 0x38c   :  { %9528 = vrot.lane.b32.xlu0 %v9517_v35, %s10462_s20  ;;  %v4193_v6 = vsel %vm4150_vm7, %v4128_v59, %v9225_v49  ;;  %v4194_v9 = vsel %vm4150_vm7, %v4129_v62, %v9226_v44  ;;  %v4524_v10 = vpop.f32.mrb[22].mxu1  ;;  %v9240_v44 = vunpack.i.l.bf16 %v12071_v48  ;;  %v1952_v23 = vld [vmem:[#allocation2 + $0x369] sm:$0xff]  ;;  %8311 = vmatprep.subr.bf16.mxu1 %v9938_v42  ;;  %v12154_v42 = vld [vmem:[#allocation2 + $0x391] sm:$0xff] }
 0x38d   :  { %v9234_v47 = vpop.permute.xlu1 %9233  ;;  %v4257_v50 = vpack.c.bf16 %v4194_v9, %v4193_v6  ;;  %v4820_v18 = vadd.f32 %v11891_v3, %v4751_v39  ;;  %v4752_v19 = vmul.f32 %v11880_v8, %v4524_v10  ;;  %v4526_v13 = vpop.f32.mrb[23].mxu1  ;;  %v1904_v10 = vld [vmem:[#allocation2 + $0x468] sm:$0xff]  ;;  %v4262_v32 = vpack.c.bf16 %v1953_v14, %v1952_v23 }
 0x38e   :  { %v12089_v52 = vpop.permute.xlu0 %9248  ;;  %v9236_v28 = vunpack.i.h.bf16 %v9234_v47  ;;  %v9235_v35 = vunpack.i.l.bf16 %v9234_v47  ;;  %v1905_v47 = vld [vmem:[#allocation2 + $0x470] sm:$0xff] }
 0x38f   :  { %9523 = vrot.lane.b32.xlu1 %v12054_v34, %s10461_s10  ;;  %4648 = vmatmul.mubr.bf16.gmra.mrb[84].mxu1 %v4257_v50  ;;  %v4884_v22 = vmax.f32 %v4820_v18, 0.0  ;;  %v4821_v55 = vadd.f32 %v11891_v3, %v4752_v19  ;;  %v9562_v30 = vpack.i.bf16 %v1905_v47, %v1904_v10  ;;  %v12152_v57 = vld [vmem:[#allocation2 + $0x389] sm:$0xff] }
 0x390   :  { %9538 = vrot.lane.b32.xlu0 %v9537_v54, %s10464_s18  ;;  %8102 = vmatprep.mubr.msk.bf16.mxu1 %vm179_vm0, %v4260_v2  ;;  %v4000_v20 = vsel %vm3955_vm4, %v3935_v12, %v9235_v35  ;;  %v4001_v46 = vsel %vm3955_vm4, %v3936_v38, %v9236_v28  ;;  %v5114_v38 = vld [vmem:[#allocation4 + $0x8] sm:$0xff] }
 0x391   :  { %v12100_v36 = vpop.permute.xlu1 %9243  ;;  %v4942_v37 = vmax.f32 %v4882_v4, %v4884_v22  ;;  %v4885_v34 = vmax.f32 %v4821_v55, 0.0  ;;  %v4065_v39 = vsel %vm4020_vm5, %v4000_v20, %v9240_v44  ;;  %v4066_v48 = vsel %vm4020_vm5, %v4001_v46, %v9241_v33  ;;  %v9940_v22 = vld [vmem:[#allocation15 + $0x68] sm:$0xff]   ;;  %v9942_v20 = vld [vmem:[#allocation15 + $0x70] sm:$0xff]   ;;  %v12170_v47 = vld [vmem:[#allocation14] ss:$0 sm:$0xff] }
 0x392   :  { %v9259_v43 = vpop.permute.xlu0 %9258  ;;  %v9246_v6 = vunpack.i.h.bf16 %v12100_v36  ;;  %v9245_v9 = vunpack.i.l.bf16 %v12100_v36 }
 0x393   :  { %9533 = vrot.lane.b32.xlu1 %v9532_v16, %s10463_s4  ;;  %4974 = vst.msk [vmem:[#allocation3 + $0x20] sm:$0xff] %vm270_vm2, %v4942_v37  ;;  %v4943_v1 = vmax.f32 %v4883_v58, %v4885_v34  ;;  %v9261_v59 = vunpack.i.h.bf16 %v9259_v43  ;;  %v9260_v62 = vunpack.i.l.bf16 %v9259_v43  ;;  %v9251_v58 = vunpack.i.h.bf16 %v12089_v52 }
 0x394   :  { %9548 = vrot.lane.b32.xlu0 %v9537_v54, %s10445_s27  ;;  %v9939_v54 = vld [vmem:[#allocation15 + $0x20] sm:$0xff]   ;;  %v3809_v55 = vsel %vm179_vm0, %v1440_v7, %v9246_v6  ;;  %v3808_v28 = vsel %vm179_vm0, %v1439_v24, %v9245_v9  ;;  %v9250_v37 = vunpack.i.l.bf16 %v12089_v52  ;;  %v5195_v6 = vld [vmem:[#allocation4 + $0x37] sm:$0xff]  ;;  %v9944_v9 = vld [vmem:[#allocation15 + $0x78] sm:$0xff]  }
 0x395   :  { %v9254_v49 = vpop.permute.xlu1 %9253  ;;  %4975 = vst.msk [vmem:[#allocation3 + $0x28] sm:$0xff] %vm270_vm2, %v4943_v1  ;;  %8312 = vmatpush3.bf16.msra.mxu1 %v9939_v54  ;;  %v3873_v1 = vsel %vm270_vm2, %v3809_v55, %v9251_v58  ;;  %v1441_v55 = vld [vmem:[#allocation2 + $0x347] sm:$0xff] }
 0x396   :  { %v9256_v51 = vunpack.i.h.bf16 %v9254_v49  ;;  %v9255_v60 = vunpack.i.l.bf16 %v9254_v49  ;;  %v12112_v25 = vpop.permute.xlu0 %9268  ;;  %8313 = vmatprep.subr.bf16.mxu1 %v9940_v22  ;;  %v3872_v27 = vsel %vm270_vm2, %v3808_v28, %v9250_v37  ;;  %v1442_v28 = vld [vmem:[#allocation2 + $0x34f] sm:$0xff] }
 0x397   :  { %9543 = vrot.lane.b32.xlu1 %v9532_v16, %s10465_s0  ;;  %v4529_v31 = vpop.f32.mrb[24].mxu1  ;;  %v9271_v49 = vunpack.i.h.bf16 %v12112_v25 }
 0x398   :  { %9553 = vrot.lane.b32.xlu0 %v9552_v26, %s10463_s4  ;;  %v4130_v4 = vsel %vm4085_vm6, %v4065_v39, %v9255_v60  ;;  %v4131_v45 = vsel %vm4085_vm6, %v4066_v48, %v9256_v51  ;;  %v4531_v50 = vpop.f32.mrb[25].mxu1  ;;  %v4753_v53 = vmul.f32 %v11880_v8, %v4529_v31  ;;  %v5115_v26 = vld [vmem:[#allocation4 + $0x20] sm:$0xff]  ;;  %v9270_v51 = vunpack.i.l.bf16 %v12112_v25  ;;  %v5130_v39 = vld [vmem:[#allocation4 + $0x9] sm:$0xff] }
 0x399   :  { %v9264_v2 = vpop.permute.xlu1 %9263  ;;  %v4195_v18 = vsel %vm4150_vm7, %v4130_v4, %v9260_v62  ;;  %v4196_v19 = vsel %vm4150_vm7, %v4131_v45, %v9261_v59  ;;  %v12130_v17 = vpop.f32.mrb[26].mxu1  ;;  %8314 = vmatpush3.bf16.msra.mxu1 %v9941_v40  ;;  %v9943_v8 = vld [vmem:[#allocation15 + $0x30] sm:$0xff]   ;;  %v9567_v56 = vpack.i.bf16 %v5115_v26, %v5114_v38  ;;  %v9945_v45 = vld [vmem:[#allocation15 + $0x38] sm:$0xff]  }
 0x39a   :  { %v12128_v13 = vpop.permute.xlu0 %9278  ;;  %v4259_v21 = vpack.c.bf16 %v4196_v19, %v4195_v18  ;;  %v4534_v5 = vpop.f32.mrb[27].mxu1  ;;  %v9266_v35 = vunpack.i.h.bf16 %v9264_v2  ;;  %v9265_v41 = vunpack.i.l.bf16 %v9264_v2  ;;  %8315 = vmatprep.subr.bf16.mxu1 %v9942_v20  ;;  %v12157_v59 = vadd.f32 %v11891_v3, %v4753_v53  ;;  %v5146_v18 = vld [vmem:[#allocation4 + $0x1f] sm:$0xff] }
 0x39b   :  { %9558 = vrot.lane.b32.xlu1 %v9557_v15, %s10466_s15  ;;  %v4264_v3 = vpack.c.bf16 %v12154_v42, %v12152_v57  ;;  %v9281_v14 = vunpack.i.h.bf16 %v12128_v13  ;;  %v9280_v10 = vunpack.i.l.bf16 %v12128_v13  ;;  %v4754_v50 = vmul.f32 %v12170_v47, %v12130_v17 }
 0x39c   :  { %9578 = vrot.lane.b32.xlu0 %v9577_v11, %s10462_s20  ;;  %4656 = vmatmul.mubr.bf16.gmra.mrb[88].mxu1 %v4259_v21  ;;  %v5006_v36 = vld [vmem:[#allocation3 + $0x20] ss:$2 sm:$0xff]  ;;  %v5038_v16 = vld [vmem:[#allocation3 + $0x21] ss:$2 sm:$0xff]  ;;  %v3937_v52 = vsel %vm3890_vm3, %v3872_v27, %v9265_v41  ;;  %v3938_v46 = vsel %vm3890_vm3, %v3873_v1, %v9266_v35  ;;  %v9572_v15 = vpack.i.bf16 %v12124_v29, %v5130_v39  ;;  %v4886_v19 = vmax.f32 %v12157_v59, 0.0 }
 0x39d   :  { %v9274_v34 = vpop.permute.xlu1 %9273  ;;  %8103 = vmatprep.mubr.msk.bf16.mxu1 %vm179_vm0, %v4262_v32  ;;  %v5067_v43 = vmax.f32 %v5006_v36, %v5038_v16  ;;  %8316 = vmatpush3.bf16.msra.mxu1 %v9943_v8  ;;  %v4002_v48 = vsel %vm3955_vm4, %v3937_v52, %v9270_v51  ;;  %v4003_v23 = vsel %vm3955_vm4, %v3938_v46, %v9271_v49 }
 0x39e   :  { %v9289_v12 = vpop.permute.xlu0 %9288  ;;  %v9276_v33 = vunpack.i.h.bf16 %v9274_v34  ;;  %v9275_v44 = vunpack.i.l.bf16 %v9274_v34  ;;  %8317 = vmatprep.subr.bf16.mxu1 %v9944_v9  ;;  %v9582_v7 = vpack.i.bf16 %v5195_v6, %v5146_v18  ;;  %v3811_v37 = vsel %vm179_vm0, %v1442_v28, %v9281_v14 }
 0x39f   :  { %9563 = vrot.lane.b32.xlu1 %v9562_v30, %s10464_s18  ;;  %5084 = vst.msk [vmem:[#allocation4 + $0x50] sm:$0xff] %vm270_vm2, %v5067_v43  ;;  %v9291_v25 = vunpack.i.h.bf16 %v9289_v12  ;;  %v9290_v54 = vunpack.i.l.bf16 %v9289_v12  ;;  %v3810_v34 = vsel %vm179_vm0, %v1441_v55, %v9280_v10  ;;  %v12195_v43 = vld [vmem:[#allocation14 + $0x1] ss:$0 sm:$0xff] }
 0x3a0   :  { %v4067_v31 = vsel %vm4020_vm5, %v4002_v48, %v9275_v44  ;;  %v4068_v4 = vsel %vm4020_vm5, %v4003_v23, %v9276_v33  ;;  %v5211_v33 = vld [vmem:[#allocation4 + $0x38] sm:$0xff] }
 0x3a1   :  { %v12150_v60 = vpop.permute.xlu1 %9283  ;;  %8318 = vmatpush3.bf16.msra.mxu1 %v9945_v45  ;;  %v4132_v30 = vsel %vm4085_vm6, %v4067_v31, %v9290_v54  ;;  %v4133_v22 = vsel %vm4085_vm6, %v4068_v4, %v9291_v25 }
 0x3a2   :  { %v12159_v62 = vpop.permute.xlu0 %9298  ;;  %v9286_v13 = vunpack.i.h.bf16 %v12150_v60  ;;  %v9285_v5 = vunpack.i.l.bf16 %v12150_v60  ;;  %8419 = vmatprep.subr.bf16.mxu1 %v11932_v61  ;;  %v4823_v61 = vadd.f32 %v12195_v43, %v4754_v50 }
 0x3a3   :  { %9568 = vrot.lane.b32.xlu1 %v9567_v56, %s10462_s20  ;;  %v9301_v26 = vunpack.i.h.bf16 %v12159_v62  ;;  %v9300_v27 = vunpack.i.l.bf16 %v12159_v62 }
 0x3a4   :  { %v3874_v44 = vsel %vm270_vm2, %v3810_v34, %v9285_v5  ;;  %v3875_v8 = vsel %vm270_vm2, %v3811_v37, %v9286_v13  ;;  %v4887_v48 = vmax.f32 %v4823_v61, 0.0  ;;  %v1956_v5 = vld [vmem:[#allocation2 + $0x3a9] sm:$0xff] }
 0x3a5   :  { %v9294_v2 = vpop.permute.xlu1 %9293  ;;  %v3940_v9 = vsel %vm3890_vm3, %v3875_v8, %v9301_v26 }
 0x3a6   :  { %v9296_v11 = vunpack.i.h.bf16 %v9294_v2  ;;  %v9295_v21 = vunpack.i.l.bf16 %v9294_v2  ;;  %v12176_v24 = vpop.permute.xlu0 %9308  ;;  %v4537_v32 = vpop.f32.mrb[28].mxu1  ;;  %v12181_v17 = vld [vmem:[#allocation4 + $0x51] sm:$0xff] }
 0x3a7   :  { %9573 = vrot.lane.b32.xlu1 %v9572_v15, %s10445_s27  ;;  %v12183_v29 = vld [vmem:[#allocation4 + $0x4f] sm:$0xff]  ;;  %v4755_v35 = vmul.f32 %v12170_v47, %v4537_v32  ;;  %v4539_v41 = vpop.f32.mrb[29].mxu1  ;;  %v5725_v40 = vpack.c.bf16 %v12181_v17, %v12115_v63  ;;  %v9311_v57 = vunpack.i.h.bf16 %v12176_v24  ;;  %v9310_v42 = vunpack.i.l.bf16 %v12176_v24 }
 0x3a8   :  { %v9587_v36 = vpack.i.bf16 %v12183_v29, %v5195_v6  ;;  %v4197_v16 = vsel %vm4150_vm7, %v4132_v30, %v9295_v21  ;;  %v5212_v58 = vld [vmem:[#allocation4 + $0x50] sm:$0xff]  ;;  %v4540_v53 = vpop.f32.mrb[30].mxu1  ;;  %v4198_v38 = vsel %vm4150_vm7, %v4133_v22, %v9296_v11  ;;  %v3939_v6 = vsel %vm3890_vm3, %v3874_v44, %v9300_v27 }
 0x3a9   :  { %v9304_v12 = vpop.permute.xlu1 %9303  ;;  %v4824_v1 = vadd.f32 %v12195_v43, %v4755_v35  ;;  %v4756_v20 = vmul.f32 %v12170_v47, %v4540_v53  ;;  %8403 = vmatprep.mubr.msk.bf16.mxu0 %vm270_vm2, %v5725_v40  ;;  %v4542_v46 = vpop.f32.mrb[31].mxu1  ;;  %v4261_v49 = vpack.c.bf16 %v4198_v38, %v4197_v16  ;;  %v9592_v51 = vpack.i.bf16 %v5212_v58, %v5211_v33  ;;  %v1957_v32 = vld [vmem:[#allocation2 + $0x3b1] sm:$0xff] }
 0x3aa   :  { %v12203_v52 = vpop.permute.xlu0 %9318  ;;  %9588 = vrot.lane.b32.xlu0 %v9587_v36, %s10445_s27  ;;  %v9306_v59 = vunpack.i.h.bf16 %v9304_v12  ;;  %v9305_v62 = vunpack.i.l.bf16 %v9304_v12  ;;  %v9602_v14 = vpack.i.bf16 %v12181_v17, %v12115_v63  ;;  %v1443_v36 = vld [vmem:[#allocation2 + $0x367] sm:$0xff]  ;;  %v1444_v16 = vld [vmem:[#allocation2 + $0x36f] sm:$0xff]  ;;  %v4266_v37 = vpack.c.bf16 %v1957_v32, %v1956_v5 }
 0x3ab   :  { %9583 = vrot.lane.b32.xlu1 %v9582_v7, %s10463_s4  ;;  %v4888_v60 = vmax.f32 %v4824_v1, 0.0  ;;  %v4825_v56 = vadd.f32 %v12195_v43, %v4756_v20  ;;  %4664 = vmatmul.mubr.bf16.gmra.mrb[92].mxu1 %v4261_v49  ;;  %v9321_v27 = vunpack.i.h.bf16 %v12203_v52  ;;  %v9320_v1 = vunpack.i.l.bf16 %v12203_v52  ;;  %v1445_v5 = vld [vmem:[#allocation2 + $0x387] sm:$0xff]  ;;  %v1446_v32 = vld [vmem:[#allocation2 + $0x38f] sm:$0xff] }
 0x3ac   :  { %8104 = vmatprep.mubr.msk.bf16.mxu1 %vm179_vm0, %v4264_v3  ;;  %v4004_v4 = vsel %vm3955_vm4, %v3939_v6, %v9305_v62  ;;  %v4005_v45 = vsel %vm3955_vm4, %v3940_v9, %v9306_v59  ;;  %v1958_v9 = vld [vmem:[#allocation2 + $0x3c9] sm:$0xff] }
 0x3ad   :  { %v9314_v39 = vpop.permute.xlu1 %9313  ;;  %v4944_v23 = vmax.f32 %v4886_v19, %v4888_v60  ;;  %v4889_v25 = vmax.f32 %v4825_v56, 0.0  ;;  %v4069_v19 = vsel %vm4020_vm5, %v4004_v4, %v9310_v42  ;;  %v4070_v11 = vsel %vm4020_vm5, %v4005_v45, %v9311_v57 }
 0x3ae   :  { %v9329_v54 = vpop.permute.xlu0 %9328  ;;  %9593 = vrot.lane.b32.xlu0 %v9592_v51, %s10463_s4  ;;  %v9316_v21 = vunpack.i.h.bf16 %v9314_v39  ;;  %v9315_v7 = vunpack.i.l.bf16 %v9314_v39 }
 0x3af   :  { %9598 = vrot.lane.b32.xlu1 %v9592_v51, %s10462_s20  ;;  %4976 = vst.msk [vmem:[#allocation3 + $0x30] sm:$0xff] %vm270_vm2, %v4944_v23  ;;  %v4945_v31 = vmax.f32 %v4887_v48, %v4889_v25  ;;  %v9331_v15 = vunpack.i.h.bf16 %v9329_v54  ;;  %v9330_v18 = vunpack.i.l.bf16 %v9329_v54 }
 0x3b0   :  { %v3813_v34 = vsel %vm179_vm0, %v1444_v16, %v9316_v21  ;;  %v3812_v61 = vsel %vm179_vm0, %v1443_v36, %v9315_v7 }
 0x3b1   :  { %v9324_v3 = vpop.permute.xlu1 %9323  ;;  %4977 = vst.msk [vmem:[#allocation3 + $0x38] sm:$0xff] %vm270_vm2, %v4945_v31  ;;  %v3876_v44 = vsel %vm270_vm2, %v3812_v61, %v9320_v1  ;;  %v3877_v8 = vsel %vm270_vm2, %v3813_v34, %v9321_v27  ;;  %v1959_v31 = vld [vmem:[#allocation2 + $0x3d1] sm:$0xff] }
 0x3b2   :  { %v9326_v10 = vunpack.i.h.bf16 %v9324_v3  ;;  %v9325_v50 = vunpack.i.l.bf16 %v9324_v3  ;;  %v9339_v2 = vpop.permute.xlu0 %9338 }
 0x3b3   :  { %9603 = vrot.lane.b32.xlu1 %v9602_v14, %s10445_s27  ;;  %v4545_v63 = vpop.f32.mrb[32].mxu1  ;;  %v9341_v59 = vunpack.i.h.bf16 %v9339_v2  ;;  %v9340_v62 = vunpack.i.l.bf16 %v9339_v2 }
 0x3b4   :  { %v4134_v24 = vsel %vm4085_vm6, %v4069_v19, %v9325_v50  ;;  %v4135_v13 = vsel %vm4085_vm6, %v4070_v11, %v9326_v10  ;;  %v4547_v30 = vpop.f32.mrb[33].mxu1  ;;  %v4757_v52 = vmul.f32 %v12170_v47, %v4545_v63 }
 0x3b5   :  { %v9334_v22 = vpop.permute.xlu1 %9333  ;;  %v4199_v55 = vsel %vm4150_vm7, %v4134_v24, %v9330_v18  ;;  %v4200_v28 = vsel %vm4150_vm7, %v4135_v13, %v9331_v15  ;;  %v4548_v41 = vpop.f32.mrb[34].mxu1  ;;  %v4268_v18 = vpack.c.bf16 %v1959_v31, %v1958_v9 }
 0x3b6   :  { %v12234_v35 = vpop.permute.xlu0 %9348  ;;  %v4263_v40 = vpack.c.bf16 %v4200_v28, %v4199_v55  ;;  %v4550_v58 = vpop.f32.mrb[35].mxu1  ;;  %v9336_v53 = vunpack.i.h.bf16 %v9334_v22  ;;  %v9335_v12 = vunpack.i.l.bf16 %v9334_v22  ;;  %v4826_v57 = vadd.f32 %v12195_v43, %v4757_v52 }
 0x3b7   :  { %v9351_v42 = vunpack.i.h.bf16 %v12234_v35  ;;  %v9350_v3 = vunpack.i.l.bf16 %v12234_v35  ;;  %v4758_v10 = vmul.f32 %v12170_v47, %v4548_v41 }
 0x3b8   :  { %4672 = vmatmul.mubr.bf16.gmra.mrb[96].mxu1 %v4263_v40  ;;  %v5008_v38 = vld [vmem:[#allocation3 + $0x30] ss:$2 sm:$0xff]  ;;  %v5040_v26 = vld [vmem:[#allocation3 + $0x31] ss:$2 sm:$0xff]  ;;  %v3941_v49 = vsel %vm3890_vm3, %v3876_v44, %v9335_v12  ;;  %v3942_v51 = vsel %vm3890_vm3, %v3877_v8, %v9336_v53  ;;  %v4890_v41 = vmax.f32 %v4826_v57, 0.0 }
 0x3b9   :  { %v9344_v20 = vpop.permute.xlu1 %9343  ;;  %8105 = vmatprep.mubr.msk.bf16.mxu1 %vm179_vm0, %v4266_v37  ;;  %v5068_v46 = vmax.f32 %v5008_v38, %v5040_v26  ;;  %v4006_v23 = vsel %vm3955_vm4, %v3941_v49, %v9340_v62  ;;  %v4007_v25 = vsel %vm3955_vm4, %v3942_v51, %v9341_v59  ;;  %v3815_v40 = vsel %vm179_vm0, %v1446_v32, %v9351_v42 }
 0x3ba   :  { %v9359_v33 = vpop.permute.xlu0 %9358  ;;  %v9346_v60 = vunpack.i.h.bf16 %v9344_v20  ;;  %v9345_v56 = vunpack.i.l.bf16 %v9344_v20  ;;  %v3814_v36 = vsel %vm179_vm0, %v1445_v5, %v9350_v3  ;;  %v4827_v34 = vadd.f32 %v12195_v43, %v4758_v10 }
 0x3bb   :  { %5085 = vst.msk [vmem:[#allocation4 + $0x68] sm:$0xff] %vm270_vm2, %v5068_v46  ;;  %v9361_v54 = vunpack.i.h.bf16 %v9359_v33  ;;  %v9360_v6 = vunpack.i.l.bf16 %v9359_v33 }
 0x3bc   :  { %v4071_v4 = vsel %vm4020_vm5, %v4006_v23, %v9345_v56  ;;  %v4072_v45 = vsel %vm4020_vm5, %v4007_v25, %v9346_v60  ;;  %v4891_v49 = vmax.f32 %v4827_v34, 0.0 }
 0x3bd   :  { %v9354_v39 = vpop.permute.xlu1 %9353  ;;  %v4136_v19 = vsel %vm4085_vm6, %v4071_v4, %v9360_v6  ;;  %v4137_v11 = vsel %vm4085_vm6, %v4072_v45, %v9361_v54 }
 0x3be   :  { %v12247_v48 = vpop.permute.xlu0 %9368  ;;  %v9356_v21 = vunpack.i.h.bf16 %v9354_v39  ;;  %v9355_v7 = vunpack.i.l.bf16 %v9354_v39 }
 0x3bf   :  { %v9371_v61 = vunpack.i.h.bf16 %v12247_v48  ;;  %v9370_v27 = vunpack.i.l.bf16 %v12247_v48 }
 0x3c0   :  { %v3878_v38 = vsel %vm270_vm2, %v3814_v36, %v9355_v7  ;;  %v3879_v26 = vsel %vm270_vm2, %v3815_v40, %v9356_v21 }
 0x3c1   :  { %v9364_v14 = vpop.permute.xlu1 %9363  ;;  %v3943_v59 = vsel %vm3890_vm3, %v3878_v38, %v9370_v27  ;;  %v3944_v62 = vsel %vm3890_vm3, %v3879_v26, %v9371_v61 }
 0x3c2   :  { %v9366_v50 = vunpack.i.h.bf16 %v9364_v14  ;;  %v9365_v2 = vunpack.i.l.bf16 %v9364_v14  ;;  %v12257_v15 = vpop.permute.xlu0 %9378  ;;  %v4553_v24 = vpop.f32.mrb[36].mxu1  ;;  %v12261_v13 = vld [vmem:[#allocation4 + $0x69] sm:$0xff] }
 0x3c3   :  { %v12263_v63 = vld [vmem:[#allocation4 + $0x67] sm:$0xff]  ;;  %v4759_v30 = vmul.f32 %v12170_v47, %v4553_v24  ;;  %v4555_v22 = vpop.f32.mrb[37].mxu1  ;;  %v9607_v55 = vpack.i.bf16 %v12261_v13, %v12181_v17  ;;  %v9381_v23 = vunpack.i.h.bf16 %v12257_v15  ;;  %v9380_v25 = vunpack.i.l.bf16 %v12257_v15 }
 0x3c4   :  { %v9612_v28 = vpack.i.bf16 %v12263_v63, %v12183_v29  ;;  %v4201_v35 = vsel %vm4150_vm7, %v4136_v19, %v9365_v2  ;;  %v4556_v16 = vpop.f32.mrb[38].mxu1  ;;  %v4202_v37 = vsel %vm4150_vm7, %v4137_v11, %v9366_v50  ;;  %v1960_v15 = vld [vmem:[#allocation2 + $0x3e9] sm:$0xff] }
 0x3c5   :  { %v9374_v58 = vpop.permute.xlu1 %9373  ;;  %v4828_v17 = vadd.f32 %v12195_v43, %v4759_v30  ;;  %v4760_v53 = vmul.f32 %v12170_v47, %v4556_v16  ;;  %9608 = vrot.lane.b32.xlu0 %v9607_v55, %s10462_s20  ;;  %v4558_v12 = vpop.f32.mrb[39].mxu1  ;;  %v4265_v1 = vpack.c.bf16 %v4202_v37, %v4201_v35  ;;  %v1447_v30 = vld [vmem:[#allocation2 + $0x3a7] sm:$0xff]  ;;  %v1448_v22 = vld [vmem:[#allocation2 + $0x3af] sm:$0xff] }
 0x3c6   :  { %v12278_v29 = vpop.permute.xlu0 %9388  ;;  %9613 = vrot.lane.b32.xlu1 %v9612_v28, %s10463_s4  ;;  %v9376_v33 = vunpack.i.h.bf16 %v9374_v58  ;;  %v9375_v44 = vunpack.i.l.bf16 %v9374_v58 }
 0x3c7   :  { %v4892_v20 = vmax.f32 %v4828_v17, 0.0  ;;  %v4829_v46 = vadd.f32 %v12195_v43, %v4760_v53  ;;  %4680 = vmatmul.mubr.bf16.gmra.mrb[100].mxu1 %v4265_v1  ;;  %v9391_v37 = vunpack.i.h.bf16 %v12278_v29  ;;  %v9390_v34 = vunpack.i.l.bf16 %v12278_v29 }
 0x3c8   :  { %8106 = vmatprep.mubr.msk.bf16.mxu1 %vm179_vm0, %v4268_v18  ;;  %v4008_v39 = vsel %vm3955_vm4, %v3943_v59, %v9375_v44  ;;  %v4009_v48 = vsel %vm3955_vm4, %v3944_v62, %v9376_v33  ;;  %v1961_v18 = vld [vmem:[#allocation2 + $0x3f1] sm:$0xff] }
 0x3c9   :  { %v9384_v8 = vpop.permute.xlu1 %9383  ;;  %v4946_v51 = vmax.f32 %v4890_v41, %v4892_v20  ;;  %v4893_v60 = vmax.f32 %v4829_v46, 0.0  ;;  %v4073_v57 = vsel %vm4020_vm5, %v4008_v39, %v9380_v25  ;;  %v4074_v42 = vsel %vm4020_vm5, %v4009_v48, %v9381_v23 }
 0x3ca   :  { %v9399_v56 = vpop.permute.xlu0 %9398  ;;  %v9386_v3 = vunpack.i.h.bf16 %v9384_v8  ;;  %v9385_v14 = vunpack.i.l.bf16 %v9384_v8  ;;  %v4270_v28 = vpack.c.bf16 %v1961_v18, %v1960_v15 }
 0x3cb   :  { %4978 = vst.msk [vmem:[#allocation3 + $0x40] sm:$0xff] %vm270_vm2, %v4946_v51  ;;  %v4947_v52 = vmax.f32 %v4891_v49, %v4893_v60  ;;  %v9401_v4 = vunpack.i.h.bf16 %v9399_v56  ;;  %v9400_v45 = vunpack.i.l.bf16 %v9399_v56  ;;  %v12319_v51 = vld [vmem:[#allocation2 + $0x409] sm:$0xff]  ;;  %v1963_v60 = vld [vmem:[#allocation2 + $0x411] sm:$0xff] }
 0x3cc   :  { %v3817_v35 = vsel %vm179_vm0, %v1448_v22, %v9386_v3  ;;  %v3816_v41 = vsel %vm179_vm0, %v1447_v30, %v9385_v14 }
 0x3cd   :  { %v9394_v54 = vpop.permute.xlu1 %9393  ;;  %4979 = vst.msk [vmem:[#allocation3 + $0x48] sm:$0xff] %vm270_vm2, %v4947_v52  ;;  %v3880_v38 = vsel %vm270_vm2, %v3816_v41, %v9390_v34  ;;  %v3881_v26 = vsel %vm270_vm2, %v3817_v35, %v9391_v37 }
 0x3ce   :  { %v9396_v6 = vunpack.i.h.bf16 %v9394_v54  ;;  %v9395_v9 = vunpack.i.l.bf16 %v9394_v54  ;;  %v9409_v31 = vpop.permute.xlu0 %9408 }
 0x3cf   :  { %v4561_v2 = vpop.f32.mrb[40].mxu1  ;;  %v9411_v29 = vunpack.i.h.bf16 %v9409_v31  ;;  %v9410_v33 = vunpack.i.l.bf16 %v9409_v31 }
 0x3d0   :  { %v4138_v10 = vsel %vm4085_vm6, %v4073_v57, %v9395_v9  ;;  %v4139_v50 = vsel %vm4085_vm6, %v4074_v42, %v9396_v6  ;;  %v4563_v19 = vpop.f32.mrb[41].mxu1  ;;  %v4761_v53 = vmul.f32 %v12170_v47, %v4561_v2  ;;  %v4272_v6 = vpack.c.bf16 %v1963_v60, %v12319_v51  ;;  %v12332_v42 = vld [vmem:[#allocation4 + $0x68] sm:$0xff] }
 0x3d1   :  { %v9404_v11 = vpop.permute.xlu1 %9403  ;;  %v4203_v21 = vsel %vm4150_vm7, %v4138_v10, %v9400_v45  ;;  %v4204_v7 = vsel %vm4150_vm7, %v4139_v50, %v9401_v4  ;;  %v4564_v5 = vpop.f32.mrb[42].mxu1 }
 0x3d2   :  { %v12301_v24 = vpop.permute.xlu0 %9418  ;;  %v4267_v32 = vpack.c.bf16 %v4204_v7, %v4203_v21  ;;  %v4566_v55 = vpop.f32.mrb[43].mxu1  ;;  %v9406_v40 = vunpack.i.h.bf16 %v9404_v11  ;;  %v9405_v36 = vunpack.i.l.bf16 %v9404_v11  ;;  %v12315_v8 = vadd.f32 %v12195_v43, %v4761_v53  ;;  %v1449_v11 = vld [vmem:[#allocation2 + $0x3c7] sm:$0xff]  ;;  %v1450_v21 = vld [vmem:[#allocation2 + $0x3cf] sm:$0xff] }
 0x3d3   :  { %v9421_v23 = vunpack.i.h.bf16 %v12301_v24  ;;  %v9420_v25 = vunpack.i.l.bf16 %v12301_v24  ;;  %v4762_v31 = vmul.f32 %v12170_v47, %v4564_v5 }
 0x3d4   :  { %4688 = vmatmul.mubr.bf16.gmra.mrb[104].mxu1 %v4267_v32  ;;  %v5010_v16 = vld [vmem:[#allocation3 + $0x40] ss:$2 sm:$0xff]  ;;  %v5042_v58 = vld [vmem:[#allocation3 + $0x41] ss:$2 sm:$0xff]  ;;  %v3945_v27 = vsel %vm3890_vm3, %v3880_v38, %v9405_v36  ;;  %v3946_v1 = vsel %vm3890_vm3, %v3881_v26, %v9406_v40  ;;  %v4894_v9 = vmax.f32 %v12315_v8, 0.0 }
 0x3d5   :  { %v9414_v61 = vpop.permute.xlu1 %9413  ;;  %8107 = vmatprep.mubr.msk.bf16.mxu1 %vm179_vm0, %v4270_v28  ;;  %v5069_v17 = vmax.f32 %v5010_v16, %v5042_v58  ;;  %v4010_v56 = vsel %vm3955_vm4, %v3945_v27, %v9410_v33  ;;  %v4011_v59 = vsel %vm3955_vm4, %v3946_v1, %v9411_v29  ;;  %v3819_v22 = vsel %vm179_vm0, %v1450_v21, %v9421_v23 }
 0x3d6   :  { %v9429_v12 = vpop.permute.xlu0 %9428  ;;  %v9416_v20 = vunpack.i.h.bf16 %v9414_v61  ;;  %v9415_v46 = vunpack.i.l.bf16 %v9414_v61  ;;  %v3818_v55 = vsel %vm179_vm0, %v1449_v11, %v9420_v25  ;;  %v4831_v36 = vadd.f32 %v12195_v43, %v4762_v31 }
 0x3d7   :  { %5086 = vst.msk [vmem:[#allocation4 + $0x80] sm:$0xff] %vm270_vm2, %v5069_v17  ;;  %v9431_v62 = vunpack.i.h.bf16 %v9429_v12  ;;  %v9430_v52 = vunpack.i.l.bf16 %v9429_v12 }
 0x3d8   :  { %v4075_v39 = vsel %vm4020_vm5, %v4010_v56, %v9415_v46  ;;  %v4076_v48 = vsel %vm4020_vm5, %v4011_v59, %v9416_v20  ;;  %v4895_v29 = vmax.f32 %v4831_v36, 0.0 }
 0x3d9   :  { %v9424_v44 = vpop.permute.xlu1 %9423  ;;  %v4140_v3 = vsel %vm4085_vm6, %v4075_v39, %v9430_v52  ;;  %v4141_v14 = vsel %vm4085_vm6, %v4076_v48, %v9431_v62 }
 0x3da   :  { %v12317_v49 = vpop.permute.xlu0 %9438  ;;  %v9426_v10 = vunpack.i.h.bf16 %v9424_v44  ;;  %v9425_v50 = vunpack.i.l.bf16 %v9424_v44 }
 0x3db   :  { %v9441_v16 = vunpack.i.h.bf16 %v12317_v49  ;;  %v9440_v53 = vunpack.i.l.bf16 %v12317_v49 }
 0x3dc   :  { %v3882_v61 = vsel %vm270_vm2, %v3818_v55, %v9425_v50  ;;  %v3883_v17 = vsel %vm270_vm2, %v3819_v22, %v9426_v10  ;;  %v1965_v10 = vld [vmem:[#allocation2 + $0x431] sm:$0xff] }
 0x3dd   :  { %v9434_v54 = vpop.permute.xlu1 %9433  ;;  %v3947_v49 = vsel %vm3890_vm3, %v3882_v61, %v9440_v53  ;;  %v3948_v51 = vsel %vm3890_vm3, %v3883_v17, %v9441_v16 }
 0x3de   :  { %v9436_v4 = vunpack.i.h.bf16 %v9434_v54  ;;  %v9435_v45 = vunpack.i.l.bf16 %v9434_v54  ;;  %v12330_v57 = vpop.permute.xlu0 %9448  ;;  %v4569_v2 = vpop.f32.mrb[44].mxu1  ;;  %v12336_v15 = vld [vmem:[#allocation4 + $0x81] sm:$0xff] }
 0x3df   :  { %v12338_v18 = vld [vmem:[#allocation4 + $0x7f] sm:$0xff]  ;;  %v4763_v7 = vmul.f32 %v12170_v47, %v4569_v2  ;;  %v4571_v24 = vpop.f32.mrb[45].mxu1  ;;  %v5728_v5 = vpack.c.bf16 %v12336_v15, %v12261_v13  ;;  %v9632_v46 = vpack.i.bf16 %v12336_v15, %v12261_v13  ;;  %v9451_v59 = vunpack.i.h.bf16 %v12330_v57 }
 0x3e0   :  { %v5119_v19 = vld [vmem:[#allocation4 + $0x80] sm:$0xff]  ;;  %v9617_v32 = vpack.i.bf16 %v12338_v18, %v12263_v63  ;;  %v4572_v28 = vpop.f32.mrb[46].mxu1  ;;  %v4205_v41 = vsel %vm4150_vm7, %v4140_v3, %v9435_v45  ;;  %v4206_v40 = vsel %vm4150_vm7, %v4141_v14, %v9436_v4  ;;  %v9450_v62 = vunpack.i.l.bf16 %v12330_v57  ;;  %v1964_v57 = vld [vmem:[#allocation2 + $0x429] sm:$0xff] }
 0x3e1   :  { %v9627_v30 = vpack.i.bf16 %v5119_v19, %v12332_v42  ;;  %v9444_v35 = vpop.permute.xlu1 %9443  ;;  %v4832_v58 = vadd.f32 %v12195_v43, %v4763_v7  ;;  %v4764_v63 = vmul.f32 %v12170_v47, %v4572_v28  ;;  %8404 = vmatmul.mubr.msk.bf16.vlgmr.msra.gmra.mrb[128].mxu0 %vm270_vm2, %v5728_v5  ;;  %v4574_v34 = vpop.f32.mrb[47].mxu1  ;;  %v4269_v12 = vpack.c.bf16 %v4206_v40, %v4205_v41  ;;  %v1451_v5 = vld [vmem:[#allocation2 + $0x3e7] sm:$0xff] }
 0x3e2   :  { %v12354_v37 = vpop.permute.xlu0 %9458  ;;  %9618 = vrot.lane.b32.xlu0 %v9617_v32, %s10445_s27  ;;  %v9446_v27 = vunpack.i.h.bf16 %v9444_v35  ;;  %v9445_v1 = vunpack.i.l.bf16 %v9444_v35  ;;  %v1452_v32 = vld [vmem:[#allocation2 + $0x3ef] sm:$0xff]  ;;  %v4274_v22 = vpack.c.bf16 %v1965_v10, %v1964_v57  ;;  %v1453_v10 = vld [vmem:[#allocation2 + $0x407] sm:$0xff] }
 0x3e3   :  { %9628 = vrot.lane.b32.xlu1 %v9627_v30, %s10462_s20  ;;  %v4896_v38 = vmax.f32 %v4832_v58, 0.0  ;;  %v4833_v26 = vadd.f32 %v12195_v43, %v4764_v63  ;;  %4696 = vmatmul.mubr.bf16.gmra.mrb[108].mxu1 %v4269_v12  ;;  %v9461_v16 = vunpack.i.h.bf16 %v12354_v37  ;;  %v9460_v58 = vunpack.i.l.bf16 %v12354_v37 }
 0x3e4   :  { %8108 = vmatprep.mubr.msk.bf16.mxu1 %vm179_vm0, %v4272_v6  ;;  %v4012_v56 = vsel %vm3955_vm4, %v3947_v49, %v9445_v1  ;;  %v4013_v13 = vsel %vm3955_vm4, %v3948_v51, %v9446_v27  ;;  %v1966_v51 = vld [vmem:[#allocation2 + $0x449] sm:$0xff] }
 0x3e5   :  { %v9454_v20 = vpop.permute.xlu1 %9453  ;;  %v4948_v33 = vmax.f32 %v4894_v9, %v4896_v38  ;;  %v4897_v44 = vmax.f32 %v4833_v26, 0.0  ;;  %v4077_v6 = vsel %vm4020_vm5, %v4012_v56, %v9450_v62  ;;  %v4078_v9 = vsel %vm4020_vm5, %v4013_v13, %v9451_v59 }
 0x3e6   :  { %v9469_v8 = vpop.permute.xlu0 %9468  ;;  %9623 = vrot.lane.b32.xlu0 %v9627_v30, %s10463_s4  ;;  %v9456_v31 = vunpack.i.h.bf16 %v9454_v20  ;;  %v9455_v4 = vunpack.i.l.bf16 %v9454_v20 }
 0x3e7   :  { %9633 = vrot.lane.b32.xlu1 %v9632_v46, %s10445_s27  ;;  %4980 = vst.msk [vmem:[#allocation3 + $0x50] sm:$0xff] %vm270_vm2, %v4948_v33  ;;  %v4949_v60 = vmax.f32 %v4895_v29, %v4897_v44  ;;  %v9471_v25 = vunpack.i.h.bf16 %v9469_v8  ;;  %v9470_v54 = vunpack.i.l.bf16 %v9469_v8 }
 0x3e8   :  { %v3821_v55 = vsel %vm179_vm0, %v1452_v32, %v9456_v31  ;;  %v3820_v28 = vsel %vm179_vm0, %v1451_v5, %v9455_v4 }
 0x3e9   :  { %v9464_v52 = vpop.permute.xlu1 %9463  ;;  %4981 = vst.msk [vmem:[#allocation3 + $0x58] sm:$0xff] %vm270_vm2, %v4949_v60  ;;  %v3884_v17 = vsel %vm270_vm2, %v3820_v28, %v9460_v58  ;;  %v3885_v53 = vsel %vm270_vm2, %v3821_v55, %v9461_v16  ;;  %v1967_v60 = vld [vmem:[#allocation2 + $0x451] sm:$0xff] }
 0x3ea   :  { %v9466_v39 = vunpack.i.h.bf16 %v9464_v52  ;;  %v9465_v48 = vunpack.i.l.bf16 %v9464_v52  ;;  %v9479_v23 = vpop.permute.xlu0 %9478 }
 0x3eb   :  { %v4577_v14 = vpop.f32.mrb[48].mxu1  ;;  %v9481_v1 = vunpack.i.h.bf16 %v9479_v23  ;;  %v9480_v20 = vunpack.i.l.bf16 %v9479_v23 }
 0x3ec   :  { %v4142_v45 = vsel %vm4085_vm6, %v4077_v6, %v9465_v48  ;;  %v4143_v3 = vsel %vm4085_vm6, %v4078_v9, %v9466_v39  ;;  %v4579_v50 = vpop.f32.mrb[49].mxu1  ;;  %v4765_v37 = vmul.f32 %v12170_v47, %v4577_v14  ;;  %v4276_v6 = vpack.c.bf16 %v1967_v60, %v1966_v51 }
 0x3ed   :  { %v9474_v2 = vpop.permute.xlu1 %9473  ;;  %v4207_v19 = vsel %vm4150_vm7, %v4142_v45, %v9470_v54  ;;  %v4208_v11 = vsel %vm4150_vm7, %v4143_v3, %v9471_v25  ;;  %v4580_v7 = vpop.f32.mrb[50].mxu1  ;;  %v1454_v50 = vld [vmem:[#allocation2 + $0x40f] sm:$0xff] }
 0x3ee   :  { %v12382_v21 = vpop.permute.xlu0 %9488  ;;  %v4271_v24 = vpack.c.bf16 %v4208_v11, %v4207_v19  ;;  %v4582_v30 = vpop.f32.mrb[51].mxu1  ;;  %v9476_v35 = vunpack.i.h.bf16 %v9474_v2  ;;  %v9475_v41 = vunpack.i.l.bf16 %v9474_v2  ;;  %v4834_v59 = vadd.f32 %v12195_v43, %v4765_v37 }
 0x3ef   :  { %v9491_v62 = vunpack.i.h.bf16 %v12382_v21  ;;  %v9490_v52 = vunpack.i.l.bf16 %v12382_v21  ;;  %v4766_v48 = vmul.f32 %v12170_v47, %v4580_v7 }
 0x3f0   :  { %4704 = vmatmul.mubr.bf16.gmra.mrb[112].mxu1 %v4271_v24  ;;  %v5012_v40 = vld [vmem:[#allocation3 + $0x50] ss:$2 sm:$0xff]  ;;  %v5044_v36 = vld [vmem:[#allocation3 + $0x51] ss:$2 sm:$0xff]  ;;  %v3949_v12 = vsel %vm3890_vm3, %v3884_v17, %v9475_v41  ;;  %v3950_v38 = vsel %vm3890_vm3, %v3885_v53, %v9476_v35  ;;  %v4898_v24 = vmax.f32 %v4834_v59, 0.0 }
 0x3f1   :  { %v9484_v63 = vpop.permute.xlu1 %9483  ;;  %8109 = vmatprep.mubr.msk.bf16.mxu1 %vm179_vm0, %v4274_v22  ;;  %v5070_v34 = vmax.f32 %v5012_v40, %v5044_v36  ;;  %v4014_v33 = vsel %vm3955_vm4, %v3949_v12, %v9480_v20  ;;  %v4015_v44 = vsel %vm3955_vm4, %v3950_v38, %v9481_v1  ;;  %v3823_v5 = vsel %vm179_vm0, %v1454_v50, %v9491_v62 }
 0x3f2   :  { %v9499_v61 = vpop.permute.xlu0 %9498  ;;  %v9486_v26 = vunpack.i.h.bf16 %v9484_v63  ;;  %v9485_v27 = vunpack.i.l.bf16 %v9484_v63  ;;  %v3822_v32 = vsel %vm179_vm0, %v1453_v10, %v9490_v52  ;;  %v4835_v28 = vadd.f32 %v12195_v43, %v4766_v48  ;;  %v1456_v48 = vld [vmem:[#allocation2 + $0x42f] sm:$0xff] }
 0x3f3   :  { %5087 = vst.msk [vmem:[#allocation4 + $0x98] sm:$0xff] %vm270_vm2, %v5070_v34  ;;  %v9501_v8 = vunpack.i.h.bf16 %v9499_v61  ;;  %v9500_v49 = vunpack.i.l.bf16 %v9499_v61 }
 0x3f4   :  { %v4079_v56 = vsel %vm4020_vm5, %v4014_v33, %v9485_v27  ;;  %v4080_v13 = vsel %vm4020_vm5, %v4015_v44, %v9486_v26  ;;  %v4899_v38 = vmax.f32 %v4835_v28, 0.0  ;;  %v1969_v33 = vld [vmem:[#allocation2 + $0x471] sm:$0xff] }
 0x3f5   :  { %v9494_v46 = vpop.permute.xlu1 %9493  ;;  %v4144_v9 = vsel %vm4085_vm6, %v4079_v56, %v9500_v49  ;;  %v4145_v31 = vsel %vm4085_vm6, %v4080_v13, %v9501_v8 }
 0x3f6   :  { %v12395_v29 = vpop.permute.xlu0 %9508  ;;  %v9496_v4 = vunpack.i.h.bf16 %v9494_v46  ;;  %v9495_v45 = vunpack.i.l.bf16 %v9494_v46 }
 0x3f7   :  { %v9510_v35 = vunpack.i.l.bf16 %v12395_v29  ;;  %v9511_v16 = vunpack.i.h.bf16 %v12395_v29  ;;  %v1968_v29 = vld [vmem:[#allocation2 + $0x469] sm:$0xff] }
 0x3f8   :  { %v3886_v36 = vsel %vm270_vm2, %v3822_v32, %v9495_v45  ;;  %v3887_v34 = vsel %vm270_vm2, %v3823_v5, %v9496_v4  ;;  %v4278_v52 = vpack.c.bf16 %v1969_v33, %v1968_v29 }
 0x3f9   :  { %v9504_v39 = vpop.permute.xlu1 %9503  ;;  %v3951_v26 = vsel %vm3890_vm3, %v3886_v36, %v9510_v35  ;;  %v3952_v37 = vsel %vm3890_vm3, %v3887_v34, %v9511_v16 }
 0x3fa   :  { %v9506_v23 = vunpack.i.h.bf16 %v9504_v39  ;;  %v9505_v25 = vunpack.i.l.bf16 %v9504_v39  ;;  %v12405_v54 = vpop.permute.xlu0 %9518  ;;  %v4585_v3 = vpop.f32.mrb[52].mxu1  ;;  %v12409_v14 = vld [vmem:[#allocation4 + $0x99] sm:$0xff]  ;;  %v1455_v39 = vld [vmem:[#allocation2 + $0x427] sm:$0xff] }
 0x3fb   :  { %v12411_v57 = vld [vmem:[#allocation4 + $0x97] sm:$0xff]  ;;  %v4767_v2 = vmul.f32 %v12170_v47, %v4585_v3  ;;  %v4587_v19 = vpop.f32.mrb[53].mxu1  ;;  %v9637_v11 = vpack.i.bf16 %v12409_v14, %v12336_v15  ;;  %v9521_v60 = vunpack.i.h.bf16 %v12405_v54  ;;  %v9520_v56 = vunpack.i.l.bf16 %v12405_v54 }
 0x3fc   :  { %v9642_v21 = vpack.i.bf16 %v12411_v57, %v12338_v18  ;;  %v4209_v7 = vsel %vm4150_vm7, %v4144_v9, %v9505_v25  ;;  %v4588_v30 = vpop.f32.mrb[54].mxu1  ;;  %v4210_v55 = vsel %vm4150_vm7, %v4145_v31, %v9506_v23 }
 0x3fd   :  { %v9514_v22 = vpop.permute.xlu1 %9513  ;;  %v4836_v15 = vadd.f32 %v12195_v43, %v4767_v2  ;;  %v4768_v41 = vmul.f32 %v12170_v47, %v4588_v30  ;;  %9638 = vrot.lane.b32.xlu0 %v9637_v11, %s10462_s20  ;;  %v4590_v40 = vpop.f32.mrb[55].mxu1  ;;  %v4273_v63 = vpack.c.bf16 %v4210_v55, %v4209_v7 }
 0x3fe   :  { %v9529_v18 = vpop.permute.xlu0 %9528  ;;  %9643 = vrot.lane.b32.xlu1 %v9642_v21, %s10463_s4  ;;  %v9515_v58 = vunpack.i.l.bf16 %v9514_v22  ;;  %v9516_v53 = vunpack.i.h.bf16 %v9514_v22 }
 0x3ff   :  { %v4900_v61 = vmax.f32 %v4836_v15, 0.0  ;;  %v4837_v17 = vadd.f32 %v12195_v43, %v4768_v41  ;;  %4712 = vmatmul.mubr.bf16.gmra.mrb[116].mxu1 %v4273_v63  ;;  %v9531_v50 = vunpack.i.h.bf16 %v9529_v18  ;;  %v9530_v2 = vunpack.i.l.bf16 %v9529_v18 }
 0x400   :  { %8110 = vmatprep.mubr.msk.bf16.mxu1 %vm179_vm0, %v4276_v6  ;;  %v4016_v46 = vsel %vm3955_vm4, %v3951_v26, %v9515_v58  ;;  %v4017_v8 = vsel %vm3955_vm4, %v3952_v37, %v9516_v53 }
 0x401   :  { %v9524_v12 = vpop.permute.xlu1 %9523  ;;  %v4950_v27 = vmax.f32 %v4898_v24, %v4900_v61  ;;  %v4901_v1 = vmax.f32 %v4837_v17, 0.0  ;;  %v4081_v6 = vsel %vm4020_vm5, %v4016_v46, %v9520_v56  ;;  %v4082_v9 = vsel %vm4020_vm5, %v4017_v8, %v9521_v60 }
 0x402   :  { %v9539_v20 = vpop.permute.xlu0 %9538  ;;  %v9526_v49 = vunpack.i.h.bf16 %v9524_v12  ;;  %v9525_v51 = vunpack.i.l.bf16 %v9524_v12 }
 0x403   :  { %4982 = vst.msk [vmem:[#allocation3 + $0x60] sm:$0xff] %vm270_vm2, %v4950_v27  ;;  %v4951_v44 = vmax.f32 %v4899_v38, %v4901_v1  ;;  %v9541_v23 = vunpack.i.h.bf16 %v9539_v20  ;;  %v9540_v25 = vunpack.i.l.bf16 %v9539_v20 }
 0x404   :  { %v3825_v4 = vsel %vm179_vm0, %v1456_v48, %v9526_v49  ;;  %v3824_v45 = vsel %vm179_vm0, %v1455_v39, %v9525_v51 }
 0x405   :  { %v9534_v13 = vpop.permute.xlu1 %9533  ;;  %4983 = vst.msk [vmem:[#allocation3 + $0x68] sm:$0xff] %vm270_vm2, %v4951_v44  ;;  %v3888_v22 = vsel %vm270_vm2, %v3824_v45, %v9530_v2  ;;  %v3889_v55 = vsel %vm270_vm2, %v3825_v4, %v9531_v50  ;;  %v12477_v2 = vld [vmem:[#allocation4 + $0x98] sm:$0xff] }
 0x406   :  { %v9536_v59 = vunpack.i.h.bf16 %v9534_v13  ;;  %v9535_v62 = vunpack.i.l.bf16 %v9534_v13  ;;  %v9549_v31 = vpop.permute.xlu0 %9548 }
 0x407   :  { %v4593_v10 = vpop.f32.mrb[56].mxu1  ;;  %v9551_v40 = vunpack.i.h.bf16 %v9549_v31  ;;  %v9550_v36 = vunpack.i.l.bf16 %v9549_v31 }
 0x408   :  { %v4146_v54 = vsel %vm4085_vm6, %v4081_v6, %v9535_v62  ;;  %v4147_v3 = vsel %vm4085_vm6, %v4082_v9, %v9536_v59  ;;  %v4595_v19 = vpop.f32.mrb[57].mxu1  ;;  %v4769_v16 = vmul.f32 %v12170_v47, %v4593_v10 }
 0x409   :  { %v9544_v11 = vpop.permute.xlu1 %9543  ;;  %v4211_v21 = vsel %vm4150_vm7, %v4146_v54, %v9540_v25  ;;  %v4212_v7 = vsel %vm4150_vm7, %v4147_v3, %v9541_v23  ;;  %v4596_v32 = vpop.f32.mrb[58].mxu1 }
 0x40a   :  { %v9546_v24 = vunpack.i.h.bf16 %v9544_v11  ;;  %v9545_v5 = vunpack.i.l.bf16 %v9544_v11  ;;  %v4275_v30 = vpack.c.bf16 %v4212_v7, %v4211_v21  ;;  %v4598_v28 = vpop.f32.mrb[59].mxu1  ;;  %v9554_v58 = vpop.permute.xlu0 %9553  ;;  %v4770_v38 = vmul.f32 %v12170_v47, %v4596_v32 }
 0x40b   :  { %v9556_v61 = vunpack.i.h.bf16 %v9554_v58  ;;  %v9555_v12 = vunpack.i.l.bf16 %v9554_v58  ;;  %v4838_v29 = vadd.f32 %v12195_v43, %v4769_v16 }
 0x40c   :  { %v3953_v35 = vsel %vm3890_vm3, %v3888_v22, %v9545_v5  ;;  %v3954_v15 = vsel %vm3890_vm3, %v3889_v55, %v9546_v24  ;;  %4720 = vmatmul.mubr.bf16.gmra.mrb[120].mxu1 %v4275_v30  ;;  %v5014_v41 = vld [vmem:[#allocation3 + $0x60] ss:$2 sm:$0xff]  ;;  %v5046_v18 = vld [vmem:[#allocation3 + $0x61] ss:$2 sm:$0xff]  ;;  %v4839_v51 = vadd.f32 %v12195_v43, %v4770_v38  ;;  %v10160_v38 = vld [vmem:[#allocation4 + $0x38] sm:$0xff] }
 0x40d   :  { %v9559_v63 = vpop.permute.xlu1 %9558  ;;  %8111 = vmatprep.mubr.msk.bf16.mxu1 %vm179_vm0, %v4278_v52  ;;  %v5071_v34 = vmax.f32 %v5014_v41, %v5046_v18  ;;  %v4018_v26 = vsel %vm3955_vm4, %v3953_v35, %v9550_v36  ;;  %v4019_v27 = vsel %vm3955_vm4, %v3954_v15, %v9551_v40  ;;  %v4902_v6 = vmax.f32 %v4838_v29, 0.0  ;;  %v5098_v35 = vld [vmem:[#allocation4 + $0x7] sm:$0xff] }
 0x40e   :  { %v9561_v17 = vunpack.i.h.bf16 %v9559_v63  ;;  %v9560_v53 = vunpack.i.l.bf16 %v9559_v63  ;;  %v4903_v3 = vmax.f32 %v4839_v51, 0.0 }
 0x40f   :  { %5088 = vst.msk [vmem:[#allocation4 + $0xb0] sm:$0xff] %vm270_vm2, %v5071_v34 }
 0x410   :  { %v4083_v1 = vsel %vm4020_vm5, %v4018_v26, %v9560_v53  ;;  %v4084_v20 = vsel %vm4020_vm5, %v4019_v27, %v9561_v17  ;;  %v4601_v37 = vpop.f32.mrb[60].mxu1  ;;  %v5162_v17 = vld [vmem:[#allocation4 + $0x20] sm:$0xff] }
 0x411   :  { %v9564_v46 = vpop.permute.xlu1 %9563  ;;  %v4771_v33 = vmul.f32 %v12170_v47, %v4601_v37  ;;  %v4603_v49 = vpop.f32.mrb[61].mxu1  ;;  %v4148_v56 = vsel %vm4085_vm6, %v4083_v1, %v9555_v12  ;;  %v4149_v13 = vsel %vm4085_vm6, %v4084_v20, %v9556_v61  ;;  %v5099_v53 = vld [vmem:[#allocation4 + $0x1f] sm:$0xff] }
 0x412   :  { %v9566_v44 = vunpack.i.h.bf16 %v9564_v46  ;;  %v9565_v8 = vunpack.i.l.bf16 %v9564_v46  ;;  %v4604_v60 = vpop.f32.mrb[62].mxu1 }
 0x413   :  { %v4840_v59 = vadd.f32 %v12195_v43, %v4771_v33  ;;  %v4772_v62 = vmul.f32 %v12170_v47, %v4604_v60  ;;  %v4606_v52 = vpop.f32.mrb[63].mxu1  ;;  %v9579_v47 = vpop.permute.xlu0 %9578 }
 0x414   :  { %v4213_v39 = vsel %vm4150_vm7, %v4148_v56, %v9565_v8  ;;  %v4214_v48 = vsel %vm4150_vm7, %v4149_v13, %v9566_v44  ;;  %v9581_v5 = vunpack.i.h.bf16 %v9579_v47  ;;  %v9580_v32 = vunpack.i.l.bf16 %v9579_v47 }
 0x415   :  { %v9569_v23 = vpop.permute.xlu1 %9568  ;;  %v4277_v25 = vpack.c.bf16 %v4214_v48, %v4213_v39  ;;  %v4904_v9 = vmax.f32 %v4840_v59, 0.0  ;;  %v4841_v31 = vadd.f32 %v12195_v43, %v4772_v62  ;;  %v12507_v39 = vld [vmem:[#allocation14] ss:$0 sm:$0xff] }
 0x416   :  { %v12471_v4 = vld [vmem:[#allocation4 + $0xb1] sm:$0xff]  ;;  %v9571_v30 = vunpack.i.h.bf16 %v9569_v23  ;;  %v9570_v22 = vunpack.i.l.bf16 %v9569_v23  ;;  %v5675_v12 = vsel %vm270_vm2, %v5162_v17, %v9580_v32  ;;  %v5676_v26 = vsel %vm270_vm2, %v10160_v38, %v9581_v5 }
 0x417   :  { %4728 = vmatmul.mubr.bf16.gmra.mrb[124].mxu1 %v4277_v25  ;;  %v12473_v45 = vld [vmem:[#allocation4 + $0xaf] sm:$0xff]  ;;  %v4952_v10 = vmax.f32 %v4902_v6, %v4904_v9  ;;  %v4905_v50 = vmax.f32 %v4841_v31, 0.0  ;;  %v5731_v11 = vpack.c.bf16 %v12471_v4, %v12409_v14  ;;  %v9662_v40 = vpack.i.bf16 %v12471_v4, %v12409_v14  ;;  %v12511_v31 = vld [vmem:[#allocation14 + $0x1] ss:$0 sm:$0xff] }
 0x418   :  { %v12475_v54 = vld [vmem:[#allocation4 + $0xb0] sm:$0xff]  ;;  %v9647_v43 = vpack.i.bf16 %v12473_v45, %v12411_v57  ;;  %v5627_v27 = vsel %vm270_vm2, %v5098_v35, %v9570_v22  ;;  %v5628_v1 = vsel %vm270_vm2, %v5099_v53, %v9571_v30 }
 0x419   :  { %v9574_v19 = vpop.permute.xlu1 %9573  ;;  %v9657_v21 = vpack.i.bf16 %v12475_v54, %v12477_v2  ;;  %4984 = vst.msk [vmem:[#allocation3 + $0x70] sm:$0xff] %vm270_vm2, %v4952_v10  ;;  %v4953_v7 = vmax.f32 %v4903_v3, %v4905_v50  ;;  %8407 = vmatprep.mubr.msk.bf16.mxu0 %vm270_vm2, %v5731_v11  ;;  %v10162_v23 = vld [vmem:[#allocation15 + $0x80] sm:$0xff]   ;;  %v10163_v6 = vld [vmem:[#allocation15 + $0x88] sm:$0xff]   ;;  %v5234_v50 = vld [vmem:[#allocation4 + $0xe1] sm:$0xff] }
 0x41a   :  { %9648 = vrot.lane.b32.xlu0 %v9647_v43, %s10445_s27  ;;  %v9576_v15 = vunpack.i.h.bf16 %v9574_v19  ;;  %v9575_v41 = vunpack.i.l.bf16 %v9574_v19 }
 0x41b   :  { %v4609_v24 = vpop.f32.mrb[64].mxu1  ;;  %4985 = vst.msk [vmem:[#allocation3 + $0x78] sm:$0xff] %vm270_vm2, %v4953_v7  ;;  %9658 = vrot.lane.b32.xlu1 %v9657_v21, %s10462_s20 }
 0x41c   :  { %v9589_v55 = vpop.permute.xlu0 %9588  ;;  %v4611_v28 = vpop.f32.mrb[65].mxu1  ;;  %v5643_v20 = vsel %vm3955_vm4, %v5627_v27, %v9575_v41  ;;  %v5644_v37 = vsel %vm3955_vm4, %v5628_v1, %v9576_v15  ;;  %v4773_v48 = vmul.f32 %v12507_v39, %v4609_v24  ;;  %v5202_v15 = vld [vmem:[#allocation4 + $0xdf] sm:$0xff] }
 0x41d   :  { %v9584_v18 = vpop.permute.xlu1 %9583  ;;  %v4612_v36 = vpop.f32.mrb[66].mxu1  ;;  %v9591_v16 = vunpack.i.h.bf16 %v9589_v55  ;;  %v9590_v58 = vunpack.i.l.bf16 %v9589_v55  ;;  %v5122_v1 = vld [vmem:[#allocation4 + $0xf8] sm:$0xff] }
 0x41e   :  { %v9586_v63 = vunpack.i.h.bf16 %v9584_v18  ;;  %v9585_v34 = vunpack.i.l.bf16 %v9584_v18  ;;  %v4614_v61 = vpop.f32.mrb[67].mxu1  ;;  %9653 = vrot.lane.b32.xlu0 %v9657_v21, %s10463_s4  ;;  %v4774_v25 = vmul.f32 %v12507_v39, %v4612_v36  ;;  %v4842_v3 = vadd.f32 %v12511_v31, %v4773_v48 }
 0x41f   :  { %9663 = vrot.lane.b32.xlu1 %v9662_v40, %s10445_s27  ;;  %v5692_v33 = vsel %vm3955_vm4, %v5676_v26, %v9591_v16  ;;  %v5691_v44 = vsel %vm3955_vm4, %v5675_v12, %v9590_v58  ;;  %v5218_v58 = vld [vmem:[#allocation4 + $0xe0] sm:$0xff] }
 0x420   :  { %v9594_v14 = vpop.permute.xlu0 %9593  ;;  %v5660_v8 = vsel %vm4085_vm6, %v5644_v37, %v9586_v63  ;;  %v5659_v49 = vsel %vm4085_vm6, %v5643_v20, %v9585_v34  ;;  %v4843_v11 = vadd.f32 %v12511_v31, %v4774_v25  ;;  %v4906_v55 = vmax.f32 %v4842_v3, 0.0 }
 0x421   :  { %v9596_v46 = vunpack.i.h.bf16 %v9594_v14  ;;  %v9595_v29 = vunpack.i.l.bf16 %v9594_v14  ;;  %v5723_v52 = vpack.c.bf16 %v5660_v8, %v5659_v49  ;;  %v5138_v49 = vld [vmem:[#allocation4 + $0xf9] sm:$0xff] }
 0x422   :  { %v5016_v51 = vld [vmem:[#allocation3 + $0x70] ss:$2 sm:$0xff]  ;;  %v5048_v60 = vld [vmem:[#allocation3 + $0x71] ss:$2 sm:$0xff]  ;;  %v4907_v41 = vmax.f32 %v4843_v11, 0.0 }
 0x423   :  { %v5707_v56 = vsel %vm4085_vm6, %v5691_v44, %v9595_v29  ;;  %v5708_v13 = vsel %vm4085_vm6, %v5692_v33, %v9596_v46  ;;  %v5072_v59 = vmax.f32 %v5016_v51, %v5048_v60  ;;  %v9599_v60 = vpop.permute.xlu1 %9598 }
 0x424   :  { %v5724_v62 = vpack.c.bf16 %v5708_v13, %v5707_v56  ;;  %v9600_v11 = vunpack.i.l.bf16 %v9599_v60 }
 0x425   :  { %5089 = vst.msk [vmem:[#allocation4 + $0xc8] sm:$0xff] %vm270_vm2, %v5072_v59 }
 0x426   :  { %5947 = vmatprep.mubr.bf16.mxu1 %v5724_v62 }
 0x427   :  { %5948 = vmatmul.mubr.bf16.vlgmr.msra.gmra.mrb[128].mxu1 %v5723_v52 }
 0x428   :  { %8421 = vmatpush3.bf16.msra.mxu1 %v10162_v23 }
 0x429   :  { %8420 = vmatprep.subr.bf16.mxu1 %v10163_v6 }
 0x42a   :  { %v4617_v9 = vpop.f32.mrb[68].mxu1 }
 0x42b   :  { %v4775_v47 = vmul.f32 %v12507_v39, %v4617_v9  ;;  %v4619_v10 = vpop.f32.mrb[69].mxu1 }
 0x42c   :  { %v4620_v19 = vpop.f32.mrb[70].mxu1  ;;  %8422 = vmatpush3.bf16.msra.mxu1 %v10163_v6  ;;  %v5233_v24 = vld [vmem:[#allocation4 + $0xc9] sm:$0xff] }
 0x42d   :  { %v4844_v43 = vadd.f32 %v12511_v31, %v4775_v47  ;;  %v4776_v21 = vmul.f32 %v12507_v39, %v4620_v19  ;;  %v4622_v7 = vpop.f32.mrb[71].mxu1  ;;  %v5153_v5 = vld [vmem:[#allocation4 + $0xc7] sm:$0xff]  ;;  %v5734_v32 = vpack.c.bf16 %v5234_v50, %v5233_v24  ;;  %v9667_v30 = vpack.i.bf16 %v5233_v24, %v12471_v4  ;;  %v9604_v47 = vpop.permute.xlu1 %9603 }
 0x42e   :  { %v9682_v22 = vpack.i.bf16 %v5153_v5, %v12473_v45  ;;  %v9672_v36 = vpack.i.bf16 %v5202_v15, %v5153_v5  ;;  %v12526_v16 = vld [vmem:[#allocation4 + $0xc8] sm:$0xff]  ;;  %v9601_v19 = vunpack.i.h.bf16 %v9599_v60  ;;  %v9606_v7 = vunpack.i.h.bf16 %v9604_v47 }
 0x42f   :  { %v4908_v28 = vmax.f32 %v4844_v43, 0.0  ;;  %v4845_v35 = vadd.f32 %v12511_v31, %v4776_v21  ;;  %8408 = vmatmul.mubr.msk.bf16.gmra.mrb[132].mxu0 %vm270_vm2, %v5734_v32  ;;  %9668 = vrot.lane.b32.xlu0 %v9667_v30, %s10462_s20  ;;  %v9677_v63 = vpack.i.bf16 %v5218_v58, %v12526_v16  ;;  %v9605_v24 = vunpack.i.l.bf16 %v9604_v47 }
 0x430   :  { %9683 = vrot.lane.b32.xlu1 %v9682_v22, %s10463_s4  ;;  %6303 = vmatprep.mubr.bf16.mxu0 %v10459_v0 }
 0x431   :  { %v4954_v18 = vmax.f32 %v4906_v55, %v4908_v28  ;;  %v4909_v40 = vmax.f32 %v4845_v35, 0.0  ;;  %v5100_v28 = vld [vmem:[#allocation4 + $0x37] sm:$0xff]  ;;  %v5101_v35 = vld [vmem:[#allocation4 + $0x4f] sm:$0xff] }
 0x432   :  { %v5630_v58 = vsel %vm270_vm2, %v5101_v35, %v9601_v19 }
 0x433   :  { %4986 = vst.msk [vmem:[#allocation3 + $0x80] sm:$0xff] %vm270_vm2, %v4954_v18  ;;  %v4955_v4 = vmax.f32 %v4907_v41, %v4909_v40  ;;  %9673 = vrot.lane.b32.xlu0 %v9672_v36, %s10445_s27 }
 0x435   :  { %4987 = vst.msk [vmem:[#allocation3 + $0x88] sm:$0xff] %vm270_vm2, %v4955_v4  ;;  %v5629_v4 = vsel %vm270_vm2, %v5100_v28, %v9600_v11 }
 0x437   :  { %v4625_v34 = vpop.f32.mrb[72].mxu1  ;;  %9678 = vrot.lane.b32.xlu0 %v9677_v63, %s10463_s4  ;;  %v9609_v50 = vpop.permute.xlu0 %9608  ;;  %v5164_v63 = vld [vmem:[#allocation4 + $0x50] sm:$0xff] }
 0x438   :  { %v4627_v61 = vpop.f32.mrb[73].mxu1  ;;  %v4777_v27 = vmul.f32 %v12507_v39, %v4625_v34  ;;  %v9614_v43 = vpop.permute.xlu1 %9613  ;;  %v9610_v5 = vunpack.i.l.bf16 %v9609_v50  ;;  %v9611_v22 = vunpack.i.h.bf16 %v9609_v50  ;;  %v5645_v34 = vsel %vm3955_vm4, %v5629_v4, %v9605_v24 }
 0x439   :  { %v4628_v17 = vpop.f32.mrb[74].mxu1  ;;  %v9616_v15 = vunpack.i.h.bf16 %v9614_v43  ;;  %v9615_v41 = vunpack.i.l.bf16 %v9614_v43  ;;  %v5646_v61 = vsel %vm3955_vm4, %v5630_v58, %v9606_v7 }
 0x43a   :  { %v4630_v53 = vpop.f32.mrb[75].mxu1  ;;  %v4778_v14 = vmul.f32 %v12507_v39, %v4628_v17  ;;  %v4846_v46 = vadd.f32 %v12511_v31, %v4777_v27  ;;  %v5677_v17 = vsel %vm270_vm2, %v5164_v63, %v9610_v5 }
 0x43c   :  { %v5018_v12 = vld [vmem:[#allocation3 + $0x80] ss:$2 sm:$0xff]  ;;  %v5050_v38 = vld [vmem:[#allocation3 + $0x81] ss:$2 sm:$0xff]  ;;  %v4847_v56 = vadd.f32 %v12511_v31, %v4778_v14  ;;  %v4910_v52 = vmax.f32 %v4846_v46, 0.0 }
 0x43d   :  { %v5073_v26 = vmax.f32 %v5018_v12, %v5050_v38 }
 0x43e   :  { %v4911_v6 = vmax.f32 %v4847_v56, 0.0 }
 0x43f   :  { %5090 = vst.msk [vmem:[#allocation4 + $0x110] sm:$0xff] %vm270_vm2, %v5073_v26  ;;  %v5678_v26 = vsel %vm270_vm2, %v12332_v42, %v9611_v22 }
 0x446   :  { %v4633_v20 = vpop.f32.mrb[76].mxu1  ;;  %v12535_v37 = vld [vmem:[#allocation4 + $0x110] sm:$0xff] }
 0x447   :  { %v4779_v29 = vmul.f32 %v12507_v39, %v4633_v20  ;;  %v4635_v33 = vpop.f32.mrb[77].mxu1  ;;  %v9687_v44 = vpack.i.bf16 %v12535_v37, %v5122_v1  ;;  %v12540_v51 = vld [vmem:[#allocation4 + $0x111] sm:$0xff] }
 0x448   :  { %v4636_v8 = vpop.f32.mrb[78].mxu1  ;;  %v9692_v25 = vpack.i.bf16 %v12540_v51, %v5138_v49  ;;  %v5662_v33 = vsel %vm4085_vm6, %v5646_v61, %v9616_v15 }
 0x449   :  { %v4848_v13 = vadd.f32 %v12511_v31, %v4779_v29  ;;  %v4780_v59 = vmul.f32 %v12507_v39, %v4636_v8  ;;  %9688 = vrot.lane.b32.xlu1 %v9687_v44, %s10462_s20  ;;  %v4638_v62 = vpop.f32.mrb[79].mxu1  ;;  %v5661_v29 = vsel %vm4085_vm6, %v5645_v34, %v9615_v41 }
 0x44a   :  { %v5726_v60 = vpack.c.bf16 %v5662_v33, %v5661_v29  ;;  %v12567_v62 = vld [vmem:[#allocation4 + $0x10f] sm:$0xff] }
 0x44b   :  { %v4912_v48 = vmax.f32 %v4848_v13, 0.0  ;;  %v4849_v23 = vadd.f32 %v12511_v31, %v4780_v59 }
 0x44d   :  { %v4956_v9 = vmax.f32 %v4910_v52, %v4912_v48  ;;  %v4913_v3 = vmax.f32 %v4849_v23, 0.0  ;;  %9693 = vrot.lane.b32.xlu1 %v9692_v25, %s10445_s27 }
 0x44f   :  { %4988 = vst.msk [vmem:[#allocation3 + $0x90] sm:$0xff] %vm270_vm2, %v4956_v9  ;;  %v4957_v10 = vmax.f32 %v4911_v6, %v4913_v3 }
 0x451   :  { %4989 = vst.msk [vmem:[#allocation3 + $0x98] sm:$0xff] %vm270_vm2, %v4957_v10 }
 0x453   :  { %v4641_v21 = vpop.f32.mrb[80].mxu1 }
 0x454   :  { %v9619_v32 = vpop.permute.xlu0 %9618  ;;  %v4643_v30 = vpop.f32.mrb[81].mxu1  ;;  %v4781_v42 = vmul.f32 %v12507_v39, %v4641_v21 }
 0x455   :  { %v4644_v55 = vpop.f32.mrb[82].mxu1  ;;  %v9621_v18 = vunpack.i.h.bf16 %v9619_v32  ;;  %v9620_v40 = vunpack.i.l.bf16 %v9619_v32 }
 0x456   :  { %v4646_v36 = vpop.f32.mrb[83].mxu1  ;;  %v4782_v56 = vmul.f32 %v12507_v39, %v4644_v55  ;;  %v4850_v48 = vadd.f32 %v12511_v31, %v4781_v42 }
 0x457   :  { %v5694_v20 = vsel %vm3955_vm4, %v5678_v26, %v9621_v18  ;;  %v5693_v46 = vsel %vm3955_vm4, %v5677_v17, %v9620_v40  ;;  %v9629_v17 = vpop.permute.xlu1 %9628 }
 0x458   :  { %v5020_v53 = vld [vmem:[#allocation3 + $0x90] ss:$2 sm:$0xff]  ;;  %v5052_v12 = vld [vmem:[#allocation3 + $0x91] ss:$2 sm:$0xff]  ;;  %v9624_v38 = vpop.permute.xlu0 %9623  ;;  %v4851_v47 = vadd.f32 %v12511_v31, %v4782_v56  ;;  %v4914_v11 = vmax.f32 %v4850_v48, 0.0 }
 0x459   :  { %v5074_v27 = vmax.f32 %v5020_v53, %v5052_v12  ;;  %v9626_v1 = vunpack.i.h.bf16 %v9624_v38  ;;  %v9625_v14 = vunpack.i.l.bf16 %v9624_v38 }
 0x45b   :  { %5091 = vst.msk [vmem:[#allocation4 + $0x128] sm:$0xff] %vm270_vm2, %v5074_v27  ;;  %v5709_v44 = vsel %vm4085_vm6, %v5693_v46, %v9625_v14  ;;  %v5710_v8 = vsel %vm4085_vm6, %v5694_v20, %v9626_v1 }
 0x45c   :  { %v5727_v49 = vpack.c.bf16 %v5710_v8, %v5709_v44  ;;  %v9634_v8 = vpop.permute.xlu1 %9633 }
 0x45e   :  { %5955 = vmatprep.mubr.bf16.mxu1 %v5727_v49 }
 0x45f   :  { %5956 = vmatmul.mubr.bf16.gmra.mrb[132].mxu1 %v5726_v60 }
 0x462   :  { %v4649_v13 = vpop.f32.mrb[84].mxu1  ;;  %v5187_v59 = vld [vmem:[#allocation4 + $0x129] sm:$0xff] }
 0x463   :  { %v12569_v52 = vld [vmem:[#allocation4 + $0x127] sm:$0xff]  ;;  %v4783_v23 = vmul.f32 %v12507_v39, %v4649_v13  ;;  %v4651_v25 = vpop.f32.mrb[85].mxu1  ;;  %v9697_v6 = vpack.i.bf16 %v5187_v59, %v12540_v51  ;;  %v4915_v51 = vmax.f32 %v4851_v47, 0.0 }
 0x464   :  { %v9702_v9 = vpack.i.bf16 %v12569_v52, %v12567_v62  ;;  %v4652_v3 = vpop.f32.mrb[86].mxu1  ;;  %v12588_v40 = vld [vmem:[#allocation4 + $0x128] sm:$0xff]  ;;  %v9630_v25 = vunpack.i.l.bf16 %v9629_v17 }
 0x465   :  { %v4852_v10 = vadd.f32 %v12511_v31, %v4783_v23  ;;  %v4784_v50 = vmul.f32 %v12507_v39, %v4652_v3  ;;  %9698 = vrot.lane.b32.xlu0 %v9697_v6, %s10462_s20  ;;  %v4654_v19 = vpop.f32.mrb[87].mxu1  ;;  %v9631_v23 = vunpack.i.h.bf16 %v9629_v17  ;;  %v9635_v3 = vunpack.i.l.bf16 %v9634_v8 }
 0x466   :  { %9703 = vrot.lane.b32.xlu1 %v9702_v9, %s10463_s4  ;;  %v9636_v9 = vunpack.i.h.bf16 %v9634_v8 }
 0x467   :  { %v4916_v43 = vmax.f32 %v4852_v10, 0.0  ;;  %v4853_v21 = vadd.f32 %v12511_v31, %v4784_v50 }
 0x469   :  { %v4958_v7 = vmax.f32 %v4914_v11, %v4916_v43  ;;  %v4917_v24 = vmax.f32 %v4853_v21, 0.0  ;;  %v5102_v21 = vld [vmem:[#allocation4 + $0x67] sm:$0xff] }
 0x46b   :  { %4990 = vst.msk [vmem:[#allocation3 + $0xa0] sm:$0xff] %vm270_vm2, %v4958_v7  ;;  %v4959_v5 = vmax.f32 %v4915_v51, %v4917_v24 }
 0x46d   :  { %4991 = vst.msk [vmem:[#allocation3 + $0xa8] sm:$0xff] %vm270_vm2, %v4959_v5  ;;  %v5631_v5 = vsel %vm270_vm2, %v5102_v21, %v9630_v25 }
 0x46f   :  { %v4657_v32 = vpop.f32.mrb[88].mxu1  ;;  %v9639_v56 = vpop.permute.xlu0 %9638 }
 0x470   :  { %v4659_v30 = vpop.f32.mrb[89].mxu1  ;;  %v4785_v41 = vmul.f32 %v12507_v39, %v4657_v32  ;;  %v9644_v48 = vpop.permute.xlu1 %9643  ;;  %v9640_v47 = vunpack.i.l.bf16 %v9639_v56  ;;  %v9641_v19 = vunpack.i.h.bf16 %v9639_v56  ;;  %v10165_v32 = vld [vmem:[#allocation4 + $0x7f] sm:$0xff] }
 0x471   :  { %v4660_v22 = vpop.f32.mrb[90].mxu1  ;;  %v9645_v11 = vunpack.i.l.bf16 %v9644_v48  ;;  %v9646_v51 = vunpack.i.h.bf16 %v9644_v48  ;;  %v5632_v30 = vsel %vm270_vm2, %v10165_v32, %v9631_v23 }
 0x472   :  { %v4662_v55 = vpop.f32.mrb[91].mxu1  ;;  %v4786_v4 = vmul.f32 %v12507_v39, %v4660_v22  ;;  %v4854_v53 = vadd.f32 %v12511_v31, %v4785_v41  ;;  %v5166_v22 = vld [vmem:[#allocation4 + $0x80] sm:$0xff]  ;;  %v5680_v41 = vsel %vm270_vm2, %v12477_v2, %v9641_v19 }
 0x473   :  { %v5647_v55 = vsel %vm3955_vm4, %v5631_v5, %v9635_v3 }
 0x474   :  { %v5022_v28 = vld [vmem:[#allocation3 + $0xa0] ss:$2 sm:$0xff]  ;;  %v5054_v35 = vld [vmem:[#allocation3 + $0xa1] ss:$2 sm:$0xff]  ;;  %v4855_v27 = vadd.f32 %v12511_v31, %v4786_v4  ;;  %v4918_v29 = vmax.f32 %v4854_v53, 0.0  ;;  %v5663_v17 = vsel %vm4085_vm6, %v5647_v55, %v9645_v11 }
 0x475   :  { %v5075_v15 = vmax.f32 %v5022_v28, %v5054_v35  ;;  %v5648_v28 = vsel %vm3955_vm4, %v5632_v30, %v9636_v9  ;;  %v5679_v35 = vsel %vm270_vm2, %v5166_v22, %v9640_v47 }
 0x476   :  { %v4919_v49 = vmax.f32 %v4855_v27, 0.0 }
 0x477   :  { %5092 = vst.msk [vmem:[#allocation4 + $0x140] sm:$0xff] %vm270_vm2, %v5075_v15 }
 0x47e   :  { %v12586_v18 = vld [vmem:[#allocation4 + $0x13f] sm:$0xff]  ;;  %v4665_v34 = vpop.f32.mrb[92].mxu1 }
 0x47f   :  { %v12590_v36 = vld [vmem:[#allocation4 + $0x140] sm:$0xff]  ;;  %v9707_v58 = vpack.i.bf16 %v12586_v18, %v12569_v52  ;;  %v4787_v12 = vmul.f32 %v12507_v39, %v4665_v34  ;;  %v4667_v38 = vpop.f32.mrb[93].mxu1 }
 0x480   :  { %v9717_v63 = vpack.i.bf16 %v12590_v36, %v12588_v40  ;;  %v12597_v61 = vld [vmem:[#allocation4 + $0x141] sm:$0xff]  ;;  %v4668_v26 = vpop.f32.mrb[94].mxu1 }
 0x481   :  { %9708 = vrot.lane.b32.xlu0 %v9707_v58, %s10445_s27  ;;  %v4856_v1 = vadd.f32 %v12511_v31, %v4787_v12  ;;  %v4788_v14 = vmul.f32 %v12507_v39, %v4668_v26  ;;  %v4670_v20 = vpop.f32.mrb[95].mxu1  ;;  %v9722_v46 = vpack.i.bf16 %v12597_v61, %v5187_v59  ;;  %v5664_v26 = vsel %vm4085_vm6, %v5648_v28, %v9646_v51 }
 0x482   :  { %9718 = vrot.lane.b32.xlu1 %v9717_v63, %s10462_s20 }
 0x483   :  { %v4920_v33 = vmax.f32 %v4856_v1, 0.0  ;;  %v4857_v44 = vadd.f32 %v12511_v31, %v4788_v14  ;;  %v5729_v14 = vpack.c.bf16 %v5664_v26, %v5663_v17 }
 0x485   :  { %9713 = vrot.lane.b32.xlu0 %v9717_v63, %s10463_s4  ;;  %v4960_v60 = vmax.f32 %v4918_v29, %v4920_v33  ;;  %v4921_v42 = vmax.f32 %v4857_v44, 0.0 }
 0x486   :  { %9723 = vrot.lane.b32.xlu1 %v9722_v46, %s10445_s27 }
 0x487   :  { %4992 = vst.msk [vmem:[#allocation3 + $0xb0] sm:$0xff] %vm270_vm2, %v4960_v60  ;;  %v4961_v13 = vmax.f32 %v4919_v49, %v4921_v42 }
 0x489   :  { %4993 = vst.msk [vmem:[#allocation3 + $0xb8] sm:$0xff] %vm270_vm2, %v4961_v13 }
 0x48b   :  { %v4673_v59 = vpop.f32.mrb[96].mxu1 }
 0x48c   :  { %v4675_v6 = vpop.f32.mrb[97].mxu1  ;;  %v9649_v10 = vpop.permute.xlu0 %9648  ;;  %v4789_v20 = vmul.f32 %v12507_v39, %v4673_v59 }
 0x48d   :  { %v4676_v50 = vpop.f32.mrb[98].mxu1  ;;  %v9651_v7 = vunpack.i.h.bf16 %v9649_v10  ;;  %v9650_v24 = vunpack.i.l.bf16 %v9649_v10  ;;  %v9659_v46 = vpop.permute.xlu1 %9658 }
 0x48e   :  { %v4678_v43 = vpop.f32.mrb[99].mxu1  ;;  %v4790_v29 = vmul.f32 %v12507_v39, %v4676_v50  ;;  %v4858_v49 = vadd.f32 %v12511_v31, %v4789_v20  ;;  %v9661_v21 = vunpack.i.h.bf16 %v9659_v46  ;;  %v9660_v51 = vunpack.i.l.bf16 %v9659_v46 }
 0x48f   :  { %v5696_v12 = vsel %vm3955_vm4, %v5680_v41, %v9651_v7  ;;  %v5695_v38 = vsel %vm3955_vm4, %v5679_v35, %v9650_v24 }
 0x490   :  { %v9654_v15 = vpop.permute.xlu0 %9653  ;;  %v5024_v4 = vld [vmem:[#allocation3 + $0xb0] ss:$2 sm:$0xff]  ;;  %v5056_v58 = vld [vmem:[#allocation3 + $0xb1] ss:$2 sm:$0xff]  ;;  %v4859_v59 = vadd.f32 %v12511_v31, %v4790_v29  ;;  %v4922_v9 = vmax.f32 %v4858_v49, 0.0 }
 0x491   :  { %v9656_v63 = vunpack.i.h.bf16 %v9654_v15  ;;  %v9655_v34 = vunpack.i.l.bf16 %v9654_v15  ;;  %v5076_v53 = vmax.f32 %v5024_v4, %v5056_v58  ;;  %v9664_v3 = vpop.permute.xlu1 %9663 }
 0x492   :  { %v4923_v19 = vmax.f32 %v4859_v59, 0.0  ;;  %v9666_v5 = vunpack.i.h.bf16 %v9664_v3  ;;  %v9665_v32 = vunpack.i.l.bf16 %v9664_v3 }
 0x493   :  { %v5711_v27 = vsel %vm4085_vm6, %v5695_v38, %v9655_v34  ;;  %v5712_v1 = vsel %vm4085_vm6, %v5696_v12, %v9656_v63  ;;  %5093 = vst.msk [vmem:[#allocation4 + $0x158] sm:$0xff] %vm270_vm2, %v5076_v53  ;;  %v5633_v63 = vsel %vm270_vm2, %v12411_v57, %v9660_v51  ;;  %v5634_v34 = vsel %vm270_vm2, %v12473_v45, %v9661_v21 }
 0x494   :  { %v5730_v2 = vpack.c.bf16 %v5712_v1, %v5711_v27  ;;  %v5649_v53 = vsel %vm3955_vm4, %v5633_v63, %v9665_v32  ;;  %v5650_v12 = vsel %vm3955_vm4, %v5634_v34, %v9666_v5 }
 0x496   :  { %5963 = vmatprep.mubr.bf16.mxu1 %v5730_v2 }
 0x497   :  { %5964 = vmatmul.mubr.bf16.gmra.mrb[136].mxu1 %v5729_v14 }
 0x49a   :  { %v4681_v33 = vpop.f32.mrb[100].mxu1  ;;  %v12628_v44 = vld [vmem:[#allocation4 + $0x159] sm:$0xff] }
 0x49b   :  { %v12630_v8 = vld [vmem:[#allocation4 + $0x157] sm:$0xff]  ;;  %v4791_v60 = vmul.f32 %v12507_v39, %v4681_v33  ;;  %v4683_v42 = vpop.f32.mrb[101].mxu1  ;;  %v9727_v56 = vpack.i.bf16 %v12628_v44, %v12597_v61 }
 0x49c   :  { %v9732_v13 = vpack.i.bf16 %v12630_v8, %v12586_v18  ;;  %v4684_v48 = vpop.f32.mrb[102].mxu1 }
 0x49d   :  { %v4860_v23 = vadd.f32 %v12511_v31, %v4791_v60  ;;  %v4792_v25 = vmul.f32 %v12507_v39, %v4684_v48  ;;  %9728 = vrot.lane.b32.xlu0 %v9727_v56, %s10462_s20  ;;  %v4686_v6 = vpop.f32.mrb[103].mxu1 }
 0x49e   :  { %9733 = vrot.lane.b32.xlu1 %v9732_v13, %s10463_s4 }
 0x49f   :  { %v4924_v47 = vmax.f32 %v4860_v23, 0.0  ;;  %v4861_v10 = vadd.f32 %v12511_v31, %v4792_v25  ;;  %v12671_v25 = vld [vmem:[#allocation4 + $0x158] sm:$0xff] }
 0x4a1   :  { %v9669_v50 = vpop.permute.xlu0 %9668  ;;  %v4962_v11 = vmax.f32 %v4922_v9, %v4924_v47  ;;  %v4925_v43 = vmax.f32 %v4861_v10, 0.0 }
 0x4a2   :  { %v9684_v24 = vpop.permute.xlu1 %9683  ;;  %v9671_v22 = vunpack.i.h.bf16 %v9669_v50  ;;  %v9670_v55 = vunpack.i.l.bf16 %v9669_v50 }
 0x4a3   :  { %4994 = vst.msk [vmem:[#allocation3 + $0xc0] sm:$0xff] %vm270_vm2, %v4962_v11  ;;  %v4963_v7 = vmax.f32 %v4923_v19, %v4925_v43  ;;  %v9686_v35 = vunpack.i.h.bf16 %v9684_v24  ;;  %v9685_v15 = vunpack.i.l.bf16 %v9684_v24 }
 0x4a4   :  { %v5681_v27 = vsel %vm270_vm2, %v12475_v54, %v9670_v55  ;;  %v5682_v1 = vsel %vm270_vm2, %v12526_v16, %v9671_v22 }
 0x4a5   :  { %v9674_v30 = vpop.permute.xlu0 %9673  ;;  %4995 = vst.msk [vmem:[#allocation3 + $0xc8] sm:$0xff] %vm270_vm2, %v4963_v7  ;;  %v5665_v45 = vsel %vm4085_vm6, %v5649_v53, %v9685_v15  ;;  %v5666_v46 = vsel %vm4085_vm6, %v5650_v12, %v9686_v35 }
 0x4a6   :  { %v9676_v41 = vunpack.i.h.bf16 %v9674_v30  ;;  %v9675_v4 = vunpack.i.l.bf16 %v9674_v30  ;;  %v5732_v42 = vpack.c.bf16 %v5666_v46, %v5665_v45 }
 0x4a7   :  { %v4689_v28 = vpop.f32.mrb[104].mxu1 }
 0x4a8   :  { %v4691_v58 = vpop.f32.mrb[105].mxu1  ;;  %v5697_v57 = vsel %vm3955_vm4, %v5681_v27, %v9675_v4  ;;  %v5698_v20 = vsel %vm3955_vm4, %v5682_v1, %v9676_v41  ;;  %v4793_v16 = vmul.f32 %v12507_v39, %v4689_v28 }
 0x4a9   :  { %v4692_v17 = vpop.f32.mrb[106].mxu1  ;;  %v9679_v38 = vpop.permute.xlu0 %9678 }
 0x4aa   :  { %v4694_v26 = vpop.f32.mrb[107].mxu1  ;;  %v9681_v2 = vunpack.i.h.bf16 %v9679_v38  ;;  %v9680_v14 = vunpack.i.l.bf16 %v9679_v38  ;;  %v4794_v59 = vmul.f32 %v12507_v39, %v4692_v17  ;;  %v4862_v50 = vadd.f32 %v12511_v31, %v4793_v16 }
 0x4ac   :  { %v5713_v29 = vsel %vm4085_vm6, %v5697_v57, %v9680_v14  ;;  %v5714_v33 = vsel %vm4085_vm6, %v5698_v20, %v9681_v2  ;;  %v5026_v49 = vld [vmem:[#allocation3 + $0xc0] ss:$2 sm:$0xff]  ;;  %v5058_v60 = vld [vmem:[#allocation3 + $0xc1] ss:$2 sm:$0xff]  ;;  %v4863_v24 = vadd.f32 %v12511_v31, %v4794_v59  ;;  %v4926_v22 = vmax.f32 %v4862_v50, 0.0 }
 0x4ad   :  { %v5733_v54 = vpack.c.bf16 %v5714_v33, %v5713_v29  ;;  %v5077_v56 = vmax.f32 %v5026_v49, %v5058_v60 }
 0x4ae   :  { %v4927_v15 = vmax.f32 %v4863_v24, 0.0 }
 0x4af   :  { %5971 = vmatprep.mubr.bf16.mxu1 %v5733_v54  ;;  %5094 = vst.msk [vmem:[#allocation4 + $0x170] sm:$0xff] %vm270_vm2, %v5077_v56 }
 0x4b0   :  { %5972 = vmatmul.mubr.bf16.gmra.mrb[140].mxu1 %v5732_v42 }
 0x4b4   :  { %v12664_v13 = vpop.f32.mrb[128].mxu0 }
 0x4b5   :  { %v12666_v48 = vpop.f32.mrb[129].mxu0 }
 0x4b6   :  { %v12669_v23 = vpop.f32.mrb[130].mxu0  ;;  %v4697_v6 = vpop.f32.mrb[108].mxu1  ;;  %v12675_v3 = vld [vmem:[#allocation4 + $0x16f] sm:$0xff] }
 0x4b7   :  { %v12673_v9 = vpop.f32.mrb[131].mxu0  ;;  %v12677_v47 = vld [vmem:[#allocation4 + $0x170] sm:$0xff]  ;;  %v4795_v19 = vmul.f32 %v12507_v39, %v4697_v6  ;;  %v4699_v11 = vpop.f32.mrb[109].mxu1  ;;  %v9737_v43 = vpack.i.bf16 %v12675_v3, %v12630_v8 }
 0x4b8   :  { %v12679_v10 = vld [vmem:[#allocation4 + $0x171] sm:$0xff]  ;;  %v9747_v21 = vpack.i.bf16 %v12677_v47, %v12671_v25  ;;  %v4700_v51 = vpop.f32.mrb[110].mxu1 }
 0x4b9   :  { %v5740_v7 = vpack.c.bf16 %v12679_v10, %v12628_v44  ;;  %v4864_v5 = vadd.f32 %v12511_v31, %v4795_v19  ;;  %v4796_v32 = vmul.f32 %v12507_v39, %v4700_v51  ;;  %9738 = vrot.lane.b32.xlu0 %v9737_v43, %s10445_s27  ;;  %v4702_v30 = vpop.f32.mrb[111].mxu1  ;;  %v9752_v35 = vpack.i.bf16 %v12679_v10, %v12628_v44 }
 0x4ba   :  { %9748 = vrot.lane.b32.xlu1 %v9747_v21, %s10462_s20 }
 0x4bb   :  { %v4928_v55 = vmax.f32 %v4864_v5, 0.0  ;;  %v4865_v28 = vadd.f32 %v12511_v31, %v4796_v32 }
 0x4bd   :  { %v4964_v41 = vmax.f32 %v4926_v22, %v4928_v55  ;;  %v4929_v4 = vmax.f32 %v4865_v28, 0.0  ;;  %9743 = vrot.lane.b32.xlu0 %v9747_v21, %s10463_s4  ;;  %v9689_v22 = vpop.permute.xlu1 %9688 }
 0x4be   :  { %9753 = vrot.lane.b32.xlu1 %v9752_v35, %s10445_s27 }
 0x4bf   :  { %4996 = vst.msk [vmem:[#allocation3 + $0xd0] sm:$0xff] %vm270_vm2, %v4964_v41  ;;  %v4965_v58 = vmax.f32 %v4927_v15, %v4929_v4 }
 0x4c1   :  { %4997 = vst.msk [vmem:[#allocation3 + $0xd8] sm:$0xff] %vm270_vm2, %v4965_v58 }
 0x4c3   :  { %v4705_v63 = vpop.f32.mrb[112].mxu1 }
 0x4c4   :  { %v4707_v34 = vpop.f32.mrb[113].mxu1  ;;  %v4797_v27 = vmul.f32 %v12507_v39, %v4705_v63 }
 0x4c5   :  { %v4708_v17 = vpop.f32.mrb[114].mxu1 }
 0x4c6   :  { %v4710_v53 = vpop.f32.mrb[115].mxu1  ;;  %v4798_v1 = vmul.f32 %v12507_v39, %v4708_v17  ;;  %v4866_v20 = vadd.f32 %v12511_v31, %v4797_v27  ;;  %v9694_v17 = vpop.permute.xlu1 %9693 }
 0x4c8   :  { %v5028_v12 = vld [vmem:[#allocation3 + $0xd0] ss:$2 sm:$0xff]  ;;  %v5060_v38 = vld [vmem:[#allocation3 + $0xd1] ss:$2 sm:$0xff]  ;;  %v4867_v60 = vadd.f32 %v12511_v31, %v4798_v1  ;;  %v4930_v16 = vmax.f32 %v4866_v20, 0.0 }
 0x4c9   :  { %v5078_v26 = vmax.f32 %v5028_v12, %v5060_v38 }
 0x4ca   :  { %v4931_v50 = vmax.f32 %v4867_v60, 0.0 }
 0x4cb   :  { %5095 = vst.msk [vmem:[#allocation4 + $0x188] sm:$0xff] %vm270_vm2, %v5078_v26 }
 0x4d2   :  { %v4713_v2 = vpop.f32.mrb[116].mxu1  ;;  %v12704_v14 = vld [vmem:[#allocation4 + $0x189] sm:$0xff] }
 0x4d3   :  { %v12706_v57 = vld [vmem:[#allocation4 + $0x187] sm:$0xff]  ;;  %v4799_v45 = vmul.f32 %v12507_v39, %v4713_v2  ;;  %v4715_v46 = vpop.f32.mrb[117].mxu1  ;;  %v9757_v29 = vpack.i.bf16 %v12704_v14, %v12679_v10 }
 0x4d4   :  { %v9762_v33 = vpack.i.bf16 %v12706_v57, %v12675_v3  ;;  %v4716_v49 = vpop.f32.mrb[118].mxu1  ;;  %v12731_v20 = vld [vmem:[#allocation4 + $0x188] sm:$0xff] }
 0x4d5   :  { %v4868_v54 = vadd.f32 %v12511_v31, %v4799_v45  ;;  %v4800_v42 = vmul.f32 %v12507_v39, %v4716_v49  ;;  %9758 = vrot.lane.b32.xlu0 %v9757_v29, %s10462_s20  ;;  %v4718_v56 = vpop.f32.mrb[119].mxu1 }
 0x4d6   :  { %9763 = vrot.lane.b32.xlu1 %v9762_v33, %s10463_s4  ;;  %v9691_v56 = vunpack.i.h.bf16 %v9689_v22 }
 0x4d7   :  { %v4932_v59 = vmax.f32 %v4868_v54, 0.0  ;;  %v4869_v6 = vadd.f32 %v12511_v31, %v4800_v42  ;;  %v9699_v26 = vpop.permute.xlu0 %9698 }
 0x4d8   :  { %v9704_v49 = vpop.permute.xlu1 %9703 }
 0x4d9   :  { %v4966_v19 = vmax.f32 %v4930_v16, %v4932_v59  ;;  %v4933_v11 = vmax.f32 %v4869_v6, 0.0  ;;  %v5106_v59 = vld [vmem:[#allocation4 + $0xf7] sm:$0xff]  ;;  %v9696_v6 = vunpack.i.h.bf16 %v9694_v17 }
 0x4db   :  { %4998 = vst.msk [vmem:[#allocation3 + $0xe0] sm:$0xff] %vm270_vm2, %v4966_v19  ;;  %v4967_v43 = vmax.f32 %v4931_v50, %v4933_v11  ;;  %v9695_v50 = vunpack.i.l.bf16 %v9694_v17 }
 0x4dd   :  { %4999 = vst.msk [vmem:[#allocation3 + $0xe8] sm:$0xff] %vm270_vm2, %v4967_v43  ;;  %v9701_v43 = vunpack.i.h.bf16 %v9699_v26 }
 0x4df   :  { %v4721_v21 = vpop.f32.mrb[120].mxu1 }
 0x4e0   :  { %v4723_v51 = vpop.f32.mrb[121].mxu1  ;;  %v4801_v55 = vmul.f32 %v12507_v39, %v4721_v21  ;;  %v9700_v21 = vunpack.i.l.bf16 %v9699_v26 }
 0x4e1   :  { %v4724_v24 = vpop.f32.mrb[122].mxu1  ;;  %v9706_v51 = vunpack.i.h.bf16 %v9704_v49 }
 0x4e2   :  { %v4726_v5 = vpop.f32.mrb[123].mxu1  ;;  %v4802_v35 = vmul.f32 %v12507_v39, %v4724_v24  ;;  %v4870_v41 = vadd.f32 %v12511_v31, %v4801_v55  ;;  %v9705_v24 = vunpack.i.l.bf16 %v9704_v49  ;;  %v5636_v55 = vsel %vm270_vm2, %v12567_v62, %v9691_v56 }
 0x4e4   :  { %v5030_v32 = vld [vmem:[#allocation3 + $0xe0] ss:$2 sm:$0xff]  ;;  %v5062_v30 = vld [vmem:[#allocation3 + $0xe1] ss:$2 sm:$0xff]  ;;  %v4871_v63 = vadd.f32 %v12511_v31, %v4802_v35  ;;  %v4934_v27 = vmax.f32 %v4870_v41, 0.0  ;;  %v5652_v35 = vsel %vm3955_vm4, %v5636_v55, %v9696_v6  ;;  %v5683_v41 = vsel %vm270_vm2, %v12535_v37, %v9700_v21 }
 0x4e5   :  { %v5079_v28 = vmax.f32 %v5030_v32, %v5062_v30 }
 0x4e6   :  { %v4935_v45 = vmax.f32 %v4871_v63, 0.0 }
 0x4e7   :  { %5096 = vst.msk [vmem:[#allocation4 + $0x1a0] sm:$0xff] %vm270_vm2, %v5079_v28 }
 0x4ea   :  { %v4729_v15 = vpop.f32.mrb[124].mxu1 }
 0x4eb   :  { %v4803_v4 = vmul.f32 %v12507_v39, %v4729_v15  ;;  %v4731_v58 = vpop.f32.mrb[125].mxu1 }
 0x4ec   :  { %v4732_v34 = vpop.f32.mrb[126].mxu1 }
 0x4ed   :  { %v4872_v53 = vadd.f32 %v12511_v31, %v4803_v4  ;;  %v4804_v12 = vmul.f32 %v12507_v39, %v4732_v34  ;;  %v4734_v38 = vpop.f32.mrb[127].mxu1  ;;  %v5684_v4 = vsel %vm270_vm2, %v12588_v40, %v9701_v43 }
 0x4ee   :  { %v12733_v46 = vld [vmem:[#allocation4 + $0x19f] sm:$0xff] }
 0x4ef   :  { %v4936_v1 = vmax.f32 %v4872_v53, 0.0  ;;  %v4873_v2 = vadd.f32 %v12511_v31, %v4804_v12  ;;  %v12735_v29 = vld [vmem:[#allocation4 + $0x1a0] sm:$0xff]  ;;  %v9767_v39 = vpack.i.bf16 %v12733_v46, %v12706_v57  ;;  %v9690_v31 = vunpack.i.l.bf16 %v9689_v22 }
 0x4f0   :  { %v12737_v33 = vld [vmem:[#allocation4 + $0x1a1] sm:$0xff]  ;;  %v9777_v42 = vpack.i.bf16 %v12735_v29, %v12731_v20  ;;  %v5668_v53 = vsel %vm4085_vm6, %v5652_v35, %v9706_v51 }
 0x4f1   :  { %v4968_v60 = vmax.f32 %v4934_v27, %v4936_v1  ;;  %v4937_v54 = vmax.f32 %v4873_v2, 0.0  ;;  %v5743_v16 = vpack.c.bf16 %v12737_v33, %v12704_v14  ;;  %9768 = vrot.lane.b32.xlu0 %v9767_v39, %s10445_s27  ;;  %v9782_v30 = vpack.i.bf16 %v12737_v33, %v12704_v14  ;;  %v9946_v14 = vld [vmem:[#allocation18 + $0x40] ss:$8 sps:$4 sm:$0xff]  }
 0x4f2   :  { %9778 = vrot.lane.b32.xlu1 %v9777_v42, %s10462_s20  ;;  %v5635_v22 = vsel %vm270_vm2, %v5106_v59, %v9690_v31  ;;  %v12772_v31 = vld [vmem:[#allocation17 + $0x1] ss:$0 sm:$0xff] }
 0x4f3   :  { %5000 = vst.msk [vmem:[#allocation3 + $0xf0] sm:$0xff] %vm270_vm2, %v4968_v60  ;;  %v4969_v19 = vmax.f32 %v4935_v45, %v4937_v54  ;;  %v9709_v11 = vpop.permute.xlu0 %9708  ;;  %v5651_v28 = vsel %vm3955_vm4, %v5635_v22, %v9695_v50  ;;  %v12768_v54 = vld [vmem:[#allocation17] ss:$0 sm:$0xff] }
 0x4f4   :  { %v9711_v5 = vunpack.i.h.bf16 %v9709_v11  ;;  %v9710_v32 = vunpack.i.l.bf16 %v9709_v11  ;;  %v5667_v17 = vsel %vm4085_vm6, %v5651_v28, %v9705_v24  ;;  %v5210_v28 = vld [vmem:[#allocation4 + $0x1cf] sm:$0xff] }
 0x4f5   :  { %5001 = vst.msk [vmem:[#allocation3 + $0xf8] sm:$0xff] %vm270_vm2, %v4969_v19  ;;  %9773 = vrot.lane.b32.xlu0 %v9777_v42, %s10463_s4  ;;  %v5735_v49 = vpack.c.bf16 %v5668_v53, %v5667_v17 }
 0x4f6   :  { %9783 = vrot.lane.b32.xlu1 %v9782_v30, %s10445_s27  ;;  %v5700_v34 = vsel %vm3955_vm4, %v5684_v4, %v9711_v5  ;;  %v5699_v62 = vsel %vm3955_vm4, %v5683_v41, %v9710_v32  ;;  %v5226_v41 = vld [vmem:[#allocation4 + $0x1d0] sm:$0xff] }
 0x4f7   :  { %v9714_v15 = vpop.permute.xlu0 %9713 }
 0x4f8   :  { %v9716_v58 = vunpack.i.h.bf16 %v9714_v15  ;;  %v9715_v63 = vunpack.i.l.bf16 %v9714_v15 }
 0x4fa   :  { %v8319_v12 = vpop.f32.mrb[128].mxu1  ;;  %v5715_v38 = vsel %vm4085_vm6, %v5699_v62, %v9715_v63  ;;  %v5716_v26 = vsel %vm4085_vm6, %v5700_v34, %v9716_v58  ;;  %v9719_v58 = vpop.permute.xlu1 %9718 }
 0x4fb   :  { %v8320_v27 = vpop.f32.mrb[129].mxu1  ;;  %v5736_v37 = vpack.c.bf16 %v5716_v26, %v5715_v38  ;;  %v9721_v17 = vunpack.i.h.bf16 %v9719_v58  ;;  %v9720_v53 = vunpack.i.l.bf16 %v9719_v58 }
 0x4fc   :  { %v5032_v1 = vld [vmem:[#allocation3 + $0xf0] ss:$2 sm:$0xff]  ;;  %v5064_v2 = vld [vmem:[#allocation3 + $0xf1] ss:$2 sm:$0xff]  ;;  %v8321_v40 = vadd.f32 %v8320_v27, %v8319_v12  ;;  %v8322_v45 = vpop.f32.mrb[130].mxu1 }
 0x4fd   :  { %v5080_v60 = vmax.f32 %v5032_v1, %v5064_v2  ;;  %v8323_v39 = vpop.f32.mrb[131].mxu1  ;;  %5979 = vmatprep.mubr.bf16.mxu1 %v5736_v37 }
 0x4fe   :  { %v6047_v42 = vadd.f32 %v8321_v40, %v12666_v48  ;;  %v8324_v56 = vadd.f32 %v8323_v39, %v8322_v45  ;;  %5980 = vmatmul.mubr.bf16.gmra.mrb[144].mxu1 %v5735_v49  ;;  %v9724_v63 = vpop.permute.xlu1 %9723  ;;  %v5637_v49 = vsel %vm270_vm2, %v12569_v52, %v9720_v53 }
 0x4ff   :  { %5097 = vst.msk [vmem:[#allocation4 + $0x1b8] sm:$0xff] %vm270_vm2, %v5080_v60  ;;  %v9725_v38 = vunpack.i.l.bf16 %v9724_v63  ;;  %v9726_v27 = vunpack.i.h.bf16 %v9724_v63  ;;  %v5638_v60 = vsel %vm270_vm2, %v12586_v18, %v9721_v17 }
 0x500   :  { %v6114_v59 = vmul.f32 %v12768_v54, %v6047_v42  ;;  %v6050_v6 = vadd.f32 %v8324_v56, %v12673_v9 }
 0x501   :  { %v5653_v42 = vsel %vm3955_vm4, %v5637_v49, %v9725_v38 }
 0x502   :  { %v6135_v50 = vadd.f32 %v12772_v31, %v6114_v59  ;;  %v6115_v19 = vmul.f32 %v12768_v54, %v6050_v6  ;;  %v12778_v11 = vpop.f32.mrb[132].mxu0 }
 0x503   :  { %v12781_v21 = vpop.f32.mrb[133].mxu0 }
 0x504   :  { %v6136_v43 = vadd.f32 %v12772_v31, %v6115_v19  ;;  %v12783_v48 = vpop.f32.mrb[134].mxu0  ;;  %v6151_v51 = vmax.f32 %v6135_v50, 0.0  ;;  %v5654_v19 = vsel %vm3955_vm4, %v5638_v60, %v9726_v27 }
 0x505   :  { %v12785_v5 = vpop.f32.mrb[135].mxu0 }
 0x506   :  { %v6152_v24 = vmax.f32 %v6136_v43, 0.0  ;;  %v12787_v32 = vld [vmem:[#allocation4 + $0x1b9] sm:$0xff] }
 0x507   :  { %v5161_v30 = vld [vmem:[#allocation4 + $0x1b7] sm:$0xff]  ;;  %v9787_v9 = vpack.i.bf16 %v12787_v32, %v12737_v33  ;;  %v9951_v33 = vld [vmem:[#allocation18 + $0x4] ss:$8 sps:$4 sm:$0xff]  }
 0x508   :  { %v9802_v22 = vpack.i.bf16 %v5161_v30, %v12733_v46  ;;  %v6167_v55 = vmax.f32 %v6151_v51, %v6152_v24  ;;  %v9792_v35 = vpack.i.bf16 %v5210_v28, %v5161_v30  ;;  %v12795_v15 = vld [vmem:[#allocation4 + $0x1b8] sm:$0xff]  ;;  %6358 = vmatprep.subr.bf16.mxu1 %v9951_v33 }
 0x509   :  { %9788 = vrot.lane.b32.xlu0 %v9787_v9, %s10462_s20  ;;  %v9797_v4 = vpack.i.bf16 %v5226_v41, %v12795_v15 }
 0x50a   :  { %9803 = vrot.lane.b32.xlu1 %v9802_v22, %s10463_s4  ;;  %6175 = vst.msk [vmem:[#allocation5] sm:$0xff] %vm3955_vm4, %v6167_v55 }
 0x50d   :  { %9793 = vrot.lane.b32.xlu0 %v9792_v35, %s10445_s27  ;;  %s10467_s27 = smov [#allocation24]  }
 0x50e   :  { %s7975_s30 = sshll.u32 %s10467_s27, 4  ;;  %s7976_s30 = int_to_ptr.vmem [resolvable:$true] %s7975_s30 }
 0x50f   :  { %v9729_v34 = vpop.permute.xlu0 %9728  ;;  %s10408_s24 = scalar_lea.vmem %s7976_s30, 32  ;;  %p10413_p5 = scmp.lt.s32.totalorder %s7976_s30, %s7976_s30 }
 0x510   :  { %v9734_v62 = vpop.permute.xlu1 %9733  ;;  %v9730_v26 = vunpack.i.l.bf16 %v9729_v34  ;;  %v9731_v37 = vunpack.i.h.bf16 %v9729_v34  ;;  %p10409_p4 = scmp.ne.s32.totalorder %s7976_s30, %s10408_s24  ;;  %p10414_p6 = scmp.lt.s32.totalorder %s10408_s24, %s10408_s24 }
 0x511   :  { %9798 = vrot.lane.b32.xlu0 %v9797_v4, %s10463_s4  ;;  %v9735_v1 = vunpack.i.l.bf16 %v9734_v62  ;;  %v9736_v40 = vunpack.i.h.bf16 %v9734_v62 }
 0x512   :  { %v5685_v56 = vsel %vm270_vm2, %v12590_v36, %v9730_v26  ;;  %v5686_v43 = vsel %vm270_vm2, %v12671_v25, %v9731_v37  ;;  %p10415_p7 = por %p10414_p6, %p10413_p5 }
 0x513   :  { %v5669_v24 = vsel %vm4085_vm6, %v5653_v42, %v9735_v1  ;;  %v5670_v36 = vsel %vm4085_vm6, %v5654_v19, %v9736_v40 }
 0x514   :  { %v5738_v4 = vpack.c.bf16 %v5670_v36, %v5669_v24  ;;  %p10416_p8 = pnand %p10415_p7, %p10409_p4 }
 0x52b   :  { %v9739_v12 = vpop.permute.xlu0 %9738 }
 0x52c   :  { %v9740_v2 = vunpack.i.l.bf16 %v9739_v12  ;;  %v9741_v45 = vunpack.i.h.bf16 %v9739_v12 }
 0x52e   :  { %v5701_v51 = vsel %vm3955_vm4, %v5685_v56, %v9740_v2  ;;  %v5702_v18 = vsel %vm3955_vm4, %v5686_v43, %v9741_v45 }
 0x52f   :  { %v9744_v39 = vpop.permute.xlu0 %9743 }
 0x530   :  { %v9746_v59 = vunpack.i.h.bf16 %v9744_v39  ;;  %v9745_v6 = vunpack.i.l.bf16 %v9744_v39 }
 0x532   :  { %v8325_v50 = vpop.f32.mrb[132].mxu1  ;;  %v5717_v22 = vsel %vm4085_vm6, %v5701_v51, %v9745_v6  ;;  %v5718_v28 = vsel %vm4085_vm6, %v5702_v18, %v9746_v59 }
 0x533   :  { %v8326_v52 = vpop.f32.mrb[133].mxu1  ;;  %v5739_v25 = vpack.c.bf16 %v5718_v28, %v5717_v22 }
 0x534   :  { %v8327_v30 = vadd.f32 %v8326_v52, %v8325_v50  ;;  %v8328_v9 = vpop.f32.mrb[134].mxu1 }
 0x535   :  { %v8329_v55 = vpop.f32.mrb[135].mxu1  ;;  %5987 = vmatprep.mubr.bf16.mxu1 %v5739_v25 }
 0x536   :  { %v6055_v35 = vadd.f32 %v12664_v13, %v8327_v30  ;;  %v8330_v41 = vadd.f32 %v8329_v55, %v8328_v9  ;;  %5988 = vmatmul.mubr.bf16.gmra.mrb[148].mxu1 %v5738_v4  ;;  %v9749_v13 = vpop.permute.xlu1 %9748 }
 0x537   :  { %v9751_v37 = vunpack.i.h.bf16 %v9749_v13  ;;  %v9750_v1 = vunpack.i.l.bf16 %v9749_v13 }
 0x538   :  { %v6116_v58 = vmul.f32 %v12768_v54, %v6055_v35  ;;  %v6058_v63 = vadd.f32 %v12669_v23, %v8330_v41 }
 0x539   :  { %v5639_v6 = vsel %vm270_vm2, %v12630_v8, %v9750_v1  ;;  %v5640_v50 = vsel %vm270_vm2, %v12675_v3, %v9751_v37 }
 0x53a   :  { %v6137_v34 = vadd.f32 %v12772_v31, %v6116_v58  ;;  %v6117_v62 = vmul.f32 %v12768_v54, %v6058_v63  ;;  %v9754_v26 = vpop.permute.xlu1 %9753 }
 0x53b   :  { %v9756_v23 = vunpack.i.h.bf16 %v9754_v26  ;;  %v9755_v40 = vunpack.i.l.bf16 %v9754_v26 }
 0x53c   :  { %v6138_v17 = vadd.f32 %v12772_v31, %v6117_v62  ;;  %v6153_v53 = vmax.f32 %v6137_v34, 0.0 }
 0x53d   :  { %v5655_v19 = vsel %vm3955_vm4, %v5639_v6, %v9755_v40  ;;  %v5656_v43 = vsel %vm3955_vm4, %v5640_v50, %v9756_v23 }
 0x53e   :  { %v6154_v12 = vmax.f32 %v6138_v17, 0.0 }
 0x540   :  { %v6168_v38 = vmax.f32 %v6153_v53, %v6154_v12 }
 0x542   :  { %6176 = vst.msk [vmem:[#allocation5 + $0x8] sm:$0xff] %vm3955_vm4, %v6168_v38 }
 0x547   :  { %v9759_v27 = vpop.permute.xlu0 %9758 }
 0x548   :  { %v9764_v2 = vpop.permute.xlu1 %9763  ;;  %v9761_v49 = vunpack.i.h.bf16 %v9759_v27  ;;  %v9760_v60 = vunpack.i.l.bf16 %v9759_v27 }
 0x549   :  { %v9766_v39 = vunpack.i.h.bf16 %v9764_v2  ;;  %v9765_v42 = vunpack.i.l.bf16 %v9764_v2 }
 0x54a   :  { %v5687_v52 = vsel %vm270_vm2, %v12677_v47, %v9760_v60  ;;  %v5688_v24 = vsel %vm270_vm2, %v12731_v20, %v9761_v49 }
 0x54b   :  { %v5671_v3 = vsel %vm4085_vm6, %v5655_v19, %v9765_v42  ;;  %v5672_v36 = vsel %vm4085_vm6, %v5656_v43, %v9766_v39 }
 0x54c   :  { %v5741_v4 = vpack.c.bf16 %v5672_v36, %v5671_v3 }
 0x563   :  { %v9769_v45 = vpop.permute.xlu0 %9768 }
 0x564   :  { %v9771_v56 = vunpack.i.h.bf16 %v9769_v45  ;;  %v9770_v59 = vunpack.i.l.bf16 %v9769_v45  ;;  %v9779_v12 = vpop.permute.xlu1 %9778 }
 0x565   :  { %v9781_v1 = vunpack.i.h.bf16 %v9779_v12  ;;  %v9780_v2 = vunpack.i.l.bf16 %v9779_v12 }
 0x566   :  { %v5704_v9 = vsel %vm3955_vm4, %v5688_v24, %v9771_v56  ;;  %v5703_v8 = vsel %vm3955_vm4, %v5687_v52, %v9770_v59 }
 0x567   :  { %v9774_v51 = vpop.permute.xlu0 %9773  ;;  %v5641_v6 = vsel %vm270_vm2, %v12706_v57, %v9780_v2  ;;  %v5642_v50 = vsel %vm270_vm2, %v12733_v46, %v9781_v1  ;;  %v9955_v1 = vld [vmem:[#allocation18 + $0x10] ss:$8 sps:$4 sm:$0xff]   ;;  %v9960_v2 = vld [vmem:[#allocation18 + $0x64] ss:$8 sps:$4 sm:$0xff]  }
 0x568   :  { %v9776_v18 = vunpack.i.h.bf16 %v9774_v51  ;;  %v9775_v30 = vunpack.i.l.bf16 %v9774_v51  ;;  %v9784_v37 = vpop.permute.xlu1 %9783 }
 0x569   :  { %v9786_v40 = vunpack.i.h.bf16 %v9784_v37  ;;  %v9785_v45 = vunpack.i.l.bf16 %v9784_v37  ;;  %v9954_v37 = vld [vmem:[#allocation18 + $0x54] ss:$8 sps:$4 sm:$0xff]  }
 0x56a   :  { %v8331_v22 = vpop.f32.mrb[136].mxu1  ;;  %v5719_v28 = vsel %vm4085_vm6, %v5703_v8, %v9775_v30  ;;  %v5720_v35 = vsel %vm4085_vm6, %v5704_v9, %v9776_v18 }
 0x56b   :  { %v8332_v55 = vpop.f32.mrb[137].mxu1  ;;  %v5742_v25 = vpack.c.bf16 %v5720_v35, %v5719_v28  ;;  %v5657_v19 = vsel %vm3955_vm4, %v5641_v6, %v9785_v45  ;;  %v5658_v43 = vsel %vm3955_vm4, %v5642_v50, %v9786_v40  ;;  %v9963_v40 = vld [vmem:[#allocation18 + $0x24] ss:$8 sps:$4 sm:$0xff]   ;;  %v9961_v45 = vld [vmem:[#allocation18 + $0x20] ss:$8 sps:$4 sm:$0xff]  }
 0x56c   :  { %v8333_v47 = vadd.f32 %v8332_v55, %v8331_v22  ;;  %v8334_v41 = vpop.f32.mrb[138].mxu1 }
 0x56d   :  { %v8335_v20 = vpop.f32.mrb[139].mxu1  ;;  %5995 = vmatprep.mubr.bf16.mxu1 %v5742_v25 }
 0x56e   :  { %v6063_v58 = vadd.f32 %v8333_v47, %v12781_v21  ;;  %v8336_v63 = vadd.f32 %v8335_v20, %v8334_v41  ;;  %5996 = vmatmul.mubr.bf16.gmra.mrb[152].mxu1 %v5741_v4  ;;  %v5235_v20 = vld [vmem:[#allocation4 + $0x129] sm:$0xff] }
 0x56f   :  { %v5737_v4 = vpack.c.bf16 %v12597_v61, %v5235_v20  ;;  %v5242_v61 = vld [vmem:[#allocation4 + $0x1d1] sm:$0xff] }
 0x570   :  { %v6118_v34 = vmul.f32 %v12768_v54, %v6063_v58  ;;  %v6066_v62 = vadd.f32 %v8336_v63, %v12785_v5 }
 0x572   :  { %v6139_v17 = vadd.f32 %v12772_v31, %v6118_v34  ;;  %v6119_v53 = vmul.f32 %v12768_v54, %v6066_v62 }
 0x574   :  { %v6140_v38 = vadd.f32 %v12772_v31, %v6119_v53  ;;  %v6155_v13 = vmax.f32 %v6139_v17, 0.0 }
 0x576   :  { %v6156_v26 = vmax.f32 %v6140_v38, 0.0 }
 0x578   :  { %v6169_v27 = vmax.f32 %v6155_v13, %v6156_v26 }
 0x57a   :  { %6177 = vst.msk [vmem:[#allocation5 + $0x10] sm:$0xff] %vm3955_vm4, %v6169_v27  ;;  %v9948_v27 = vld [vmem:[#allocation18 + $0x44] ss:$8 sps:$4 sm:$0xff]  }
 0x57b   :  { %v9789_v21 = vpop.permute.xlu0 %9788  ;;  %6271 = vmatprep.subr.bf16.mxu0 %v9948_v27  ;;  %v6183_v27 = vld [vmem:[#allocation5] ss:$2 sm:$0xff] }
 0x57c   :  { %v9804_v23 = vpop.permute.xlu1 %9803  ;;  %v9791_v49 = vunpack.i.h.bf16 %v9789_v21  ;;  %v9790_v60 = vunpack.i.l.bf16 %v9789_v21  ;;  %6272 = vmatpush1.bf16.msra.mxu0 %v9946_v14  ;;  %v9957_v21 = vld [vmem:[#allocation18 + $0x14] ss:$8 sps:$4 sm:$0xff]   ;;  %v6191_v14 = vld [vmem:[#allocation5 + $0x1] ss:$2 sm:$0xff] }
 0x57d   :  { %v9806_v39 = vunpack.i.h.bf16 %v9804_v23  ;;  %v9805_v42 = vunpack.i.l.bf16 %v9804_v23  ;;  %6273 = vmatprep.subr.bf16.mxu0 %v9954_v37  ;;  %v9958_v23 = vld [vmem:[#allocation18 + $0x60] ss:$8 sps:$4 sm:$0xff]  }
 0x57e   :  { %v5689_v52 = vsel %vm270_vm2, %v12735_v29, %v9790_v60  ;;  %v5690_v24 = vsel %vm270_vm2, %v12795_v15, %v9791_v49  ;;  %v9964_v49 = vld [vmem:[#allocation18 + $0x70] ss:$8 sps:$4 sm:$0xff]   ;;  %v9969_v60 = vld [vmem:[#allocation18 + $0x34] ss:$8 sps:$4 sm:$0xff]  }
 0x57f   :  { %v9794_v5 = vpop.permute.xlu0 %9793  ;;  %v5673_v46 = vsel %vm4085_vm6, %v5657_v19, %v9805_v42  ;;  %v5674_v3 = vsel %vm4085_vm6, %v5658_v43, %v9806_v39  ;;  %v9967_v39 = vld [vmem:[#allocation18 + $0x30] ss:$8 sps:$4 sm:$0xff]   ;;  %v9972_v42 = vld [vmem:[#allocation18 + $0x84] ss:$8 sps:$4 sm:$0xff]  }
 0x580   :  { %v9796_v56 = vunpack.i.h.bf16 %v9794_v5  ;;  %v9795_v59 = vunpack.i.l.bf16 %v9794_v5  ;;  %v5744_v25 = vpack.c.bf16 %v5674_v3, %v5673_v46  ;;  %v9966_v5 = vld [vmem:[#allocation18 + $0x74] ss:$8 sps:$4 sm:$0xff]  }
 0x582   :  { %v5705_v8 = vsel %vm3955_vm4, %v5689_v52, %v9795_v59  ;;  %v5706_v57 = vsel %vm3955_vm4, %v5690_v24, %v9796_v56  ;;  %v9975_v56 = vld [vmem:[#allocation18 + $0xc4] ss:$8 sps:$4 sm:$0xff]  }
 0x583   :  { %v9799_v51 = vpop.permute.xlu0 %9798  ;;  %v8337_v9 = vpop.f32.mrb[140].mxu1 }
 0x584   :  { %v9801_v18 = vunpack.i.h.bf16 %v9799_v51  ;;  %v9800_v30 = vunpack.i.l.bf16 %v9799_v51  ;;  %v8338_v22 = vpop.f32.mrb[141].mxu1 }
 0x585   :  { %v8339_v36 = vadd.f32 %v8338_v22, %v8337_v9  ;;  %v8340_v55 = vpop.f32.mrb[142].mxu1 }
 0x586   :  { %v5721_v28 = vsel %vm4085_vm6, %v5705_v8, %v9800_v30  ;;  %v5722_v29 = vsel %vm4085_vm6, %v5706_v57, %v9801_v18  ;;  %v8341_v35 = vpop.f32.mrb[143].mxu1 }
 0x587   :  { %v5745_v15 = vpack.c.bf16 %v5722_v29, %v5721_v28  ;;  %v6071_v47 = vadd.f32 %v12778_v11, %v8339_v36  ;;  %v8342_v41 = vadd.f32 %v8341_v35, %v8340_v55 }
 0x589   :  { %6003 = vmatprep.mubr.bf16.mxu1 %v5745_v15  ;;  %v6120_v58 = vmul.f32 %v12768_v54, %v6071_v47  ;;  %v6074_v63 = vadd.f32 %v12783_v48, %v8342_v41  ;;  %v5746_v48 = vpack.c.bf16 %v5242_v61, %v12787_v32  ;;  %v9952_v32 = vld [vmem:[#allocation18 + $0x50] ss:$8 sps:$4 sm:$0xff]  }
 0x58a   :  { %6004 = vmatmul.mubr.bf16.gmra.mrb[156].mxu1 %v5744_v25  ;;  %6274 = vmatpush1.bf16.msra.mxu0 %v9952_v32 }
 0x58b   :  { %8411 = vmatprep.mubr.msk.bf16.mxu1 %vm270_vm2, %v5737_v4  ;;  %v6141_v34 = vadd.f32 %v12772_v31, %v6120_v58  ;;  %v6121_v62 = vmul.f32 %v12768_v54, %v6074_v63  ;;  %6275 = vmatprep.subr.bf16.mxu0 %v9960_v2 }
 0x58d   :  { %v6142_v17 = vadd.f32 %v12772_v31, %v6121_v62  ;;  %v6157_v11 = vmax.f32 %v6141_v34, 0.0 }
 0x58e   :  { %6276 = vmatpush1.bf16.msra.mxu0 %v9958_v23 }
 0x58f   :  { %v6158_v53 = vmax.f32 %v6142_v17, 0.0  ;;  %6277 = vmatprep.subr.bf16.mxu0 %v9966_v5 }
 0x591   :  { %v6170_v12 = vmax.f32 %v6157_v11, %v6158_v53 }
 0x592   :  { %8412 = vmatmul.mubr.msk.bf16.vlgmr.msra.gmra.mrb[160].mxu1 %vm270_vm2, %v5740_v7  ;;  %6278 = vmatpush1.bf16.msra.mxu0 %v9964_v49 }
 0x593   :  { %8415 = vmatprep.mubr.msk.bf16.mxu1 %vm270_vm2, %v5743_v16  ;;  %6178 = vst.msk [vmem:[#allocation5 + $0x18] sm:$0xff] %vm3955_vm4, %v6170_v12  ;;  %v9949_v16 = vld [vmem:[#allocation18] ss:$8 sps:$4 sm:$0xff]   ;;  %6454 = vmatprep.subr.bf16.mxu0 %v9972_v42 }
 0x594   :  { %6359 = vmatpush1.bf16.msra.mxu1 %v9949_v16 }
 0x595   :  { %6360 = vmatprep.subr.bf16.mxu1 %v9957_v21 }
 0x598   :  { %6361 = vmatpush1.bf16.msra.mxu1 %v9955_v1 }
 0x599   :  { %6362 = vmatprep.subr.bf16.mxu1 %v9963_v40 }
 0x59a   :  { %8416 = vmatmul.mubr.msk.bf16.gmra.mrb[164].mxu1 %vm270_vm2, %v5746_v48 }
 0x59b   :  { %6390 = vmatprep.mubr.bf16.mxu1 %v10459_v0 }
 0x59c   :  { %6363 = vmatpush1.bf16.msra.mxu1 %v9961_v45  ;;  %v6198_v45 = vmax.f32 %v6183_v27, %v6191_v14  ;;  %v10000_v27 = vld [vmem:[#allocation18 + $0x110] ss:$8 sps:$4 sm:$0xff]   ;;  %v10008_v14 = vld [vmem:[#allocation18 + $0x124] ss:$8 sps:$4 sm:$0xff]  }
 0x59d   :  { %6364 = vmatprep.subr.bf16.mxu1 %v9969_v60 }
 0x5a0   :  { %6365 = vmatpush1.bf16.msra.mxu1 %v9967_v39 }
 0x5a1   :  { %6552 = vmatprep.subr.bf16.mxu1 %v9975_v56 }
 0x5d1   :  { %v8343_v38 = vpop.f32.mrb[144].mxu1 }
 0x5d2   :  { %v8344_v13 = vpop.f32.mrb[145].mxu1 }
 0x5d3   :  { %v8345_v26 = vadd.f32 %v8344_v13, %v8343_v38  ;;  %v8346_v44 = vpop.f32.mrb[146].mxu1 }
 0x5d4   :  { %v8347_v10 = vpop.f32.mrb[147].mxu1 }
 0x5d5   :  { %v12882_v7 = vadd.f32 %v8347_v10, %v8346_v44 }
 0x609   :  { %v8349_v59 = vpop.f32.mrb[148].mxu1 }
 0x60a   :  { %v8350_v6 = vpop.f32.mrb[149].mxu1 }
 0x60b   :  { %v8351_v50 = vadd.f32 %v8350_v6, %v8349_v59  ;;  %v8352_v19 = vpop.f32.mrb[150].mxu1  ;;  %v6202_v59 = vpack.c.bf16 %v6198_v45, %v6198_v45 }
 0x60c   :  { %v8353_v43 = vpop.f32.mrb[151].mxu1 }
 0x60d   :  { %v8354_v51 = vadd.f32 %v8353_v43, %v8352_v19 }
 0x641   :  { %v8355_v52 = vpop.f32.mrb[152].mxu1 }
 0x642   :  { %v8356_v24 = vpop.f32.mrb[153].mxu1 }
 0x643   :  { %v8357_v18 = vadd.f32 %v8356_v24, %v8355_v52  ;;  %v8358_v30 = vpop.f32.mrb[154].mxu1  ;;  %v12904_v24 = vunpack.c.l.b16 %v6202_v59 }
 0x644   :  { %v8359_v9 = vpop.f32.mrb[155].mxu1 }
 0x645   :  { %v8360_v8 = vadd.f32 %v8359_v9, %v8358_v30  ;;  %v9970_v9 = vld [vmem:[#allocation18 + $0x80] ss:$8 sps:$4 sm:$0xff]  }
 0x65d   :  { %v8361_v57 = vpop.f32.mrb[156].mxu1 }
 0x65e   :  { %v8362_v22 = vpop.f32.mrb[157].mxu1 }
 0x65f   :  { %v8363_v46 = vadd.f32 %v8362_v22, %v8361_v57  ;;  %v8364_v3 = vpop.f32.mrb[158].mxu1 }
 0x660   :  { %v8365_v36 = vpop.f32.mrb[159].mxu1 }
 0x661   :  { %v8366_v55 = vadd.f32 %v8365_v36, %v8364_v3  ;;  %v9973_v3 = vld [vmem:[#allocation18 + $0xc0] ss:$8 sps:$4 sm:$0xff]  }
 0x665   :  { %v8413_v28 = vpop.f32.mrb[160].mxu1 }
 0x666   :  { %v6087_v29 = vadd.f32 %v8413_v28, %v8351_v50  ;;  %v6078_v35 = vpop.f32.mrb[161].mxu1  ;;  %v9981_v28 = vld [vmem:[#allocation18 + $0xd4] ss:$8 sps:$4 sm:$0xff]  }
 0x667   :  { %v6079_v15 = vadd.f32 %v8345_v26, %v6078_v35  ;;  %v8414_v47 = vpop.f32.mrb[162].mxu1  ;;  %v9984_v35 = vld [vmem:[#allocation18 + $0xa4] ss:$8 sps:$4 sm:$0xff]  }
 0x668   :  { %v6124_v41 = vmul.f32 %v12768_v54, %v6087_v29  ;;  %v6090_v25 = vadd.f32 %v8414_v47, %v8354_v51  ;;  %v6081_v20 = vpop.f32.mrb[163].mxu1  ;;  %v9976_v29 = vld [vmem:[#allocation18 + $0x90] ss:$8 sps:$4 sm:$0xff]   ;;  %v9987_v47 = vld [vmem:[#allocation18 + $0xe4] ss:$8 sps:$4 sm:$0xff]  }
 0x669   :  { %v6122_v4 = vmul.f32 %v12768_v54, %v6079_v15  ;;  %v6082_v58 = vadd.f32 %v12882_v7, %v6081_v20  ;;  %v9979_v15 = vld [vmem:[#allocation18 + $0xd0] ss:$8 sps:$4 sm:$0xff]   ;;  %v9985_v20 = vld [vmem:[#allocation18 + $0xe0] ss:$8 sps:$4 sm:$0xff]  }
 0x66a   :  { %v6145_v63 = vadd.f32 %v12772_v31, %v6124_v41  ;;  %v6125_v34 = vmul.f32 %v12768_v54, %v6090_v25  ;;  %v9982_v41 = vld [vmem:[#allocation18 + $0xa0] ss:$8 sps:$4 sm:$0xff]   ;;  %v9990_v25 = vld [vmem:[#allocation18 + $0xb4] ss:$8 sps:$4 sm:$0xff]  }
 0x66b   :  { %v6143_v62 = vadd.f32 %v12772_v31, %v6122_v4  ;;  %v6123_v17 = vmul.f32 %v12768_v54, %v6082_v58  ;;  %v9993_v58 = vld [vmem:[#allocation18 + $0xf4] ss:$8 sps:$4 sm:$0xff]  }
 0x66c   :  { %v6146_v11 = vadd.f32 %v12772_v31, %v6125_v34  ;;  %v6161_v61 = vmax.f32 %v6145_v63, 0.0  ;;  %v9988_v63 = vld [vmem:[#allocation18 + $0xb0] ss:$8 sps:$4 sm:$0xff]   ;;  %v6407_v34 = vrot.slane %v12904_v24, 2 }
 0x66d   :  { %v6144_v53 = vadd.f32 %v12772_v31, %v6123_v17  ;;  %v8417_v12 = vpop.f32.mrb[164].mxu1  ;;  %v6159_v26 = vmax.f32 %v6143_v62, 0.0  ;;  %v9996_v17 = vld [vmem:[#allocation18 + $0x104] ss:$8 sps:$4 sm:$0xff]  }
 0x66e   :  { %v6162_v48 = vmax.f32 %v6146_v11, 0.0  ;;  %v6103_v38 = vadd.f32 %v8417_v12, %v8363_v46  ;;  %v6094_v13 = vpop.f32.mrb[165].mxu1  ;;  %v9978_v46 = vld [vmem:[#allocation18 + $0x94] ss:$8 sps:$4 sm:$0xff]   ;;  %v9991_v11 = vld [vmem:[#allocation18 + $0xf0] ss:$8 sps:$4 sm:$0xff]  }
 0x66f   :  { %v6160_v44 = vmax.f32 %v6144_v53, 0.0  ;;  %v6095_v10 = vadd.f32 %v8357_v18, %v6094_v13  ;;  %v8418_v7 = vpop.f32.mrb[166].mxu1  ;;  %v6505_v12 = vrot.slane %v12904_v24, 3 }
 0x670   :  { %v6172_v33 = vmax.f32 %v6161_v61, %v6162_v48  ;;  %v6128_v16 = vmul.f32 %v12768_v54, %v6103_v38  ;;  %v6106_v37 = vadd.f32 %v8418_v7, %v8366_v55  ;;  %v6097_v32 = vpop.f32.mrb[167].mxu1  ;;  %v9999_v61 = vld [vmem:[#allocation18 + $0x144] ss:$8 sps:$4 sm:$0xff]   ;;  %v9994_v48 = vld [vmem:[#allocation18 + $0x100] ss:$8 sps:$4 sm:$0xff]  }
 0x671   :  { %v6171_v21 = vmax.f32 %v6159_v26, %v6160_v44  ;;  %v6126_v1 = vmul.f32 %v12768_v54, %v6095_v10  ;;  %v6098_v2 = vadd.f32 %v8360_v8, %v6097_v32  ;;  %v10002_v26 = vld [vmem:[#allocation18 + $0x114] ss:$8 sps:$4 sm:$0xff]   ;;  %v9997_v44 = vld [vmem:[#allocation18 + $0x140] ss:$8 sps:$4 sm:$0xff]  }
 0x672   :  { %6180 = vst.msk [vmem:[#allocation5 + $0x28] sm:$0xff] %vm3955_vm4, %v6172_v33  ;;  %v6149_v23 = vadd.f32 %v12772_v31, %v6128_v16  ;;  %v6129_v40 = vmul.f32 %v12768_v54, %v6106_v37  ;;  %v10005_v7 = vld [vmem:[#allocation18 + $0x154] ss:$8 sps:$4 sm:$0xff]   ;;  %v10003_v33 = vld [vmem:[#allocation18 + $0x150] ss:$8 sps:$4 sm:$0xff]  }
 0x673   :  { %6179 = vst.msk [vmem:[#allocation5 + $0x20] sm:$0xff] %vm3955_vm4, %v6171_v21  ;;  %v6147_v5 = vadd.f32 %v12772_v31, %v6126_v1  ;;  %v6127_v49 = vmul.f32 %v12768_v54, %v6098_v2  ;;  %v10011_v16 = vld [vmem:[#allocation18 + $0x164] ss:$8 sps:$4 sm:$0xff]   ;;  %v10006_v37 = vld [vmem:[#allocation18 + $0x120] ss:$8 sps:$4 sm:$0xff]  }
 0x674   :  { %v6150_v60 = vadd.f32 %v12772_v31, %v6129_v40  ;;  %v6165_v42 = vmax.f32 %v6149_v23, 0.0  ;;  %v10014_v32 = vld [vmem:[#allocation18 + $0x134] ss:$8 sps:$4 sm:$0xff]   ;;  %v10009_v21 = vld [vmem:[#allocation18 + $0x160] ss:$8 sps:$4 sm:$0xff]   ;;  %v6603_v40 = vrot.slane %v12904_v24, 4 }
 0x675   :  { %v6148_v39 = vadd.f32 %v12772_v31, %v6127_v49  ;;  %v6163_v6 = vmax.f32 %v6147_v5, 0.0  ;;  %v6224_v31 = vrot.slane %v12904_v24, 1  ;;  %v10017_v2 = vld [vmem:[#allocation18 + $0x174] ss:$8 sps:$4 sm:$0xff]   ;;  %v10012_v23 = vld [vmem:[#allocation18 + $0x130] ss:$8 sps:$4 sm:$0xff]  }
 0x676   :  { %v6166_v56 = vmax.f32 %v6150_v60, 0.0  ;;  %v10020_v5 = vld [vmem:[#allocation18 + $0x184] ss:$8 sps:$4 sm:$0xff]   ;;  %v10015_v49 = vld [vmem:[#allocation18 + $0x170] ss:$8 sps:$4 sm:$0xff]  }
 0x677   :  { %v6164_v50 = vmax.f32 %v6148_v39, 0.0  ;;  %v6701_v39 = vrot.slane %v12904_v24, 5 }
 0x678   :  { %v6174_v19 = vmax.f32 %v6165_v42, %v6166_v56  ;;  %v10023_v42 = vld [vmem:[#allocation18 + $0x1c4] ss:$8 sps:$4 sm:$0xff]   ;;  %v10018_v56 = vld [vmem:[#allocation18 + $0x180] ss:$8 sps:$4 sm:$0xff]  }
 0x679   :  { %v6173_v43 = vmax.f32 %v6163_v6, %v6164_v50  ;;  %v10026_v50 = vld [vmem:[#allocation18 + $0x194] ss:$8 sps:$4 sm:$0xff]  }
 0x67a   :  { %v6187_v51 = vld [vmem:[#allocation5 + $0x20] ss:$2 sm:$0xff]  ;;  %v6195_v52 = vld [vmem:[#allocation5 + $0x21] ss:$2 sm:$0xff]  ;;  %6182 = vst.msk [vmem:[#allocation5 + $0x38] sm:$0xff] %vm3955_vm4, %v6174_v19 }
 0x67b   :  { %v6200_v18 = vmax.f32 %v6187_v51, %v6195_v52  ;;  %6181 = vst.msk [vmem:[#allocation5 + $0x30] sm:$0xff] %vm3955_vm4, %v6173_v43  ;;  %v10021_v19 = vld [vmem:[#allocation18 + $0x1c0] ss:$8 sps:$4 sm:$0xff]   ;;  %v10029_v51 = vld [vmem:[#allocation18 + $0x1d4] ss:$8 sps:$4 sm:$0xff]  }
 0x67c   :  { %v10024_v52 = vld [vmem:[#allocation18 + $0x190] ss:$8 sps:$4 sm:$0xff]  }
 0x67d   :  { %v6203_v54 = vpack.c.bf16 %v6200_v18, %v6200_v18  ;;  %v10032_v18 = vld [vmem:[#allocation18 + $0x1a4] ss:$8 sps:$4 sm:$0xff]  }
 0x67f   :  { %v12907_v30 = vunpack.c.l.b16 %v6203_v54  ;;  %v10027_v54 = vld [vmem:[#allocation18 + $0x1d0] ss:$8 sps:$4 sm:$0xff]  }
 0x681   :  { %v6226_v8 = vsel %vm6225_vm9, %v12907_v30, %v6224_v31  ;;  %v6312_v57 = vrot.slane %v12907_v30, 7  ;;  %v6408_v4 = vrot.slane %v12907_v30, 1  ;;  %v6506_v62 = vrot.slane %v12907_v30, 2  ;;  %v10035_v31 = vld [vmem:[#allocation18 + $0x1e4] ss:$8 sps:$4 sm:$0xff]  }
 0x682   :  { %v6227_v22 = vpack.c.b16 %v6226_v8, %v6226_v8  ;;  %v6604_v1 = vrot.slane %v12907_v30, 3  ;;  %v6702_v45 = vrot.slane %v12907_v30, 4  ;;  %v10038_v8 = vld [vmem:[#allocation18 + $0x1b4] ss:$8 sps:$4 sm:$0xff]  }
 0x683   :  { %v6313_v36 = vsel %vm6225_vm9, %v6312_v57, %v12904_v24  ;;  %v6409_v53 = vsel %vm6225_vm9, %v6408_v4, %v6407_v34  ;;  %v6507_v38 = vsel %vm6225_vm9, %v6506_v62, %v6505_v12  ;;  %v10033_v57 = vld [vmem:[#allocation18 + $0x1e0] ss:$8 sps:$4 sm:$0xff]  }
 0x684   :  { %8150 = vmatmul.mubr.msk.bf16.vlgmr.msra.gmra.mrb[136].mxu0 %vm3955_vm4, %v6227_v22  ;;  %v6314_v55 = vpack.c.b16 %v6313_v36, %v6313_v36  ;;  %v6410_v13 = vpack.c.b16 %v6409_v53, %v6409_v53  ;;  %v6508_v10 = vpack.c.b16 %v6507_v38, %v6507_v38  ;;  %v6605_v60 = vsel %vm6225_vm9, %v6604_v1, %v6603_v40  ;;  %v10041_v36 = vld [vmem:[#allocation18 + $0x1f4] ss:$8 sps:$4 sm:$0xff]   ;;  %v10066_v40 = vld [vmem:[#allocation18 + $0x280] ss:$8 sps:$4 sm:$0xff]  }
 0x685   :  { %6455 = vmatpush1.bf16.msra.mxu0 %v9970_v9  ;;  %6486 = vmatprep.mubr.bf16.mxu0 %v10459_v0  ;;  %v6703_v59 = vsel %vm6225_vm9, %v6702_v45, %v6701_v39  ;;  %v6606_v6 = vpack.c.b16 %v6605_v60, %v6605_v60  ;;  %v10030_v9 = vld [vmem:[#allocation18 + $0x1a0] ss:$8 sps:$4 sm:$0xff]   ;;  %v6800_v22 = vrot.slane %v12907_v30, 5 }
 0x686   :  { %8159 = vmatmul.mubr.msk.bf16.vlgmr.msra.gmra.mrb[168].mxu1 %vm3955_vm4, %v6314_v55  ;;  %6456 = vmatprep.subr.bf16.mxu0 %v9978_v46  ;;  %v6704_v43 = vpack.c.b16 %v6703_v59, %v6703_v59  ;;  %v6189_v46 = vld [vmem:[#allocation5 + $0x30] ss:$2 sm:$0xff]  ;;  %v6193_v4 = vld [vmem:[#allocation5 + $0x11] ss:$2 sm:$0xff]  ;;  %v10080_v59 = vld [vmem:[#allocation18 + $0x2a4] ss:$8 sps:$4 sm:$0xff]  }
 0x687   :  { %6553 = vmatpush1.bf16.msra.mxu1 %v9973_v3  ;;  %6584 = vmatprep.mubr.bf16.mxu1 %v10459_v0  ;;  %v6197_v3 = vld [vmem:[#allocation5 + $0x31] ss:$2 sm:$0xff] }
 0x688   :  { %6554 = vmatprep.subr.bf16.mxu1 %v9981_v28  ;;  %v10036_v55 = vld [vmem:[#allocation18 + $0x1b0] ss:$8 sps:$4 sm:$0xff]   ;;  %v6799_v28 = vrot.slane %v12904_v24, 6  ;;  %v10069_v60 = vld [vmem:[#allocation18 + $0x2c0] ss:$8 sps:$4 sm:$0xff]  }
 0x689   :  { %6457 = vmatpush1.bf16.msra.mxu0 %v9976_v29  ;;  %v6898_v29 = vrot.slane %v12907_v30, 6  ;;  %v10050_v30 = vld [vmem:[#allocation18 + $0x214] ss:$8 sps:$4 sm:$0xff]  }
 0x68a   :  { %6458 = vmatprep.subr.bf16.mxu0 %v9984_v35  ;;  %v10044_v35 = vld [vmem:[#allocation18 + $0x204] ss:$8 sps:$4 sm:$0xff]  }
 0x68b   :  { %6555 = vmatpush1.bf16.msra.mxu1 %v9979_v15  ;;  %v6201_v15 = vmax.f32 %v6189_v46, %v6197_v3  ;;  %v10095_v3 = vld [vmem:[#allocation18 + $0x344] ss:$8 sps:$4 sm:$0xff]  }
 0x68c   :  { %6556 = vmatprep.subr.bf16.mxu1 %v9987_v47  ;;  %v10039_v47 = vld [vmem:[#allocation18 + $0x1f0] ss:$8 sps:$4 sm:$0xff]  }
 0x68d   :  { %6459 = vmatpush1.bf16.msra.mxu0 %v9982_v41  ;;  %v6801_v41 = vsel %vm6225_vm9, %v6800_v22, %v6799_v28 }
 0x68e   :  { %6460 = vmatprep.subr.bf16.mxu0 %v9990_v25  ;;  %v6897_v25 = vrot.slane %v12904_v24, 7  ;;  %v6802_v62 = vpack.c.b16 %v6801_v41, %v6801_v41  ;;  %v10053_v24 = vld [vmem:[#allocation18 + $0x254] ss:$8 sps:$4 sm:$0xff]   ;;  %v10096_v41 = vld [vmem:[#allocation18 + $0x310] ss:$8 sps:$4 sm:$0xff]  }
 0x68f   :  { %6557 = vmatpush1.bf16.msra.mxu1 %v9985_v20  ;;  %v6185_v20 = vld [vmem:[#allocation5 + $0x10] ss:$2 sm:$0xff] }
 0x690   :  { %6558 = vmatprep.subr.bf16.mxu1 %v9993_v58  ;;  %v10047_v58 = vld [vmem:[#allocation18 + $0x244] ss:$8 sps:$4 sm:$0xff]   ;;  %v6899_v34 = vsel %vm6225_vm9, %v6898_v29, %v6897_v25  ;;  %v6199_v53 = vmax.f32 %v6185_v20, %v6193_v4  ;;  %v10098_v29 = vld [vmem:[#allocation18 + $0x314] ss:$8 sps:$4 sm:$0xff]   ;;  %v10099_v20 = vld [vmem:[#allocation18 + $0x350] ss:$8 sps:$4 sm:$0xff]  }
 0x691   :  { %6461 = vmatpush1.bf16.msra.mxu0 %v9988_v63  ;;  %v10042_v63 = vld [vmem:[#allocation18 + $0x200] ss:$8 sps:$4 sm:$0xff]   ;;  %v6900_v12 = vpack.c.b16 %v6899_v34, %v6899_v34  ;;  %v10104_v25 = vld [vmem:[#allocation18 + $0x324] ss:$8 sps:$4 sm:$0xff]  }
 0x692   :  { %6650 = vmatprep.subr.bf16.mxu0 %v9996_v17  ;;  %v6988_v17 = vpack.c.bf16 %v6201_v15, %v6201_v15  ;;  %v10107_v4 = vld [vmem:[#allocation18 + $0x364] ss:$8 sps:$4 sm:$0xff]   ;;  %v10105_v34 = vld [vmem:[#allocation18 + $0x360] ss:$8 sps:$4 sm:$0xff]  }
 0x693   :  { %6559 = vmatpush1.bf16.msra.mxu1 %v9991_v11  ;;  %v10045_v11 = vld [vmem:[#allocation18 + $0x240] ss:$8 sps:$4 sm:$0xff]  }
 0x694   :  { %8168 = vmatmul.mubr.msk.bf16.vlgmr.msra.gmra.mrb[140].mxu0 %vm3955_vm4, %v6410_v13  ;;  %6748 = vmatprep.subr.bf16.mxu1 %v9999_v61  ;;  %v10048_v61 = vld [vmem:[#allocation18 + $0x210] ss:$8 sps:$4 sm:$0xff]   ;;  %v12948_v38 = vunpack.c.l.b16 %v6988_v17 }
 0x695   :  { %6651 = vmatpush1.bf16.msra.mxu0 %v9994_v48  ;;  %6682 = vmatprep.mubr.bf16.mxu0 %v10459_v0  ;;  %v10056_v48 = vld [vmem:[#allocation18 + $0x224] ss:$8 sps:$4 sm:$0xff]   ;;  %v10051_v13 = vld [vmem:[#allocation18 + $0x250] ss:$8 sps:$4 sm:$0xff]  }
 0x696   :  { %8177 = vmatmul.mubr.msk.bf16.vlgmr.msra.gmra.mrb[172].mxu1 %vm3955_vm4, %v6508_v10  ;;  %6652 = vmatprep.subr.bf16.mxu0 %v10002_v26  ;;  %v6987_v26 = vpack.c.bf16 %v6199_v53, %v6199_v53  ;;  %v10054_v10 = vld [vmem:[#allocation18 + $0x220] ss:$8 sps:$4 sm:$0xff]   ;;  %v10108_v17 = vld [vmem:[#allocation18 + $0x330] ss:$8 sps:$4 sm:$0xff]   ;;  %v7490_v53 = vrot.slane %v12948_v38, 4 }
 0x697   :  { %6749 = vmatpush1.bf16.msra.mxu1 %v9997_v44  ;;  %6780 = vmatprep.mubr.bf16.mxu1 %v10459_v0  ;;  %v10059_v44 = vld [vmem:[#allocation18 + $0x264] ss:$8 sps:$4 sm:$0xff]  }
 0x698   :  { %6750 = vmatprep.subr.bf16.mxu1 %v10005_v7  ;;  %v10062_v7 = vld [vmem:[#allocation18 + $0x234] ss:$8 sps:$4 sm:$0xff]  }
 0x699   :  { %6653 = vmatpush1.bf16.msra.mxu0 %v10000_v27  ;;  %v10057_v27 = vld [vmem:[#allocation18 + $0x260] ss:$8 sps:$4 sm:$0xff]  }
 0x69a   :  { %6654 = vmatprep.subr.bf16.mxu0 %v10008_v14  ;;  %v12951_v14 = vunpack.c.l.b16 %v6987_v26  ;;  %v10114_v26 = vld [vmem:[#allocation18 + $0x380] ss:$8 sps:$4 sm:$0xff]  }
 0x69b   :  { %6751 = vmatpush1.bf16.msra.mxu1 %v10003_v33  ;;  %v7001_v33 = vrot.slane %v12948_v38, 7 }
 0x69c   :  { %6752 = vmatprep.subr.bf16.mxu1 %v10011_v16  ;;  %v10065_v16 = vld [vmem:[#allocation18 + $0x274] ss:$8 sps:$4 sm:$0xff]   ;;  %v7293_v46 = vrot.slane %v12951_v14, 3 }
 0x69d   :  { %6655 = vmatpush1.bf16.msra.mxu0 %v10006_v37  ;;  %v10060_v37 = vld [vmem:[#allocation18 + $0x230] ss:$8 sps:$4 sm:$0xff]   ;;  %v7002_v1 = vsel %vm6225_vm9, %v7001_v33, %v12951_v14 }
 0x69e   :  { %6656 = vmatprep.subr.bf16.mxu0 %v10014_v32  ;;  %v10068_v32 = vld [vmem:[#allocation18 + $0x284] ss:$8 sps:$4 sm:$0xff]  }
 0x69f   :  { %6753 = vmatpush1.bf16.msra.mxu1 %v10009_v21  ;;  %v10063_v21 = vld [vmem:[#allocation18 + $0x270] ss:$8 sps:$4 sm:$0xff]  }
 0x6a0   :  { %6754 = vmatprep.subr.bf16.mxu1 %v10017_v2  ;;  %v7098_v2 = vrot.slane %v12951_v14, 1 }
 0x6a1   :  { %6657 = vmatpush1.bf16.msra.mxu0 %v10012_v23  ;;  %v10071_v23 = vld [vmem:[#allocation18 + $0x2c4] ss:$8 sps:$4 sm:$0xff]  }
 0x6a2   :  { %6846 = vmatprep.subr.bf16.mxu0 %v10020_v5  ;;  %v7099_v45 = vsel %vm6225_vm9, %v12948_v38, %v7098_v2  ;;  %v7003_v5 = vpack.c.b16 %v7002_v1, %v7002_v1  ;;  %v10131_v1 = vld [vmem:[#allocation18 + $0x3e4] ss:$8 sps:$4 sm:$0xff]   ;;  %v10126_v2 = vld [vmem:[#allocation18 + $0x3a0] ss:$8 sps:$4 sm:$0xff]  }
 0x6a3   :  { %6755 = vmatpush1.bf16.msra.mxu1 %v10015_v49  ;;  %v10074_v49 = vld [vmem:[#allocation18 + $0x294] ss:$8 sps:$4 sm:$0xff]   ;;  %v7100_v39 = vpack.c.b16 %v7099_v45, %v7099_v45  ;;  %v7588_v45 = vrot.slane %v12948_v38, 5 }
 0x6a4   :  { %8186 = vmatmul.mubr.msk.bf16.vlgmr.msra.gmra.mrb[144].mxu0 %vm3955_vm4, %v6606_v6  ;;  %6944 = vmatprep.subr.bf16.mxu1 %v10023_v42  ;;  %v10077_v42 = vld [vmem:[#allocation18 + $0x2d4] ss:$8 sps:$4 sm:$0xff]   ;;  %v10075_v6 = vld [vmem:[#allocation18 + $0x2d0] ss:$8 sps:$4 sm:$0xff]  }
 0x6a5   :  { %6847 = vmatpush1.bf16.msra.mxu0 %v10018_v56  ;;  %6878 = vmatprep.mubr.bf16.mxu0 %v10459_v0  ;;  %v10072_v56 = vld [vmem:[#allocation18 + $0x290] ss:$8 sps:$4 sm:$0xff]  }
 0x6a6   :  { %8195 = vmatmul.mubr.msk.bf16.vlgmr.msra.gmra.mrb[176].mxu1 %vm3955_vm4, %v6704_v43  ;;  %6848 = vmatprep.subr.bf16.mxu0 %v10026_v50  ;;  %v10083_v50 = vld [vmem:[#allocation18 + $0x2e4] ss:$8 sps:$4 sm:$0xff]   ;;  %v10086_v43 = vld [vmem:[#allocation18 + $0x2b4] ss:$8 sps:$4 sm:$0xff]  }
 0x6a7   :  { %6945 = vmatpush1.bf16.msra.mxu1 %v10021_v19  ;;  %6976 = vmatprep.mubr.bf16.mxu1 %v10459_v0  ;;  %v10078_v19 = vld [vmem:[#allocation18 + $0x2a0] ss:$8 sps:$4 sm:$0xff]  }
 0x6a8   :  { %6946 = vmatprep.subr.bf16.mxu1 %v10029_v51  ;;  %v10081_v51 = vld [vmem:[#allocation18 + $0x2e0] ss:$8 sps:$4 sm:$0xff]  }
 0x6a9   :  { %6849 = vmatpush1.bf16.msra.mxu0 %v10024_v52  ;;  %v7196_v52 = vrot.slane %v12948_v38, 1 }
 0x6aa   :  { %6850 = vmatprep.subr.bf16.mxu0 %v10032_v18  ;;  %v10089_v18 = vld [vmem:[#allocation18 + $0x2f4] ss:$8 sps:$4 sm:$0xff]  }
 0x6ab   :  { %6947 = vmatpush1.bf16.msra.mxu1 %v10027_v54  ;;  %v10084_v54 = vld [vmem:[#allocation18 + $0x2b0] ss:$8 sps:$4 sm:$0xff]  }
 0x6ac   :  { %6948 = vmatprep.subr.bf16.mxu1 %v10035_v31  ;;  %v7195_v31 = vrot.slane %v12951_v14, 2 }
 0x6ad   :  { %6851 = vmatpush1.bf16.msra.mxu0 %v10030_v9  ;;  %v7294_v9 = vrot.slane %v12948_v38, 2 }
 0x6ae   :  { %6852 = vmatprep.subr.bf16.mxu0 %v10038_v8  ;;  %v10092_v8 = vld [vmem:[#allocation18 + $0x304] ss:$8 sps:$4 sm:$0xff]   ;;  %v7197_v22 = vsel %vm6225_vm9, %v7196_v52, %v7195_v31  ;;  %v10143_v52 = vld [vmem:[#allocation21 + $0x10] sm:$0xff]  }
 0x6af   :  { %6949 = vmatpush1.bf16.msra.mxu1 %v10033_v57  ;;  %v10087_v57 = vld [vmem:[#allocation18 + $0x2f0] ss:$8 sps:$4 sm:$0xff]   ;;  %v7198_v28 = vpack.c.b16 %v7197_v22, %v7197_v22  ;;  %v10146_v31 = vld [vmem:[#allocation21 + $0x60] sm:$0xff]  }
 0x6b0   :  { %6950 = vmatprep.subr.bf16.mxu1 %v10041_v36  ;;  %v10090_v36 = vld [vmem:[#allocation18 + $0x300] ss:$8 sps:$4 sm:$0xff]   ;;  %v10150_v22 = vld [vmem:[#allocation21 + $0x70] sm:$0xff]  }
 0x6b1   :  { %6853 = vmatpush1.bf16.msra.mxu0 %v10036_v55  ;;  %v7295_v55 = vsel %vm6225_vm9, %v7294_v9, %v7293_v46  ;;  %v10147_v9 = vld [vmem:[#allocation21 + $0x20] sm:$0xff]   ;;  %v10151_v46 = vld [vmem:[#allocation21 + $0x30] sm:$0xff]  }
 0x6b2   :  { %7047 = vmatprep.subr.bf16.mxu0 %v10044_v35  ;;  %v10093_v35 = vld [vmem:[#allocation18 + $0x340] ss:$8 sps:$4 sm:$0xff]   ;;  %v7296_v15 = vpack.c.b16 %v7295_v55, %v7295_v55 }
 0x6b3   :  { %6951 = vmatpush1.bf16.msra.mxu1 %v10039_v47  ;;  %v10101_v47 = vld [vmem:[#allocation18 + $0x354] ss:$8 sps:$4 sm:$0xff]  }
 0x6b4   :  { %8204 = vmatmul.mubr.msk.bf16.vlgmr.msra.gmra.mrb[148].mxu0 %vm3955_vm4, %v6802_v62  ;;  %7144 = vmatprep.subr.bf16.mxu1 %v10047_v58  ;;  %v10102_v58 = vld [vmem:[#allocation18 + $0x320] ss:$8 sps:$4 sm:$0xff]   ;;  %v7392_v62 = vrot.slane %v12948_v38, 3 }
 0x6b5   :  { %7048 = vmatpush1.bf16.msra.mxu0 %v10042_v63  ;;  %7079 = vmatprep.mubr.bf16.mxu0 %v10459_v0  ;;  %v10110_v63 = vld [vmem:[#allocation18 + $0x334] ss:$8 sps:$4 sm:$0xff]  }
 0x6b6   :  { %8213 = vmatmul.mubr.msk.bf16.vlgmr.msra.gmra.mrb[180].mxu1 %vm3955_vm4, %v6900_v12  ;;  %7049 = vmatprep.subr.bf16.mxu0 %v10050_v30  ;;  %v10113_v30 = vld [vmem:[#allocation18 + $0x374] ss:$8 sps:$4 sm:$0xff]   ;;  %v10116_v12 = vld [vmem:[#allocation18 + $0x384] ss:$8 sps:$4 sm:$0xff]  }
 0x6b7   :  { %7145 = vmatpush1.bf16.msra.mxu1 %v10045_v11  ;;  %7176 = vmatprep.mubr.bf16.mxu1 %v10459_v0  ;;  %v7391_v11 = vrot.slane %v12951_v14, 4 }
 0x6b8   :  { %7146 = vmatprep.subr.bf16.mxu1 %v10053_v24  ;;  %v10111_v24 = vld [vmem:[#allocation18 + $0x370] ss:$8 sps:$4 sm:$0xff]  }
 0x6b9   :  { %7050 = vmatpush1.bf16.msra.mxu0 %v10048_v61  ;;  %v7393_v61 = vsel %vm6225_vm9, %v7392_v62, %v7391_v11 }
 0x6ba   :  { %7051 = vmatprep.subr.bf16.mxu0 %v10056_v48  ;;  %v7489_v48 = vrot.slane %v12951_v14, 5 }
 0x6bb   :  { %7147 = vmatpush1.bf16.msra.mxu1 %v10051_v13  ;;  %v10119_v13 = vld [vmem:[#allocation18 + $0x3c4] ss:$8 sps:$4 sm:$0xff]  }
 0x6bc   :  { %7148 = vmatprep.subr.bf16.mxu1 %v10059_v44  ;;  %v7491_v44 = vsel %vm6225_vm9, %v7490_v53, %v7489_v48 }
 0x6bd   :  { %7052 = vmatpush1.bf16.msra.mxu0 %v10054_v10  ;;  %v7394_v10 = vpack.c.b16 %v7393_v61, %v7393_v61  ;;  %v7492_v33 = vpack.c.b16 %v7491_v44, %v7491_v44 }
 0x6be   :  { %7053 = vmatprep.subr.bf16.mxu0 %v10062_v7  ;;  %v10122_v7 = vld [vmem:[#allocation18 + $0x394] ss:$8 sps:$4 sm:$0xff]  }
 0x6bf   :  { %7149 = vmatpush1.bf16.msra.mxu1 %v10057_v27  ;;  %v10117_v27 = vld [vmem:[#allocation18 + $0x3c0] ss:$8 sps:$4 sm:$0xff]  }
 0x6c0   :  { %7150 = vmatprep.subr.bf16.mxu1 %v10065_v16  ;;  %v10125_v16 = vld [vmem:[#allocation18 + $0x3d4] ss:$8 sps:$4 sm:$0xff]  }
 0x6c1   :  { %7054 = vmatpush1.bf16.msra.mxu0 %v10060_v37  ;;  %v10120_v37 = vld [vmem:[#allocation18 + $0x390] ss:$8 sps:$4 sm:$0xff]  }
 0x6c2   :  { %7242 = vmatprep.subr.bf16.mxu0 %v10068_v32  ;;  %v10128_v32 = vld [vmem:[#allocation18 + $0x3a4] ss:$8 sps:$4 sm:$0xff]  }
 0x6c3   :  { %7151 = vmatpush1.bf16.msra.mxu1 %v10063_v21  ;;  %v10123_v21 = vld [vmem:[#allocation18 + $0x3d0] ss:$8 sps:$4 sm:$0xff]  }
 0x6c4   :  { %8222 = vmatmul.mubr.msk.bf16.vlgmr.msra.gmra.mrb[152].mxu0 %vm3955_vm4, %v7003_v5  ;;  %7340 = vmatprep.subr.bf16.mxu1 %v10071_v23  ;;  %v10134_v23 = vld [vmem:[#allocation18 + $0x3b4] ss:$8 sps:$4 sm:$0xff]  }
 0x6c5   :  { %7243 = vmatpush1.bf16.msra.mxu0 %v10066_v40  ;;  %7274 = vmatprep.mubr.bf16.mxu0 %v10459_v0  ;;  %v10129_v40 = vld [vmem:[#allocation18 + $0x3e0] ss:$8 sps:$4 sm:$0xff]   ;;  %v10137_v5 = vld [vmem:[#allocation18 + $0x3f4] ss:$8 sps:$4 sm:$0xff]  }
 0x6c6   :  { %8231 = vmatmul.mubr.msk.bf16.vlgmr.msra.gmra.mrb[184].mxu1 %vm3955_vm4, %v7100_v39  ;;  %7244 = vmatprep.subr.bf16.mxu0 %v10074_v49  ;;  %v10132_v49 = vld [vmem:[#allocation18 + $0x3b0] ss:$8 sps:$4 sm:$0xff]   ;;  %v7686_v39 = vrot.slane %v12948_v38, 6  ;;  %v10139_v38 = vld [vmem:[#allocation21] sm:$0xff]  }
 0x6c7   :  { %7341 = vmatpush1.bf16.msra.mxu1 %v10069_v60  ;;  %7372 = vmatprep.mubr.bf16.mxu1 %v10459_v0  ;;  %v7587_v60 = vrot.slane %v12951_v14, 6 }
 0x6c8   :  { %7342 = vmatprep.subr.bf16.mxu1 %v10077_v42 }
 0x6c9   :  { %7245 = vmatpush1.bf16.msra.mxu0 %v10072_v56  ;;  %v7589_v42 = vsel %vm6225_vm9, %v7588_v45, %v7587_v60  ;;  %v7685_v56 = vrot.slane %v12951_v14, 7  ;;  %v10142_v14 = vld [vmem:[#allocation21 + $0x50] sm:$0xff]  }
 0x6ca   :  { %7246 = vmatprep.subr.bf16.mxu0 %v10080_v59 }
 0x6cb   :  { %7343 = vmatpush1.bf16.msra.mxu1 %v10075_v6  ;;  %v7687_v59 = vsel %vm6225_vm9, %v7686_v39, %v7685_v56  ;;  %v7590_v6 = vpack.c.b16 %v7589_v42, %v7589_v42 }
 0x6cc   :  { %7344 = vmatprep.subr.bf16.mxu1 %v10083_v50  ;;  %v7688_v50 = vpack.c.b16 %v7687_v59, %v7687_v59 }
 0x6cd   :  { %7247 = vmatpush1.bf16.msra.mxu0 %v10078_v19  ;;  %v10138_v19 = vld [vmem:[#allocation21 + $0x40] sm:$0xff]  }
 0x6ce   :  { %7248 = vmatprep.subr.bf16.mxu0 %v10086_v43  ;;  %v10140_v43 = vld [vmem:[#allocation21 + $0x48] sm:$0xff]  }
 0x6cf   :  { %7345 = vmatpush1.bf16.msra.mxu1 %v10081_v51  ;;  %v10141_v51 = vld [vmem:[#allocation21 + $0x8] sm:$0xff]  }
 0x6d0   :  { %7346 = vmatprep.subr.bf16.mxu1 %v10089_v18  ;;  %v10144_v18 = vld [vmem:[#allocation21 + $0x58] sm:$0xff]  }
 0x6d1   :  { %7249 = vmatpush1.bf16.msra.mxu0 %v10084_v54  ;;  %v10145_v54 = vld [vmem:[#allocation21 + $0x18] sm:$0xff]  }
 0x6d2   :  { %7438 = vmatprep.subr.bf16.mxu0 %v10092_v8  ;;  %v10148_v8 = vld [vmem:[#allocation21 + $0x68] sm:$0xff]  }
 0x6d3   :  { %7347 = vmatpush1.bf16.msra.mxu1 %v10087_v57  ;;  %v10149_v57 = vld [vmem:[#allocation21 + $0x28] sm:$0xff]  }
 0x6d4   :  { %8240 = vmatmul.mubr.msk.bf16.vlgmr.msra.gmra.mrb[156].mxu0 %vm3955_vm4, %v7198_v28  ;;  %7536 = vmatprep.subr.bf16.mxu1 %v10095_v3  ;;  %v10152_v3 = vld [vmem:[#allocation21 + $0x78] sm:$0xff]  }
 0x6d5   :  { %7439 = vmatpush1.bf16.msra.mxu0 %v10090_v36  ;;  %7470 = vmatprep.mubr.bf16.mxu0 %v10459_v0  ;;  %v10153_v36 = vld [vmem:[#allocation21 + $0x38] sm:$0xff]  }
 0x6d6   :  { %8249 = vmatmul.mubr.msk.bf16.vlgmr.msra.gmra.mrb[188].mxu1 %vm3955_vm4, %v7296_v15  ;;  %7440 = vmatprep.subr.bf16.mxu0 %v10098_v29 }
 0x6d7   :  { %7537 = vmatpush1.bf16.msra.mxu1 %v10093_v35  ;;  %7568 = vmatprep.mubr.bf16.mxu1 %v10459_v0 }
 0x6d8   :  { %7538 = vmatprep.subr.bf16.mxu1 %v10101_v47 }
 0x6d9   :  { %7441 = vmatpush1.bf16.msra.mxu0 %v10096_v41 }
 0x6da   :  { %7442 = vmatprep.subr.bf16.mxu0 %v10104_v25 }
 0x6db   :  { %7539 = vmatpush1.bf16.msra.mxu1 %v10099_v20 }
 0x6dc   :  { %7540 = vmatprep.subr.bf16.mxu1 %v10107_v4 }
 0x6dd   :  { %7443 = vmatpush1.bf16.msra.mxu0 %v10102_v58 }
 0x6de   :  { %7444 = vmatprep.subr.bf16.mxu0 %v10110_v63 }
 0x6df   :  { %7541 = vmatpush1.bf16.msra.mxu1 %v10105_v34 }
 0x6e0   :  { %7542 = vmatprep.subr.bf16.mxu1 %v10113_v30 }
 0x6e1   :  { %7445 = vmatpush1.bf16.msra.mxu0 %v10108_v17 }
 0x6e2   :  { %7634 = vmatprep.subr.bf16.mxu0 %v10116_v12 }
 0x6e3   :  { %7543 = vmatpush1.bf16.msra.mxu1 %v10111_v24 }
 0x6e4   :  { %8258 = vmatmul.mubr.msk.bf16.vlgmr.msra.gmra.mrb[160].mxu0 %vm3955_vm4, %v7394_v10  ;;  %7732 = vmatprep.subr.bf16.mxu1 %v10119_v13 }
 0x6e5   :  { %7635 = vmatpush1.bf16.msra.mxu0 %v10114_v26  ;;  %7666 = vmatprep.mubr.bf16.mxu0 %v10459_v0 }
 0x6e6   :  { %8267 = vmatmul.mubr.msk.bf16.vlgmr.msra.gmra.mrb[192].mxu1 %vm3955_vm4, %v7492_v33  ;;  %7636 = vmatprep.subr.bf16.mxu0 %v10122_v7 }
 0x6e7   :  { %7733 = vmatpush1.bf16.msra.mxu1 %v10117_v27  ;;  %7764 = vmatprep.mubr.bf16.mxu1 %v10459_v0  ;;  %v10135_v0 = vld [vmem:[#allocation18 + $0x3f0] ss:$8 sps:$4 sm:$0xff]  }
 0x6e8   :  { %7734 = vmatprep.subr.bf16.mxu1 %v10125_v16 }
 0x6e9   :  { %7637 = vmatpush1.bf16.msra.mxu0 %v10120_v37 }
 0x6ea   :  { %7638 = vmatprep.subr.bf16.mxu0 %v10128_v32 }
 0x6eb   :  { %7735 = vmatpush1.bf16.msra.mxu1 %v10123_v21 }
 0x6ec   :  { %7736 = vmatprep.subr.bf16.mxu1 %v10131_v1 }
 0x6ed   :  { %7639 = vmatpush1.bf16.msra.mxu0 %v10126_v2 }
 0x6ee   :  { %7640 = vmatprep.subr.bf16.mxu0 %v10134_v23 }
 0x6ef   :  { %7737 = vmatpush1.bf16.msra.mxu1 %v10129_v40 }
 0x6f0   :  { %7738 = vmatprep.subr.bf16.mxu1 %v10137_v5 }
 0x6f1   :  { %7641 = vmatpush1.bf16.msra.mxu0 %v10132_v49 }
 0x6f2   :  { %8377 = vmatprep.subr.bf16.mxu0 %v10138_v19 }
 0x6f3   :  { %7739 = vmatpush1.bf16.msra.mxu1 %v10135_v0 }
 0x6f4   :  { %8276 = vmatmul.mubr.msk.bf16.vlgmr.msra.gmra.mrb[164].mxu0 %vm3955_vm4, %v7590_v6 }
 0x6f5   :  { %8378 = vmatpush3.bf16.msra.mxu0 %v10139_v38 }
 0x6f6   :  { %8285 = vmatmul.mubr.msk.bf16.vlgmr.msra.gmra.mrb[196].mxu1 %vm3955_vm4, %v7688_v50  ;;  %8379 = vmatprep.subr.bf16.mxu0 %v10140_v43 }
 0x6f9   :  { %8380 = vmatpush3.bf16.msra.mxu0 %v10141_v51 }
 0x6fa   :  { %8381 = vmatprep.subr.bf16.mxu0 %v10142_v14 }
 0x6fd   :  { %8382 = vmatpush3.bf16.msra.mxu0 %v10143_v52 }
 0x6fe   :  { %8383 = vmatprep.subr.bf16.mxu0 %v10144_v18 }
 0x701   :  { %8384 = vmatpush3.bf16.msra.mxu0 %v10145_v54 }
 0x702   :  { %8385 = vmatprep.subr.bf16.mxu0 %v10146_v31 }
 0x705   :  { %8386 = vmatpush3.bf16.msra.mxu0 %v10147_v9 }
 0x706   :  { %8387 = vmatprep.subr.bf16.mxu0 %v10148_v8 }
 0x709   :  { %8388 = vmatpush3.bf16.msra.mxu0 %v10149_v57 }
 0x70a   :  { %8389 = vmatprep.subr.bf16.mxu0 %v10150_v22 }
 0x70d   :  { %8390 = vmatpush3.bf16.msra.mxu0 %v10151_v46 }
 0x70e   :  { %8391 = vmatprep.subr.bf16.mxu0 %v10152_v3 }
 0x711   :  { %8392 = vmatpush3.bf16.msra.mxu0 %v10153_v36 }
 0x757   :  { %v6305_v55 = vpop.f32.mrb[136].mxu0 }
 0x758   :  { %v6307_v28 = vpop.f32.mrb[137].mxu0 }
 0x759   :  { %v6309_v29 = vpop.f32.mrb[138].mxu0  ;;  %v6392_v35 = vpop.f32.mrb[168].mxu1 }
 0x75a   :  { %v6393_v15 = vadd.f32 %v6392_v35, %v6305_v55  ;;  %v6310_v47 = vpop.f32.mrb[139].mxu0  ;;  %v6394_v41 = vpop.f32.mrb[169].mxu1 }
 0x75b   :  { %v6395_v25 = vadd.f32 %v6394_v41, %v6307_v28  ;;  %v6396_v20 = vpop.f32.mrb[170].mxu1 }
 0x75c   :  { %v6397_v4 = vpop.f32.mrb[171].mxu1 }
 0x767   :  { %v6488_v58 = vpop.f32.mrb[140].mxu0 }
 0x768   :  { %v6495_v63 = vadd.f32 %v6488_v58, %v6393_v15  ;;  %v6490_v34 = vpop.f32.mrb[141].mxu0 }
 0x769   :  { %v6496_v62 = vadd.f32 %v6490_v34, %v6395_v25  ;;  %v6492_v30 = vpop.f32.mrb[142].mxu0  ;;  %v6586_v17 = vpop.f32.mrb[172].mxu1 }
 0x76a   :  { %v6593_v11 = vadd.f32 %v6586_v17, %v6495_v63  ;;  %v6493_v53 = vpop.f32.mrb[143].mxu0  ;;  %v6588_v12 = vpop.f32.mrb[173].mxu1 }
 0x76b   :  { %v6594_v24 = vadd.f32 %v6588_v12, %v6496_v62  ;;  %v6590_v61 = vpop.f32.mrb[174].mxu1  ;;  %v7777_v12 = vlaneseq }
 0x76c   :  { %v6591_v48 = vpop.f32.mrb[175].mxu1 }
 0x76d   :  { %v7775_v48 = vld [vmem:[#allocation20] sm:$0x3] }
 0x777   :  { %v6684_v13 = vpop.f32.mrb[144].mxu0 }
 0x778   :  { %v6691_v26 = vadd.f32 %v6684_v13, %v6593_v11  ;;  %v6686_v44 = vpop.f32.mrb[145].mxu0 }
 0x779   :  { %v6692_v10 = vadd.f32 %v6686_v44, %v6594_v24  ;;  %v6688_v7 = vpop.f32.mrb[146].mxu0  ;;  %v6782_v27 = vpop.f32.mrb[176].mxu1  ;;  %v7778_v24 = vshrl.u32 %v7777_v12, 7 }
 0x77a   :  { %v6789_v33 = vadd.f32 %v6782_v27, %v6691_v26  ;;  %v6689_v16 = vpop.f32.mrb[147].mxu0  ;;  %v6784_v37 = vpop.f32.mrb[177].mxu1 }
 0x77b   :  { %v6790_v32 = vadd.f32 %v6784_v37, %v6692_v10  ;;  %v6786_v21 = vpop.f32.mrb[178].mxu1  ;;  %v7779_v61 = vsub.s32 0, %v7778_v24  ;;  %v7783_v13 = vsub.s32 1, %v7778_v24 }
 0x77c   :  { %v6787_v1 = vpop.f32.mrb[179].mxu1 }
 0x77d   :  { %v7780_v7 = vrot.slane %v7775_v48, %v7779_v61  ;;  %v7784_v37 = vrot.slane %v7775_v48, %v7783_v13 }
 0x787   :  { %v6880_v2 = vpop.f32.mrb[148].mxu0 }
 0x788   :  { %v6887_v23 = vadd.f32 %v6880_v2, %v6789_v33  ;;  %v6882_v40 = vpop.f32.mrb[149].mxu0 }
 0x789   :  { %v6888_v45 = vadd.f32 %v6882_v40, %v6790_v32  ;;  %v6884_v5 = vpop.f32.mrb[150].mxu0  ;;  %v6978_v49 = vpop.f32.mrb[180].mxu1 }
 0x78a   :  { %v6985_v60 = vadd.f32 %v6978_v49, %v6887_v23  ;;  %v6885_v39 = vpop.f32.mrb[151].mxu0  ;;  %v6980_v0 = vpop.f32.mrb[181].mxu1 }
 0x78b   :  { %v6986_v42 = vadd.f32 %v6980_v0, %v6888_v45  ;;  %v6982_v56 = vpop.f32.mrb[182].mxu1 }
 0x78c   :  { %v6983_v59 = vpop.f32.mrb[183].mxu1  ;;  %v8286_v56 = vld [vmem:[#allocation23] ss:$0 sm:$0xff] }
 0x797   :  { %v7081_v6 = vpop.f32.mrb[152].mxu0 }
 0x798   :  { %v7088_v50 = vadd.f32 %v7081_v6, %v6985_v60  ;;  %v7083_v19 = vpop.f32.mrb[153].mxu0 }
 0x799   :  { %v7089_v38 = vadd.f32 %v7083_v19, %v6986_v42  ;;  %v7085_v43 = vpop.f32.mrb[154].mxu0  ;;  %v7178_v51 = vpop.f32.mrb[184].mxu1 }
 0x79a   :  { %v7185_v14 = vadd.f32 %v7178_v51, %v7088_v50  ;;  %v7086_v52 = vpop.f32.mrb[155].mxu0  ;;  %v7180_v18 = vpop.f32.mrb[185].mxu1 }
 0x79b   :  { %v7186_v54 = vadd.f32 %v7180_v18, %v7089_v38  ;;  %v7182_v31 = vpop.f32.mrb[186].mxu1 }
 0x79c   :  { %v7183_v9 = vpop.f32.mrb[187].mxu1 }
 0x7a7   :  { %v7276_v8 = vpop.f32.mrb[156].mxu0 }
 0x7a8   :  { %v7283_v57 = vadd.f32 %v7276_v8, %v7185_v14  ;;  %v7278_v22 = vpop.f32.mrb[157].mxu0 }
 0x7a9   :  { %v7284_v46 = vadd.f32 %v7278_v22, %v7186_v54  ;;  %v7280_v3 = vpop.f32.mrb[158].mxu0  ;;  %v7374_v36 = vpop.f32.mrb[188].mxu1 }
 0x7aa   :  { %v7381_v55 = vadd.f32 %v7374_v36, %v7283_v57  ;;  %v7281_v28 = vpop.f32.mrb[159].mxu0  ;;  %v7376_v29 = vpop.f32.mrb[189].mxu1 }
 0x7ab   :  { %v7382_v35 = vadd.f32 %v7376_v29, %v7284_v46  ;;  %v7378_v15 = vpop.f32.mrb[190].mxu1 }
 0x7ac   :  { %v7379_v47 = vpop.f32.mrb[191].mxu1 }
 0x7b7   :  { %v7472_v41 = vpop.f32.mrb[160].mxu0 }
 0x7b8   :  { %v7479_v25 = vadd.f32 %v7472_v41, %v7381_v55  ;;  %v7474_v20 = vpop.f32.mrb[161].mxu0 }
 0x7b9   :  { %v7480_v4 = vadd.f32 %v7474_v20, %v7382_v35  ;;  %v7476_v58 = vpop.f32.mrb[162].mxu0  ;;  %v7570_v63 = vpop.f32.mrb[192].mxu1 }
 0x7ba   :  { %v7577_v34 = vadd.f32 %v7570_v63, %v7479_v25  ;;  %v7477_v62 = vpop.f32.mrb[163].mxu0  ;;  %v7572_v30 = vpop.f32.mrb[193].mxu1 }
 0x7bb   :  { %v7578_v17 = vadd.f32 %v7572_v30, %v7480_v4  ;;  %v7574_v11 = vpop.f32.mrb[194].mxu1 }
 0x7bc   :  { %v7575_v53 = vpop.f32.mrb[195].mxu1 }
 0x7c7   :  { %v7668_v26 = vpop.f32.mrb[164].mxu0 }
 0x7c8   :  { %v7675_v44 = vadd.f32 %v7668_v26, %v7577_v34  ;;  %v7670_v10 = vpop.f32.mrb[165].mxu0 }
 0x7c9   :  { %v7676_v27 = vadd.f32 %v7670_v10, %v7578_v17  ;;  %v7672_v33 = vpop.f32.mrb[166].mxu0  ;;  %v7766_v16 = vpop.f32.mrb[196].mxu1 }
 0x7ca   :  { %v7773_v32 = vadd.f32 %v7766_v16, %v7675_v44  ;;  %v7673_v21 = vpop.f32.mrb[167].mxu0  ;;  %v7768_v1 = vpop.f32.mrb[197].mxu1 }
 0x7cb   :  { %v7774_v2 = vadd.f32 %v7768_v1, %v7676_v27  ;;  %v7770_v23 = vpop.f32.mrb[198].mxu1 }
 0x7cc   :  { %v7787_v40 = vadd.f32 %v7780_v7, %v7773_v32  ;;  %v7771_v45 = vpop.f32.mrb[199].mxu1 }
 0x7cd   :  { %v7788_v5 = vadd.f32 %v7784_v37, %v7774_v2 }
 0x7ce   :  { %v7789_v49 = vmax.f32 %v7787_v40, 0.0 }
 0x7cf   :  { %v7790_v60 = vmax.f32 %v7788_v5, 0.0 }
 0x7d0   :  { %v7791_v0 = vpack.c.bf16 %v7789_v49, %v7789_v49 }
 0x7d1   :  { %v7792_v39 = vpack.c.bf16 %v7790_v60, %v7790_v60 }
 0x7d3   :  { %7960 = vmatprep.mubr.bf16.mxu0 %v7792_v39 }
 0x7d4   :  { %7961 = vmatmul.mubr.bf16.vlgmr.msra.gmra.mrb[168].mxu0 %v7791_v0 }
 0x8a7   :  { %v8393_v42 = vpop.f32.mrb[168].mxu0 }
 0x8a8   :  { %v8394_v59 = vpop.f32.mrb[169].mxu0 }
 0x8a9   :  { %v8395_v6 = vadd.f32 %v8394_v59, %v8393_v42  ;;  %v8396_v50 = vpop.f32.mrb[170].mxu0 }
 0x8aa   :  { %v8397_v19 = vpop.f32.mrb[171].mxu0 }
 0x8ab   :  { %v7963_v38 = vadd.f32 %v8395_v6, %v8286_v56 }
 0x8ad   :  { %7968 = vst [vmem:[#allocation24] sm:$0x3] %v7963_v38 }
 0x8ae   :  { %10419 = shalt.err (!%p10416_p8)
}
 0x8af   :  { %s10420_s12 = scalar_lea.hbm %s13014_s11, 32 }
 0x8b0   :  { %p10421_p9 = scmp.ne.s32.totalorder %s13014_s11, %s10420_s12  ;;  %p10424_p10 = scmp.lt.u32.totalorder %s10420_s12, %s13014_s11 }
 0x8b2   :  { %p10426_p11 = pnand %p10424_p10, %p10421_p9 }
 0x8b4   :  { %10429 = shalt.err (!%p10426_p11)
}
 0x8b5   :  { %7978 = dma.vmem_to_hbm [thread:$0]  %s7976_s30, 32, %s13014_s11, [#allocation8]  }
 0x8b6   :  { %10442 = dma.done.wait [#allocation8], 32  }
 0x8b7   :  { %10443 = vsyncadd [#allocation8], 4294967264 }
 0x8b8   :  { %7982 = vsyncpa [#allocation7], 1 }
 0x8b9   :  { %7983 = vsyncpa [#allocation10], 1 }
 0x8ba   :  { %7984 = vsyncpa [#allocation13], 1 }
 0x8bb   :  { %7985 = vsyncpa [#allocation16], 1 }
 0x8bc   :  { %7986 = vsyncpa [#allocation19], 1 }
 0x8bd   :  { %7987 = vsyncpa [#allocation22], 1 }
 0x8be   :  { %7988 = vsyncpa [#allocation8], 1 }

</bundles_post_ra>
